<compile_context>
chip_gen: v7x
topology: tpu7x:2x2x1
jax: 0.10.0
libtpu: 0.0.40
codegen_flags: <defaults>
</compile_context>

<pallas_src>
import functools

import jax
import jax.numpy as jnp
from jax.experimental import pallas as pl
from jax.experimental.pallas import tpu as pltpu

_BN_EPS = 1e-5            # nn.BatchNorm2d default eps
_ROW_TILE = 512           # conv row tile (review: 256 -> 512)
_BIG_ROW_TILE = 1024      # used when M is large enough to amortize it
_FC1_IN = 64 * 7 * 7      # 3136
_FC1_IN_PAD = 3200        # 25 * 128: tile-friendly K for the head's K-blocking
_FC1_K_CHUNK = 640        # 5 chunks of 640 (each a multiple of 128)

_CONV_CFG = ((32, 8, 4), (64, 4, 2), (64, 3, 1))  # (out_channels, kernel, stride)


def _round_up(x, m):
    return (x + m - 1) // m * m


def _pick_vmem_limit():
    """Per-generation VMEM budget (v7x: 64 MiB/TC, v5e/v6e: 128 MiB)."""
    try:
        cap = int(pltpu.get_tpu_info().vmem_capacity_bytes)
    except Exception:
        cap = 64 * 1024 * 1024          # conservative default (v7x per-TC size)
    return max(32 * 1024 * 1024, min(cap * 3 // 4, 100 * 1024 * 1024))


_VMEM_LIMIT = _pick_vmem_limit()
# Budget for keeping the whole pre-BN activation resident in a VMEM scratch.
_Y_RESIDENT_BYTES = min(12 * 1024 * 1024, _VMEM_LIMIT // 3)


# ----------------------------- Pallas kernels ------------------------------ #

def _conv_bn_relu_fused_kernel(p_ref, w_ref, g_ref, b_ref, o_ref,
                               y_sc, sum_sc, ssq_sc, *, tm, rows, inv_rows):
    """Fused conv-as-matmul + train-mode BatchNorm + ReLU (VMEM-resident y)."""
    ph = pl.program_id(0)
    m = pl.program_id(1)

    @pl.when(ph == 0)
    def _():
        y = jnp.dot(p_ref[...], w_ref[...], preferred_element_type=jnp.float32)
        y_sc[m] = y

        @pl.when(m == 0)
        def _():
            sum_sc[...] = jnp.zeros_like(sum_sc)

        sum_sc[...] += jnp.sum(y, axis=0, keepdims=True)

    @pl.when(ph == 1)
    def _():
        @pl.when(m == 0)
        def _():
            ssq_sc[...] = jnp.zeros_like(ssq_sc)

        mean = sum_sc[...] * inv_rows
        row = m * tm + jax.lax.broadcasted_iota(jnp.int32, (tm, 128), 0)
        d = jnp.where(row < rows, y_sc[m] - mean, 0.0)   # mask zero-padded rows
        ssq_sc[...] += jnp.sum(d * d, axis=0, keepdims=True)

    @pl.when(ph == 2)
    def _():
        mean = sum_sc[...] * inv_rows
        var = ssq_sc[...] * inv_rows                     # biased, as PyTorch BN
        scale = g_ref[...] * jax.lax.rsqrt(var + _BN_EPS)
        shift = b_ref[...] - mean * scale
        o_ref[...] = jnp.maximum(y_sc[m] * scale + shift, 0.0).astype(o_ref.dtype)


def _conv_mm_stats_kernel(p_ref, w_ref, y_ref, sum_ref, ssq_ref):
    """Fallback pass 1: y = patches @ w; store bf16 y; accumulate f32 stats."""
    y = jnp.dot(p_ref[...], w_ref[...], preferred_element_type=jnp.float32)
    y_ref[...] = y.astype(y_ref.dtype)

    @pl.when(pl.program_id(0) == 0)
    def _():
        sum_ref[...] = jnp.zeros_like(sum_ref)
        ssq_ref[...] = jnp.zeros_like(ssq_ref)

    sum_ref[...] += jnp.sum(y, axis=0, keepdims=True)
    ssq_ref[...] += jnp.sum(y * y, axis=0, keepdims=True)


def _bn_relu_kernel(y_ref, sum_ref, ssq_ref, g_ref, b_ref, o_ref, *, inv_rows):
    """Fallback pass 2: single-pass BN (E[y^2]-E[y]^2, f32 accum) + ReLU."""
    # TODO(synk): the large-batch fallback keeps single-pass variance; switch to
    # a per-tile Welford merge if batches get big enough for cancellation.
    y = y_ref[...].astype(jnp.float32)
    mean = sum_ref[...] * inv_rows
    var = jnp.maximum(ssq_ref[...] * inv_rows - mean * mean, 0.0)
    scale = g_ref[...] * jax.lax.rsqrt(var + _BN_EPS)
    shift = b_ref[...] - mean * scale
    o_ref[...] = jnp.maximum(y * scale + shift, 0.0).astype(o_ref.dtype)


def _dueling_head_kernel(f_ref, w1_ref, b1_ref, w2_ref, b2_ref, o_ref, acc_ref,
                         *, n_actions):
    """K-blocked fused dueling head: fc1 (adv|value) accumulated over K chunks,
    then bias+ReLU, one lane-dense fc2 matmul, and the dueling combine via an
    iota lane mask (no lane-sparse N=6/N=1 matmuls or stores)."""
    k = pl.program_id(0)

    @pl.when(k == 0)
    def _():
        acc_ref[...] = jnp.zeros_like(acc_ref)

    acc_ref[...] += jnp.dot(f_ref[...], w1_ref[...],
                            preferred_element_type=jnp.float32)

    @pl.when(k == pl.num_programs(0) - 1)
    def _():
        h = jnp.maximum(acc_ref[...] + b1_ref[...], 0.0).astype(jnp.bfloat16)
        z = jnp.dot(h, w2_ref[...], preferred_element_type=jnp.float32) + b2_ref[...]
        lane = jax.lax.broadcasted_iota(jnp.int32, z.shape, dimension=1)
        adv_sum = jnp.sum(jnp.where(lane < n_actions, z, 0.0), axis=1, keepdims=True)
        value = jnp.sum(jnp.where(lane == n_actions, z, 0.0), axis=1, keepdims=True)
        # lanes [0, n_actions) hold q-values; the rest is garbage, sliced off outside
        o_ref[...] = z + value - adv_sum * (1.0 / n_actions)


# ------------------------------ Pallas wrappers ----------------------------- #

def conv_bn_relu(patches, w, gamma, beta):
    """patches: [M, K] bf16 (rows (b,oh,ow), cols (kh,kw,c)); w: [K, 128] bf16
    (zero-padded out-channels); gamma/beta: [1,128] f32.  Returns [M, 128] bf16
    = ReLU(BN(patches @ w)) with batch statistics over all M real rows."""
    M, K = patches.shape
    max_tm = _BIG_ROW_TILE if M > 4096 else _ROW_TILE
    tm = min(_round_up(M, 16), max_tm)          # 16: bf16 sublane packing
    mp = _round_up(M, tm)
    if mp != M:
        patches = jnp.pad(patches, ((0, mp - M), (0, 0)))
    n_tiles = mp // tm
    inv_rows = 1.0 / M

    if mp * 128 * 4 <= _Y_RESIDENT_BYTES:
        # Fused path: the pre-BN activation never touches HBM.
        n_phases = 3
        out = pl.pallas_call(
            functools.partial(_conv_bn_relu_fused_kernel,
                              tm=tm, rows=M, inv_rows=inv_rows),
            grid=(n_phases, n_tiles),
            in_specs=[
                # Pin patches to the last tile once phase 0 is done: no re-fetch.
                pl.BlockSpec((tm, K),
                             lambda ph, m: (jnp.where(ph == 0, m, n_tiles - 1), 0)),
                pl.BlockSpec((K, 128), lambda ph, m: (0, 0)),
                pl.BlockSpec((1, 128), lambda ph, m: (0, 0)),
                pl.BlockSpec((1, 128), lambda ph, m: (0, 0)),
            ],
            # Output blocks are only produced (and written back) in the last phase.
            out_specs=pl.BlockSpec(
                (tm, 128), lambda ph, m: (jnp.where(ph == n_phases - 1, m, 0), 0)),
            out_shape=jax.ShapeDtypeStruct((mp, 128), jnp.bfloat16),
            scratch_shapes=[pltpu.VMEM((n_tiles, tm, 128), jnp.float32),
                            pltpu.VMEM((1, 128), jnp.float32),
                            pltpu.VMEM((1, 128), jnp.float32)],
            compiler_params=pltpu.CompilerParams(
                dimension_semantics=("arbitrary", "arbitrary"),
                vmem_limit_bytes=_VMEM_LIMIT),
        )(patches, w, gamma, beta)
        return out[:M]

    # Large-batch fallback: two passes with a bf16 HBM intermediate.
    grid = (n_tiles,)
    y, s, ss = pl.pallas_call(
        _conv_mm_stats_kernel,
        grid=grid,
        in_specs=[pl.BlockSpec((tm, K), lambda m: (m, 0)),
                  pl.BlockSpec((K, 128), lambda m: (0, 0))],
        out_specs=(pl.BlockSpec((tm, 128), lambda m: (m, 0)),
                   pl.BlockSpec((1, 128), lambda m: (0, 0)),
                   pl.BlockSpec((1, 128), lambda m: (0, 0))),
        out_shape=(jax.ShapeDtypeStruct((mp, 128), jnp.bfloat16),
                   jax.ShapeDtypeStruct((1, 128), jnp.float32),
                   jax.ShapeDtypeStruct((1, 128), jnp.float32)),
        compiler_params=pltpu.CompilerParams(
            dimension_semantics=("arbitrary",),      # stats accumulate across tiles
            vmem_limit_bytes=_VMEM_LIMIT),
    )(patches, w)

    out = pl.pallas_call(
        functools.partial(_bn_relu_kernel, inv_rows=inv_rows),
        grid=grid,
        in_specs=[pl.BlockSpec((tm, 128), lambda m: (m, 0)),
                  pl.BlockSpec((1, 128), lambda m: (0, 0)),
                  pl.BlockSpec((1, 128), lambda m: (0, 0)),
                  pl.BlockSpec((1, 128), lambda m: (0, 0)),
                  pl.BlockSpec((1, 128), lambda m: (0, 0))],
        out_specs=pl.BlockSpec((tm, 128), lambda m: (m, 0)),
        out_shape=jax.ShapeDtypeStruct((mp, 128), jnp.bfloat16),
        compiler_params=pltpu.CompilerParams(
            dimension_semantics=("parallel",),       # independent tiles -> megacore
            vmem_limit_bytes=_VMEM_LIMIT),
    )(y, s, ss, gamma, beta)
    return out[:M]


def dueling_head(feat, w1, b1, w2, b2, n_actions):
    """feat: [B, 3136] bf16 -> [B, n_actions] f32."""
    B, K = feat.shape
    kp = w1.shape[0]                    # 3200 (zero-padded fc1 rows)
    bp = _round_up(B, 16)
    feat = jnp.pad(feat, ((0, bp - B), (0, kp - K)))
    n_k = kp // _FC1_K_CHUNK
    q = pl.pallas_call(
        functools.partial(_dueling_head_kernel, n_actions=n_actions),
        grid=(n_k,),
        in_specs=[pl.BlockSpec((bp, _FC1_K_CHUNK), lambda k: (0, k)),
                  pl.BlockSpec((_FC1_K_CHUNK, 1024), lambda k: (k, 0)),
                  pl.BlockSpec((1, 1024), lambda k: (0, 0)),
                  pl.BlockSpec((1024, 128), lambda k: (0, 0)),
                  pl.BlockSpec((1, 128), lambda k: (0, 0))],
        out_specs=pl.BlockSpec((bp, 128), lambda k: (0, 0)),
        out_shape=jax.ShapeDtypeStruct((bp, 128), jnp.float32),
        scratch_shapes=[pltpu.VMEM((bp, 1024), jnp.float32)],
        compiler_params=pltpu.CompilerParams(
            dimension_semantics=("arbitrary",),
            vmem_limit_bytes=_VMEM_LIMIT),
    )(feat, w1, b1, w2, b2)
    return q[:B, :n_actions]


# --------------------------------- JAX glue --------------------------------- #

def _im2col_nhwc(x, kh, kw, stride):
    """x: [B, H, W, C] -> patches [B*OH*OW, KH*KW*C]; rows (b,oh,ow), cols (kh,kw,c).

    TODO(synk): fold this into the conv kernel (KH*KW reduction grid axis /
    Element windows) to avoid materializing the patch array in HBM.
    """
    B, H, W, C = x.shape
    oh = (H - kh) // stride + 1
    ow = (W - kw) // stride + 1
    cols = []
    for i in range(kh):
        for j in range(kw):
            cols.append(x[:, i:i + stride * (oh - 1) + 1:stride,
                          j:j + stride * (ow - 1) + 1:stride, :])
    p = jnp.stack(cols, axis=3)                       # [B, OH, OW, KH*KW, C]
    return p.reshape(B * oh * ow, kh * kw * C), oh, ow


def init_params(key, in_channels=4, n_actions=6):
    ks = jax.random.split(key, 10)

    def uniform(k, shape, fan_in):
        bound = 1.0 / jnp.sqrt(jnp.float32(fan_in))
        return jax.random.uniform(k, shape, jnp.float32, -bound, bound)

    p = {}
    ic = in_channels
    for li, (oc, kk, _st) in enumerate(_CONV_CFG, start=1):
        fan_in = ic * kk * kk
        w = uniform(ks[li - 1], (oc, ic, kk, kk), fan_in)             # PyTorch OIHW
        w = jnp.transpose(w, (2, 3, 1, 0)).reshape(kk * kk * ic, oc)  # rows (kh,kw,c)
        if li == 1:
            w = w / 255.0   # fold x/255 input scaling into conv1 (conv is linear)
        # conv bias omitted: exact no-op under train-mode BatchNorm.
        p[f"cw{li}"] = jnp.pad(w, ((0, 0), (0, 128 - oc))).astype(jnp.bfloat16)
        p[f"g{li}"] = jnp.pad(jnp.ones((1, oc), jnp.float32), ((0, 0), (0, 128 - oc)))
        p[f"be{li}"] = jnp.zeros((1, 128), jnp.float32)
        ic = oc

    feat = _FC1_IN
    # fc1_adv / fc1_value: rows re-ordered from PyTorch's NCHW flatten
    # (c*49 + oh*7 + ow) to our NHWC flatten ((oh*7 + ow)*64 + c), concatenated
    # column-wise into one [3136, 1024] matrix, then zero-padded to K=3200 so
    # the dueling head's K-blocking uses 128-aligned chunks.
    def fc1(k):
        w = uniform(k, (512, 64, 7, 7), feat)                          # [out, c, oh, ow]
        return jnp.transpose(w, (2, 3, 1, 0)).reshape(feat, 512)       # rows (oh,ow,c)
    w1 = jnp.concatenate([fc1(ks[3]), fc1(ks[4])], axis=1)
    p["w1"] = jnp.pad(w1, ((0, _FC1_IN_PAD - feat), (0, 0))).astype(jnp.bfloat16)
    p["b1"] = jnp.concatenate([uniform(ks[5], (1, 512), feat),
                               uniform(ks[6], (1, 512), feat)], axis=1)

    # fc2_adv | fc2_value packed into one lane-dense [1024, 128] matrix:
    # rows 0:512 -> advantage logits in lanes [0, n_actions),
    # rows 512:1024 -> value in lane n_actions, all other lanes zero.
    w2a = uniform(ks[7], (512, n_actions), 512)
    w2v = uniform(ks[8], (512, 1), 512)
    w2 = jnp.zeros((1024, 128), jnp.float32)
    w2 = w2.at[:512, :n_actions].set(w2a).at[512:, n_actions].set(w2v[:, 0])
    p["w2"] = w2.astype(jnp.bfloat16)
    b2 = uniform(ks[9], (1, n_actions + 1), 512)
    p["b2"] = jnp.zeros((1, 128), jnp.float32).at[:, :n_actions + 1].set(b2)
    return p


@functools.partial(jax.jit, static_argnames="n_actions")
def forward(params, x, n_actions=6):
    """x: [B, in_channels, 84, 84] NCHW raw pixel values -> [B, n_actions] f32."""
    B = x.shape[0]
    a = jnp.transpose(x, (0, 2, 3, 1)).astype(jnp.bfloat16)   # NCHW -> NHWC (once)
    for li, (oc, kk, st) in enumerate(_CONV_CFG, start=1):
        patches, oh, ow = _im2col_nhwc(a, kk, kk, st)          # 84->20->9->7
        h = conv_bn_relu(patches, params[f"cw{li}"],
                         params[f"g{li}"], params[f"be{li}"])  # [M, 128] bf16
        a = h[:, :oc].reshape(B, oh, ow, oc)                   # drop lane padding
    feat = a.reshape(B, -1)   # NHWC flatten; fc1 rows were permuted to match NCHW order
    return dueling_head(feat, params["w1"], params["b1"],
                        params["w2"], params["b2"], n_actions)


if __name__ == "__main__":
    key = jax.random.PRNGKey(0)
    pkey, xkey = jax.random.split(key)
    params = init_params(pkey, in_channels=4, n_actions=6)
    # batch=2, channels=4, spatial=84x84: 84 is required so the conv stack yields
    # 7x7 features, matching fc1's in_features of 64*7*7 in the PyTorch module.
    x = jax.random.randint(xkey, (2, 4, 84, 84), 0, 256, dtype=jnp.int32).astype(jnp.float32)
    out = forward(params, x, n_actions=6)
    jax.block_until_ready(out)
    assert out.shape == (2, 6), out.shape
    assert jnp.all(jnp.isfinite(out))
    print("KERNEL_OK")
</pallas_src>

<mosaic_0001>
module attributes {stable_mosaic.version = 11 : i64} {
  func.func @_conv_bn_relu_fused_kernel(%arg0: i32, %arg1: i32, %arg2: memref<512x256xbf16, #tpu.memory_space<vmem>>, %arg3: memref<256x128xbf16, #tpu.memory_space<vmem>>, %arg4: memref<1x128xf32, #tpu.memory_space<vmem>>, %arg5: memref<1x128xf32, #tpu.memory_space<vmem>>, %arg6: memref<512x128xbf16, #tpu.memory_space<vmem>>, %arg7: memref<2x512x128xf32, #tpu.memory_space<vmem>>, %arg8: memref<1x128xf32, #tpu.memory_space<vmem>>, %arg9: memref<1x128xf32, #tpu.memory_space<vmem>>) attributes {dimension_semantics = [#tpu.dimension_semantics<arbitrary>, #tpu.dimension_semantics<arbitrary>], iteration_bounds = array<i64: 3, 2>, scalar_prefetch = 0 : i64, scratch_operands = 3 : i64, tpu.core_type = #tpu.core_type<tc>, window_params = [{transform_indices = @transform_0, window_bounds = array<i64: 512, 256>}, {pipeline_mode = #tpu.pipeline_mode<synchronous>, transform_indices = @transform_1, window_bounds = array<i64: 256, 128>}, {pipeline_mode = #tpu.pipeline_mode<synchronous>, transform_indices = @transform_2, window_bounds = array<i64: 1, 128>}, {pipeline_mode = #tpu.pipeline_mode<synchronous>, transform_indices = @transform_3, window_bounds = array<i64: 1, 128>}, {transform_indices = @transform_4, window_bounds = array<i64: 512, 128>}]} {
    %c0_i32 = arith.constant 0 : i32
    %0 = arith.cmpi eq, %arg0, %c0_i32 : i32
    %1 = arith.extui %0 : i1 to i32
    %c0_i32_0 = arith.constant 0 : i32
    %2 = arith.cmpi ne, %1, %c0_i32_0 : i32
    scf.if %2 {
      %c0 = arith.constant 0 : index
      %c0_3 = arith.constant 0 : index
      %9 = vector.load %arg2[%c0, %c0_3] : memref<512x256xbf16, #tpu.memory_space<vmem>>, vector<512x256xbf16>
      %c0_4 = arith.constant 0 : index
      %c0_5 = arith.constant 0 : index
      %10 = vector.load %arg3[%c0_4, %c0_5] : memref<256x128xbf16, #tpu.memory_space<vmem>>, vector<256x128xbf16>
      %cst = arith.constant dense<0.000000e+00> : vector<512x128xf32>
      %11 = tpu.matmul %9, %10, %cst {dimension_numbers = #tpu.dot_dimension_numbers<[1], [0], [0], [1], [0, 0, 1, 1], [], []>} : vector<512x256xbf16>, vector<256x128xbf16>, vector<512x128xf32> -> vector<512x128xf32>
      %12 = arith.index_cast %arg1 : i32 to index
      %c0_6 = arith.constant 0 : index
      %c0_7 = arith.constant 0 : index
      %13 = vector.load %arg7[%12, %c0_6, %c0_7] : memref<2x512x128xf32, #tpu.memory_space<vmem>>, vector<1x512x128xf32>
      %14 = vector.shape_cast %13 : vector<1x512x128xf32> to vector<512x128xf32>
      %15 = vector.shape_cast %11 : vector<512x128xf32> to vector<1x512x128xf32>
      tpu.vector_store %arg7[%12, %c0_6, %c0_7], %15 {strides = array<i32>} : memref<2x512x128xf32, #tpu.memory_space<vmem>>, vector<1x512x128xf32>,
      %c0_i32_8 = arith.constant 0 : i32
      %16 = arith.cmpi eq, %arg1, %c0_i32_8 : i32
      %17 = arith.extui %16 : i1 to i32
      %c0_i32_9 = arith.constant 0 : i32
      %18 = arith.cmpi ne, %17, %c0_i32_9 : i32
      scf.if %18 {
        %cst_15 = arith.constant 0.000000e+00 : f32
        %24 = vector.broadcast %cst_15 : f32 to vector<1x128xf32>
        %c0_16 = arith.constant 0 : index
        %c0_17 = arith.constant 0 : index
        %25 = vector.load %arg8[%c0_16, %c0_17] : memref<1x128xf32, #tpu.memory_space<vmem>>, vector<1x128xf32>
        tpu.vector_store %arg8[%c0_16, %c0_17], %24 {strides = array<i32>} : memref<1x128xf32, #tpu.memory_space<vmem>>, vector<1x128xf32>,
      } else {
      }
      %c0_10 = arith.constant 0 : index
      %c0_11 = arith.constant 0 : index
      %19 = vector.load %arg8[%c0_10, %c0_11] : memref<1x128xf32, #tpu.memory_space<vmem>>, vector<1x128xf32>
      %cst_12 = arith.constant dense<0.000000e+00> : vector<128xf32>
      %20 = vector.multi_reduction <add>, %11, %cst_12 [0] : vector<512x128xf32> to vector<128xf32>
      %21 = vector.shape_cast %20 : vector<128xf32> to vector<1x128xf32>
      %22 = arith.addf %19, %21 : vector<1x128xf32>
      %c0_13 = arith.constant 0 : index
      %c0_14 = arith.constant 0 : index
      %23 = vector.load %arg8[%c0_13, %c0_14] : memref<1x128xf32, #tpu.memory_space<vmem>>, vector<1x128xf32>
      tpu.vector_store %arg8[%c0_13, %c0_14], %22 {strides = array<i32>} : memref<1x128xf32, #tpu.memory_space<vmem>>, vector<1x128xf32>,
    } else {
    }
    %c1_i32 = arith.constant 1 : i32
    %3 = arith.cmpi eq, %arg0, %c1_i32 : i32
    %4 = arith.extui %3 : i1 to i32
    %c0_i32_1 = arith.constant 0 : i32
    %5 = arith.cmpi ne, %4, %c0_i32_1 : i32
    scf.if %5 {
      %c0_i32_3 = arith.constant 0 : i32
      %9 = arith.cmpi eq, %arg1, %c0_i32_3 : i32
      %10 = arith.extui %9 : i1 to i32
      %c0_i32_4 = arith.constant 0 : i32
      %11 = arith.cmpi ne, %10, %c0_i32_4 : i32
      scf.if %11 {
        %cst_14 = arith.constant 0.000000e+00 : f32
        %34 = vector.broadcast %cst_14 : f32 to vector<1x128xf32>
        %c0_15 = arith.constant 0 : index
        %c0_16 = arith.constant 0 : index
        %35 = vector.load %arg9[%c0_15, %c0_16] : memref<1x128xf32, #tpu.memory_space<vmem>>, vector<1x128xf32>
        tpu.vector_store %arg9[%c0_15, %c0_16], %34 {strides = array<i32>} : memref<1x128xf32, #tpu.memory_space<vmem>>, vector<1x128xf32>,
      } else {
      }
      %c0 = arith.constant 0 : index
      %c0_5 = arith.constant 0 : index
      %12 = vector.load %arg8[%c0, %c0_5] : memref<1x128xf32, #tpu.memory_space<vmem>>, vector<1x128xf32>
      %cst = arith.constant 1.250000e-03 : f32
      %13 = vector.broadcast %cst : f32 to vector<1x128xf32>
      %14 = arith.mulf %12, %13 : vector<1x128xf32>
      %c512_i32 = arith.constant 512 : i32
      %15 = arith.muli %arg1, %c512_i32 : i32
      %16 = tpu.iota {dimensions = array<i32: 0>} : vector<512x128xi32>
      %17 = vector.broadcast %15 : i32 to vector<512x128xi32>
      %18 = arith.addi %17, %16 : vector<512x128xi32>
      %c800_i32 = arith.constant 800 : i32
      %19 = vector.broadcast %c800_i32 : i32 to vector<512x128xi32>
      %20 = arith.cmpi slt, %18, %19 : vector<512x128xi32>
      %21 = arith.index_cast %arg1 : i32 to index
      %c0_6 = arith.constant 0 : index
      %c0_7 = arith.constant 0 : index
      %22 = vector.load %arg7[%21, %c0_6, %c0_7] : memref<2x512x128xf32, #tpu.memory_space<vmem>>, vector<1x512x128xf32>
      %23 = vector.shape_cast %22 : vector<1x512x128xf32> to vector<512x128xf32>
      %24 = vector.broadcast %14 : vector<1x128xf32> to vector<512x128xf32>
      %25 = arith.subf %23, %24 : vector<512x128xf32>
      %cst_8 = arith.constant 0.000000e+00 : f32
      %26 = vector.broadcast %cst_8 : f32 to vector<512x128xf32>
      %27 = arith.select %20, %25, %26 : vector<512x128xi1>, vector<512x128xf32>
      %c0_9 = arith.constant 0 : index
      %c0_10 = arith.constant 0 : index
      %28 = vector.load %arg9[%c0_9, %c0_10] : memref<1x128xf32, #tpu.memory_space<vmem>>, vector<1x128xf32>
      %29 = arith.mulf %27, %27 : vector<512x128xf32>
      %cst_11 = arith.constant dense<0.000000e+00> : vector<128xf32>
      %30 = vector.multi_reduction <add>, %29, %cst_11 [0] : vector<512x128xf32> to vector<128xf32>
      %31 = vector.shape_cast %30 : vector<128xf32> to vector<1x128xf32>
      %32 = arith.addf %28, %31 : vector<1x128xf32>
      %c0_12 = arith.constant 0 : index
      %c0_13 = arith.constant 0 : index
      %33 = vector.load %arg9[%c0_12, %c0_13] : memref<1x128xf32, #tpu.memory_space<vmem>>, vector<1x128xf32>
      tpu.vector_store %arg9[%c0_12, %c0_13], %32 {strides = array<i32>} : memref<1x128xf32, #tpu.memory_space<vmem>>, vector<1x128xf32>,
    } else {
    }
    %c2_i32 = arith.constant 2 : i32
    %6 = arith.cmpi eq, %arg0, %c2_i32 : i32
    %7 = arith.extui %6 : i1 to i32
    %c0_i32_2 = arith.constant 0 : i32
    %8 = arith.cmpi ne, %7, %c0_i32_2 : i32
    scf.if %8 {
      %c0 = arith.constant 0 : index
      %c0_3 = arith.constant 0 : index
      %9 = vector.load %arg8[%c0, %c0_3] : memref<1x128xf32, #tpu.memory_space<vmem>>, vector<1x128xf32>
      %cst = arith.constant 1.250000e-03 : f32
      %10 = vector.broadcast %cst : f32 to vector<1x128xf32>
      %11 = arith.mulf %9, %10 : vector<1x128xf32>
      %c0_4 = arith.constant 0 : index
      %c0_5 = arith.constant 0 : index
      %12 = vector.load %arg9[%c0_4, %c0_5] : memref<1x128xf32, #tpu.memory_space<vmem>>, vector<1x128xf32>
      %cst_6 = arith.constant 1.250000e-03 : f32
      %13 = vector.broadcast %cst_6 : f32 to vector<1x128xf32>
      %14 = arith.mulf %12, %13 : vector<1x128xf32>
      %c0_7 = arith.constant 0 : index
      %c0_8 = arith.constant 0 : index
      %15 = vector.load %arg4[%c0_7, %c0_8] : memref<1x128xf32, #tpu.memory_space<vmem>>, vector<1x128xf32>
      %cst_9 = arith.constant 9.99999974E-6 : f32
      %16 = vector.broadcast %cst_9 : f32 to vector<1x128xf32>
      %17 = arith.addf %14, %16 : vector<1x128xf32>
      %18 = math.rsqrt %17 : vector<1x128xf32>
      %19 = arith.mulf %15, %18 : vector<1x128xf32>
      %c0_10 = arith.constant 0 : index
      %c0_11 = arith.constant 0 : index
      %20 = vector.load %arg5[%c0_10, %c0_11] : memref<1x128xf32, #tpu.memory_space<vmem>>, vector<1x128xf32>
      %21 = arith.mulf %11, %19 : vector<1x128xf32>
      %22 = arith.subf %20, %21 : vector<1x128xf32>
      %23 = arith.index_cast %arg1 : i32 to index
      %c0_12 = arith.constant 0 : index
      %c0_13 = arith.constant 0 : index
      %24 = vector.load %arg7[%23, %c0_12, %c0_13] : memref<2x512x128xf32, #tpu.memory_space<vmem>>, vector<1x512x128xf32>
      %25 = vector.shape_cast %24 : vector<1x512x128xf32> to vector<512x128xf32>
      %26 = vector.broadcast %19 : vector<1x128xf32> to vector<512x128xf32>
      %27 = arith.mulf %25, %26 : vector<512x128xf32>
      %28 = vector.broadcast %22 : vector<1x128xf32> to vector<512x128xf32>
      %29 = arith.addf %27, %28 : vector<512x128xf32>
      %cst_14 = arith.constant 0.000000e+00 : f32
      %30 = vector.broadcast %cst_14 : f32 to vector<512x128xf32>
      %31 = arith.maximumf %29, %30 : vector<512x128xf32>
      %32 = arith.truncf %31 : vector<512x128xf32> to vector<512x128xbf16>
      %c0_15 = arith.constant 0 : index
      %c0_16 = arith.constant 0 : index
      %33 = vector.load %arg6[%c0_15, %c0_16] : memref<512x128xbf16, #tpu.memory_space<vmem>>, vector<512x128xbf16>
      tpu.vector_store %arg6[%c0_15, %c0_16], %32 {strides = array<i32>} : memref<512x128xbf16, #tpu.memory_space<vmem>>, vector<512x128xbf16>,
    } else {
    }
    return
  }
  func.func @transform_0(%arg0: i32, %arg1: i32) -> (i32, i32) {
    %c0_i32 = arith.constant 0 : i32
    %0 = arith.cmpi eq, %arg0, %c0_i32 : i32
    %c1_i32 = arith.constant 1 : i32
    %1 = arith.select %0, %arg1, %c1_i32 : i32
    %c0_i32_0 = arith.constant 0 : i32
    %c0_i32_1 = arith.constant 0 : i32
    return %1, %c0_i32_0 : i32, i32
  }
  func.func @transform_1(%arg0: i32, %arg1: i32) -> (i32, i32) {
    %c0_i32 = arith.constant 0 : i32
    %c0_i32_0 = arith.constant 0 : i32
    %c0_i32_1 = arith.constant 0 : i32
    return %c0_i32, %c0_i32_0 : i32, i32
  }
  func.func @transform_2(%arg0: i32, %arg1: i32) -> (i32, i32) {
    %c0_i32 = arith.constant 0 : i32
    %c0_i32_0 = arith.constant 0 : i32
    %c0_i32_1 = arith.constant 0 : i32
    return %c0_i32, %c0_i32_0 : i32, i32
  }
  func.func @transform_3(%arg0: i32, %arg1: i32) -> (i32, i32) {
    %c0_i32 = arith.constant 0 : i32
    %c0_i32_0 = arith.constant 0 : i32
    %c0_i32_1 = arith.constant 0 : i32
    return %c0_i32, %c0_i32_0 : i32, i32
  }
  func.func @transform_4(%arg0: i32, %arg1: i32) -> (i32, i32) {
    %c2_i32 = arith.constant 2 : i32
    %0 = arith.cmpi eq, %arg0, %c2_i32 : i32
    %c0_i32 = arith.constant 0 : i32
    %1 = arith.select %0, %arg1, %c0_i32 : i32
    %c0_i32_0 = arith.constant 0 : i32
    %c0_i32_1 = arith.constant 0 : i32
    return %1, %c0_i32_0 : i32, i32
  }
}

module attributes {stable_mosaic.version = 11 : i64} {
  func.func @_conv_bn_relu_fused_kernel(%arg0: i32, %arg1: i32, %arg2: memref<176x512xbf16, #tpu.memory_space<vmem>>, %arg3: memref<512x128xbf16, #tpu.memory_space<vmem>>, %arg4: memref<1x128xf32, #tpu.memory_space<vmem>>, %arg5: memref<1x128xf32, #tpu.memory_space<vmem>>, %arg6: memref<176x128xbf16, #tpu.memory_space<vmem>>, %arg7: memref<1x176x128xf32, #tpu.memory_space<vmem>>, %arg8: memref<1x128xf32, #tpu.memory_space<vmem>>, %arg9: memref<1x128xf32, #tpu.memory_space<vmem>>) attributes {dimension_semantics = [#tpu.dimension_semantics<arbitrary>, #tpu.dimension_semantics<arbitrary>], iteration_bounds = array<i64: 3, 1>, scalar_prefetch = 0 : i64, scratch_operands = 3 : i64, tpu.core_type = #tpu.core_type<tc>, window_params = [{transform_indices = @transform_0, window_bounds = array<i64: 176, 512>}, {pipeline_mode = #tpu.pipeline_mode<synchronous>, transform_indices = @transform_1, window_bounds = array<i64: 512, 128>}, {pipeline_mode = #tpu.pipeline_mode<synchronous>, transform_indices = @transform_2, window_bounds = array<i64: 1, 128>}, {pipeline_mode = #tpu.pipeline_mode<synchronous>, transform_indices = @transform_3, window_bounds = array<i64: 1, 128>}, {transform_indices = @transform_4, window_bounds = array<i64: 176, 128>}]} {
    %c0_i32 = arith.constant 0 : i32
    %0 = arith.cmpi eq, %arg0, %c0_i32 : i32
    %1 = arith.extui %0 : i1 to i32
    %c0_i32_0 = arith.constant 0 : i32
    %2 = arith.cmpi ne, %1, %c0_i32_0 : i32
    scf.if %2 {
      %c0 = arith.constant 0 : index
      %c0_3 = arith.constant 0 : index
      %9 = vector.load %arg2[%c0, %c0_3] : memref<176x512xbf16, #tpu.memory_space<vmem>>, vector<176x512xbf16>
      %c0_4 = arith.constant 0 : index
      %c0_5 = arith.constant 0 : index
      %10 = vector.load %arg3[%c0_4, %c0_5] : memref<512x128xbf16, #tpu.memory_space<vmem>>, vector<512x128xbf16>
      %cst = arith.constant dense<0.000000e+00> : vector<176x128xf32>
      %11 = tpu.matmul %9, %10, %cst {dimension_numbers = #tpu.dot_dimension_numbers<[1], [0], [0], [1], [0, 0, 1, 1], [], []>} : vector<176x512xbf16>, vector<512x128xbf16>, vector<176x128xf32> -> vector<176x128xf32>
      %12 = arith.index_cast %arg1 : i32 to index
      %c0_6 = arith.constant 0 : index
      %c0_7 = arith.constant 0 : index
      %13 = vector.load %arg7[%12, %c0_6, %c0_7] : memref<1x176x128xf32, #tpu.memory_space<vmem>>, vector<1x176x128xf32>
      %14 = vector.shape_cast %13 : vector<1x176x128xf32> to vector<176x128xf32>
      %15 = vector.shape_cast %11 : vector<176x128xf32> to vector<1x176x128xf32>
      tpu.vector_store %arg7[%12, %c0_6, %c0_7], %15 {strides = array<i32>} : memref<1x176x128xf32, #tpu.memory_space<vmem>>, vector<1x176x128xf32>,
      %c0_i32_8 = arith.constant 0 : i32
      %16 = arith.cmpi eq, %arg1, %c0_i32_8 : i32
      %17 = arith.extui %16 : i1 to i32
      %c0_i32_9 = arith.constant 0 : i32
      %18 = arith.cmpi ne, %17, %c0_i32_9 : i32
      scf.if %18 {
        %cst_15 = arith.constant 0.000000e+00 : f32
        %24 = vector.broadcast %cst_15 : f32 to vector<1x128xf32>
        %c0_16 = arith.constant 0 : index
        %c0_17 = arith.constant 0 : index
        %25 = vector.load %arg8[%c0_16, %c0_17] : memref<1x128xf32, #tpu.memory_space<vmem>>, vector<1x128xf32>
        tpu.vector_store %arg8[%c0_16, %c0_17], %24 {strides = array<i32>} : memref<1x128xf32, #tpu.memory_space<vmem>>, vector<1x128xf32>,
      } else {
      }
      %c0_10 = arith.constant 0 : index
      %c0_11 = arith.constant 0 : index
      %19 = vector.load %arg8[%c0_10, %c0_11] : memref<1x128xf32, #tpu.memory_space<vmem>>, vector<1x128xf32>
      %cst_12 = arith.constant dense<0.000000e+00> : vector<128xf32>
      %20 = vector.multi_reduction <add>, %11, %cst_12 [0] : vector<176x128xf32> to vector<128xf32>
      %21 = vector.shape_cast %20 : vector<128xf32> to vector<1x128xf32>
      %22 = arith.addf %19, %21 : vector<1x128xf32>
      %c0_13 = arith.constant 0 : index
      %c0_14 = arith.constant 0 : index
      %23 = vector.load %arg8[%c0_13, %c0_14] : memref<1x128xf32, #tpu.memory_space<vmem>>, vector<1x128xf32>
      tpu.vector_store %arg8[%c0_13, %c0_14], %22 {strides = array<i32>} : memref<1x128xf32, #tpu.memory_space<vmem>>, vector<1x128xf32>,
    } else {
    }
    %c1_i32 = arith.constant 1 : i32
    %3 = arith.cmpi eq, %arg0, %c1_i32 : i32
    %4 = arith.extui %3 : i1 to i32
    %c0_i32_1 = arith.constant 0 : i32
    %5 = arith.cmpi ne, %4, %c0_i32_1 : i32
    scf.if %5 {
      %c0_i32_3 = arith.constant 0 : i32
      %9 = arith.cmpi eq, %arg1, %c0_i32_3 : i32
      %10 = arith.extui %9 : i1 to i32
      %c0_i32_4 = arith.constant 0 : i32
      %11 = arith.cmpi ne, %10, %c0_i32_4 : i32
      scf.if %11 {
        %cst_14 = arith.constant 0.000000e+00 : f32
        %34 = vector.broadcast %cst_14 : f32 to vector<1x128xf32>
        %c0_15 = arith.constant 0 : index
        %c0_16 = arith.constant 0 : index
        %35 = vector.load %arg9[%c0_15, %c0_16] : memref<1x128xf32, #tpu.memory_space<vmem>>, vector<1x128xf32>
        tpu.vector_store %arg9[%c0_15, %c0_16], %34 {strides = array<i32>} : memref<1x128xf32, #tpu.memory_space<vmem>>, vector<1x128xf32>,
      } else {
      }
      %c0 = arith.constant 0 : index
      %c0_5 = arith.constant 0 : index
      %12 = vector.load %arg8[%c0, %c0_5] : memref<1x128xf32, #tpu.memory_space<vmem>>, vector<1x128xf32>
      %cst = arith.constant 0.00617283955 : f32
      %13 = vector.broadcast %cst : f32 to vector<1x128xf32>
      %14 = arith.mulf %12, %13 : vector<1x128xf32>
      %c176_i32 = arith.constant 176 : i32
      %15 = arith.muli %arg1, %c176_i32 : i32
      %16 = tpu.iota {dimensions = array<i32: 0>} : vector<176x128xi32>
      %17 = vector.broadcast %15 : i32 to vector<176x128xi32>
      %18 = arith.addi %17, %16 : vector<176x128xi32>
      %c162_i32 = arith.constant 162 : i32
      %19 = vector.broadcast %c162_i32 : i32 to vector<176x128xi32>
      %20 = arith.cmpi slt, %18, %19 : vector<176x128xi32>
      %21 = arith.index_cast %arg1 : i32 to index
      %c0_6 = arith.constant 0 : index
      %c0_7 = arith.constant 0 : index
      %22 = vector.load %arg7[%21, %c0_6, %c0_7] : memref<1x176x128xf32, #tpu.memory_space<vmem>>, vector<1x176x128xf32>
      %23 = vector.shape_cast %22 : vector<1x176x128xf32> to vector<176x128xf32>
      %24 = vector.broadcast %14 : vector<1x128xf32> to vector<176x128xf32>
      %25 = arith.subf %23, %24 : vector<176x128xf32>
      %cst_8 = arith.constant 0.000000e+00 : f32
      %26 = vector.broadcast %cst_8 : f32 to vector<176x128xf32>
      %27 = arith.select %20, %25, %26 : vector<176x128xi1>, vector<176x128xf32>
      %c0_9 = arith.constant 0 : index
      %c0_10 = arith.constant 0 : index
      %28 = vector.load %arg9[%c0_9, %c0_10] : memref<1x128xf32, #tpu.memory_space<vmem>>, vector<1x128xf32>
      %29 = arith.mulf %27, %27 : vector<176x128xf32>
      %cst_11 = arith.constant dense<0.000000e+00> : vector<128xf32>
      %30 = vector.multi_reduction <add>, %29, %cst_11 [0] : vector<176x128xf32> to vector<128xf32>
      %31 = vector.shape_cast %30 : vector<128xf32> to vector<1x128xf32>
      %32 = arith.addf %28, %31 : vector<1x128xf32>
      %c0_12 = arith.constant 0 : index
      %c0_13 = arith.constant 0 : index
      %33 = vector.load %arg9[%c0_12, %c0_13] : memref<1x128xf32, #tpu.memory_space<vmem>>, vector<1x128xf32>
      tpu.vector_store %arg9[%c0_12, %c0_13], %32 {strides = array<i32>} : memref<1x128xf32, #tpu.memory_space<vmem>>, vector<1x128xf32>,
    } else {
    }
    %c2_i32 = arith.constant 2 : i32
    %6 = arith.cmpi eq, %arg0, %c2_i32 : i32
    %7 = arith.extui %6 : i1 to i32
    %c0_i32_2 = arith.constant 0 : i32
    %8 = arith.cmpi ne, %7, %c0_i32_2 : i32
    scf.if %8 {
      %c0 = arith.constant 0 : index
      %c0_3 = arith.constant 0 : index
      %9 = vector.load %arg8[%c0, %c0_3] : memref<1x128xf32, #tpu.memory_space<vmem>>, vector<1x128xf32>
      %cst = arith.constant 0.00617283955 : f32
      %10 = vector.broadcast %cst : f32 to vector<1x128xf32>
      %11 = arith.mulf %9, %10 : vector<1x128xf32>
      %c0_4 = arith.constant 0 : index
      %c0_5 = arith.constant 0 : index
      %12 = vector.load %arg9[%c0_4, %c0_5] : memref<1x128xf32, #tpu.memory_space<vmem>>, vector<1x128xf32>
      %cst_6 = arith.constant 0.00617283955 : f32
      %13 = vector.broadcast %cst_6 : f32 to vector<1x128xf32>
      %14 = arith.mulf %12, %13 : vector<1x128xf32>
      %c0_7 = arith.constant 0 : index
      %c0_8 = arith.constant 0 : index
      %15 = vector.load %arg4[%c0_7, %c0_8] : memref<1x128xf32, #tpu.memory_space<vmem>>, vector<1x128xf32>
      %cst_9 = arith.constant 9.99999974E-6 : f32
      %16 = vector.broadcast %cst_9 : f32 to vector<1x128xf32>
      %17 = arith.addf %14, %16 : vector<1x128xf32>
      %18 = math.rsqrt %17 : vector<1x128xf32>
      %19 = arith.mulf %15, %18 : vector<1x128xf32>
      %c0_10 = arith.constant 0 : index
      %c0_11 = arith.constant 0 : index
      %20 = vector.load %arg5[%c0_10, %c0_11] : memref<1x128xf32, #tpu.memory_space<vmem>>, vector<1x128xf32>
      %21 = arith.mulf %11, %19 : vector<1x128xf32>
      %22 = arith.subf %20, %21 : vector<1x128xf32>
      %23 = arith.index_cast %arg1 : i32 to index
      %c0_12 = arith.constant 0 : index
      %c0_13 = arith.constant 0 : index
      %24 = vector.load %arg7[%23, %c0_12, %c0_13] : memref<1x176x128xf32, #tpu.memory_space<vmem>>, vector<1x176x128xf32>
      %25 = vector.shape_cast %24 : vector<1x176x128xf32> to vector<176x128xf32>
      %26 = vector.broadcast %19 : vector<1x128xf32> to vector<176x128xf32>
      %27 = arith.mulf %25, %26 : vector<176x128xf32>
      %28 = vector.broadcast %22 : vector<1x128xf32> to vector<176x128xf32>
      %29 = arith.addf %27, %28 : vector<176x128xf32>
      %cst_14 = arith.constant 0.000000e+00 : f32
      %30 = vector.broadcast %cst_14 : f32 to vector<176x128xf32>
      %31 = arith.maximumf %29, %30 : vector<176x128xf32>
      %32 = arith.truncf %31 : vector<176x128xf32> to vector<176x128xbf16>
      %c0_15 = arith.constant 0 : index
      %c0_16 = arith.constant 0 : index
      %33 = vector.load %arg6[%c0_15, %c0_16] : memref<176x128xbf16, #tpu.memory_space<vmem>>, vector<176x128xbf16>
      tpu.vector_store %arg6[%c0_15, %c0_16], %32 {strides = array<i32>} : memref<176x128xbf16, #tpu.memory_space<vmem>>, vector<176x128xbf16>,
    } else {
    }
    return
  }
  func.func @transform_0(%arg0: i32, %arg1: i32) -> (i32, i32) {
    %c0_i32 = arith.constant 0 : i32
    %0 = arith.cmpi eq, %arg0, %c0_i32 : i32
    %c0_i32_0 = arith.constant 0 : i32
    %1 = arith.select %0, %arg1, %c0_i32_0 : i32
    %c0_i32_1 = arith.constant 0 : i32
    %c0_i32_2 = arith.constant 0 : i32
    return %1, %c0_i32_1 : i32, i32
  }
  func.func @transform_1(%arg0: i32, %arg1: i32) -> (i32, i32) {
    %c0_i32 = arith.constant 0 : i32
    %c0_i32_0 = arith.constant 0 : i32
    %c0_i32_1 = arith.constant 0 : i32
    return %c0_i32, %c0_i32_0 : i32, i32
  }
  func.func @transform_2(%arg0: i32, %arg1: i32) -> (i32, i32) {
    %c0_i32 = arith.constant 0 : i32
    %c0_i32_0 = arith.constant 0 : i32
    %c0_i32_1 = arith.constant 0 : i32
    return %c0_i32, %c0_i32_0 : i32, i32
  }
  func.func @transform_3(%arg0: i32, %arg1: i32) -> (i32, i32) {
    %c0_i32 = arith.constant 0 : i32
    %c0_i32_0 = arith.constant 0 : i32
    %c0_i32_1 = arith.constant 0 : i32
    return %c0_i32, %c0_i32_0 : i32, i32
  }
  func.func @transform_4(%arg0: i32, %arg1: i32) -> (i32, i32) {
    %c2_i32 = arith.constant 2 : i32
    %0 = arith.cmpi eq, %arg0, %c2_i32 : i32
    %c0_i32 = arith.constant 0 : i32
    %1 = arith.select %0, %arg1, %c0_i32 : i32
    %c0_i32_0 = arith.constant 0 : i32
    %c0_i32_1 = arith.constant 0 : i32
    return %1, %c0_i32_0 : i32, i32
  }
}

module attributes {stable_mosaic.version = 11 : i64} {
  func.func @_conv_bn_relu_fused_kernel(%arg0: i32, %arg1: i32, %arg2: memref<112x576xbf16, #tpu.memory_space<vmem>>, %arg3: memref<576x128xbf16, #tpu.memory_space<vmem>>, %arg4: memref<1x128xf32, #tpu.memory_space<vmem>>, %arg5: memref<1x128xf32, #tpu.memory_space<vmem>>, %arg6: memref<112x128xbf16, #tpu.memory_space<vmem>>, %arg7: memref<1x112x128xf32, #tpu.memory_space<vmem>>, %arg8: memref<1x128xf32, #tpu.memory_space<vmem>>, %arg9: memref<1x128xf32, #tpu.memory_space<vmem>>) attributes {dimension_semantics = [#tpu.dimension_semantics<arbitrary>, #tpu.dimension_semantics<arbitrary>], iteration_bounds = array<i64: 3, 1>, scalar_prefetch = 0 : i64, scratch_operands = 3 : i64, tpu.core_type = #tpu.core_type<tc>, window_params = [{transform_indices = @transform_0, window_bounds = array<i64: 112, 576>}, {pipeline_mode = #tpu.pipeline_mode<synchronous>, transform_indices = @transform_1, window_bounds = array<i64: 576, 128>}, {pipeline_mode = #tpu.pipeline_mode<synchronous>, transform_indices = @transform_2, window_bounds = array<i64: 1, 128>}, {pipeline_mode = #tpu.pipeline_mode<synchronous>, transform_indices = @transform_3, window_bounds = array<i64: 1, 128>}, {transform_indices = @transform_4, window_bounds = array<i64: 112, 128>}]} {
    %c0_i32 = arith.constant 0 : i32
    %0 = arith.cmpi eq, %arg0, %c0_i32 : i32
    %1 = arith.extui %0 : i1 to i32
    %c0_i32_0 = arith.constant 0 : i32
    %2 = arith.cmpi ne, %1, %c0_i32_0 : i32
    scf.if %2 {
      %c0 = arith.constant 0 : index
      %c0_3 = arith.constant 0 : index
      %9 = vector.load %arg2[%c0, %c0_3] : memref<112x576xbf16, #tpu.memory_space<vmem>>, vector<112x576xbf16>
      %c0_4 = arith.constant 0 : index
      %c0_5 = arith.constant 0 : index
      %10 = vector.load %arg3[%c0_4, %c0_5] : memref<576x128xbf16, #tpu.memory_space<vmem>>, vector<576x128xbf16>
      %cst = arith.constant dense<0.000000e+00> : vector<112x128xf32>
      %11 = tpu.matmul %9, %10, %cst {dimension_numbers = #tpu.dot_dimension_numbers<[1], [0], [0], [1], [0, 0, 1, 1], [], []>} : vector<112x576xbf16>, vector<576x128xbf16>, vector<112x128xf32> -> vector<112x128xf32>
      %12 = arith.index_cast %arg1 : i32 to index
      %c0_6 = arith.constant 0 : index
      %c0_7 = arith.constant 0 : index
      %13 = vector.load %arg7[%12, %c0_6, %c0_7] : memref<1x112x128xf32, #tpu.memory_space<vmem>>, vector<1x112x128xf32>
      %14 = vector.shape_cast %13 : vector<1x112x128xf32> to vector<112x128xf32>
      %15 = vector.shape_cast %11 : vector<112x128xf32> to vector<1x112x128xf32>
      tpu.vector_store %arg7[%12, %c0_6, %c0_7], %15 {strides = array<i32>} : memref<1x112x128xf32, #tpu.memory_space<vmem>>, vector<1x112x128xf32>,
      %c0_i32_8 = arith.constant 0 : i32
      %16 = arith.cmpi eq, %arg1, %c0_i32_8 : i32
      %17 = arith.extui %16 : i1 to i32
      %c0_i32_9 = arith.constant 0 : i32
      %18 = arith.cmpi ne, %17, %c0_i32_9 : i32
      scf.if %18 {
        %cst_15 = arith.constant 0.000000e+00 : f32
        %24 = vector.broadcast %cst_15 : f32 to vector<1x128xf32>
        %c0_16 = arith.constant 0 : index
        %c0_17 = arith.constant 0 : index
        %25 = vector.load %arg8[%c0_16, %c0_17] : memref<1x128xf32, #tpu.memory_space<vmem>>, vector<1x128xf32>
        tpu.vector_store %arg8[%c0_16, %c0_17], %24 {strides = array<i32>} : memref<1x128xf32, #tpu.memory_space<vmem>>, vector<1x128xf32>,
      } else {
      }
      %c0_10 = arith.constant 0 : index
      %c0_11 = arith.constant 0 : index
      %19 = vector.load %arg8[%c0_10, %c0_11] : memref<1x128xf32, #tpu.memory_space<vmem>>, vector<1x128xf32>
      %cst_12 = arith.constant dense<0.000000e+00> : vector<128xf32>
      %20 = vector.multi_reduction <add>, %11, %cst_12 [0] : vector<112x128xf32> to vector<128xf32>
      %21 = vector.shape_cast %20 : vector<128xf32> to vector<1x128xf32>
      %22 = arith.addf %19, %21 : vector<1x128xf32>
      %c0_13 = arith.constant 0 : index
      %c0_14 = arith.constant 0 : index
      %23 = vector.load %arg8[%c0_13, %c0_14] : memref<1x128xf32, #tpu.memory_space<vmem>>, vector<1x128xf32>
      tpu.vector_store %arg8[%c0_13, %c0_14], %22 {strides = array<i32>} : memref<1x128xf32, #tpu.memory_space<vmem>>, vector<1x128xf32>,
    } else {
    }
    %c1_i32 = arith.constant 1 : i32
    %3 = arith.cmpi eq, %arg0, %c1_i32 : i32
    %4 = arith.extui %3 : i1 to i32
    %c0_i32_1 = arith.constant 0 : i32
    %5 = arith.cmpi ne, %4, %c0_i32_1 : i32
    scf.if %5 {
      %c0_i32_3 = arith.constant 0 : i32
      %9 = arith.cmpi eq, %arg1, %c0_i32_3 : i32
      %10 = arith.extui %9 : i1 to i32
      %c0_i32_4 = arith.constant 0 : i32
      %11 = arith.cmpi ne, %10, %c0_i32_4 : i32
      scf.if %11 {
        %cst_14 = arith.constant 0.000000e+00 : f32
        %34 = vector.broadcast %cst_14 : f32 to vector<1x128xf32>
        %c0_15 = arith.constant 0 : index
        %c0_16 = arith.constant 0 : index
        %35 = vector.load %arg9[%c0_15, %c0_16] : memref<1x128xf32, #tpu.memory_space<vmem>>, vector<1x128xf32>
        tpu.vector_store %arg9[%c0_15, %c0_16], %34 {strides = array<i32>} : memref<1x128xf32, #tpu.memory_space<vmem>>, vector<1x128xf32>,
      } else {
      }
      %c0 = arith.constant 0 : index
      %c0_5 = arith.constant 0 : index
      %12 = vector.load %arg8[%c0, %c0_5] : memref<1x128xf32, #tpu.memory_space<vmem>>, vector<1x128xf32>
      %cst = arith.constant 0.0102040814 : f32
      %13 = vector.broadcast %cst : f32 to vector<1x128xf32>
      %14 = arith.mulf %12, %13 : vector<1x128xf32>
      %c112_i32 = arith.constant 112 : i32
      %15 = arith.muli %arg1, %c112_i32 : i32
      %16 = tpu.iota {dimensions = array<i32: 0>} : vector<112x128xi32>
      %17 = vector.broadcast %15 : i32 to vector<112x128xi32>
      %18 = arith.addi %17, %16 : vector<112x128xi32>
      %c98_i32 = arith.constant 98 : i32
      %19 = vector.broadcast %c98_i32 : i32 to vector<112x128xi32>
      %20 = arith.cmpi slt, %18, %19 : vector<112x128xi32>
      %21 = arith.index_cast %arg1 : i32 to index
      %c0_6 = arith.constant 0 : index
      %c0_7 = arith.constant 0 : index
      %22 = vector.load %arg7[%21, %c0_6, %c0_7] : memref<1x112x128xf32, #tpu.memory_space<vmem>>, vector<1x112x128xf32>
      %23 = vector.shape_cast %22 : vector<1x112x128xf32> to vector<112x128xf32>
      %24 = vector.broadcast %14 : vector<1x128xf32> to vector<112x128xf32>
      %25 = arith.subf %23, %24 : vector<112x128xf32>
      %cst_8 = arith.constant 0.000000e+00 : f32
      %26 = vector.broadcast %cst_8 : f32 to vector<112x128xf32>
      %27 = arith.select %20, %25, %26 : vector<112x128xi1>, vector<112x128xf32>
      %c0_9 = arith.constant 0 : index
      %c0_10 = arith.constant 0 : index
      %28 = vector.load %arg9[%c0_9, %c0_10] : memref<1x128xf32, #tpu.memory_space<vmem>>, vector<1x128xf32>
      %29 = arith.mulf %27, %27 : vector<112x128xf32>
      %cst_11 = arith.constant dense<0.000000e+00> : vector<128xf32>
      %30 = vector.multi_reduction <add>, %29, %cst_11 [0] : vector<112x128xf32> to vector<128xf32>
      %31 = vector.shape_cast %30 : vector<128xf32> to vector<1x128xf32>
      %32 = arith.addf %28, %31 : vector<1x128xf32>
      %c0_12 = arith.constant 0 : index
      %c0_13 = arith.constant 0 : index
      %33 = vector.load %arg9[%c0_12, %c0_13] : memref<1x128xf32, #tpu.memory_space<vmem>>, vector<1x128xf32>
      tpu.vector_store %arg9[%c0_12, %c0_13], %32 {strides = array<i32>} : memref<1x128xf32, #tpu.memory_space<vmem>>, vector<1x128xf32>,
    } else {
    }
    %c2_i32 = arith.constant 2 : i32
    %6 = arith.cmpi eq, %arg0, %c2_i32 : i32
    %7 = arith.extui %6 : i1 to i32
    %c0_i32_2 = arith.constant 0 : i32
    %8 = arith.cmpi ne, %7, %c0_i32_2 : i32
    scf.if %8 {
      %c0 = arith.constant 0 : index
      %c0_3 = arith.constant 0 : index
      %9 = vector.load %arg8[%c0, %c0_3] : memref<1x128xf32, #tpu.memory_space<vmem>>, vector<1x128xf32>
      %cst = arith.constant 0.0102040814 : f32
      %10 = vector.broadcast %cst : f32 to vector<1x128xf32>
      %11 = arith.mulf %9, %10 : vector<1x128xf32>
      %c0_4 = arith.constant 0 : index
      %c0_5 = arith.constant 0 : index
      %12 = vector.load %arg9[%c0_4, %c0_5] : memref<1x128xf32, #tpu.memory_space<vmem>>, vector<1x128xf32>
      %cst_6 = arith.constant 0.0102040814 : f32
      %13 = vector.broadcast %cst_6 : f32 to vector<1x128xf32>
      %14 = arith.mulf %12, %13 : vector<1x128xf32>
      %c0_7 = arith.constant 0 : index
      %c0_8 = arith.constant 0 : index
      %15 = vector.load %arg4[%c0_7, %c0_8] : memref<1x128xf32, #tpu.memory_space<vmem>>, vector<1x128xf32>
      %cst_9 = arith.constant 9.99999974E-6 : f32
      %16 = vector.broadcast %cst_9 : f32 to vector<1x128xf32>
      %17 = arith.addf %14, %16 : vector<1x128xf32>
      %18 = math.rsqrt %17 : vector<1x128xf32>
      %19 = arith.mulf %15, %18 : vector<1x128xf32>
      %c0_10 = arith.constant 0 : index
      %c0_11 = arith.constant 0 : index
      %20 = vector.load %arg5[%c0_10, %c0_11] : memref<1x128xf32, #tpu.memory_space<vmem>>, vector<1x128xf32>
      %21 = arith.mulf %11, %19 : vector<1x128xf32>
      %22 = arith.subf %20, %21 : vector<1x128xf32>
      %23 = arith.index_cast %arg1 : i32 to index
      %c0_12 = arith.constant 0 : index
      %c0_13 = arith.constant 0 : index
      %24 = vector.load %arg7[%23, %c0_12, %c0_13] : memref<1x112x128xf32, #tpu.memory_space<vmem>>, vector<1x112x128xf32>
      %25 = vector.shape_cast %24 : vector<1x112x128xf32> to vector<112x128xf32>
      %26 = vector.broadcast %19 : vector<1x128xf32> to vector<112x128xf32>
      %27 = arith.mulf %25, %26 : vector<112x128xf32>
      %28 = vector.broadcast %22 : vector<1x128xf32> to vector<112x128xf32>
      %29 = arith.addf %27, %28 : vector<112x128xf32>
      %cst_14 = arith.constant 0.000000e+00 : f32
      %30 = vector.broadcast %cst_14 : f32 to vector<112x128xf32>
      %31 = arith.maximumf %29, %30 : vector<112x128xf32>
      %32 = arith.truncf %31 : vector<112x128xf32> to vector<112x128xbf16>
      %c0_15 = arith.constant 0 : index
      %c0_16 = arith.constant 0 : index
      %33 = vector.load %arg6[%c0_15, %c0_16] : memref<112x128xbf16, #tpu.memory_space<vmem>>, vector<112x128xbf16>
      tpu.vector_store %arg6[%c0_15, %c0_16], %32 {strides = array<i32>} : memref<112x128xbf16, #tpu.memory_space<vmem>>, vector<112x128xbf16>,
    } else {
    }
    return
  }
  func.func @transform_0(%arg0: i32, %arg1: i32) -> (i32, i32) {
    %c0_i32 = arith.constant 0 : i32
    %0 = arith.cmpi eq, %arg0, %c0_i32 : i32
    %c0_i32_0 = arith.constant 0 : i32
    %1 = arith.select %0, %arg1, %c0_i32_0 : i32
    %c0_i32_1 = arith.constant 0 : i32
    %c0_i32_2 = arith.constant 0 : i32
    return %1, %c0_i32_1 : i32, i32
  }
  func.func @transform_1(%arg0: i32, %arg1: i32) -> (i32, i32) {
    %c0_i32 = arith.constant 0 : i32
    %c0_i32_0 = arith.constant 0 : i32
    %c0_i32_1 = arith.constant 0 : i32
    return %c0_i32, %c0_i32_0 : i32, i32
  }
  func.func @transform_2(%arg0: i32, %arg1: i32) -> (i32, i32) {
    %c0_i32 = arith.constant 0 : i32
    %c0_i32_0 = arith.constant 0 : i32
    %c0_i32_1 = arith.constant 0 : i32
    return %c0_i32, %c0_i32_0 : i32, i32
  }
  func.func @transform_3(%arg0: i32, %arg1: i32) -> (i32, i32) {
    %c0_i32 = arith.constant 0 : i32
    %c0_i32_0 = arith.constant 0 : i32
    %c0_i32_1 = arith.constant 0 : i32
    return %c0_i32, %c0_i32_0 : i32, i32
  }
  func.func @transform_4(%arg0: i32, %arg1: i32) -> (i32, i32) {
    %c2_i32 = arith.constant 2 : i32
    %0 = arith.cmpi eq, %arg0, %c2_i32 : i32
    %c0_i32 = arith.constant 0 : i32
    %1 = arith.select %0, %arg1, %c0_i32 : i32
    %c0_i32_0 = arith.constant 0 : i32
    %c0_i32_1 = arith.constant 0 : i32
    return %1, %c0_i32_0 : i32, i32
  }
}

module attributes {stable_mosaic.version = 11 : i64} {
  func.func @_dueling_head_kernel(%arg0: i32, %arg1: memref<16x640xbf16, #tpu.memory_space<vmem>>, %arg2: memref<640x1024xbf16, #tpu.memory_space<vmem>>, %arg3: memref<1x1024xf32, #tpu.memory_space<vmem>>, %arg4: memref<1024x128xbf16, #tpu.memory_space<vmem>>, %arg5: memref<1x128xf32, #tpu.memory_space<vmem>>, %arg6: memref<16x128xf32, #tpu.memory_space<vmem>>, %arg7: memref<16x1024xf32, #tpu.memory_space<vmem>>) attributes {dimension_semantics = [#tpu.dimension_semantics<arbitrary>], iteration_bounds = array<i64: 5>, scalar_prefetch = 0 : i64, scratch_operands = 1 : i64, tpu.core_type = #tpu.core_type<tc>, window_params = [{transform_indices = @transform_0, window_bounds = array<i64: 16, 640>}, {transform_indices = @transform_1, window_bounds = array<i64: 640, 1024>}, {pipeline_mode = #tpu.pipeline_mode<synchronous>, transform_indices = @transform_2, window_bounds = array<i64: 1, 1024>}, {pipeline_mode = #tpu.pipeline_mode<synchronous>, transform_indices = @transform_3, window_bounds = array<i64: 1024, 128>}, {pipeline_mode = #tpu.pipeline_mode<synchronous>, transform_indices = @transform_4, window_bounds = array<i64: 1, 128>}, {pipeline_mode = #tpu.pipeline_mode<synchronous>, transform_indices = @transform_5, window_bounds = array<i64: 16, 128>}]} {
    %c0_i32 = arith.constant 0 : i32
    %0 = arith.cmpi eq, %arg0, %c0_i32 : i32
    %1 = arith.extui %0 : i1 to i32
    %c0_i32_0 = arith.constant 0 : i32
    %2 = arith.cmpi ne, %1, %c0_i32_0 : i32
    scf.if %2 {
      %cst_9 = arith.constant 0.000000e+00 : f32
      %12 = vector.broadcast %cst_9 : f32 to vector<16x1024xf32>
      %c0_10 = arith.constant 0 : index
      %c0_11 = arith.constant 0 : index
      %13 = vector.load %arg7[%c0_10, %c0_11] : memref<16x1024xf32, #tpu.memory_space<vmem>>, vector<16x1024xf32>
      tpu.vector_store %arg7[%c0_10, %c0_11], %12 {strides = array<i32>} : memref<16x1024xf32, #tpu.memory_space<vmem>>, vector<16x1024xf32>,
    } else {
    }
    %c0 = arith.constant 0 : index
    %c0_1 = arith.constant 0 : index
    %3 = vector.load %arg7[%c0, %c0_1] : memref<16x1024xf32, #tpu.memory_space<vmem>>, vector<16x1024xf32>
    %c0_2 = arith.constant 0 : index
    %c0_3 = arith.constant 0 : index
    %4 = vector.load %arg1[%c0_2, %c0_3] : memref<16x640xbf16, #tpu.memory_space<vmem>>, vector<16x640xbf16>
    %c0_4 = arith.constant 0 : index
    %c0_5 = arith.constant 0 : index
    %5 = vector.load %arg2[%c0_4, %c0_5] : memref<640x1024xbf16, #tpu.memory_space<vmem>>, vector<640x1024xbf16>
    %cst = arith.constant dense<0.000000e+00> : vector<16x1024xf32>
    %6 = tpu.matmul %4, %5, %cst {dimension_numbers = #tpu.dot_dimension_numbers<[1], [0], [0], [1], [0, 0, 1, 1], [], []>} : vector<16x640xbf16>, vector<640x1024xbf16>, vector<16x1024xf32> -> vector<16x1024xf32>
    %7 = arith.addf %3, %6 : vector<16x1024xf32>
    %c0_6 = arith.constant 0 : index
    %c0_7 = arith.constant 0 : index
    %8 = vector.load %arg7[%c0_6, %c0_7] : memref<16x1024xf32, #tpu.memory_space<vmem>>, vector<16x1024xf32>
    tpu.vector_store %arg7[%c0_6, %c0_7], %7 {strides = array<i32>} : memref<16x1024xf32, #tpu.memory_space<vmem>>, vector<16x1024xf32>,
    %c4_i32 = arith.constant 4 : i32
    %9 = arith.cmpi eq, %arg0, %c4_i32 : i32
    %10 = arith.extui %9 : i1 to i32
    %c0_i32_8 = arith.constant 0 : i32
    %11 = arith.cmpi ne, %10, %c0_i32_8 : i32
    scf.if %11 {
      %c0_9 = arith.constant 0 : index
      %c0_10 = arith.constant 0 : index
      %12 = vector.load %arg7[%c0_9, %c0_10] : memref<16x1024xf32, #tpu.memory_space<vmem>>, vector<16x1024xf32>
      %c0_11 = arith.constant 0 : index
      %c0_12 = arith.constant 0 : index
      %13 = vector.load %arg3[%c0_11, %c0_12] : memref<1x1024xf32, #tpu.memory_space<vmem>>, vector<1x1024xf32>
      %14 = vector.broadcast %13 : vector<1x1024xf32> to vector<16x1024xf32>
      %15 = arith.addf %12, %14 : vector<16x1024xf32>
      %cst_13 = arith.constant 0.000000e+00 : f32
      %16 = vector.broadcast %cst_13 : f32 to vector<16x1024xf32>
      %17 = arith.maximumf %15, %16 : vector<16x1024xf32>
      %18 = arith.truncf %17 : vector<16x1024xf32> to vector<16x1024xbf16>
      %c0_14 = arith.constant 0 : index
      %c0_15 = arith.constant 0 : index
      %19 = vector.load %arg4[%c0_14, %c0_15] : memref<1024x128xbf16, #tpu.memory_space<vmem>>, vector<1024x128xbf16>
      %cst_16 = arith.constant dense<0.000000e+00> : vector<16x128xf32>
      %20 = tpu.matmul %18, %19, %cst_16 {dimension_numbers = #tpu.dot_dimension_numbers<[1], [0], [0], [1], [0, 0, 1, 1], [], []>} : vector<16x1024xbf16>, vector<1024x128xbf16>, vector<16x128xf32> -> vector<16x128xf32>
      %c0_17 = arith.constant 0 : index
      %c0_18 = arith.constant 0 : index
      %21 = vector.load %arg5[%c0_17, %c0_18] : memref<1x128xf32, #tpu.memory_space<vmem>>, vector<1x128xf32>
      %22 = vector.broadcast %21 : vector<1x128xf32> to vector<16x128xf32>
      %23 = arith.addf %20, %22 : vector<16x128xf32>
      %24 = tpu.iota {dimensions = array<i32: 1>} : vector<16x128xi32>
      %c6_i32 = arith.constant 6 : i32
      %25 = vector.broadcast %c6_i32 : i32 to vector<16x128xi32>
      %26 = arith.cmpi slt, %24, %25 : vector<16x128xi32>
      %cst_19 = arith.constant 0.000000e+00 : f32
      %27 = vector.broadcast %cst_19 : f32 to vector<16x128xf32>
      %28 = arith.select %26, %23, %27 : vector<16x128xi1>, vector<16x128xf32>
      %cst_20 = arith.constant dense<0.000000e+00> : vector<16xf32>
      %29 = vector.multi_reduction <add>, %28, %cst_20 [1] : vector<16x128xf32> to vector<16xf32>
      %30 = vector.shape_cast %29 : vector<16xf32> to vector<16x1xf32>
      %c6_i32_21 = arith.constant 6 : i32
      %31 = vector.broadcast %c6_i32_21 : i32 to vector<16x128xi32>
      %32 = arith.cmpi eq, %24, %31 : vector<16x128xi32>
      %cst_22 = arith.constant 0.000000e+00 : f32
      %33 = vector.broadcast %cst_22 : f32 to vector<16x128xf32>
      %34 = arith.select %32, %23, %33 : vector<16x128xi1>, vector<16x128xf32>
      %cst_23 = arith.constant dense<0.000000e+00> : vector<16xf32>
      %35 = vector.multi_reduction <add>, %34, %cst_23 [1] : vector<16x128xf32> to vector<16xf32>
      %36 = vector.shape_cast %35 : vector<16xf32> to vector<16x1xf32>
      %37 = vector.broadcast %36 : vector<16x1xf32> to vector<16x128xf32>
      %38 = arith.addf %23, %37 : vector<16x128xf32>
      %cst_24 = arith.constant 0.166666672 : f32
      %39 = vector.broadcast %cst_24 : f32 to vector<16x1xf32>
      %40 = arith.mulf %30, %39 : vector<16x1xf32>
      %41 = vector.broadcast %40 : vector<16x1xf32> to vector<16x128xf32>
      %42 = arith.subf %38, %41 : vector<16x128xf32>
      %c0_25 = arith.constant 0 : index
      %c0_26 = arith.constant 0 : index
      %43 = vector.load %arg6[%c0_25, %c0_26] : memref<16x128xf32, #tpu.memory_space<vmem>>, vector<16x128xf32>
      tpu.vector_store %arg6[%c0_25, %c0_26], %42 {strides = array<i32>} : memref<16x128xf32, #tpu.memory_space<vmem>>, vector<16x128xf32>,
    } else {
    }
    return
  }
  func.func @transform_0(%arg0: i32) -> (i32, i32) {
    %c0_i32 = arith.constant 0 : i32
    %c0_i32_0 = arith.constant 0 : i32
    return %c0_i32, %arg0 : i32, i32
  }
  func.func @transform_1(%arg0: i32) -> (i32, i32) {
    %c0_i32 = arith.constant 0 : i32
    %c0_i32_0 = arith.constant 0 : i32
    return %arg0, %c0_i32 : i32, i32
  }
  func.func @transform_2(%arg0: i32) -> (i32, i32) {
    %c0_i32 = arith.constant 0 : i32
    %c0_i32_0 = arith.constant 0 : i32
    %c0_i32_1 = arith.constant 0 : i32
    return %c0_i32, %c0_i32_0 : i32, i32
  }
  func.func @transform_3(%arg0: i32) -> (i32, i32) {
    %c0_i32 = arith.constant 0 : i32
    %c0_i32_0 = arith.constant 0 : i32
    %c0_i32_1 = arith.constant 0 : i32
    return %c0_i32, %c0_i32_0 : i32, i32
  }
  func.func @transform_4(%arg0: i32) -> (i32, i32) {
    %c0_i32 = arith.constant 0 : i32
    %c0_i32_0 = arith.constant 0 : i32
    %c0_i32_1 = arith.constant 0 : i32
    return %c0_i32, %c0_i32_0 : i32, i32
  }
  func.func @transform_5(%arg0: i32) -> (i32, i32) {
    %c0_i32 = arith.constant 0 : i32
    %c0_i32_0 = arith.constant 0 : i32
    %c0_i32_1 = arith.constant 0 : i32
    return %c0_i32, %c0_i32_0 : i32, i32
  }
}

</mosaic_0001>

<bundles_post_ra>
// kernel: forward.4
= control target key start
LH: loop header
LB: loop body
LE: loop exit
PB: predicated region body
PF: predicated region fallthrough
CT: control target
= control target key end

     0   :  { %s3092_s15 = smov 0   ;;  %s3094_s16 = smov 0   ;;  %s4582_s0 = inlined_call_operand.vmem [shape: bf16[1024,256], index: 0, kind: input, shape index: {}]   ;;  %s4583_s1 = inlined_call_operand.vmem [shape: bf16[256,128], index: 1, kind: input, shape index: {}]   ;;  %s4584_s2 = inlined_call_operand.vmem [shape: f32[1,128], index: 2, kind: input, shape index: {}]   ;;  %s4585_s3 = inlined_call_operand.vmem [shape: f32[1,128], index: 3, kind: input, shape index: {}]   ;;  %s4586_s4 = inlined_call_operand.vmem [shape: bf16[1024,128], index: 4, kind: output, shape index: {}]  }
   0x1   :  { %s3096_s17 = smov 0   ;;  %s3098_s18 = smov 0  }
   0x2   :  { %s3100_s19 = smov 0  }
   0x3 LB: > { %s23_s20 = sadd.s32 1, %s3054_s17  ;;  %s26_s21 = sadd.s32 1, %s3058_s18  ;;  %s3062_s19 = sphi %s3100_s19, %s14_s19   ;;  %s3058_s18 = sphi %s3098_s18, %s4691_s18   ;;  %s3054_s17 = sphi %s3096_s17, %s4690_s17   ;;  %s3050_s16 = sphi %s3094_s16, %s4689_s16   ;;  %s3046_s15 = sphi %s3092_s15, %s4688_s15  }
   0x4   : > { %p24_p0 = scmp.ge.s32.totalorder %s23_s20, 2  ;;  %p2419_p1 = scmp.ge.s32.totalorder %s3062_s19, 1 }
   0x5   : > { %p188_p2 = scmp.lt.s32.totalorder %s3062_s19, 7 }
   0x6   : > { %s4693_s20 = smov (%p24_p0, %s23_s20), 0  ;;  %s4695_s21 = smov (!%p24_p0, %s26_s21), %s3058_s18 }
   0x7   : > { %p189_p3 = pnand %p2419_p1, %p188_p2  ;;  %p28_p4 = scmp.ge.s32.totalorder %s4695_s21, 3 }
   0x8   : > { %p219_p5 = scmp.eq.s32.totalorder (!%p189_p3), %s3050_s16, 0  ;;  %p230_p6 = scmp.eq.s32.totalorder (!%p189_p3), %s3050_s16, 2 }
   0x9   : > { %s4697_s21 = smov (%p28_p4, %s4695_s21), 0  ;;  %192 = sbr.rel (%p189_p3) target bundleno = 868 (0x364), region = 36 }
   0xa   : > { %p2425_p9 = scmp.ne.s32.totalorder (!%p189_p3), %s3050_s16, 0 }
  0x10   : > { %s220_s22 = scalar_select %p219_p5, %s3046_s15, 1 }
  0x11   : > { %s231_s23 = scalar_select %p230_p6, %s3046_s15, 0 }
  0x12   : > { %s2420_s24 = sshll.u32 %s220_s22, 6  ;;  %244 = sbr.rel (%p2425_p9) target bundleno = 567 (0x237), region = 40 }
  0x13   : > { %p222_p7 = scmp.lt.s32.totalorder %s2420_s24, 127  ;;  %s2423_s25 = sshll.u32 %s231_s23, 6 }
  0x14   : > { %p233_p8 = scmp.lt.s32.totalorder %s2423_s25, 127 }
  0x15   : > { %s4699_s24 = smov (!%p222_p7, %s2420_s24), 127 }
  0x16   : > { %s4701_s25 = smov (!%p233_p8, %s2423_s25), 127  ;;  %s2579_s26 = sshll.u32 %s4699_s24, 3 }
  0x17   : > { %s3133_s29 = scalar_lea.vmem %s4582_s0, %s2579_s26  ;;  %s2424_s30 = sshll.u32 %s4701_s25, 2 }
  0x18   : > { %s3138_s7 = scalar_lea.vmem %s4586_s4, %s2424_s30 }
  0x19   : > { %v2910_v0 = vld [vmem:[%s4583_s1] sm:$0xff]   ;;  %v3064_v1 = vmov 0   ;;  %v2911_v2 = vld [vmem:[%s4583_s1 + $0x8] sm:$0xff]   ;;  %v2912_v3 = vld [vmem:[%s4583_s1 + $0x10] sm:$0xff]   ;;  %s2506_s5 = sshll.u32 %s3046_s15, 9  ;;  %p2507_p10 = scmp.ne.s32.totalorder %s3046_s15, 0 }
  0x1a   : > { %757 = vmatprep.subr.bf16.mxu0 %v3064_v1  ;;  %2835 = vmatprep.subr.bf16.mxu1 %v3064_v1  ;;  %v2913_v4 = vld [vmem:[%s4583_s1 + $0x18] sm:$0xff]   ;;  %v2914_v5 = vld [vmem:[%s4583_s1 + $0x20] sm:$0xff]   ;;  %v2915_v7 = vld [vmem:[%s4583_s1 + $0x28] sm:$0xff]   ;;  %s3290_s6 = scalar_lea.vmem [#allocation2], %s2506_s5 }
  0x1b   : > { %758 = vmatpush1.bf16.msra.mxu0 %v2910_v0  ;;  %2851 = vmatpush1.bf16.msra.mxu1 %v2910_v0  ;;  %v2928_v6 = vld [vmem:[%s3133_s29 + $0x4] ss:$8 sps:$4 sm:$0xff]   ;;  %v2916_v9 = vld [vmem:[%s4583_s1 + $0x30] sm:$0xff]   ;;  %v2917_v10 = vld [vmem:[%s4583_s1 + $0x38] sm:$0xff]  }
  0x1c   : > { %759 = vmatprep.subr.bf16.mxu0 %v3064_v1  ;;  %2836 = vmatprep.subr.bf16.mxu1 %v3064_v1  ;;  %v2931_v8 = vld [vmem:[%s3133_s29 + $0x104] ss:$8 sps:$4 sm:$0xff]   ;;  %v2920_v13 = vld [vmem:[%s4583_s1 + $0x50] sm:$0xff]   ;;  %v2921_v14 = vld [vmem:[%s4583_s1 + $0x58] sm:$0xff]  }
  0x1d   : > { %789 = vmatprep.mubr.bf16.mxu0 %v2928_v6  ;;  %917 = vmatprep.mubr.bf16.mxu1 %v2931_v8  ;;  %v2918_v11 = vld [vmem:[%s4583_s1 + $0x40] sm:$0xff]   ;;  %v2919_v12 = vld [vmem:[%s4583_s1 + $0x48] sm:$0xff]   ;;  %v2924_v17 = vld [vmem:[%s4583_s1 + $0x70] sm:$0xff]  }
  0x1e   : > { %v2922_v15 = vld [vmem:[%s4583_s1 + $0x60] sm:$0xff]   ;;  %v2923_v16 = vld [vmem:[%s4583_s1 + $0x68] sm:$0xff]   ;;  %v2925_v18 = vld [vmem:[%s4583_s1 + $0x78] sm:$0xff]  }
  0x1f   : > { %760 = vmatpush1.bf16.msra.mxu0 %v2911_v2  ;;  %2852 = vmatpush1.bf16.msra.mxu1 %v2911_v2  ;;  %v2926_v19 = vld [vmem:[%s3133_s29] ss:$8 sps:$4 sm:$0xff]   ;;  %v2932_v21 = vld [vmem:[%s3133_s29 + $0x14] ss:$8 sps:$4 sm:$0xff]   ;;  %v2936_v23 = vld [vmem:[%s3133_s29 + $0x10] ss:$8 sps:$4 sm:$0xff]  }
  0x20   : > { %761 = vmatprep.subr.bf16.mxu0 %v3064_v1  ;;  %2837 = vmatprep.subr.bf16.mxu1 %v3064_v1  ;;  %v2929_v20 = vld [vmem:[%s3133_s29 + $0x100] ss:$8 sps:$4 sm:$0xff]   ;;  %v2934_v22 = vld [vmem:[%s3133_s29 + $0x114] ss:$8 sps:$4 sm:$0xff]   ;;  %v2937_v24 = vld [vmem:[%s3133_s29 + $0x110] ss:$8 sps:$4 sm:$0xff]  }
  0x21   : > { %v2938_v25 = vld [vmem:[%s3133_s29 + $0x24] ss:$8 sps:$4 sm:$0xff]   ;;  %v2942_v27 = vld [vmem:[%s3133_s29 + $0x20] ss:$8 sps:$4 sm:$0xff]   ;;  %v2944_v29 = vld [vmem:[%s3133_s29 + $0x34] ss:$8 sps:$4 sm:$0xff]  }
  0x22   : > { %v2940_v26 = vld [vmem:[%s3133_s29 + $0x124] ss:$8 sps:$4 sm:$0xff]   ;;  %v2943_v28 = vld [vmem:[%s3133_s29 + $0x120] ss:$8 sps:$4 sm:$0xff]   ;;  %v2946_v30 = vld [vmem:[%s3133_s29 + $0x134] ss:$8 sps:$4 sm:$0xff]  }
  0x23   : > { %762 = vmatpush1.bf16.msra.mxu0 %v2912_v3  ;;  %2853 = vmatpush1.bf16.msra.mxu1 %v2912_v3  ;;  %v2948_v31 = vld [vmem:[%s3133_s29 + $0x30] ss:$8 sps:$4 sm:$0xff]   ;;  %v2950_v33 = vld [vmem:[%s3133_s29 + $0x44] ss:$8 sps:$4 sm:$0xff]   ;;  %v2954_v35 = vld [vmem:[%s3133_s29 + $0x40] ss:$8 sps:$4 sm:$0xff]  }
  0x24   : > { %763 = vmatprep.subr.bf16.mxu0 %v3064_v1  ;;  %2838 = vmatprep.subr.bf16.mxu1 %v3064_v1  ;;  %v2949_v32 = vld [vmem:[%s3133_s29 + $0x130] ss:$8 sps:$4 sm:$0xff]   ;;  %v2952_v34 = vld [vmem:[%s3133_s29 + $0x144] ss:$8 sps:$4 sm:$0xff]   ;;  %v2955_v36 = vld [vmem:[%s3133_s29 + $0x140] ss:$8 sps:$4 sm:$0xff]  }
  0x25   : > { %v2956_v37 = vld [vmem:[%s3133_s29 + $0x54] ss:$8 sps:$4 sm:$0xff]   ;;  %v2960_v39 = vld [vmem:[%s3133_s29 + $0x50] ss:$8 sps:$4 sm:$0xff]   ;;  %v2962_v41 = vld [vmem:[%s3133_s29 + $0x64] ss:$8 sps:$4 sm:$0xff]  }
  0x26   : > { %v2958_v38 = vld [vmem:[%s3133_s29 + $0x154] ss:$8 sps:$4 sm:$0xff]   ;;  %v2961_v40 = vld [vmem:[%s3133_s29 + $0x150] ss:$8 sps:$4 sm:$0xff]   ;;  %v2964_v42 = vld [vmem:[%s3133_s29 + $0x164] ss:$8 sps:$4 sm:$0xff]  }
  0x27   : > { %764 = vmatpush1.bf16.msra.mxu0 %v2913_v4  ;;  %2854 = vmatpush1.bf16.msra.mxu1 %v2913_v4  ;;  %v2966_v43 = vld [vmem:[%s3133_s29 + $0x60] ss:$8 sps:$4 sm:$0xff]   ;;  %v2968_v45 = vld [vmem:[%s3133_s29 + $0x74] ss:$8 sps:$4 sm:$0xff]   ;;  %v2972_v47 = vld [vmem:[%s3133_s29 + $0x70] ss:$8 sps:$4 sm:$0xff]  }
  0x28   : > { %765 = vmatprep.subr.bf16.mxu0 %v3064_v1  ;;  %2839 = vmatprep.subr.bf16.mxu1 %v3064_v1  ;;  %v2967_v44 = vld [vmem:[%s3133_s29 + $0x160] ss:$8 sps:$4 sm:$0xff]   ;;  %v2970_v46 = vld [vmem:[%s3133_s29 + $0x174] ss:$8 sps:$4 sm:$0xff]   ;;  %v2973_v48 = vld [vmem:[%s3133_s29 + $0x170] ss:$8 sps:$4 sm:$0xff]  }
  0x29   : > { %v2974_v49 = vld [vmem:[%s3133_s29 + $0x84] ss:$8 sps:$4 sm:$0xff]   ;;  %v2978_v51 = vld [vmem:[%s3133_s29 + $0x80] ss:$8 sps:$4 sm:$0xff]   ;;  %v2980_v53 = vld [vmem:[%s3133_s29 + $0x94] ss:$8 sps:$4 sm:$0xff]  }
  0x2a   : > { %v2976_v50 = vld [vmem:[%s3133_s29 + $0x184] ss:$8 sps:$4 sm:$0xff]   ;;  %v2979_v52 = vld [vmem:[%s3133_s29 + $0x180] ss:$8 sps:$4 sm:$0xff]   ;;  %v2982_v54 = vld [vmem:[%s3133_s29 + $0x194] ss:$8 sps:$4 sm:$0xff]  }
  0x2b   : > { %766 = vmatpush1.bf16.msra.mxu0 %v2914_v5  ;;  %2855 = vmatpush1.bf16.msra.mxu1 %v2914_v5  ;;  %v2984_v55 = vld [vmem:[%s3133_s29 + $0x90] ss:$8 sps:$4 sm:$0xff]   ;;  %v2986_v57 = vld [vmem:[%s3133_s29 + $0xa4] ss:$8 sps:$4 sm:$0xff]   ;;  %v2990_v59 = vld [vmem:[%s3133_s29 + $0xa0] ss:$8 sps:$4 sm:$0xff]  }
  0x2c   : > { %767 = vmatprep.subr.bf16.mxu0 %v3064_v1  ;;  %2840 = vmatprep.subr.bf16.mxu1 %v3064_v1  ;;  %v2985_v56 = vld [vmem:[%s3133_s29 + $0x190] ss:$8 sps:$4 sm:$0xff]   ;;  %v2988_v58 = vld [vmem:[%s3133_s29 + $0x1a4] ss:$8 sps:$4 sm:$0xff]   ;;  %v2991_v60 = vld [vmem:[%s3133_s29 + $0x1a0] ss:$8 sps:$4 sm:$0xff]  }
  0x2d   : > { %v2992_v61 = vld [vmem:[%s3133_s29 + $0xb4] ss:$8 sps:$4 sm:$0xff]   ;;  %v2996_v63 = vld [vmem:[%s3133_s29 + $0xb0] ss:$8 sps:$4 sm:$0xff]   ;;  %v3000_v2 = vld [vmem:[%s3133_s29 + $0x1c4] ss:$8 sps:$4 sm:$0xff]  }
  0x2e   : > { %v2994_v62 = vld [vmem:[%s3133_s29 + $0x1b4] ss:$8 sps:$4 sm:$0xff]   ;;  %v2997_v0 = vld [vmem:[%s3133_s29 + $0x1b0] ss:$8 sps:$4 sm:$0xff]   ;;  %v3002_v3 = vld [vmem:[%s3133_s29 + $0xc0] ss:$8 sps:$4 sm:$0xff]  }
  0x2f   : > { %768 = vmatpush1.bf16.msra.mxu0 %v2915_v7  ;;  %2856 = vmatpush1.bf16.msra.mxu1 %v2915_v7  ;;  %v3003_v4 = vld [vmem:[%s3133_s29 + $0x1c0] ss:$8 sps:$4 sm:$0xff]   ;;  %v3004_v5 = vld [vmem:[%s3133_s29 + $0xd4] ss:$8 sps:$4 sm:$0xff]   ;;  %v3008_v7 = vld [vmem:[%s3133_s29 + $0xd0] ss:$8 sps:$4 sm:$0xff]  }
  0x30   : > { %769 = vmatprep.subr.bf16.mxu0 %v3064_v1  ;;  %2841 = vmatprep.subr.bf16.mxu1 %v3064_v1  ;;  %v3006_v6 = vld [vmem:[%s3133_s29 + $0x1d4] ss:$8 sps:$4 sm:$0xff]   ;;  %v3009_v8 = vld [vmem:[%s3133_s29 + $0x1d0] ss:$8 sps:$4 sm:$0xff]  }
  0x33   : > { %770 = vmatpush1.bf16.msra.mxu0 %v2916_v9  ;;  %2857 = vmatpush1.bf16.msra.mxu1 %v2916_v9  ;;  %v3010_v9 = vld [vmem:[%s3133_s29 + $0xe4] ss:$8 sps:$4 sm:$0xff]  }
  0x34   : > { %771 = vmatprep.subr.bf16.mxu0 %v3064_v1  ;;  %2842 = vmatprep.subr.bf16.mxu1 %v3064_v1 }
  0x37   : > { %772 = vmatpush1.bf16.msra.mxu0 %v2917_v10  ;;  %2858 = vmatpush1.bf16.msra.mxu1 %v2917_v10  ;;  %v3012_v10 = vld [vmem:[%s3133_s29 + $0x1e4] ss:$8 sps:$4 sm:$0xff]  }
  0x38   : > { %773 = vmatprep.subr.bf16.mxu0 %v3064_v1  ;;  %2843 = vmatprep.subr.bf16.mxu1 %v3064_v1 }
  0x3b   : > { %774 = vmatpush1.bf16.msra.mxu0 %v2918_v11  ;;  %2859 = vmatpush1.bf16.msra.mxu1 %v2918_v11  ;;  %v3014_v11 = vld [vmem:[%s3133_s29 + $0xe0] ss:$8 sps:$4 sm:$0xff]  }
  0x3c   : > { %775 = vmatprep.subr.bf16.mxu0 %v3064_v1  ;;  %2844 = vmatprep.subr.bf16.mxu1 %v3064_v1 }
  0x3f   : > { %776 = vmatpush1.bf16.msra.mxu0 %v2919_v12  ;;  %2860 = vmatpush1.bf16.msra.mxu1 %v2919_v12  ;;  %v3015_v12 = vld [vmem:[%s3133_s29 + $0x1e0] ss:$8 sps:$4 sm:$0xff]  }
  0x40   : > { %777 = vmatprep.subr.bf16.mxu0 %v3064_v1  ;;  %2845 = vmatprep.subr.bf16.mxu1 %v3064_v1 }
  0x43   : > { %778 = vmatpush1.bf16.msra.mxu0 %v2920_v13  ;;  %2861 = vmatpush1.bf16.msra.mxu1 %v2920_v13  ;;  %v3016_v13 = vld [vmem:[%s3133_s29 + $0xf4] ss:$8 sps:$4 sm:$0xff]  }
  0x44   : > { %779 = vmatprep.subr.bf16.mxu0 %v3064_v1  ;;  %2846 = vmatprep.subr.bf16.mxu1 %v3064_v1 }
  0x47   : > { %780 = vmatpush1.bf16.msra.mxu0 %v2921_v14  ;;  %2862 = vmatpush1.bf16.msra.mxu1 %v2921_v14  ;;  %v3018_v14 = vld [vmem:[%s3133_s29 + $0x1f4] ss:$8 sps:$4 sm:$0xff]  }
  0x48   : > { %781 = vmatprep.subr.bf16.mxu0 %v3064_v1  ;;  %2847 = vmatprep.subr.bf16.mxu1 %v3064_v1 }
  0x4b   : > { %782 = vmatpush1.bf16.msra.mxu0 %v2922_v15  ;;  %2863 = vmatpush1.bf16.msra.mxu1 %v2922_v15  ;;  %v3020_v15 = vld [vmem:[%s3133_s29 + $0xf0] ss:$8 sps:$4 sm:$0xff]  }
  0x4c   : > { %783 = vmatprep.subr.bf16.mxu0 %v3064_v1  ;;  %2848 = vmatprep.subr.bf16.mxu1 %v3064_v1 }
  0x4f   : > { %784 = vmatpush1.bf16.msra.mxu0 %v2923_v16  ;;  %2864 = vmatpush1.bf16.msra.mxu1 %v2923_v16  ;;  %v3021_v16 = vld [vmem:[%s3133_s29 + $0x1f0] ss:$8 sps:$4 sm:$0xff]  }
  0x50   : > { %785 = vmatprep.subr.bf16.mxu0 %v3064_v1  ;;  %2849 = vmatprep.subr.bf16.mxu1 %v3064_v1 }
  0x53   : > { %786 = vmatpush1.bf16.msra.mxu0 %v2924_v17  ;;  %2865 = vmatpush1.bf16.msra.mxu1 %v2924_v17 }
  0x54   : > { %787 = vmatprep.subr.bf16.mxu0 %v3064_v1  ;;  %2850 = vmatprep.subr.bf16.mxu1 %v3064_v1  ;;  %v2998_v1 = vld [vmem:[%s3133_s29 + $0xc4] ss:$8 sps:$4 sm:$0xff]  }
  0x57   : > { %788 = vmatpush1.bf16.msra.mxu0 %v2925_v18  ;;  %2866 = vmatpush1.bf16.msra.mxu1 %v2925_v18 }
  0x5a   : > { %790 = vmatmul.mubr.bf16.vlgmr.msra.gmra.mrb[0].mxu0 %v2926_v19  ;;  %918 = vmatmul.mubr.bf16.vlgmr.msra.gmra.mrb[0].mxu1 %v2929_v20 }
  0x5b   : > { %797 = vmatprep.mubr.bf16.mxu0 %v2932_v21  ;;  %925 = vmatprep.mubr.bf16.mxu1 %v2934_v22 }
  0x62   : > { %798 = vmatmul.mubr.bf16.gmra.mrb[4].mxu0 %v2936_v23  ;;  %926 = vmatmul.mubr.bf16.gmra.mrb[4].mxu1 %v2937_v24 }
  0x63   : > { %805 = vmatprep.mubr.bf16.mxu0 %v2938_v25  ;;  %933 = vmatprep.mubr.bf16.mxu1 %v2940_v26 }
  0x6a   : > { %806 = vmatmul.mubr.bf16.gmra.mrb[8].mxu0 %v2942_v27  ;;  %934 = vmatmul.mubr.bf16.gmra.mrb[8].mxu1 %v2943_v28 }
  0x6b   : > { %813 = vmatprep.mubr.bf16.mxu0 %v2944_v29  ;;  %941 = vmatprep.mubr.bf16.mxu1 %v2946_v30 }
  0x72   : > { %814 = vmatmul.mubr.bf16.gmra.mrb[12].mxu0 %v2948_v31  ;;  %942 = vmatmul.mubr.bf16.gmra.mrb[12].mxu1 %v2949_v32 }
  0x73   : > { %821 = vmatprep.mubr.bf16.mxu0 %v2950_v33  ;;  %949 = vmatprep.mubr.bf16.mxu1 %v2952_v34 }
  0x7a   : > { %822 = vmatmul.mubr.bf16.gmra.mrb[16].mxu0 %v2954_v35  ;;  %950 = vmatmul.mubr.bf16.gmra.mrb[16].mxu1 %v2955_v36 }
  0x7b   : > { %829 = vmatprep.mubr.bf16.mxu0 %v2956_v37  ;;  %957 = vmatprep.mubr.bf16.mxu1 %v2958_v38 }
  0x82   : > { %830 = vmatmul.mubr.bf16.gmra.mrb[20].mxu0 %v2960_v39  ;;  %958 = vmatmul.mubr.bf16.gmra.mrb[20].mxu1 %v2961_v40 }
  0x83   : > { %837 = vmatprep.mubr.bf16.mxu0 %v2962_v41  ;;  %965 = vmatprep.mubr.bf16.mxu1 %v2964_v42 }
  0x8a   : > { %838 = vmatmul.mubr.bf16.gmra.mrb[24].mxu0 %v2966_v43  ;;  %966 = vmatmul.mubr.bf16.gmra.mrb[24].mxu1 %v2967_v44 }
  0x8b   : > { %845 = vmatprep.mubr.bf16.mxu0 %v2968_v45  ;;  %973 = vmatprep.mubr.bf16.mxu1 %v2970_v46 }
  0x92   : > { %846 = vmatmul.mubr.bf16.gmra.mrb[28].mxu0 %v2972_v47  ;;  %974 = vmatmul.mubr.bf16.gmra.mrb[28].mxu1 %v2973_v48 }
  0x93   : > { %853 = vmatprep.mubr.bf16.mxu0 %v2974_v49  ;;  %981 = vmatprep.mubr.bf16.mxu1 %v2976_v50 }
  0x9a   : > { %854 = vmatmul.mubr.bf16.gmra.mrb[32].mxu0 %v2978_v51  ;;  %982 = vmatmul.mubr.bf16.gmra.mrb[32].mxu1 %v2979_v52 }
  0x9b   : > { %861 = vmatprep.mubr.bf16.mxu0 %v2980_v53  ;;  %989 = vmatprep.mubr.bf16.mxu1 %v2982_v54 }
  0xa2   : > { %862 = vmatmul.mubr.bf16.gmra.mrb[36].mxu0 %v2984_v55  ;;  %990 = vmatmul.mubr.bf16.gmra.mrb[36].mxu1 %v2985_v56 }
  0xa3   : > { %869 = vmatprep.mubr.bf16.mxu0 %v2986_v57  ;;  %997 = vmatprep.mubr.bf16.mxu1 %v2988_v58 }
  0xaa   : > { %870 = vmatmul.mubr.bf16.gmra.mrb[40].mxu0 %v2990_v59  ;;  %998 = vmatmul.mubr.bf16.gmra.mrb[40].mxu1 %v2991_v60 }
  0xab   : > { %877 = vmatprep.mubr.bf16.mxu0 %v2992_v61  ;;  %1005 = vmatprep.mubr.bf16.mxu1 %v2994_v62 }
  0xb2   : > { %878 = vmatmul.mubr.bf16.gmra.mrb[44].mxu0 %v2996_v63  ;;  %1006 = vmatmul.mubr.bf16.gmra.mrb[44].mxu1 %v2997_v0 }
  0xb3   : > { %885 = vmatprep.mubr.bf16.mxu0 %v2998_v1  ;;  %1013 = vmatprep.mubr.bf16.mxu1 %v3000_v2 }
  0xba   : > { %886 = vmatmul.mubr.bf16.gmra.mrb[48].mxu0 %v3002_v3  ;;  %1014 = vmatmul.mubr.bf16.gmra.mrb[48].mxu1 %v3003_v4 }
  0xbb   : > { %893 = vmatprep.mubr.bf16.mxu0 %v3004_v5  ;;  %1021 = vmatprep.mubr.bf16.mxu1 %v3006_v6 }
  0xc2   : > { %894 = vmatmul.mubr.bf16.gmra.mrb[52].mxu0 %v3008_v7  ;;  %1022 = vmatmul.mubr.bf16.gmra.mrb[52].mxu1 %v3009_v8 }
  0xc3   : > { %901 = vmatprep.mubr.bf16.mxu0 %v3010_v9  ;;  %1029 = vmatprep.mubr.bf16.mxu1 %v3012_v10 }
  0xca   : > { %902 = vmatmul.mubr.bf16.gmra.mrb[56].mxu0 %v3014_v11  ;;  %1030 = vmatmul.mubr.bf16.gmra.mrb[56].mxu1 %v3015_v12 }
  0xcb   : > { %909 = vmatprep.mubr.bf16.mxu0 %v3016_v13  ;;  %1037 = vmatprep.mubr.bf16.mxu1 %v3018_v14 }
  0xd2   : > { %910 = vmatmul.mubr.bf16.gmra.mrb[60].mxu0 %v3020_v15  ;;  %1038 = vmatmul.mubr.bf16.gmra.mrb[60].mxu1 %v3021_v16 }
 0x12d   : > { %v3286_v17 = vpop.f32.mrb[0].mxu0  ;;  %v3288_v18 = vpop.f32.mrb[0].mxu1 }
 0x12e   : > { %1048 = vst [vmem:[%s3290_s6] sm:$0xff] %v3286_v17  ;;  %1080 = vst [vmem:[%s3290_s6 + $0x100] sm:$0xff] %v3288_v18  ;;  %v793_v19 = vpop.f32.mrb[1].mxu0  ;;  %v921_v20 = vpop.f32.mrb[1].mxu1 }
 0x12f   : > { %v3296_v21 = vpop.f32.mrb[2].mxu0  ;;  %v3298_v22 = vpop.f32.mrb[2].mxu1 }
 0x130   : > { %1049 = vst [vmem:[%s3290_s6 + $0x8] sm:$0xff] %v3296_v21  ;;  %1081 = vst [vmem:[%s3290_s6 + $0x108] sm:$0xff] %v3298_v22  ;;  %v796_v23 = vpop.f32.mrb[3].mxu0  ;;  %v924_v24 = vpop.f32.mrb[3].mxu1 }
 0x135   : > { %v3304_v25 = vpop.f32.mrb[4].mxu0  ;;  %v3306_v26 = vpop.f32.mrb[4].mxu1 }
 0x136   : > { %1050 = vst [vmem:[%s3290_s6 + $0x10] sm:$0xff] %v3304_v25  ;;  %1082 = vst [vmem:[%s3290_s6 + $0x110] sm:$0xff] %v3306_v26  ;;  %v801_v27 = vpop.f32.mrb[5].mxu0  ;;  %v929_v28 = vpop.f32.mrb[5].mxu1 }
 0x137   : > { %v3312_v29 = vpop.f32.mrb[6].mxu0  ;;  %v3314_v30 = vpop.f32.mrb[6].mxu1 }
 0x138   : > { %1051 = vst [vmem:[%s3290_s6 + $0x18] sm:$0xff] %v3312_v29  ;;  %1083 = vst [vmem:[%s3290_s6 + $0x118] sm:$0xff] %v3314_v30  ;;  %v804_v31 = vpop.f32.mrb[7].mxu0  ;;  %v932_v32 = vpop.f32.mrb[7].mxu1 }
 0x13d   : > { %v3320_v33 = vpop.f32.mrb[8].mxu0  ;;  %v3322_v34 = vpop.f32.mrb[8].mxu1 }
 0x13e   : > { %1052 = vst [vmem:[%s3290_s6 + $0x20] sm:$0xff] %v3320_v33  ;;  %1084 = vst [vmem:[%s3290_s6 + $0x120] sm:$0xff] %v3322_v34  ;;  %v809_v35 = vpop.f32.mrb[9].mxu0  ;;  %v937_v36 = vpop.f32.mrb[9].mxu1 }
 0x13f   : > { %v3328_v37 = vpop.f32.mrb[10].mxu0  ;;  %v3330_v38 = vpop.f32.mrb[10].mxu1 }
 0x140   : > { %1053 = vst [vmem:[%s3290_s6 + $0x28] sm:$0xff] %v3328_v37  ;;  %1085 = vst [vmem:[%s3290_s6 + $0x128] sm:$0xff] %v3330_v38  ;;  %v812_v39 = vpop.f32.mrb[11].mxu0  ;;  %v940_v40 = vpop.f32.mrb[11].mxu1 }
 0x145   : > { %v3336_v41 = vpop.f32.mrb[12].mxu0  ;;  %v3338_v42 = vpop.f32.mrb[12].mxu1 }
 0x146   : > { %1054 = vst [vmem:[%s3290_s6 + $0x30] sm:$0xff] %v3336_v41  ;;  %1086 = vst [vmem:[%s3290_s6 + $0x130] sm:$0xff] %v3338_v42  ;;  %v817_v43 = vpop.f32.mrb[13].mxu0  ;;  %v945_v44 = vpop.f32.mrb[13].mxu1 }
 0x147   : > { %v3344_v45 = vpop.f32.mrb[14].mxu0  ;;  %v3346_v46 = vpop.f32.mrb[14].mxu1 }
 0x148   : > { %1055 = vst [vmem:[%s3290_s6 + $0x38] sm:$0xff] %v3344_v45  ;;  %1087 = vst [vmem:[%s3290_s6 + $0x138] sm:$0xff] %v3346_v46  ;;  %v820_v47 = vpop.f32.mrb[15].mxu0  ;;  %v948_v48 = vpop.f32.mrb[15].mxu1 }
 0x14d   : > { %v3352_v49 = vpop.f32.mrb[16].mxu0  ;;  %v3354_v50 = vpop.f32.mrb[16].mxu1 }
 0x14e   : > { %1056 = vst [vmem:[%s3290_s6 + $0x40] sm:$0xff] %v3352_v49  ;;  %1088 = vst [vmem:[%s3290_s6 + $0x140] sm:$0xff] %v3354_v50  ;;  %v825_v51 = vpop.f32.mrb[17].mxu0  ;;  %v953_v52 = vpop.f32.mrb[17].mxu1 }
 0x14f   : > { %v3360_v53 = vpop.f32.mrb[18].mxu0  ;;  %v3362_v54 = vpop.f32.mrb[18].mxu1 }
 0x150   : > { %1057 = vst [vmem:[%s3290_s6 + $0x48] sm:$0xff] %v3360_v53  ;;  %1089 = vst [vmem:[%s3290_s6 + $0x148] sm:$0xff] %v3362_v54  ;;  %v828_v55 = vpop.f32.mrb[19].mxu0  ;;  %v956_v56 = vpop.f32.mrb[19].mxu1 }
 0x155   : > { %v3368_v57 = vpop.f32.mrb[20].mxu0  ;;  %v3370_v58 = vpop.f32.mrb[20].mxu1 }
 0x156   : > { %1058 = vst [vmem:[%s3290_s6 + $0x50] sm:$0xff] %v3368_v57  ;;  %1090 = vst [vmem:[%s3290_s6 + $0x150] sm:$0xff] %v3370_v58  ;;  %v833_v59 = vpop.f32.mrb[21].mxu0  ;;  %v961_v60 = vpop.f32.mrb[21].mxu1 }
 0x157   : > { %v3376_v61 = vpop.f32.mrb[22].mxu0  ;;  %v3378_v62 = vpop.f32.mrb[22].mxu1 }
 0x158   : > { %1059 = vst [vmem:[%s3290_s6 + $0x58] sm:$0xff] %v3376_v61  ;;  %1091 = vst [vmem:[%s3290_s6 + $0x158] sm:$0xff] %v3378_v62  ;;  %v836_v63 = vpop.f32.mrb[23].mxu0  ;;  %v964_v0 = vpop.f32.mrb[23].mxu1 }
 0x15d   : > { %v3384_v1 = vpop.f32.mrb[24].mxu0  ;;  %v3386_v2 = vpop.f32.mrb[24].mxu1 }
 0x15e   : > { %1060 = vst [vmem:[%s3290_s6 + $0x60] sm:$0xff] %v3384_v1  ;;  %1092 = vst [vmem:[%s3290_s6 + $0x160] sm:$0xff] %v3386_v2  ;;  %v841_v3 = vpop.f32.mrb[25].mxu0  ;;  %v969_v4 = vpop.f32.mrb[25].mxu1 }
 0x15f   : > { %v3392_v5 = vpop.f32.mrb[26].mxu0  ;;  %v3394_v6 = vpop.f32.mrb[26].mxu1 }
 0x160   : > { %1061 = vst [vmem:[%s3290_s6 + $0x68] sm:$0xff] %v3392_v5  ;;  %1093 = vst [vmem:[%s3290_s6 + $0x168] sm:$0xff] %v3394_v6  ;;  %v844_v7 = vpop.f32.mrb[27].mxu0  ;;  %v972_v8 = vpop.f32.mrb[27].mxu1 }
 0x165   : > { %v3400_v9 = vpop.f32.mrb[28].mxu0  ;;  %v3402_v10 = vpop.f32.mrb[28].mxu1 }
 0x166   : > { %1062 = vst [vmem:[%s3290_s6 + $0x70] sm:$0xff] %v3400_v9  ;;  %1094 = vst [vmem:[%s3290_s6 + $0x170] sm:$0xff] %v3402_v10  ;;  %v849_v11 = vpop.f32.mrb[29].mxu0  ;;  %v977_v12 = vpop.f32.mrb[29].mxu1 }
 0x167   : > { %v3408_v13 = vpop.f32.mrb[30].mxu0  ;;  %v3410_v14 = vpop.f32.mrb[30].mxu1 }
 0x168   : > { %1063 = vst [vmem:[%s3290_s6 + $0x78] sm:$0xff] %v3408_v13  ;;  %1095 = vst [vmem:[%s3290_s6 + $0x178] sm:$0xff] %v3410_v14  ;;  %v852_v15 = vpop.f32.mrb[31].mxu0  ;;  %v980_v16 = vpop.f32.mrb[31].mxu1 }
 0x16d   : > { %v3416_v19 = vpop.f32.mrb[32].mxu0  ;;  %v3418_v20 = vpop.f32.mrb[32].mxu1 }
 0x16e   : > { %1064 = vst [vmem:[%s3290_s6 + $0x80] sm:$0xff] %v3416_v19  ;;  %1096 = vst [vmem:[%s3290_s6 + $0x180] sm:$0xff] %v3418_v20  ;;  %v857_v23 = vpop.f32.mrb[33].mxu0  ;;  %v985_v24 = vpop.f32.mrb[33].mxu1 }
 0x16f   : > { %v3424_v27 = vpop.f32.mrb[34].mxu0  ;;  %v3426_v28 = vpop.f32.mrb[34].mxu1 }
 0x170   : > { %1065 = vst [vmem:[%s3290_s6 + $0x88] sm:$0xff] %v3424_v27  ;;  %1097 = vst [vmem:[%s3290_s6 + $0x188] sm:$0xff] %v3426_v28  ;;  %v860_v31 = vpop.f32.mrb[35].mxu0  ;;  %v988_v32 = vpop.f32.mrb[35].mxu1 }
 0x175   : > { %v3432_v35 = vpop.f32.mrb[36].mxu0  ;;  %v3434_v36 = vpop.f32.mrb[36].mxu1 }
 0x176   : > { %1066 = vst [vmem:[%s3290_s6 + $0x90] sm:$0xff] %v3432_v35  ;;  %1098 = vst [vmem:[%s3290_s6 + $0x190] sm:$0xff] %v3434_v36  ;;  %v865_v39 = vpop.f32.mrb[37].mxu0  ;;  %v993_v40 = vpop.f32.mrb[37].mxu1 }
 0x177   : > { %v3440_v43 = vpop.f32.mrb[38].mxu0  ;;  %v3442_v44 = vpop.f32.mrb[38].mxu1 }
 0x178   : > { %1067 = vst [vmem:[%s3290_s6 + $0x98] sm:$0xff] %v3440_v43  ;;  %1099 = vst [vmem:[%s3290_s6 + $0x198] sm:$0xff] %v3442_v44  ;;  %v868_v47 = vpop.f32.mrb[39].mxu0  ;;  %v996_v48 = vpop.f32.mrb[39].mxu1 }
 0x17d   : > { %v3448_v51 = vpop.f32.mrb[40].mxu0  ;;  %v3450_v52 = vpop.f32.mrb[40].mxu1 }
 0x17e   : > { %1068 = vst [vmem:[%s3290_s6 + $0xa0] sm:$0xff] %v3448_v51  ;;  %1100 = vst [vmem:[%s3290_s6 + $0x1a0] sm:$0xff] %v3450_v52  ;;  %v873_v55 = vpop.f32.mrb[41].mxu0  ;;  %v1001_v56 = vpop.f32.mrb[41].mxu1 }
 0x17f   : > { %v3456_v59 = vpop.f32.mrb[42].mxu0  ;;  %v3458_v60 = vpop.f32.mrb[42].mxu1 }
 0x180   : > { %1069 = vst [vmem:[%s3290_s6 + $0xa8] sm:$0xff] %v3456_v59  ;;  %1101 = vst [vmem:[%s3290_s6 + $0x1a8] sm:$0xff] %v3458_v60  ;;  %v876_v63 = vpop.f32.mrb[43].mxu0  ;;  %v1004_v0 = vpop.f32.mrb[43].mxu1 }
 0x185   : > { %v3464_v3 = vpop.f32.mrb[44].mxu0  ;;  %v3466_v4 = vpop.f32.mrb[44].mxu1 }
 0x186   : > { %4606 = vst [vmem:[#allocation5_spill] sm:$0xff] %v3466_v4  ;;  %1070 = vst [vmem:[%s3290_s6 + $0xb0] sm:$0xff] %v3464_v3  ;;  %v881_v7 = vpop.f32.mrb[45].mxu0  ;;  %v1009_v8 = vpop.f32.mrb[45].mxu1 }
 0x187   : > { %1102 = vst [vmem:[%s3290_s6 + $0x1b0] sm:$0xff] %v3466_v4  ;;  %v3472_v11 = vpop.f32.mrb[46].mxu0  ;;  %v3474_v12 = vpop.f32.mrb[46].mxu1 }
 0x188   : > { %4607 = vst [vmem:[#allocation6_spill] sm:$0xff] %v3474_v12  ;;  %1071 = vst [vmem:[%s3290_s6 + $0xb8] sm:$0xff] %v3472_v11  ;;  %v884_v15 = vpop.f32.mrb[47].mxu0  ;;  %v1012_v16 = vpop.f32.mrb[47].mxu1 }
 0x189   : > { %1103 = vst [vmem:[%s3290_s6 + $0x1b8] sm:$0xff] %v3474_v12 }
 0x18d   : > { %v3480_v23 = vpop.f32.mrb[48].mxu0  ;;  %v3482_v24 = vpop.f32.mrb[48].mxu1 }
 0x18e   : > { %4608 = vst [vmem:[#allocation7_spill] sm:$0xff] %v3482_v24  ;;  %1072 = vst [vmem:[%s3290_s6 + $0xc0] sm:$0xff] %v3480_v23  ;;  %v889_v31 = vpop.f32.mrb[49].mxu0  ;;  %v1017_v32 = vpop.f32.mrb[49].mxu1 }
 0x18f   : > { %1104 = vst [vmem:[%s3290_s6 + $0x1c0] sm:$0xff] %v3482_v24  ;;  %v3488_v39 = vpop.f32.mrb[50].mxu0  ;;  %v3490_v40 = vpop.f32.mrb[50].mxu1 }
 0x190   : > { %4609 = vst [vmem:[#allocation8_spill] sm:$0xff] %v3490_v40  ;;  %1073 = vst [vmem:[%s3290_s6 + $0xc8] sm:$0xff] %v3488_v39  ;;  %v892_v47 = vpop.f32.mrb[51].mxu0  ;;  %v1020_v48 = vpop.f32.mrb[51].mxu1 }
 0x191   : > { %1105 = vst [vmem:[%s3290_s6 + $0x1c8] sm:$0xff] %v3490_v40 }
 0x195   : > { %v3496_v55 = vpop.f32.mrb[52].mxu0  ;;  %v3498_v56 = vpop.f32.mrb[52].mxu1 }
 0x196   : > { %4610 = vst [vmem:[#allocation9_spill] sm:$0xff] %v3498_v56  ;;  %1074 = vst [vmem:[%s3290_s6 + $0xd0] sm:$0xff] %v3496_v55  ;;  %v897_v63 = vpop.f32.mrb[53].mxu0  ;;  %v1025_v0 = vpop.f32.mrb[53].mxu1 }
 0x197   : > { %1106 = vst [vmem:[%s3290_s6 + $0x1d0] sm:$0xff] %v3498_v56  ;;  %v898_v7 = vpop.f32.mrb[54].mxu0  ;;  %v3504_v8 = vpop.f32.mrb[54].mxu1 }
 0x198   : > { %4611 = vst [vmem:[#allocation10_spill] sm:$0xff] %v3504_v8  ;;  %1075 = vst [vmem:[%s3290_s6 + $0xd8] sm:$0xff] %v898_v7  ;;  %v900_v15 = vpop.f32.mrb[55].mxu0  ;;  %v1028_v16 = vpop.f32.mrb[55].mxu1 }
 0x199   : > { %1107 = vst [vmem:[%s3290_s6 + $0x1d8] sm:$0xff] %v3504_v8 }
 0x19d   : > { %v903_v31 = vpop.f32.mrb[56].mxu0  ;;  %v3509_v32 = vpop.f32.mrb[56].mxu1 }
 0x19e   : > { %4612 = vst [vmem:[#allocation11_spill] sm:$0xff] %v3509_v32  ;;  %1076 = vst [vmem:[%s3290_s6 + $0xe0] sm:$0xff] %v903_v31  ;;  %v905_v47 = vpop.f32.mrb[57].mxu0  ;;  %v1033_v48 = vpop.f32.mrb[57].mxu1 }
 0x19f   : > { %1108 = vst [vmem:[%s3290_s6 + $0x1e0] sm:$0xff] %v3509_v32  ;;  %v906_v63 = vpop.f32.mrb[58].mxu0  ;;  %v3514_v0 = vpop.f32.mrb[58].mxu1 }
 0x1a0   : > { %4613 = vst [vmem:[#allocation12_spill] sm:$0xff] %v3514_v0  ;;  %1077 = vst [vmem:[%s3290_s6 + $0xe8] sm:$0xff] %v906_v63  ;;  %v908_v15 = vpop.f32.mrb[59].mxu0  ;;  %v1036_v8 = vpop.f32.mrb[59].mxu1 }
 0x1a1   : > { %1109 = vst [vmem:[%s3290_s6 + $0x1e8] sm:$0xff] %v3514_v0  ;;  %v3065_v8 = vmov (!%p2507_p10), 0.0  }
 0x1a2   : > { %1116 = vst [vmem:[#allocation3] sm:$0x1] (!%p2507_p10), %v3065_v8 }
 0x1a3   : > { %1115 = sbr.rel (%p2507_p10) target bundleno = 426 (0x1aa), region = 44 }
 0x1a5   : > { %v911_v16 = vpop.f32.mrb[60].mxu0  ;;  %v3519_v56 = vpop.f32.mrb[60].mxu1 }
 0x1a6   : > { %4614 = vst [vmem:[#allocation13_spill] sm:$0xff] %v3519_v56  ;;  %1078 = vst [vmem:[%s3290_s6 + $0xf0] sm:$0xff] %v911_v16  ;;  %v913_v40 = vpop.f32.mrb[61].mxu0  ;;  %v1041_v32 = vpop.f32.mrb[61].mxu1 }
 0x1a7   : > { %1110 = vst [vmem:[%s3290_s6 + $0x1f0] sm:$0xff] %v3519_v56  ;;  %v914_v47 = vpop.f32.mrb[62].mxu0  ;;  %v3524_v24 = vpop.f32.mrb[62].mxu1 }
 0x1a8   : > { %4615 = vst [vmem:[#allocation14_spill] sm:$0xff] %v3524_v24  ;;  %1079 = vst [vmem:[%s3290_s6 + $0xf8] sm:$0xff] %v914_v47  ;;  %v916_v48 = vpop.f32.mrb[63].mxu0  ;;  %v1044_v12 = vpop.f32.mrb[63].mxu1 }
 0x1a9   : > { %1111 = vst [vmem:[%s3290_s6 + $0x1f8] sm:$0xff] %v3524_v24 }
 0x1aa PF: > { %v1118_v15 = vadd.f32 %v3296_v21, %v3286_v17 }
 0x1ac   : > { %v1119_v40 = vadd.f32 %v1118_v15, %v3304_v25  ;;  %v4621_v15 = vld [vmem:[#allocation10_spill] sm:$0xff] }
 0x1ae   : > { %v1120_v32 = vadd.f32 %v1119_v40, %v3312_v29  ;;  %v4622_v40 = vld [vmem:[#allocation11_spill] sm:$0xff] }
 0x1b0   : > { %v1121_v56 = vadd.f32 %v1120_v32, %v3320_v33  ;;  %v4623_v32 = vld [vmem:[#allocation12_spill] sm:$0xff] }
 0x1b2   : > { %v1122_v0 = vadd.f32 %v1121_v56, %v3328_v37 }
 0x1b4   : > { %v1123_v48 = vadd.f32 %v1122_v0, %v3336_v41  ;;  %v4618_v0 = vld [vmem:[#allocation7_spill] sm:$0xff] }
 0x1b6   : > { %v1124_v12 = vadd.f32 %v1123_v48, %v3344_v45  ;;  %v4624_v48 = vld [vmem:[#allocation13_spill] sm:$0xff] }
 0x1b8   : > { %v1125_v24 = vadd.f32 %v1124_v12, %v3352_v49  ;;  %v4625_v12 = vld [vmem:[#allocation14_spill] sm:$0xff] }
 0x1ba   : > { %v1126_v8 = vadd.f32 %v1125_v24, %v3360_v53 }
 0x1bc   : > { %v1127_v4 = vadd.f32 %v1126_v8, %v3368_v57 }
 0x1be   : > { %v1128_v17 = vadd.f32 %v1127_v4, %v3376_v61 }
 0x1c0   : > { %v1129_v21 = vadd.f32 %v1128_v17, %v3384_v1 }
 0x1c2   : > { %v1130_v25 = vadd.f32 %v1129_v21, %v3392_v5 }
 0x1c4   : > { %v1131_v29 = vadd.f32 %v1130_v25, %v3400_v9 }
 0x1c6   : > { %v1132_v33 = vadd.f32 %v1131_v29, %v3408_v13 }
 0x1c8   : > { %v1133_v37 = vadd.f32 %v1132_v33, %v3416_v19  ;;  %v1117_v33 = vld [vmem:[#allocation3] sm:$0x1] }
 0x1ca   : > { %v1134_v41 = vadd.f32 %v1133_v37, %v3424_v27 }
 0x1cc   : > { %v1135_v45 = vadd.f32 %v1134_v41, %v3432_v35 }
 0x1ce   : > { %v1136_v49 = vadd.f32 %v1135_v45, %v3440_v43 }
 0x1d0   : > { %v1137_v53 = vadd.f32 %v1136_v49, %v3448_v51 }
 0x1d2   : > { %v1138_v57 = vadd.f32 %v1137_v53, %v3456_v59 }
 0x1d4   : > { %v1139_v61 = vadd.f32 %v1138_v57, %v3464_v3 }
 0x1d6   : > { %v1140_v1 = vadd.f32 %v1139_v61, %v3472_v11 }
 0x1d8   : > { %v1141_v5 = vadd.f32 %v1140_v1, %v3480_v23 }
 0x1da   : > { %v1142_v9 = vadd.f32 %v1141_v5, %v3488_v39 }
 0x1dc   : > { %v1143_v13 = vadd.f32 %v1142_v9, %v3496_v55 }
 0x1de   : > { %v1144_v19 = vadd.f32 %v1143_v13, %v898_v7 }
 0x1e0   : > { %v1145_v27 = vadd.f32 %v1144_v19, %v903_v31  ;;  %v4616_v31 = vld [vmem:[#allocation5_spill] sm:$0xff] }
 0x1e2   : > { %v1146_v4 = vadd.f32 %v1145_v27, %v906_v63  ;;  %v4617_v63 = vld [vmem:[#allocation6_spill] sm:$0xff] }
 0x1e4   : > { %v1147_v35 = vadd.f32 %v1146_v4, %v911_v16  ;;  %v4619_v16 = vld [vmem:[#allocation8_spill] sm:$0xff] }
 0x1e6   : > { %v1148_v24 = vadd.f32 %v1147_v35, %v914_v47  ;;  %v4620_v47 = vld [vmem:[#allocation9_spill] sm:$0xff] }
 0x1e8   : > { %v1149_v43 = vadd.f32 %v1148_v24, %v3288_v18 }
 0x1ea   : > { %v1150_v51 = vadd.f32 %v1149_v43, %v3298_v22 }
 0x1ec   : > { %v1151_v59 = vadd.f32 %v1150_v51, %v3306_v26 }
 0x1ee   : > { %v1152_v3 = vadd.f32 %v1151_v59, %v3314_v30 }
 0x1f0   : > { %v1153_v11 = vadd.f32 %v1152_v3, %v3322_v34 }
 0x1f2   : > { %v1154_v23 = vadd.f32 %v1153_v11, %v3330_v38 }
 0x1f4   : > { %v1155_v39 = vadd.f32 %v1154_v23, %v3338_v42 }
 0x1f6   : > { %v1156_v55 = vadd.f32 %v1155_v39, %v3346_v46 }
 0x1f8   : > { %v1157_v56 = vadd.f32 %v1156_v55, %v3354_v50 }
 0x1fa   : > { %v1158_v7 = vadd.f32 %v1157_v56, %v3362_v54 }
 0x1fc   : > { %v1159_v18 = vadd.f32 %v1158_v7, %v3370_v58 }
 0x1fe   : > { %v1160_v22 = vadd.f32 %v1159_v18, %v3378_v62 }
 0x200   : > { %v1161_v26 = vadd.f32 %v1160_v22, %v3386_v2 }
 0x202   : > { %v1162_v30 = vadd.f32 %v1161_v26, %v3394_v6 }
 0x204   : > { %v1163_v34 = vadd.f32 %v1162_v30, %v3402_v10 }
 0x206   : > { %v1164_v38 = vadd.f32 %v1163_v34, %v3410_v14 }
 0x208   : > { %v1165_v42 = vadd.f32 %v1164_v38, %v3418_v20 }
 0x20a   : > { %v1166_v46 = vadd.f32 %v1165_v42, %v3426_v28 }
 0x20c   : > { %v1167_v50 = vadd.f32 %v1166_v46, %v3434_v36 }
 0x20e   : > { %v1168_v54 = vadd.f32 %v1167_v50, %v3442_v44 }
 0x210   : > { %v1169_v58 = vadd.f32 %v1168_v54, %v3450_v52 }
 0x212   : > { %v1170_v62 = vadd.f32 %v1169_v58, %v3458_v60 }
 0x214   : > { %v1171_v2 = vadd.f32 %v1170_v62, %v4616_v31 }
 0x216   : > { %v1172_v6 = vadd.f32 %v1171_v2, %v4617_v63 }
 0x218   : > { %v1173_v10 = vadd.f32 %v1172_v6, %v4618_v0 }
 0x21a   : > { %v1174_v14 = vadd.f32 %v1173_v10, %v4619_v16 }
 0x21c   : > { %v1175_v20 = vadd.f32 %v1174_v14, %v4620_v47 }
 0x21e   : > { %v1176_v28 = vadd.f32 %v1175_v20, %v4621_v15 }
 0x220   : > { %v1177_v36 = vadd.f32 %v1176_v28, %v4622_v40 }
 0x222   : > { %v1178_v44 = vadd.f32 %v1177_v36, %v4623_v32 }
 0x224   : > { %v1179_v52 = vadd.f32 %v1178_v44, %v4624_v48 }
 0x226   : > { %v1180_v60 = vadd.f32 %v1179_v52, %v4625_v12 }
 0x228   : > { %v1181_v8 = vrot.slane %v1180_v60, 4 }
 0x22a   : > { %v1182_v17 = vadd.f32 %v1181_v8, %v1180_v60 }
 0x22c   : > { %v1183_v21 = vrot.slane %v1182_v17, 2 }
 0x22e   : > { %v1184_v25 = vadd.f32 %v1183_v21, %v1182_v17 }
 0x230   : > { %v1185_v29 = vrot.slane %v1184_v25, 1 }
 0x232   : > { %v1186_v37 = vadd.f32 %v1185_v29, %v1184_v25 }
 0x234   : > { %v1187_v41 = vadd.f32 %v1186_v37, %v1117_v33 }
 0x236   : > { %1188 = vst [vmem:[#allocation3] sm:$0x1] %v1187_v41 }
 0x237 PF: > { %p2508_p11 = scmp.ne.s32.totalorder %s3050_s16, 1 }
 0x239   : > { %1192 = sbr.rel (%p2508_p11) target bundleno = 780 (0x30c), region = 48 }
 0x240   : > { %p2509_p12 = scmp.ne.s32.totalorder %s3046_s15, 0 }
 0x241   : > { %v3066_v45 = vmov (!%p2509_p12), 0.0  }
 0x242   : > { %1196 = sbr.rel (%p2509_p12) target bundleno = 585 (0x249), region = 52  ;;  %1197 = vst [vmem:[#allocation4] sm:$0x1] (!%p2509_p12), %v3066_v45 }
 0x249 PF: > { %v1201_v49 = vlaneseq  ;;  %s2510_s29 = sshll.u32 %s3046_s15, 9 }
 0x24a   : > { %v3599_v5 = vstv %s2510_s29  ;;  %s3725_s8 = scalar_lea.vmem [#allocation2], %s2510_s29 }
 0x24b   : > { %v3592_v53 = vshrl.u32 %v1201_v49, 7  ;;  %4626 = vst [vmem:[#allocation15_spill] sm:$0xff] %v3599_v5 }
 0x24d   : > { %v1235_v57 = vadd.s32 264, %v3592_v53  ;;  %v1236_v61 = vadd.s32 272, %v3592_v53  ;;  %v1237_v1 = vadd.s32 280, %v3592_v53  ;;  %v1238_v9 = vadd.s32 288, %v3592_v53 }
 0x24e   : > { %v1239_v13 = vadd.s32 296, %v3592_v53  ;;  %v1240_v19 = vadd.s32 304, %v3592_v53  ;;  %v1241_v27 = vadd.s32 312, %v3592_v53  ;;  %v1242_v4 = vadd.s32 320, %v3592_v53 }
 0x24f   : > { %v1243_v35 = vadd.s32 328, %v3592_v53  ;;  %v1244_v24 = vadd.s32 336, %v3592_v53  ;;  %v1245_v43 = vadd.s32 344, %v3592_v53  ;;  %v1246_v51 = vadd.s32 352, %v3592_v53 }
 0x250   : > { %v1247_v59 = vadd.s32 360, %v3592_v53  ;;  %v1248_v3 = vadd.s32 368, %v3592_v53  ;;  %v1249_v11 = vadd.s32 376, %v3592_v53  ;;  %v1250_v23 = vadd.s32 384, %v3592_v53 }
 0x251   : > { %v1251_v39 = vadd.s32 392, %v3592_v53  ;;  %v1252_v55 = vadd.s32 400, %v3592_v53  ;;  %v1253_v56 = vadd.s32 408, %v3592_v53  ;;  %v1254_v7 = vadd.s32 416, %v3592_v53 }
 0x252   : > { %v1255_v18 = vadd.s32 424, %v3592_v53  ;;  %v1256_v22 = vadd.s32 432, %v3592_v53  ;;  %v1257_v26 = vadd.s32 440, %v3592_v53  ;;  %v1258_v30 = vadd.s32 448, %v3592_v53 }
 0x253   : > { %v1259_v34 = vadd.s32 456, %v3592_v53  ;;  %v1260_v38 = vadd.s32 464, %v3592_v53  ;;  %v1261_v42 = vadd.s32 472, %v3592_v53  ;;  %v1262_v46 = vadd.s32 480, %v3592_v53 }
 0x254   : > { %v1263_v50 = vadd.s32 488, %v3592_v53  ;;  %v1264_v54 = vadd.s32 496, %v3592_v53  ;;  %v1265_v58 = vadd.s32 504, %v3592_v53  ;;  %v3630_v62 = vadd.s32 %v3599_v5, %v1235_v57  ;;  %v1198_v57 = vld [vmem:[#allocation3] sm:$0x1] }
 0x255   : > { %v3633_v31 = vadd.s32 %v3599_v5, %v1236_v61  ;;  %v3636_v2 = vadd.s32 %v3599_v5, %v1237_v1  ;;  %v3639_v63 = vadd.s32 %v3599_v5, %v1238_v9  ;;  %v3642_v6 = vadd.s32 %v3599_v5, %v1239_v13  ;;  %v3728_v9 = vld [vmem:[%s3725_s8 + $0x108] sm:$0xff]  ;;  %v3731_v13 = vld [vmem:[%s3725_s8 + $0x110] sm:$0xff] }
 0x256   : > { %v3645_v0 = vadd.s32 %v3599_v5, %v1240_v19  ;;  %v3648_v10 = vadd.s32 %v3599_v5, %v1241_v27  ;;  %v3651_v16 = vadd.s32 %v3599_v5, %v1242_v4  ;;  %v3654_v14 = vadd.s32 %v3599_v5, %v1243_v35  ;;  %v3734_v19 = vld [vmem:[%s3725_s8 + $0x118] sm:$0xff]  ;;  %v3737_v27 = vld [vmem:[%s3725_s8 + $0x120] sm:$0xff]  ;;  %v3740_v4 = vld [vmem:[%s3725_s8 + $0x128] sm:$0xff] }
 0x257   : > { %v3657_v47 = vadd.s32 %v3599_v5, %v1244_v24  ;;  %v3660_v20 = vadd.s32 %v3599_v5, %v1245_v43  ;;  %v3663_v15 = vadd.s32 %v3599_v5, %v1246_v51  ;;  %v3666_v28 = vadd.s32 %v3599_v5, %v1247_v59  ;;  %v3743_v35 = vld [vmem:[%s3725_s8 + $0x130] sm:$0xff]  ;;  %v3746_v24 = vld [vmem:[%s3725_s8 + $0x138] sm:$0xff]  ;;  %v3749_v43 = vld [vmem:[%s3725_s8 + $0x140] sm:$0xff] }
 0x258   : > { %v3669_v40 = vadd.s32 %v3599_v5, %v1248_v3  ;;  %v3672_v36 = vadd.s32 %v3599_v5, %v1249_v11  ;;  %v3675_v32 = vadd.s32 %v3599_v5, %v1250_v23  ;;  %v3678_v44 = vadd.s32 %v3599_v5, %v1251_v39  ;;  %4627 = vst [vmem:[#allocation16_spill] sm:$0xff] %v3743_v35  ;;  %v3752_v51 = vld [vmem:[%s3725_s8 + $0x148] sm:$0xff]  ;;  %v3755_v59 = vld [vmem:[%s3725_s8 + $0x150] sm:$0xff]  ;;  %v3758_v3 = vld [vmem:[%s3725_s8 + $0x158] sm:$0xff] }
 0x259   : > { %v3681_v48 = vadd.s32 %v3599_v5, %v1252_v55  ;;  %v3684_v52 = vadd.s32 %v3599_v5, %v1253_v56  ;;  %v3687_v12 = vadd.s32 %v3599_v5, %v1254_v7  ;;  %v3690_v60 = vadd.s32 %v3599_v5, %v1255_v18  ;;  %4628 = vst [vmem:[#allocation17_spill] sm:$0xff] %v3746_v24  ;;  %v3761_v11 = vld [vmem:[%s3725_s8 + $0x160] sm:$0xff]  ;;  %v3764_v23 = vld [vmem:[%s3725_s8 + $0x168] sm:$0xff]  ;;  %v3769_v55 = vld [vmem:[%s3725_s8 + $0x170] sm:$0xff] }
 0x25a   : > { %v3693_v8 = vadd.s32 %v3599_v5, %v1256_v22  ;;  %v3696_v17 = vadd.s32 %v3599_v5, %v1257_v26  ;;  %v3699_v21 = vadd.s32 %v3599_v5, %v1258_v30  ;;  %v3702_v25 = vadd.s32 %v3599_v5, %v1259_v34  ;;  %4629 = vst [vmem:[#allocation18_spill] sm:$0xff] %v3752_v51  ;;  %v3772_v56 = vld [vmem:[%s3725_s8 + $0x178] sm:$0xff]  ;;  %v3775_v7 = vld [vmem:[%s3725_s8 + $0x180] sm:$0xff]  ;;  %v3778_v18 = vld [vmem:[%s3725_s8 + $0x188] sm:$0xff] }
 0x25b   : > { %v3705_v29 = vadd.s32 %v3599_v5, %v1260_v38  ;;  %v3708_v33 = vadd.s32 %v3599_v5, %v1261_v42  ;;  %v3711_v37 = vadd.s32 %v3599_v5, %v1262_v46  ;;  %v3714_v41 = vadd.s32 %v3599_v5, %v1263_v50  ;;  %4630 = vst [vmem:[#allocation19_spill] sm:$0xff] %v3755_v59  ;;  %v3781_v22 = vld [vmem:[%s3725_s8 + $0x190] sm:$0xff]  ;;  %v3784_v26 = vld [vmem:[%s3725_s8 + $0x198] sm:$0xff]  ;;  %v3793_v42 = vld [vmem:[%s3725_s8 + $0x1a0] sm:$0xff] }
 0x25c   : > { %v3717_v45 = vadd.s32 %v3599_v5, %v1264_v54  ;;  %v3720_v49 = vadd.s32 %v3599_v5, %v1265_v58  ;;  %v1199_v61 = vmul.f32 0.00125, %v1198_v57  ;;  %v1463_v1 = vsub.s32 0, %v3592_v53  ;;  %4631 = vst [vmem:[#allocation20_spill] sm:$0xff] %v3758_v3  ;;  %4632 = vst [vmem:[#allocation21_spill] sm:$0xff] %v3769_v55  ;;  %v3796_v46 = vld [vmem:[%s3725_s8 + $0x1a8] sm:$0xff] }
 0x25d   : > { %4633 = vst [vmem:[#allocation22_spill] sm:$0xff] %v3772_v56  ;;  %v3799_v50 = vld [vmem:[%s3725_s8 + $0x1b0] sm:$0xff]  ;;  %v3813_v38 = vld [vmem:[%s3725_s8 + $0x1c0] sm:$0xff]  ;;  %v3816_v34 = vld [vmem:[%s3725_s8 + $0x1c8] sm:$0xff]  ;;  %v3885_v54 = vadd.s32 8, %v3592_v53  ;;  %vm1364_vm0 = vcmp.lt.s32.totalorder %v3630_v62, 800 }
 0x25e   : > { %v3766_v39 = vrot.slane %v1199_v61, %v1463_v1  ;;  %v3810_v1 = vld [vmem:[%s3725_s8 + $0x1b8] sm:$0xff]  ;;  %v3827_v30 = vld [vmem:[%s3725_s8 + $0x1d0] sm:$0xff]  ;;  %v3833_v24 = vld [vmem:[%s3725_s8 + $0x1e0] sm:$0xff]  ;;  %vm1365_vm1 = vcmp.lt.s32.totalorder %v3633_v31, 800  ;;  %vm1366_vm2 = vcmp.lt.s32.totalorder %v3636_v2, 800  ;;  %vm1367_vm3 = vcmp.lt.s32.totalorder %v3639_v63, 800 }
 0x25f   : > { %v3830_v5 = vld [vmem:[%s3725_s8 + $0x1d8] sm:$0xff]  ;;  %v3844_v59 = vld [vmem:[%s3725_s8 + $0x1e8] sm:$0xff]  ;;  %v3847_v61 = vld [vmem:[%s3725_s8 + $0x1f0] sm:$0xff]  ;;  %vm1368_vm4 = vcmp.lt.s32.totalorder %v3642_v6, 800  ;;  %vm1369_vm5 = vcmp.lt.s32.totalorder %v3645_v0, 800  ;;  %vm1385_vm11 = vcmp.lt.s32.totalorder %v3693_v8, 800 }
 0x260   : > { %v3850_v3 = vld [vmem:[%s3725_s8 + $0x1f8] sm:$0xff]  ;;  %vm1386_vm12 = vcmp.lt.s32.totalorder %v3696_v17, 800  ;;  %vm1387_vm13 = vcmp.lt.s32.totalorder %v3699_v21, 800  ;;  %vm1388_vm14 = vcmp.lt.s32.totalorder %v3702_v25, 800  ;;  %vm1389_vm15 = vcmp.lt.s32.totalorder %v3705_v29, 800 }
 0x261   : > { %vm1390_vm6 = vcmp.lt.s32.totalorder %v3708_v33, 800  ;;  %vm1391_vm7 = vcmp.lt.s32.totalorder %v3711_v37, 800  ;;  %vm1392_vm8 = vcmp.lt.s32.totalorder %v3714_v41, 800  ;;  %vm1393_vm9 = vcmp.lt.s32.totalorder %v3717_v45, 800 }
 0x262   : > { %vm1394_vm10 = vcmp.lt.s32.totalorder %v3720_v49, 800  ;;  %v4634_v35 = vsub.f32 %v3728_v9, %v3766_v39  ;;  %v4635_v55 = vsub.f32 %v3731_v13, %v3766_v39  ;;  %v4636_v57 = vsub.f32 %v3734_v19, %v3766_v39 }
 0x263   : > { %v4637_v9 = vsub.f32 %v3737_v27, %v3766_v39  ;;  %v4638_v13 = vsub.f32 %v3740_v4, %v3766_v39  ;;  %v4644_v4 = vsub.f32 %v3749_v43, %v3766_v39  ;;  %v4680_v8 = vsub.f32 %v3816_v34, %v3766_v39 }
 0x264   : > { %v3923_v51 = vsel %vm1364_vm0, %v4634_v35, 0.0  ;;  %v3930_v56 = vsel %vm1365_vm1, %v4635_v55, 0.0  ;;  %v3937_v58 = vsel %vm1366_vm2, %v4636_v57, 0.0  ;;  %v4639_v35 = vld [vmem:[#allocation16_spill] sm:$0xff]  ;;  %v4641_v55 = vld [vmem:[#allocation17_spill] sm:$0xff]  ;;  %vm4643_vm0 = vcmp.lt.s32.totalorder %v3648_v10, 800 }
 0x265   : > { %v3944_v62 = vsel %vm1367_vm3, %v4637_v9, 0.0  ;;  %v3951_v31 = vsel %vm1368_vm4, %v4638_v13, 0.0  ;;  %v4640_v19 = vsub.f32 %v4639_v35, %v3766_v39  ;;  %v4642_v27 = vsub.f32 %v4641_v55, %v3766_v39  ;;  %v4646_v57 = vld [vmem:[#allocation18_spill] sm:$0xff]  ;;  %v4649_v13 = vld [vmem:[#allocation19_spill] sm:$0xff] }
 0x266   : > { %vm4645_vm1 = vcmp.lt.s32.totalorder %v3651_v16, 800  ;;  %v4647_v9 = vsub.f32 %v4646_v57, %v3766_v39  ;;  %vm4648_vm2 = vcmp.lt.s32.totalorder %v3654_v14, 800  ;;  %v4650_v35 = vsub.f32 %v4649_v13, %v3766_v39 }
 0x267   : > { %v3958_v2 = vsel %vm1369_vm5, %v4640_v19, 0.0  ;;  %v3965_v63 = vsel %vm4643_vm0, %v4642_v27, 0.0  ;;  %v3972_v6 = vsel %vm4645_vm1, %v4644_v4, 0.0  ;;  %vm4651_vm3 = vcmp.lt.s32.totalorder %v3657_v47, 800  ;;  %v4652_v19 = vld [vmem:[#allocation20_spill] sm:$0xff]  ;;  %v4659_v4 = vld [vmem:[#allocation21_spill] sm:$0xff] }
 0x268   : > { %v3979_v0 = vsel %vm4648_vm2, %v4647_v9, 0.0  ;;  %v3986_v10 = vsel %vm4651_vm3, %v4650_v35, 0.0  ;;  %v4653_v43 = vsub.f32 %v4652_v19, %v3766_v39  ;;  %vm4654_vm4 = vcmp.lt.s32.totalorder %v3660_v20, 800  ;;  %v4662_v9 = vld [vmem:[#allocation22_spill] sm:$0xff]  ;;  %v4687_v19 = vld [vmem:[#allocation15_spill] sm:$0xff] }
 0x269   : > { %v4655_v55 = vsub.f32 %v3761_v11, %v3766_v39  ;;  %vm4656_vm5 = vcmp.lt.s32.totalorder %v3663_v15, 800  ;;  %v4657_v27 = vsub.f32 %v3764_v23, %v3766_v39  ;;  %vm4658_vm0 = vcmp.lt.s32.totalorder %v3666_v28, 800 }
 0x26a   : > { %v3993_v16 = vsel %vm4654_vm4, %v4653_v43, 0.0  ;;  %v4660_v57 = vsub.f32 %v4659_v4, %v3766_v39  ;;  %vm4661_vm1 = vcmp.lt.s32.totalorder %v3669_v40, 800  ;;  %v4663_v11 = vsub.f32 %v4662_v9, %v3766_v39 }
 0x26b   : > { %v4000_v14 = vsel %vm4656_vm5, %v4655_v55, 0.0  ;;  %v4007_v47 = vsel %vm4658_vm0, %v4657_v27, 0.0  ;;  %vm4664_vm2 = vcmp.lt.s32.totalorder %v3672_v36, 800  ;;  %v4665_v23 = vsub.f32 %v3775_v7, %v3766_v39  ;;  %v1397_v55 = vld [vmem:[%s3725_s8 + $0x8] sm:$0xff]  ;;  %v1398_v27 = vld [vmem:[%s3725_s8 + $0x10] sm:$0xff] }
 0x26c   : > { %v4014_v20 = vsel %vm4661_vm1, %v4660_v57, 0.0  ;;  %v4021_v15 = vsel %vm4664_vm2, %v4663_v11, 0.0  ;;  %vm4666_vm3 = vcmp.lt.s32.totalorder %v3675_v32, 800  ;;  %v4667_v13 = vsub.f32 %v3778_v18, %v3766_v39 }
 0x26d   : > { %v4028_v28 = vsel %vm4666_vm3, %v4665_v23, 0.0  ;;  %vm4668_vm4 = vcmp.lt.s32.totalorder %v3678_v44, 800  ;;  %v4669_v35 = vsub.f32 %v3781_v22, %v3766_v39  ;;  %vm4670_vm5 = vcmp.lt.s32.totalorder %v3681_v48, 800 }
 0x26e   : > { %v4035_v40 = vsel %vm4668_vm4, %v4667_v13, 0.0  ;;  %v4671_v7 = vsub.f32 %v3784_v26, %v3766_v39  ;;  %vm4672_vm0 = vcmp.lt.s32.totalorder %v3684_v52, 800  ;;  %v4673_v18 = vsub.f32 %v3793_v42, %v3766_v39 }
 0x26f   : > { %v4042_v36 = vsel %vm4670_vm5, %v4669_v35, 0.0  ;;  %vm4674_vm1 = vcmp.lt.s32.totalorder %v3687_v12, 800  ;;  %v4675_v22 = vsub.f32 %v3796_v46, %v3766_v39  ;;  %vm4676_vm2 = vcmp.lt.s32.totalorder %v3690_v60, 800 }
 0x270   : > { %v4049_v32 = vsel %vm4672_vm0, %v4671_v7, 0.0  ;;  %v4056_v44 = vsel %vm4674_vm1, %v4673_v18, 0.0  ;;  %v4677_v52 = vsub.f32 %v3799_v50, %v3766_v39  ;;  %v4678_v12 = vsub.f32 %v3810_v1, %v3766_v39  ;;  %v1400_v7 = vld [vmem:[%s3725_s8 + $0x20] sm:$0xff] }
 0x271   : > { %v4063_v48 = vsel %vm4676_vm2, %v4675_v22, 0.0  ;;  %v4679_v60 = vsub.f32 %v3813_v38, %v3766_v39  ;;  %v4091_v50 = vsel %vm1388_vm14, %v4680_v8, 0.0  ;;  %v4681_v17 = vsub.f32 %v3827_v30, %v3766_v39  ;;  %v1401_v8 = vld [vmem:[%s3725_s8 + $0x28] sm:$0xff] }
 0x272   : > { %v4070_v26 = vsel %vm1385_vm11, %v4677_v52, 0.0  ;;  %v4077_v42 = vsel %vm1386_vm12, %v4678_v12, 0.0  ;;  %v4682_v21 = vsub.f32 %v3830_v5, %v3766_v39  ;;  %v4683_v25 = vsub.f32 %v3833_v24, %v3766_v39 }
 0x273   : > { %v4084_v46 = vsel %vm1387_vm13, %v4679_v60, 0.0  ;;  %v4098_v1 = vsel %vm1389_vm15, %v4681_v17, 0.0  ;;  %v4684_v30 = vsub.f32 %v3844_v59, %v3766_v39  ;;  %v4685_v5 = vsub.f32 %v3847_v61, %v3766_v39  ;;  %v1396_v61 = vld [vmem:[%s3725_s8] sm:$0xff] }
 0x274   : > { %v4105_v38 = vsel %vm1390_vm6, %v4682_v21, 0.0  ;;  %v4112_v34 = vsel %vm1391_vm7, %v4683_v25, 0.0  ;;  %v4686_v24 = vsub.f32 %v3850_v3, %v3766_v39  ;;  %v1204_v59 = vadd.s32 16, %v3592_v53 }
 0x275   : > { %v4119_v29 = vsel %vm1392_vm8, %v4684_v30, 0.0  ;;  %v4126_v33 = vsel %vm1393_vm9, %v4685_v5, 0.0  ;;  %v1205_v41 = vadd.s32 24, %v3592_v53  ;;  %v1267_v43 = vadd.s32 %v4687_v19, %v3592_v53  ;;  %v1402_v5 = vld [vmem:[%s3725_s8 + $0x30] sm:$0xff] }
 0x276   : > { %v4133_v37 = vsel %vm1394_vm10, %v4686_v24, 0.0  ;;  %v1268_v45 = vadd.s32 %v4687_v19, %v3885_v54  ;;  %v1206_v3 = vadd.s32 32, %v3592_v53  ;;  %v1269_v49 = vadd.s32 %v4687_v19, %v1204_v59  ;;  %v1399_v54 = vld [vmem:[%s3725_s8 + $0x18] sm:$0xff] }
 0x277   : > { %v1466_v4 = vsub.f32 %v1396_v61, %v3766_v39  ;;  %v1467_v57 = vsub.f32 %v1397_v55, %v3766_v39  ;;  %v1207_v9 = vadd.s32 40, %v3592_v53  ;;  %v1270_v11 = vadd.s32 %v4687_v19, %v1205_v41  ;;  %v1403_v55 = vld [vmem:[%s3725_s8 + $0x38] sm:$0xff] }
 0x278   : > { %vm1331_vm6 = vcmp.lt.s32.totalorder %v1267_v43, 800  ;;  %vm1332_vm7 = vcmp.lt.s32.totalorder %v1268_v45, 800  ;;  %v1468_v23 = vsub.f32 %v1398_v27, %v3766_v39  ;;  %v1208_v13 = vadd.s32 48, %v3592_v53 }
 0x279   : > { %v1271_v35 = vadd.s32 %v4687_v19, %v1206_v3  ;;  %vm1333_vm8 = vcmp.lt.s32.totalorder %v1269_v49, 800  ;;  %v1469_v18 = vsub.f32 %v1399_v54, %v3766_v39  ;;  %v1530_v22 = vsel %vm1331_vm6, %v1466_v4, 0.0 }
 0x27a   : > { %v1531_v52 = vsel %vm1332_vm7, %v1467_v57, 0.0  ;;  %v1209_v12 = vadd.s32 56, %v3592_v53  ;;  %v1272_v60 = vadd.s32 %v4687_v19, %v1207_v9  ;;  %vm1334_vm9 = vcmp.lt.s32.totalorder %v1270_v11, 800  ;;  %v1404_v9 = vld [vmem:[%s3725_s8 + $0x40] sm:$0xff] }
 0x27b   : > { %v1210_v17 = vadd.s32 64, %v3592_v53  ;;  %v1470_v21 = vsub.f32 %v1400_v7, %v3766_v39  ;;  %v1532_v25 = vsel %vm1333_vm8, %v1468_v23, 0.0  ;;  %v1273_v30 = vadd.s32 %v4687_v19, %v1208_v13 }
 0x27c   : > { %vm1335_vm10 = vcmp.lt.s32.totalorder %v1271_v35, 800  ;;  %v1595_v24 = vmul.f32 %v1530_v22, %v1530_v22  ;;  %v1596_v59 = vmul.f32 %v1531_v52, %v1531_v52  ;;  %v1471_v41 = vsub.f32 %v1401_v8, %v3766_v39 }
 0x27d   : > { %v1533_v43 = vsel %vm1334_vm9, %v1469_v18, 0.0  ;;  %v1211_v45 = vadd.s32 72, %v3592_v53  ;;  %v1274_v61 = vadd.s32 %v4687_v19, %v1209_v12  ;;  %vm1336_vm11 = vcmp.lt.s32.totalorder %v1272_v60, 800  ;;  %v1405_v18 = vld [vmem:[%s3725_s8 + $0x48] sm:$0xff] }
 0x27e   : > { %v1597_v3 = vmul.f32 %v1532_v25, %v1532_v25  ;;  %v1212_v49 = vadd.s32 80, %v3592_v53  ;;  %v1472_v27 = vsub.f32 %v1402_v5, %v3766_v39  ;;  %v1534_v4 = vsel %vm1335_vm10, %v1470_v21, 0.0  ;;  %v1406_v21 = vld [vmem:[%s3725_s8 + $0x50] sm:$0xff] }
 0x27f   : > { %v1275_v57 = vadd.s32 %v4687_v19, %v1210_v17  ;;  %vm1337_vm12 = vcmp.lt.s32.totalorder %v1273_v30, 800  ;;  %v1598_v11 = vmul.f32 %v1533_v43, %v1533_v43  ;;  %v1659_v54 = vadd.f32 %v1596_v59, %v1595_v24  ;;  %v1407_v43 = vld [vmem:[%s3725_s8 + $0x58] sm:$0xff] }
 0x280   : > { %v1213_v23 = vadd.s32 88, %v3592_v53  ;;  %v1473_v13 = vsub.f32 %v1403_v55, %v3766_v39  ;;  %v1535_v35 = vsel %vm1336_vm11, %v1471_v41, 0.0  ;;  %v1276_v7 = vadd.s32 %v4687_v19, %v1211_v45 }
 0x281   : > { %vm1338_vm13 = vcmp.lt.s32.totalorder %v1274_v61, 800  ;;  %v1599_v22 = vmul.f32 %v1534_v4, %v1534_v4  ;;  %v1660_v52 = vadd.f32 %v1659_v54, %v1597_v3  ;;  %v1214_v12 = vadd.s32 96, %v3592_v53  ;;  %v1408_v4 = vld [vmem:[%s3725_s8 + $0x60] sm:$0xff] }
 0x282   : > { %v1474_v60 = vsub.f32 %v1404_v9, %v3766_v39  ;;  %v1536_v8 = vsel %vm1337_vm12, %v1472_v27, 0.0  ;;  %v1277_v17 = vadd.s32 %v4687_v19, %v1212_v49  ;;  %vm1339_vm14 = vcmp.lt.s32.totalorder %v1275_v57, 800 }
 0x283   : > { %v1600_v25 = vmul.f32 %v1535_v35, %v1535_v35  ;;  %v1661_v30 = vadd.f32 %v1660_v52, %v1598_v11  ;;  %v1215_v5 = vadd.s32 104, %v3592_v53  ;;  %v1475_v24 = vsub.f32 %v1405_v18, %v3766_v39  ;;  %v1409_v35 = vld [vmem:[%s3725_s8 + $0x68] sm:$0xff] }
 0x284   : > { %v1537_v59 = vsel %vm1338_vm13, %v1473_v13, 0.0  ;;  %v1278_v41 = vadd.s32 %v4687_v19, %v1213_v23  ;;  %vm1340_vm15 = vcmp.lt.s32.totalorder %v1276_v7, 800  ;;  %v1601_v45 = vmul.f32 %v1536_v8, %v1536_v8  ;;  %v1410_v8 = vld [vmem:[%s3725_s8 + $0x70] sm:$0xff] }
 0x285   : > { %v1662_v61 = vadd.f32 %v1661_v30, %v1599_v22  ;;  %v1216_v55 = vadd.s32 112, %v3592_v53  ;;  %v1476_v3 = vsub.f32 %v1406_v21, %v3766_v39  ;;  %v1538_v49 = vsel %vm1339_vm14, %v1474_v60, 0.0 }
 0x286   : > { %v1279_v27 = vadd.s32 %v4687_v19, %v1214_v12  ;;  %vm1341_vm3 = vcmp.lt.s32.totalorder %v1277_v17, 800  ;;  %v1602_v57 = vmul.f32 %v1537_v59, %v1537_v59  ;;  %v1217_v11 = vadd.s32 120, %v3592_v53  ;;  %v1411_v59 = vld [vmem:[%s3725_s8 + $0x78] sm:$0xff] }
 0x287   : > { %v1663_v9 = vadd.f32 %v1662_v61, %v1600_v25  ;;  %v1477_v54 = vsub.f32 %v1407_v43, %v3766_v39  ;;  %v1539_v23 = vsel %vm1340_vm15, %v1475_v24, 0.0  ;;  %v1280_v13 = vadd.s32 %v4687_v19, %v1215_v5 }
 0x288   : > { %vm1342_vm4 = vcmp.lt.s32.totalorder %v1278_v41, 800  ;;  %v1603_v7 = vmul.f32 %v1538_v49, %v1538_v49  ;;  %v1218_v22 = vadd.s32 128, %v3592_v53  ;;  %v1478_v52 = vsub.f32 %v1408_v4, %v3766_v39  ;;  %v1412_v49 = vld [vmem:[%s3725_s8 + $0x80] sm:$0xff] }
 0x289   : > { %v1664_v18 = vadd.f32 %v1663_v9, %v1601_v45  ;;  %v1540_v12 = vsel %vm1341_vm3, %v1476_v3, 0.0  ;;  %v1281_v60 = vadd.s32 %v4687_v19, %v1216_v55  ;;  %vm1343_vm5 = vcmp.lt.s32.totalorder %v1279_v27, 800 }
 0x28a   : > { %v1604_v17 = vmul.f32 %v1539_v23, %v1539_v23  ;;  %v1219_v25 = vadd.s32 136, %v3592_v53  ;;  %v1479_v30 = vsub.f32 %v1409_v35, %v3766_v39  ;;  %v1541_v5 = vsel %vm1342_vm4, %v1477_v54, 0.0  ;;  %v1413_v23 = vld [vmem:[%s3725_s8 + $0x88] sm:$0xff] }
 0x28b   : > { %v1665_v21 = vadd.f32 %v1664_v18, %v1602_v57  ;;  %v1282_v24 = vadd.s32 %v4687_v19, %v1217_v11  ;;  %vm1344_vm0 = vcmp.lt.s32.totalorder %v1280_v13, 800  ;;  %v1605_v41 = vmul.f32 %v1540_v12, %v1540_v12  ;;  %v1414_v12 = vld [vmem:[%s3725_s8 + $0x90] sm:$0xff] }
 0x28c   : > { %v1220_v45 = vadd.s32 144, %v3592_v53  ;;  %v1480_v61 = vsub.f32 %v1410_v8, %v3766_v39  ;;  %v1542_v55 = vsel %vm1343_vm5, %v1478_v52, 0.0  ;;  %v1283_v3 = vadd.s32 %v4687_v19, %v1218_v22 }
 0x28d   : > { %v1666_v43 = vadd.f32 %v1665_v21, %v1603_v7  ;;  %vm1345_vm1 = vcmp.lt.s32.totalorder %v1281_v60, 800  ;;  %v1606_v27 = vmul.f32 %v1541_v5, %v1541_v5  ;;  %v1221_v57 = vadd.s32 152, %v3592_v53  ;;  %v1415_v5 = vld [vmem:[%s3725_s8 + $0x98] sm:$0xff] }
 0x28e   : > { %v1481_v9 = vsub.f32 %v1411_v59, %v3766_v39  ;;  %v1543_v11 = vsel %vm1344_vm0, %v1479_v30, 0.0  ;;  %v1284_v54 = vadd.s32 %v4687_v19, %v1219_v25  ;;  %vm1346_vm2 = vcmp.lt.s32.totalorder %v1282_v24, 800 }
 0x28f   : > { %v1667_v4 = vadd.f32 %v1666_v43, %v1604_v17  ;;  %v1607_v13 = vmul.f32 %v1542_v55, %v1542_v55  ;;  %v1222_v7 = vadd.s32 160, %v3592_v53  ;;  %v1482_v18 = vsub.f32 %v1412_v49, %v3766_v39  ;;  %v1416_v55 = vld [vmem:[%s3725_s8 + $0xa0] sm:$0xff] }
 0x290   : > { %v1544_v22 = vsel %vm1345_vm1, %v1480_v61, 0.0  ;;  %v1285_v52 = vadd.s32 %v4687_v19, %v1220_v45  ;;  %vm1347_vm6 = vcmp.lt.s32.totalorder %v1283_v3, 800  ;;  %v1608_v60 = vmul.f32 %v1543_v11, %v1543_v11  ;;  %v1417_v11 = vld [vmem:[%s3725_s8 + $0xa8] sm:$0xff] }
 0x291   : > { %v1668_v35 = vadd.f32 %v1667_v4, %v1605_v41  ;;  %v1223_v17 = vadd.s32 168, %v3592_v53  ;;  %v1483_v21 = vsub.f32 %v1413_v23, %v3766_v39  ;;  %v1545_v25 = vsel %vm1346_vm2, %v1481_v9, 0.0 }
 0x292   : > { %v1286_v30 = vadd.s32 %v4687_v19, %v1221_v57  ;;  %vm1348_vm7 = vcmp.lt.s32.totalorder %v1284_v54, 800  ;;  %v1609_v24 = vmul.f32 %v1544_v22, %v1544_v22  ;;  %v1224_v41 = vadd.s32 176, %v3592_v53  ;;  %v1418_v22 = vld [vmem:[%s3725_s8 + $0xb0] sm:$0xff] }
 0x293   : > { %v1669_v8 = vadd.f32 %v1668_v35, %v1606_v27  ;;  %v1484_v43 = vsub.f32 %v1414_v12, %v3766_v39  ;;  %v1546_v45 = vsel %vm1347_vm6, %v1482_v18, 0.0  ;;  %v1287_v61 = vadd.s32 %v4687_v19, %v1222_v7 }
 0x294   : > { %vm1349_vm8 = vcmp.lt.s32.totalorder %v1285_v52, 800  ;;  %v1610_v3 = vmul.f32 %v1545_v25, %v1545_v25  ;;  %v1225_v27 = vadd.s32 184, %v3592_v53  ;;  %v1485_v4 = vsub.f32 %v1415_v5, %v3766_v39  ;;  %v1419_v25 = vld [vmem:[%s3725_s8 + $0xb8] sm:$0xff] }
 0x295   : > { %v1670_v59 = vadd.f32 %v1669_v8, %v1607_v13  ;;  %v1547_v57 = vsel %vm1348_vm7, %v1483_v21, 0.0  ;;  %v1288_v9 = vadd.s32 %v4687_v19, %v1223_v17  ;;  %vm1350_vm9 = vcmp.lt.s32.totalorder %v1286_v30, 800 }
 0x296   : > { %v1611_v54 = vmul.f32 %v1546_v45, %v1546_v45  ;;  %v1226_v13 = vadd.s32 192, %v3592_v53  ;;  %v1486_v35 = vsub.f32 %v1416_v55, %v3766_v39  ;;  %v1548_v7 = vsel %vm1349_vm8, %v1484_v43, 0.0  ;;  %v1420_v45 = vld [vmem:[%s3725_s8 + $0xc0] sm:$0xff] }
 0x297   : > { %v1671_v49 = vadd.f32 %v1670_v59, %v1608_v60  ;;  %v1289_v18 = vadd.s32 %v4687_v19, %v1224_v41  ;;  %vm1351_vm10 = vcmp.lt.s32.totalorder %v1287_v61, 800  ;;  %v1612_v52 = vmul.f32 %v1547_v57, %v1547_v57  ;;  %v1421_v57 = vld [vmem:[%s3725_s8 + $0xc8] sm:$0xff] }
 0x298   : > { %v1227_v60 = vadd.s32 200, %v3592_v53  ;;  %v1487_v8 = vsub.f32 %v1417_v11, %v3766_v39  ;;  %v1549_v17 = vsel %vm1350_vm9, %v1485_v4, 0.0  ;;  %v1290_v21 = vadd.s32 %v4687_v19, %v1225_v27 }
 0x299   : > { %v1672_v23 = vadd.f32 %v1671_v49, %v1609_v24  ;;  %vm1352_vm11 = vcmp.lt.s32.totalorder %v1288_v9, 800  ;;  %v1613_v30 = vmul.f32 %v1548_v7, %v1548_v7  ;;  %v1228_v24 = vadd.s32 208, %v3592_v53  ;;  %v1422_v7 = vld [vmem:[%s3725_s8 + $0xd0] sm:$0xff] }
 0x29a   : > { %v1488_v59 = vsub.f32 %v1418_v22, %v3766_v39  ;;  %v1550_v41 = vsel %vm1351_vm10, %v1486_v35, 0.0  ;;  %v1291_v43 = vadd.s32 %v4687_v19, %v1226_v13  ;;  %vm1353_vm12 = vcmp.lt.s32.totalorder %v1289_v18, 800 }
 0x29b   : > { %v1673_v12 = vadd.f32 %v1672_v23, %v1610_v3  ;;  %v1614_v61 = vmul.f32 %v1549_v17, %v1549_v17  ;;  %v1229_v3 = vadd.s32 216, %v3592_v53  ;;  %v1489_v49 = vsub.f32 %v1419_v25, %v3766_v39  ;;  %v1423_v17 = vld [vmem:[%s3725_s8 + $0xd8] sm:$0xff] }
 0x29c   : > { %v1551_v27 = vsel %vm1352_vm11, %v1487_v8, 0.0  ;;  %v1292_v4 = vadd.s32 %v4687_v19, %v1227_v60  ;;  %vm1354_vm13 = vcmp.lt.s32.totalorder %v1290_v21, 800  ;;  %v1615_v9 = vmul.f32 %v1550_v41, %v1550_v41  ;;  %v1424_v41 = vld [vmem:[%s3725_s8 + $0xe0] sm:$0xff] }
 0x29d   : > { %v1674_v5 = vadd.f32 %v1673_v12, %v1611_v54  ;;  %v1230_v54 = vadd.s32 224, %v3592_v53  ;;  %v1490_v23 = vsub.f32 %v1420_v45, %v3766_v39  ;;  %v1552_v13 = vsel %vm1353_vm12, %v1488_v59, 0.0 }
 0x29e   : > { %v1293_v35 = vadd.s32 %v4687_v19, %v1228_v24  ;;  %vm1355_vm14 = vcmp.lt.s32.totalorder %v1291_v43, 800  ;;  %v1616_v18 = vmul.f32 %v1551_v27, %v1551_v27  ;;  %v1491_v12 = vsub.f32 %v1421_v57, %v3766_v39  ;;  %v1425_v27 = vld [vmem:[%s3725_s8 + $0xe8] sm:$0xff] }
 0x29f   : > { %v1675_v55 = vadd.f32 %v1674_v5, %v1612_v52  ;;  %v1231_v52 = vadd.s32 232, %v3592_v53  ;;  %v1553_v60 = vsel %vm1354_vm13, %v1489_v49, 0.0  ;;  %v1294_v8 = vadd.s32 %v4687_v19, %v1229_v3 }
 0x2a0   : > { %vm1356_vm15 = vcmp.lt.s32.totalorder %v1292_v4, 800  ;;  %v1617_v21 = vmul.f32 %v1552_v13, %v1552_v13  ;;  %v1492_v5 = vsub.f32 %v1422_v7, %v3766_v39  ;;  %v1554_v24 = vsel %vm1355_vm14, %v1490_v23, 0.0  ;;  %v1426_v13 = vld [vmem:[%s3725_s8 + $0xf0] sm:$0xff] }
 0x2a1   : > { %v1676_v11 = vadd.f32 %v1675_v55, %v1613_v30  ;;  %v1232_v30 = vadd.s32 240, %v3592_v53  ;;  %v1295_v59 = vadd.s32 %v4687_v19, %v1230_v54  ;;  %vm1357_vm3 = vcmp.lt.s32.totalorder %v1293_v35, 800 }
 0x2a2   : > { %v1618_v43 = vmul.f32 %v1553_v60, %v1553_v60  ;;  %v1493_v55 = vsub.f32 %v1423_v17, %v3766_v39  ;;  %v1555_v3 = vsel %vm1356_vm15, %v1491_v12, 0.0  ;;  %v1296_v49 = vadd.s32 %v4687_v19, %v1231_v52  ;;  %v1427_v12 = vld [vmem:[%s3725_s8 + $0xf8] sm:$0xff] }
 0x2a3   : > { %v1677_v22 = vadd.f32 %v1676_v11, %v1614_v61  ;;  %v1233_v61 = vadd.s32 248, %v3592_v53  ;;  %vm1358_vm4 = vcmp.lt.s32.totalorder %v1294_v8, 800  ;;  %v1619_v4 = vmul.f32 %v1554_v24, %v1554_v24 }
 0x2a4   : > { %v1494_v11 = vsub.f32 %v1424_v41, %v3766_v39  ;;  %v1556_v54 = vsel %vm1357_vm3, %v1492_v5, 0.0  ;;  %v1297_v23 = vadd.s32 %v4687_v19, %v1232_v30  ;;  %vm1359_vm5 = vcmp.lt.s32.totalorder %v1295_v59, 800 }
 0x2a5   : > { %v1678_v25 = vadd.f32 %v1677_v22, %v1615_v9  ;;  %v1234_v9 = vadd.s32 256, %v3592_v53  ;;  %v1620_v35 = vmul.f32 %v1555_v3, %v1555_v3  ;;  %v1557_v22 = vsel %vm1358_vm4, %v1493_v55, 0.0 }
 0x2a6   : > { %v1298_v52 = vadd.s32 %v4687_v19, %v1233_v61  ;;  %vm1360_vm0 = vcmp.lt.s32.totalorder %v1296_v49, 800  ;;  %v1621_v60 = vmul.f32 %v1556_v54, %v1556_v54  ;;  %v1496_v53 = vsub.f32 %v1426_v13, %v3766_v39 }
 0x2a7   : > { %v1679_v45 = vadd.f32 %v1678_v25, %v1616_v18  ;;  %v1495_v18 = vsub.f32 %v1425_v27, %v3766_v39  ;;  %v1558_v17 = vsel %vm1359_vm5, %v1494_v11, 0.0  ;;  %vm1361_vm1 = vcmp.lt.s32.totalorder %v1297_v23, 800  ;;  %v1428_v25 = vld [vmem:[%s3725_s8 + $0x100] sm:$0xff] }
 0x2a8   : > { %v1622_v30 = vmul.f32 %v1557_v22, %v1557_v22  ;;  %v1497_v24 = vsub.f32 %v1427_v12, %v3766_v39  ;;  %vm1362_vm2 = vcmp.lt.s32.totalorder %v1298_v52, 800  ;;  %v1623_v41 = vmul.f32 %v1558_v17, %v1558_v17 }
 0x2a9   : > { %v1680_v57 = vadd.f32 %v1679_v45, %v1617_v21  ;;  %v1299_v21 = vadd.s32 %v4687_v19, %v1234_v9  ;;  %v1559_v59 = vsel %vm1360_vm0, %v1495_v18, 0.0  ;;  %v1498_v45 = vsub.f32 %v1428_v25, %v3766_v39 }
 0x2aa   : > { %v1560_v61 = vsel %vm1361_vm1, %v1496_v53, 0.0  ;;  %v1624_v55 = vmul.f32 %v1559_v59, %v1559_v59  ;;  %v1561_v49 = vsel %vm1362_vm2, %v1497_v24, 0.0  ;;  %v1628_v23 = vmul.f32 %v3923_v51, %v3923_v51 }
 0x2ab   : > { %v1681_v7 = vadd.f32 %v1680_v57, %v1618_v43  ;;  %vm1363_vm6 = vcmp.lt.s32.totalorder %v1299_v21, 800  ;;  %v1625_v27 = vmul.f32 %v1560_v61, %v1560_v61  ;;  %v1626_v57 = vmul.f32 %v1561_v49, %v1561_v49 }
 0x2ac   : > { %v1562_v19 = vsel %vm1363_vm6, %v1498_v45, 0.0  ;;  %v1631_v22 = vmul.f32 %v3944_v62, %v3944_v62  ;;  %v1632_v12 = vmul.f32 %v3951_v31, %v3951_v31  ;;  %v1633_v51 = vmul.f32 %v3958_v2, %v3958_v2 }
 0x2ad   : > { %v1682_v8 = vadd.f32 %v1681_v7, %v1619_v4  ;;  %v1627_v11 = vmul.f32 %v1562_v19, %v1562_v19  ;;  %v1630_v7 = vmul.f32 %v3937_v58, %v3937_v58  ;;  %v1635_v58 = vmul.f32 %v3972_v6, %v3972_v6 }
 0x2ae   : > { %v1636_v62 = vmul.f32 %v3979_v0, %v3979_v0  ;;  %v1637_v31 = vmul.f32 %v3986_v10, %v3986_v10  ;;  %v1638_v2 = vmul.f32 %v3993_v16, %v3993_v16  ;;  %v1640_v6 = vmul.f32 %v4007_v47, %v4007_v47 }
 0x2af   : > { %v1683_v5 = vadd.f32 %v1682_v8, %v1620_v35  ;;  %v1629_v35 = vmul.f32 %v3930_v56, %v3930_v56  ;;  %v1634_v56 = vmul.f32 %v3965_v63, %v3965_v63  ;;  %v1639_v63 = vmul.f32 %v4000_v14, %v4000_v14 }
 0x2b0   : > { %v1641_v0 = vmul.f32 %v4014_v20, %v4014_v20  ;;  %v1642_v10 = vmul.f32 %v4021_v15, %v4021_v15  ;;  %v1643_v16 = vmul.f32 %v4028_v28, %v4028_v28  ;;  %v1644_v14 = vmul.f32 %v4035_v40, %v4035_v40 }
 0x2b1   : > { %v1684_v43 = vadd.f32 %v1683_v5, %v1621_v60  ;;  %v1645_v47 = vmul.f32 %v4042_v36, %v4042_v36  ;;  %v1646_v20 = vmul.f32 %v4049_v32, %v4049_v32  ;;  %v1647_v15 = vmul.f32 %v4056_v44, %v4056_v44 }
 0x2b2   : > { %v1648_v28 = vmul.f32 %v4063_v48, %v4063_v48  ;;  %v1649_v40 = vmul.f32 %v4070_v26, %v4070_v26  ;;  %v1650_v36 = vmul.f32 %v4077_v42, %v4077_v42  ;;  %v1651_v32 = vmul.f32 %v4084_v46, %v4084_v46 }
 0x2b3   : > { %v1685_v3 = vadd.f32 %v1684_v43, %v1622_v30  ;;  %v1652_v44 = vmul.f32 %v4091_v50, %v4091_v50  ;;  %v1653_v48 = vmul.f32 %v4098_v1, %v4098_v1  ;;  %v1654_v26 = vmul.f32 %v4105_v38, %v4105_v38 }
 0x2b4   : > { %v1655_v42 = vmul.f32 %v4112_v34, %v4112_v34  ;;  %v1656_v46 = vmul.f32 %v4119_v29, %v4119_v29  ;;  %v1657_v50 = vmul.f32 %v4126_v33, %v4126_v33  ;;  %v1658_v1 = vmul.f32 %v4133_v37, %v4133_v37 }
 0x2b5   : > { %v1686_v4 = vadd.f32 %v1685_v3, %v1623_v41 }
 0x2b7   : > { %v1687_v9 = vadd.f32 %v1686_v4, %v1624_v55 }
 0x2b9   : > { %v1688_v54 = vadd.f32 %v1687_v9, %v1625_v27 }
 0x2bb   : > { %v1689_v13 = vadd.f32 %v1688_v54, %v1626_v57 }
 0x2bd   : > { %v1690_v39 = vadd.f32 %v1689_v13, %v1627_v11 }
 0x2bf   : > { %v1691_v18 = vadd.f32 %v1690_v39, %v1628_v23 }
 0x2c1   : > { %v1692_v52 = vadd.f32 %v1691_v18, %v1629_v35 }
 0x2c3   : > { %v1693_v60 = vadd.f32 %v1692_v52, %v1630_v7 }
 0x2c5   : > { %v1694_v8 = vadd.f32 %v1693_v60, %v1631_v22 }
 0x2c7   : > { %v1695_v53 = vadd.f32 %v1694_v8, %v1632_v12  ;;  %v1594_v12 = vld [vmem:[#allocation4] sm:$0x1] }
 0x2c9   : > { %v1696_v17 = vadd.f32 %v1695_v53, %v1633_v51 }
 0x2cb   : > { %v1697_v21 = vadd.f32 %v1696_v17, %v1634_v56 }
 0x2cd   : > { %v1698_v25 = vadd.f32 %v1697_v21, %v1635_v58 }
 0x2cf   : > { %v1699_v30 = vadd.f32 %v1698_v25, %v1636_v62 }
 0x2d1   : > { %v1700_v5 = vadd.f32 %v1699_v30, %v1637_v31 }
 0x2d3   : > { %v1701_v24 = vadd.f32 %v1700_v5, %v1638_v2 }
 0x2d5   : > { %v1702_v59 = vadd.f32 %v1701_v24, %v1639_v63 }
 0x2d7   : > { %v1703_v41 = vadd.f32 %v1702_v59, %v1640_v6 }
 0x2d9   : > { %v1704_v43 = vadd.f32 %v1703_v41, %v1641_v0 }
 0x2db   : > { %v1705_v45 = vadd.f32 %v1704_v43, %v1642_v10 }
 0x2dd   : > { %v1706_v61 = vadd.f32 %v1705_v45, %v1643_v16 }
 0x2df   : > { %v1707_v55 = vadd.f32 %v1706_v61, %v1644_v14 }
 0x2e1   : > { %v1708_v3 = vadd.f32 %v1707_v55, %v1645_v47 }
 0x2e3   : > { %v1709_v49 = vadd.f32 %v1708_v3, %v1646_v20 }
 0x2e5   : > { %v1710_v27 = vadd.f32 %v1709_v49, %v1647_v15 }
 0x2e7   : > { %v1711_v4 = vadd.f32 %v1710_v27, %v1648_v28 }
 0x2e9   : > { %v1712_v19 = vadd.f32 %v1711_v4, %v1649_v40 }
 0x2eb   : > { %v1713_v57 = vadd.f32 %v1712_v19, %v1650_v36 }
 0x2ed   : > { %v1714_v9 = vadd.f32 %v1713_v57, %v1651_v32 }
 0x2ef   : > { %v1715_v11 = vadd.f32 %v1714_v9, %v1652_v44 }
 0x2f1   : > { %v1716_v54 = vadd.f32 %v1715_v11, %v1653_v48 }
 0x2f3   : > { %v1717_v23 = vadd.f32 %v1716_v54, %v1654_v26 }
 0x2f5   : > { %v1718_v13 = vadd.f32 %v1717_v23, %v1655_v42 }
 0x2f7   : > { %v1719_v35 = vadd.f32 %v1718_v13, %v1656_v46 }
 0x2f9   : > { %v1720_v39 = vadd.f32 %v1719_v35, %v1657_v50 }
 0x2fb   : > { %v1721_v7 = vadd.f32 %v1720_v39, %v1658_v1 }
 0x2fd   : > { %v1722_v38 = vrot.slane %v1721_v7, 4 }
 0x2ff   : > { %v1723_v18 = vadd.f32 %v1722_v38, %v1721_v7 }
 0x301   : > { %v1724_v22 = vrot.slane %v1723_v18, 2 }
 0x303   : > { %v1725_v52 = vadd.f32 %v1724_v22, %v1723_v18 }
 0x305   : > { %v1726_v34 = vrot.slane %v1725_v52, 1 }
 0x307   : > { %v1727_v60 = vadd.f32 %v1726_v34, %v1725_v52 }
 0x309   : > { %v1728_v51 = vadd.f32 %v1727_v60, %v1594_v12 }
 0x30b   : > { %1729 = vst [vmem:[#allocation4] sm:$0x1] %v1728_v51 }
 0x30c PF: > { %p2511_p13 = scmp.ne.s32.totalorder %s3050_s16, 2 }
 0x30d   : > { %v1812_v8 = vlaneseq (!%p2511_p13)  ;;  %s2512_s9 = sshll.u32 (!%p2511_p13), %s3046_s15, 9  ;;  %v1734_v53 = vld [vmem:[#allocation3] sm:$0x1] (!%p2511_p13) }
 0x30e   : > { %1733 = sbr.rel (%p2511_p13) target bundleno = 868 (0x364), region = 56  ;;  %v1738_v58 = vld [vmem:[%s4584_s2] sm:$0x1] (!%p2511_p13)  ;;  %v1735_v17 = vmul.f32 (!%p2511_p13), 0.00125, %v1734_v53  ;;  %s4337_s13 = scalar_lea.vmem (!%p2511_p13), [#allocation2], %s2512_s9 }
 0x30f   : > { %v1813_v56 = vshrl.u32 (!%p2511_p13), %v1812_v8, 7  ;;  %v1742_v25 = vld [vmem:[%s4585_s3] sm:$0x1] (!%p2511_p13)  ;;  %v1748_v30 = vld [vmem:[%s4337_s13 + $0x8] sm:$0xff] (!%p2511_p13)  ;;  %v1749_v63 = vld [vmem:[%s4337_s13 + $0x10] sm:$0xff] (!%p2511_p13) }
 0x310   : > { %v1747_v2 = vld [vmem:[%s4337_s13] sm:$0xff] (!%p2511_p13)  ;;  %v1750_v5 = vld [vmem:[%s4337_s13 + $0x18] sm:$0xff] (!%p2511_p13)  ;;  %v1752_v59 = vld [vmem:[%s4337_s13 + $0x28] sm:$0xff] (!%p2511_p13) }
 0x311   : > { %v1814_v62 = vsub.s32 (!%p2511_p13), 0, %v1813_v56  ;;  %v1751_v6 = vld [vmem:[%s4337_s13 + $0x20] sm:$0xff] (!%p2511_p13)  ;;  %v1753_v10 = vld [vmem:[%s4337_s13 + $0x30] sm:$0xff] (!%p2511_p13)  ;;  %v1754_v41 = vld [vmem:[%s4337_s13 + $0x38] sm:$0xff] (!%p2511_p13) }
 0x312   : > { %v1736_v29 = vld [vmem:[#allocation4] sm:$0x1] (!%p2511_p13)  ;;  %v1756_v43 = vld [vmem:[%s4337_s13 + $0x48] sm:$0xff] (!%p2511_p13)  ;;  %v1757_v14 = vld [vmem:[%s4337_s13 + $0x50] sm:$0xff] (!%p2511_p13) }
 0x313   : > { %v1737_v33 = vmul.f32 (!%p2511_p13), 0.00125, %v1736_v29  ;;  %v1755_v16 = vld [vmem:[%s4337_s13 + $0x40] sm:$0xff] (!%p2511_p13)  ;;  %v1758_v55 = vld [vmem:[%s4337_s13 + $0x58] sm:$0xff] (!%p2511_p13)  ;;  %v1760_v3 = vld [vmem:[%s4337_s13 + $0x68] sm:$0xff] (!%p2511_p13) }
 0x314   : > { %v1759_v15 = vld [vmem:[%s4337_s13 + $0x60] sm:$0xff] (!%p2511_p13)  ;;  %v1761_v29 = vld [vmem:[%s4337_s13 + $0x70] sm:$0xff] (!%p2511_p13) }
 0x315   : > { %v1739_v37 = vadd.f32 1e-05, %v1737_v33  ;;  %v1762_v33 = vld [vmem:[%s4337_s13 + $0x78] sm:$0xff] }
 0x317   : > { %3022 = vrsqrt.f32 %v1739_v37 }
 0x321   : > { %v3023_v21 = vpop.eup %3022 }
 0x322   : > { %v1741_v31 = vmul.f32 %v3023_v21, %v1738_v58  ;;  %v1763_v58 = vld [vmem:[%s4337_s13 + $0x80] sm:$0xff] }
 0x324   : > { %v1743_v24 = vmul.f32 %v1741_v31, %v1735_v17  ;;  %v4344_v0 = vrot.slane %v1741_v31, %v1814_v62 }
 0x326   : > { %v1744_v45 = vsub.f32 %v1742_v25, %v1743_v24  ;;  %v1817_v47 = vmul.f32 %v4344_v0, %v1747_v2  ;;  %v1818_v61 = vmul.f32 %v4344_v0, %v1748_v30  ;;  %v1819_v20 = vmul.f32 %v4344_v0, %v1749_v63  ;;  %v1764_v25 = vld [vmem:[%s4337_s13 + $0x88] sm:$0xff]  ;;  %v1766_v24 = vld [vmem:[%s4337_s13 + $0x98] sm:$0xff] }
 0x327   : > { %v1820_v28 = vmul.f32 %v4344_v0, %v1750_v5  ;;  %v1821_v49 = vmul.f32 %v4344_v0, %v1751_v6  ;;  %v1822_v40 = vmul.f32 %v4344_v0, %v1752_v59  ;;  %v1823_v27 = vmul.f32 %v4344_v0, %v1753_v10  ;;  %v1765_v6 = vld [vmem:[%s4337_s13 + $0x90] sm:$0xff] }
 0x328   : > { %v4362_v36 = vrot.slane %v1744_v45, %v1814_v62  ;;  %v1824_v4 = vmul.f32 %v4344_v0, %v1754_v41  ;;  %v1825_v32 = vmul.f32 %v4344_v0, %v1755_v16  ;;  %v1826_v19 = vmul.f32 %v4344_v0, %v1756_v43  ;;  %v1767_v43 = vld [vmem:[%s4337_s13 + $0xa0] sm:$0xff] }
 0x329   : > { %v1827_v44 = vmul.f32 %v4344_v0, %v1757_v14  ;;  %v1828_v57 = vmul.f32 %v4344_v0, %v1758_v55  ;;  %v1829_v48 = vmul.f32 %v4344_v0, %v1759_v15  ;;  %v1830_v9 = vmul.f32 %v4344_v0, %v1760_v3 }
 0x32a   : > { %v1887_v26 = vadd.f32 %v4362_v36, %v1817_v47  ;;  %v1888_v11 = vadd.f32 %v4362_v36, %v1818_v61  ;;  %v1889_v42 = vadd.f32 %v4362_v36, %v1819_v20  ;;  %v1890_v54 = vadd.f32 %v4362_v36, %v1820_v28  ;;  %v1768_v20 = vld [vmem:[%s4337_s13 + $0xa8] sm:$0xff] }
 0x32b   : > { %v1891_v46 = vadd.f32 %v4362_v36, %v1821_v49  ;;  %v1892_v23 = vadd.f32 %v4362_v36, %v1822_v40  ;;  %v1893_v50 = vadd.f32 %v4362_v36, %v1823_v27  ;;  %v1894_v13 = vadd.f32 %v4362_v36, %v1824_v4  ;;  %v1769_v49 = vld [vmem:[%s4337_s13 + $0xb0] sm:$0xff] }
 0x32c   : > { %v1951_v1 = vmax.f32 %v1887_v26, 0.0  ;;  %v1952_v35 = vmax.f32 %v1888_v11, 0.0  ;;  %v1953_v39 = vmax.f32 %v1889_v42, 0.0  ;;  %v1954_v7 = vmax.f32 %v1890_v54, 0.0  ;;  %v1771_v26 = vld [vmem:[%s4337_s13 + $0xc0] sm:$0xff] }
 0x32d   : > { %v1955_v38 = vmax.f32 %v1891_v46, 0.0  ;;  %v1956_v18 = vmax.f32 %v1892_v23, 0.0  ;;  %v1957_v22 = vmax.f32 %v1893_v50, 0.0  ;;  %v1958_v52 = vmax.f32 %v1894_v13, 0.0  ;;  %v1772_v23 = vld [vmem:[%s4337_s13 + $0xc8] sm:$0xff] }
 0x32e   : > { %v2647_v34 = vpack.c.bf16 %v1952_v35, %v1951_v1  ;;  %v2652_v12 = vpack.c.bf16 %v1954_v7, %v1953_v39  ;;  %v1895_v60 = vadd.f32 %v4362_v36, %v1825_v32  ;;  %v1896_v51 = vadd.f32 %v4362_v36, %v1826_v19  ;;  %v1770_v19 = vld [vmem:[%s4337_s13 + $0xb8] sm:$0xff]  ;;  %v1773_v39 = vld [vmem:[%s4337_s13 + $0xd0] sm:$0xff] }
 0x32f   : > { %v2657_v37 = vpack.c.bf16 %v1956_v18, %v1955_v38  ;;  %v2662_v8 = vpack.c.bf16 %v1958_v52, %v1957_v22  ;;  %v1897_v56 = vadd.f32 %v4362_v36, %v1827_v44  ;;  %v1898_v53 = vadd.f32 %v4362_v36, %v1828_v57  ;;  %v1774_v7 = vld [vmem:[%s4337_s13 + $0xd8] sm:$0xff] }
 0x330   : > { %2648 = vst [vmem:[%s3138_s7] sm:$0xff] %v2647_v34   ;;  %2804 = vst [vmem:[%s3138_s7 + $0x8] sm:$0xff] %v2652_v12   ;;  %v1959_v17 = vmax.f32 %v1895_v60, 0.0  ;;  %v1960_v62 = vmax.f32 %v1896_v51, 0.0  ;;  %v1899_v21 = vadd.f32 %v4362_v36, %v1829_v48  ;;  %v1900_v31 = vadd.f32 %v4362_v36, %v1830_v9  ;;  %v1775_v34 = vld [vmem:[%s4337_s13 + $0xe0] sm:$0xff] }
 0x331   : > { %2805 = vst [vmem:[%s3138_s7 + $0x10] sm:$0xff] %v2657_v37   ;;  %2806 = vst [vmem:[%s3138_s7 + $0x18] sm:$0xff] %v2662_v8   ;;  %v1961_v2 = vmax.f32 %v1897_v56, 0.0  ;;  %v1962_v30 = vmax.f32 %v1898_v53, 0.0  ;;  %v1831_v63 = vmul.f32 %v4344_v0, %v1761_v29  ;;  %v1832_v5 = vmul.f32 %v4344_v0, %v1762_v33  ;;  %v1776_v33 = vld [vmem:[%s4337_s13 + $0xe8] sm:$0xff] }
 0x332   : > { %v2667_v59 = vpack.c.bf16 %v1960_v62, %v1959_v17  ;;  %v1963_v10 = vmax.f32 %v1899_v21, 0.0  ;;  %v1964_v41 = vmax.f32 %v1900_v31, 0.0  ;;  %v1833_v16 = vmul.f32 %v4344_v0, %v1763_v58  ;;  %v1777_v58 = vld [vmem:[%s4337_s13 + $0xf0] sm:$0xff] }
 0x333   : > { %v2672_v14 = vpack.c.bf16 %v1962_v30, %v1961_v2  ;;  %v1901_v45 = vadd.f32 %v4362_v36, %v1831_v63  ;;  %v1902_v47 = vadd.f32 %v4362_v36, %v1832_v5  ;;  %v1834_v61 = vmul.f32 %v4344_v0, %v1764_v25  ;;  %v1778_v25 = vld [vmem:[%s4337_s13 + $0xf8] sm:$0xff] }
 0x334   : > { %2807 = vst [vmem:[%s3138_s7 + $0x20] sm:$0xff] %v2667_v59   ;;  %v2677_v55 = vpack.c.bf16 %v1964_v41, %v1963_v10  ;;  %v1903_v15 = vadd.f32 %v4362_v36, %v1833_v16  ;;  %v1835_v3 = vmul.f32 %v4344_v0, %v1765_v6  ;;  %v1836_v28 = vmul.f32 %v4344_v0, %v1766_v24  ;;  %v1779_v6 = vld [vmem:[%s4337_s13 + $0x100] sm:$0xff]  ;;  %v1780_v16 = vld [vmem:[%s4337_s13 + $0x108] sm:$0xff] }
 0x335   : > { %2808 = vst [vmem:[%s3138_s7 + $0x28] sm:$0xff] %v2672_v14   ;;  %v1965_v40 = vmax.f32 %v1901_v45, 0.0  ;;  %v1966_v27 = vmax.f32 %v1902_v47, 0.0  ;;  %v1904_v4 = vadd.f32 %v4362_v36, %v1834_v61  ;;  %v1837_v32 = vmul.f32 %v4344_v0, %v1767_v43  ;;  %v1781_v61 = vld [vmem:[%s4337_s13 + $0x110] sm:$0xff] }
 0x336   : > { %2809 = vst [vmem:[%s3138_s7 + $0x30] sm:$0xff] %v2677_v55   ;;  %v1967_v44 = vmax.f32 %v1903_v15, 0.0  ;;  %v1905_v57 = vadd.f32 %v4362_v36, %v1835_v3  ;;  %v1906_v48 = vadd.f32 %v4362_v36, %v1836_v28  ;;  %v1838_v9 = vmul.f32 %v4344_v0, %v1768_v20  ;;  %v1782_v20 = vld [vmem:[%s4337_s13 + $0x118] sm:$0xff] }
 0x337   : > { %v2682_v11 = vpack.c.bf16 %v1966_v27, %v1965_v40  ;;  %v1968_v42 = vmax.f32 %v1904_v4, 0.0  ;;  %v1907_v54 = vadd.f32 %v4362_v36, %v1837_v32  ;;  %v1839_v46 = vmul.f32 %v4344_v0, %v1769_v49  ;;  %v1783_v49 = vld [vmem:[%s4337_s13 + $0x120] sm:$0xff] }
 0x338   : > { %v1969_v50 = vmax.f32 %v1905_v57, 0.0  ;;  %v1970_v13 = vmax.f32 %v1906_v48, 0.0  ;;  %v1908_v1 = vadd.f32 %v4362_v36, %v1838_v9  ;;  %v1840_v35 = vmul.f32 %v4344_v0, %v1770_v19  ;;  %v1784_v19 = vld [vmem:[%s4337_s13 + $0x128] sm:$0xff] }
 0x339   : > { %2810 = vst [vmem:[%s3138_s7 + $0x38] sm:$0xff] %v2682_v11   ;;  %v2687_v38 = vpack.c.bf16 %v1968_v42, %v1967_v44  ;;  %v1971_v18 = vmax.f32 %v1907_v54, 0.0  ;;  %v1909_v22 = vadd.f32 %v4362_v36, %v1839_v46  ;;  %v1841_v52 = vmul.f32 %v4344_v0, %v1771_v26  ;;  %v1785_v26 = vld [vmem:[%s4337_s13 + $0x130] sm:$0xff] }
 0x33a   : > { %v2692_v12 = vpack.c.bf16 %v1970_v13, %v1969_v50  ;;  %v1972_v60 = vmax.f32 %v1908_v1, 0.0  ;;  %v1910_v51 = vadd.f32 %v4362_v36, %v1840_v35  ;;  %v1842_v29 = vmul.f32 %v4344_v0, %v1772_v23  ;;  %v1786_v23 = vld [vmem:[%s4337_s13 + $0x138] sm:$0xff] }
 0x33b   : > { %2811 = vst [vmem:[%s3138_s7 + $0x40] sm:$0xff] %v2687_v38   ;;  %v1973_v37 = vmax.f32 %v1909_v22, 0.0  ;;  %v1911_v8 = vadd.f32 %v4362_v36, %v1841_v52  ;;  %v1843_v56 = vmul.f32 %v4344_v0, %v1773_v39  ;;  %v1844_v53 = vmul.f32 %v4344_v0, %v1774_v7  ;;  %v1787_v39 = vld [vmem:[%s4337_s13 + $0x140] sm:$0xff]  ;;  %v1788_v52 = vld [vmem:[%s4337_s13 + $0x148] sm:$0xff] }
 0x33c   : > { %2812 = vst [vmem:[%s3138_s7 + $0x48] sm:$0xff] %v2692_v12   ;;  %v2697_v17 = vpack.c.bf16 %v1972_v60, %v1971_v18  ;;  %v1974_v62 = vmax.f32 %v1910_v51, 0.0  ;;  %v1912_v21 = vadd.f32 %v4362_v36, %v1842_v29  ;;  %v1845_v31 = vmul.f32 %v4344_v0, %v1775_v34  ;;  %v1789_v29 = vld [vmem:[%s4337_s13 + $0x150] sm:$0xff] }
 0x33d   : > { %v1975_v2 = vmax.f32 %v1911_v8, 0.0  ;;  %v1913_v30 = vadd.f32 %v4362_v36, %v1843_v56  ;;  %v1914_v63 = vadd.f32 %v4362_v36, %v1844_v53  ;;  %v1846_v5 = vmul.f32 %v4344_v0, %v1776_v33  ;;  %v1790_v33 = vld [vmem:[%s4337_s13 + $0x158] sm:$0xff] }
 0x33e   : > { %2813 = vst [vmem:[%s3138_s7 + $0x50] sm:$0xff] %v2697_v17   ;;  %v2702_v24 = vpack.c.bf16 %v1974_v62, %v1973_v37  ;;  %v1976_v59 = vmax.f32 %v1912_v21, 0.0  ;;  %v1915_v10 = vadd.f32 %v4362_v36, %v1845_v31  ;;  %v1847_v41 = vmul.f32 %v4344_v0, %v1777_v58  ;;  %v1791_v58 = vld [vmem:[%s4337_s13 + $0x160] sm:$0xff] }
 0x33f   : > { %v1977_v43 = vmax.f32 %v1913_v30, 0.0  ;;  %v1978_v14 = vmax.f32 %v1914_v63, 0.0  ;;  %v1916_v45 = vadd.f32 %v4362_v36, %v1846_v5  ;;  %v1848_v47 = vmul.f32 %v4344_v0, %v1778_v25  ;;  %v1792_v25 = vld [vmem:[%s4337_s13 + $0x168] sm:$0xff] }
 0x340   : > { %2814 = vst [vmem:[%s3138_s7 + $0x58] sm:$0xff] %v2702_v24   ;;  %v2707_v55 = vpack.c.bf16 %v1976_v59, %v1975_v2  ;;  %v1979_v15 = vmax.f32 %v1915_v10, 0.0  ;;  %v1917_v3 = vadd.f32 %v4362_v36, %v1847_v41  ;;  %v1849_v28 = vmul.f32 %v4344_v0, %v1779_v6  ;;  %v1793_v6 = vld [vmem:[%s4337_s13 + $0x170] sm:$0xff] }
 0x341   : > { %v2712_v40 = vpack.c.bf16 %v1978_v14, %v1977_v43  ;;  %v1980_v27 = vmax.f32 %v1916_v45, 0.0  ;;  %v1918_v4 = vadd.f32 %v4362_v36, %v1848_v47  ;;  %v1850_v32 = vmul.f32 %v4344_v0, %v1780_v16  ;;  %v1794_v16 = vld [vmem:[%s4337_s13 + $0x178] sm:$0xff] }
 0x342   : > { %2815 = vst [vmem:[%s3138_s7 + $0x60] sm:$0xff] %v2707_v55   ;;  %v1981_v44 = vmax.f32 %v1917_v3, 0.0  ;;  %v1919_v57 = vadd.f32 %v4362_v36, %v1849_v28  ;;  %v1851_v48 = vmul.f32 %v4344_v0, %v1781_v61  ;;  %v1852_v9 = vmul.f32 %v4344_v0, %v1782_v20  ;;  %v1795_v61 = vld [vmem:[%s4337_s13 + $0x180] sm:$0xff]  ;;  %v1796_v28 = vld [vmem:[%s4337_s13 + $0x188] sm:$0xff] }
 0x343   : > { %2816 = vst [vmem:[%s3138_s7 + $0x68] sm:$0xff] %v2712_v40   ;;  %v2717_v11 = vpack.c.bf16 %v1980_v27, %v1979_v15  ;;  %v1982_v42 = vmax.f32 %v1918_v4, 0.0  ;;  %v1920_v54 = vadd.f32 %v4362_v36, %v1850_v32  ;;  %v1853_v46 = vmul.f32 %v4344_v0, %v1783_v49  ;;  %v1797_v32 = vld [vmem:[%s4337_s13 + $0x190] sm:$0xff] }
 0x344   : > { %v1983_v50 = vmax.f32 %v1919_v57, 0.0  ;;  %v1921_v13 = vadd.f32 %v4362_v36, %v1851_v48  ;;  %v1922_v1 = vadd.f32 %v4362_v36, %v1852_v9  ;;  %v1854_v35 = vmul.f32 %v4344_v0, %v1784_v19  ;;  %v1798_v19 = vld [vmem:[%s4337_s13 + $0x198] sm:$0xff] }
 0x345   : > { %2817 = vst [vmem:[%s3138_s7 + $0x70] sm:$0xff] %v2717_v11   ;;  %v2722_v7 = vpack.c.bf16 %v1982_v42, %v1981_v44  ;;  %v1984_v38 = vmax.f32 %v1920_v54, 0.0  ;;  %v1923_v18 = vadd.f32 %v4362_v36, %v1853_v46  ;;  %v1855_v22 = vmul.f32 %v4344_v0, %v1785_v26  ;;  %v1799_v26 = vld [vmem:[%s4337_s13 + $0x1a0] sm:$0xff] }
 0x346   : > { %v1985_v34 = vmax.f32 %v1921_v13, 0.0  ;;  %v1986_v12 = vmax.f32 %v1922_v1, 0.0  ;;  %v1924_v60 = vadd.f32 %v4362_v36, %v1854_v35  ;;  %v1856_v51 = vmul.f32 %v4344_v0, %v1786_v23  ;;  %v1800_v23 = vld [vmem:[%s4337_s13 + $0x1a8] sm:$0xff] }
 0x347   : > { %2818 = vst [vmem:[%s3138_s7 + $0x78] sm:$0xff] %v2722_v7   ;;  %v2727_v37 = vpack.c.bf16 %v1984_v38, %v1983_v50  ;;  %v1987_v8 = vmax.f32 %v1923_v18, 0.0  ;;  %v1925_v56 = vadd.f32 %v4362_v36, %v1855_v22  ;;  %v1857_v53 = vmul.f32 %v4344_v0, %v1787_v39  ;;  %v1801_v39 = vld [vmem:[%s4337_s13 + $0x1b0] sm:$0xff] }
 0x348   : > { %v2732_v17 = vpack.c.bf16 %v1986_v12, %v1985_v34  ;;  %v1988_v62 = vmax.f32 %v1924_v60, 0.0  ;;  %v1926_v21 = vadd.f32 %v4362_v36, %v1856_v51  ;;  %v1858_v31 = vmul.f32 %v4344_v0, %v1788_v52  ;;  %v1802_v52 = vld [vmem:[%s4337_s13 + $0x1b8] sm:$0xff] }
 0x349   : > { %2819 = vst [vmem:[%s3138_s7 + $0x80] sm:$0xff] %v2727_v37   ;;  %v1989_v2 = vmax.f32 %v1925_v56, 0.0  ;;  %v1927_v30 = vadd.f32 %v4362_v36, %v1857_v53  ;;  %v1859_v63 = vmul.f32 %v4344_v0, %v1789_v29  ;;  %v1860_v5 = vmul.f32 %v4344_v0, %v1790_v33  ;;  %v1803_v29 = vld [vmem:[%s4337_s13 + $0x1c0] sm:$0xff]  ;;  %v1804_v53 = vld [vmem:[%s4337_s13 + $0x1c8] sm:$0xff] }
 0x34a   : > { %2820 = vst [vmem:[%s3138_s7 + $0x88] sm:$0xff] %v2732_v17   ;;  %v2737_v24 = vpack.c.bf16 %v1988_v62, %v1987_v8  ;;  %v1990_v59 = vmax.f32 %v1926_v21, 0.0  ;;  %v1928_v10 = vadd.f32 %v4362_v36, %v1858_v31  ;;  %v1861_v41 = vmul.f32 %v4344_v0, %v1791_v58  ;;  %v1805_v31 = vld [vmem:[%s4337_s13 + $0x1d0] sm:$0xff] }
 0x34b   : > { %v1991_v43 = vmax.f32 %v1927_v30, 0.0  ;;  %v1929_v14 = vadd.f32 %v4362_v36, %v1859_v63  ;;  %v1930_v45 = vadd.f32 %v4362_v36, %v1860_v5  ;;  %v1862_v47 = vmul.f32 %v4344_v0, %v1792_v25  ;;  %v1806_v25 = vld [vmem:[%s4337_s13 + $0x1d8] sm:$0xff] }
 0x34c   : > { %2821 = vst [vmem:[%s3138_s7 + $0x90] sm:$0xff] %v2737_v24   ;;  %v2742_v20 = vpack.c.bf16 %v1990_v59, %v1989_v2  ;;  %v1992_v55 = vmax.f32 %v1928_v10, 0.0  ;;  %v1931_v15 = vadd.f32 %v4362_v36, %v1861_v41  ;;  %v1863_v3 = vmul.f32 %v4344_v0, %v1793_v6  ;;  %v1807_v6 = vld [vmem:[%s4337_s13 + $0x1e0] sm:$0xff] }
 0x34d   : > { %v1993_v49 = vmax.f32 %v1929_v14, 0.0  ;;  %v1994_v40 = vmax.f32 %v1930_v45, 0.0  ;;  %v1932_v27 = vadd.f32 %v4362_v36, %v1862_v47  ;;  %v1864_v4 = vmul.f32 %v4344_v0, %v1794_v16  ;;  %v1808_v16 = vld [vmem:[%s4337_s13 + $0x1e8] sm:$0xff] }
 0x34e   : > { %2822 = vst [vmem:[%s3138_s7 + $0x98] sm:$0xff] %v2742_v20   ;;  %v2747_v44 = vpack.c.bf16 %v1992_v55, %v1991_v43  ;;  %v1995_v57 = vmax.f32 %v1931_v15, 0.0  ;;  %v1933_v48 = vadd.f32 %v4362_v36, %v1863_v3  ;;  %v1865_v9 = vmul.f32 %v4344_v0, %v1795_v61  ;;  %v1809_v61 = vld [vmem:[%s4337_s13 + $0x1f0] sm:$0xff] }
 0x34f   : > { %v2752_v11 = vpack.c.bf16 %v1994_v40, %v1993_v49  ;;  %v1996_v42 = vmax.f32 %v1932_v27, 0.0  ;;  %v1934_v54 = vadd.f32 %v4362_v36, %v1864_v4  ;;  %v1866_v46 = vmul.f32 %v4344_v0, %v1796_v28  ;;  %v1810_v28 = vld [vmem:[%s4337_s13 + $0x1f8] sm:$0xff] }
 0x350   : > { %2823 = vst [vmem:[%s3138_s7 + $0xa0] sm:$0xff] %v2747_v44   ;;  %v1997_v50 = vmax.f32 %v1933_v48, 0.0  ;;  %v1935_v13 = vadd.f32 %v4362_v36, %v1865_v9  ;;  %v1867_v1 = vmul.f32 %v4344_v0, %v1797_v32  ;;  %v1868_v35 = vmul.f32 %v4344_v0, %v1798_v19 }
 0x351   : > { %2824 = vst [vmem:[%s3138_s7 + $0xa8] sm:$0xff] %v2752_v11   ;;  %v2757_v7 = vpack.c.bf16 %v1996_v42, %v1995_v57  ;;  %v1998_v38 = vmax.f32 %v1934_v54, 0.0  ;;  %v1936_v18 = vadd.f32 %v4362_v36, %v1866_v46  ;;  %v1869_v22 = vmul.f32 %v4344_v0, %v1799_v26 }
 0x352   : > { %v1999_v34 = vmax.f32 %v1935_v13, 0.0  ;;  %v1937_v12 = vadd.f32 %v4362_v36, %v1867_v1  ;;  %v1938_v60 = vadd.f32 %v4362_v36, %v1868_v35  ;;  %v1870_v51 = vmul.f32 %v4344_v0, %v1800_v23 }
 0x353   : > { %2825 = vst [vmem:[%s3138_s7 + $0xb0] sm:$0xff] %v2757_v7   ;;  %v2762_v33 = vpack.c.bf16 %v1998_v38, %v1997_v50  ;;  %v2000_v37 = vmax.f32 %v1936_v18, 0.0  ;;  %v1939_v8 = vadd.f32 %v4362_v36, %v1869_v22  ;;  %v1871_v56 = vmul.f32 %v4344_v0, %v1801_v39 }
 0x354   : > { %v2001_v58 = vmax.f32 %v1937_v12, 0.0  ;;  %v2002_v17 = vmax.f32 %v1938_v60, 0.0  ;;  %v1940_v62 = vadd.f32 %v4362_v36, %v1870_v51  ;;  %v1872_v21 = vmul.f32 %v4344_v0, %v1802_v52 }
 0x355   : > { %2826 = vst [vmem:[%s3138_s7 + $0xb8] sm:$0xff] %v2762_v33   ;;  %v2767_v2 = vpack.c.bf16 %v2000_v37, %v1999_v34  ;;  %v2003_v30 = vmax.f32 %v1939_v8, 0.0  ;;  %v1941_v63 = vadd.f32 %v4362_v36, %v1871_v56  ;;  %v1873_v5 = vmul.f32 %v4344_v0, %v1803_v29 }
 0x356   : > { %v2772_v24 = vpack.c.bf16 %v2002_v17, %v2001_v58  ;;  %v2004_v59 = vmax.f32 %v1940_v62, 0.0  ;;  %v1942_v10 = vadd.f32 %v4362_v36, %v1872_v21  ;;  %v1874_v41 = vmul.f32 %v4344_v0, %v1804_v53 }
 0x357   : > { %2827 = vst [vmem:[%s3138_s7 + $0xc0] sm:$0xff] %v2767_v2   ;;  %v2005_v43 = vmax.f32 %v1941_v63, 0.0  ;;  %v1943_v14 = vadd.f32 %v4362_v36, %v1873_v5  ;;  %v1875_v45 = vmul.f32 %v4344_v0, %v1805_v31  ;;  %v1876_v47 = vmul.f32 %v4344_v0, %v1806_v25 }
 0x358   : > { %2828 = vst [vmem:[%s3138_s7 + $0xc8] sm:$0xff] %v2772_v24   ;;  %v2777_v20 = vpack.c.bf16 %v2004_v59, %v2003_v30  ;;  %v2006_v55 = vmax.f32 %v1942_v10, 0.0  ;;  %v1944_v15 = vadd.f32 %v4362_v36, %v1874_v41  ;;  %v1877_v3 = vmul.f32 %v4344_v0, %v1807_v6 }
 0x359   : > { %v2007_v49 = vmax.f32 %v1943_v14, 0.0  ;;  %v1945_v40 = vadd.f32 %v4362_v36, %v1875_v45  ;;  %v1946_v27 = vadd.f32 %v4362_v36, %v1876_v47  ;;  %v1878_v4 = vmul.f32 %v4344_v0, %v1808_v16 }
 0x35a   : > { %2829 = vst [vmem:[%s3138_s7 + $0xd0] sm:$0xff] %v2777_v20   ;;  %v2782_v32 = vpack.c.bf16 %v2006_v55, %v2005_v43  ;;  %v2008_v19 = vmax.f32 %v1944_v15, 0.0  ;;  %v1947_v44 = vadd.f32 %v4362_v36, %v1877_v3  ;;  %v1879_v57 = vmul.f32 %v4344_v0, %v1809_v61 }
 0x35b   : > { %v2009_v48 = vmax.f32 %v1945_v40, 0.0  ;;  %v2010_v9 = vmax.f32 %v1946_v27, 0.0  ;;  %v1948_v26 = vadd.f32 %v4362_v36, %v1878_v4  ;;  %v1880_v11 = vmul.f32 %v4344_v0, %v1810_v28 }
 0x35c   : > { %2830 = vst [vmem:[%s3138_s7 + $0xd8] sm:$0xff] %v2782_v32   ;;  %v2787_v42 = vpack.c.bf16 %v2008_v19, %v2007_v49  ;;  %v2011_v54 = vmax.f32 %v1947_v44, 0.0  ;;  %v1949_v46 = vadd.f32 %v4362_v36, %v1879_v57 }
 0x35d   : > { %v2792_v23 = vpack.c.bf16 %v2010_v9, %v2009_v48  ;;  %v2012_v50 = vmax.f32 %v1948_v26, 0.0  ;;  %v1950_v13 = vadd.f32 %v4362_v36, %v1880_v11 }
 0x35e   : > { %2831 = vst [vmem:[%s3138_s7 + $0xe0] sm:$0xff] %v2787_v42   ;;  %v2013_v1 = vmax.f32 %v1949_v46, 0.0 }
 0x35f   : > { %2832 = vst [vmem:[%s3138_s7 + $0xe8] sm:$0xff] %v2792_v23   ;;  %v2797_v35 = vpack.c.bf16 %v2012_v50, %v2011_v54  ;;  %v2014_v39 = vmax.f32 %v1950_v13, 0.0 }
 0x361   : > { %2833 = vst [vmem:[%s3138_s7 + $0xf0] sm:$0xff] %v2797_v35   ;;  %v2802_v7 = vpack.c.bf16 %v2014_v39, %v2013_v1 }
 0x363   : > { %2834 = vst [vmem:[%s3138_s7 + $0xf8] sm:$0xff] %v2802_v7  }
 0x364 PF: > { %s14_s19 = sadd.s32 1, %s3062_s19   ;;  %s4688_s15 = smov %s3054_s17 }
 0x365   : > { %p11_p0 = scmp.ge.s32.totalorder %s14_s19, 8   ;;  %s4689_s16 = smov %s3058_s18 }
 0x366   : > { %s4690_s17 = smov %s4693_s20  ;;  %s4691_s18 = smov %s4697_s21 }
 0x367   :  { %13 = sbr.rel (!%p11_p0) target bundleno = 3 (0x3), region = 89 }

// kernel: forward.5
= control target key start
LH: loop header
LB: loop body
LE: loop exit
PB: predicated region body
PF: predicated region fallthrough
CT: control target
= control target key end

     0   :  { %s2114_s15 = smov 0   ;;  %s2116_s16 = smov 0   ;;  %s2488_s0 = inlined_call_operand.vmem [shape: bf16[176,512], index: 0, kind: input, shape index: {}]   ;;  %s2489_s1 = inlined_call_operand.vmem [shape: bf16[512,128], index: 1, kind: input, shape index: {}]   ;;  %s2490_s2 = inlined_call_operand.vmem [shape: f32[1,128], index: 2, kind: input, shape index: {}]   ;;  %s2491_s3 = inlined_call_operand.vmem [shape: f32[1,128], index: 3, kind: input, shape index: {}]   ;;  %s2492_s4 = inlined_call_operand.vmem [shape: bf16[176,128], index: 4, kind: output, shape index: {}]  }
   0x1   :  { %s2118_s17 = smov 0  }
   0x2 LB: > { %s26_s18 = sadd.s32 1, %s2081_s16  ;;  %p1580_p0 = scmp.ge.s32.totalorder %s2085_s17, 1  ;;  %s2085_s17 = sphi %s2118_s17, %s14_s17   ;;  %s2081_s16 = sphi %s2116_s16, %s2494_s16   ;;  %s2077_s15 = sphi %s2114_s15, %s2493_s15  }
   0x3   : > { %p28_p1 = scmp.ge.s32.totalorder %s26_s18, 3  ;;  %p188_p2 = scmp.lt.s32.totalorder %s2085_s17, 4 }
   0x5   : > { %s2496_s18 = smov (%p28_p1, %s26_s18), 0  ;;  %p189_p3 = pnand %p1580_p0, %p188_p2 }
   0x6   : > { %p1581_p4 = scmp.ne.s32.totalorder (!%p189_p3), %s2077_s15, 0 }
   0x7   : > { %192 = sbr.rel (%p189_p3) target bundleno = 486 (0x1e6), region = 36 }
   0xe   : > { %244 = sbr.rel (%p1581_p4) target bundleno = 365 (0x16d), region = 40  ;;  %v1963_v0 = vld [vmem:[%s2489_s1 + $0x40] sm:$0xff] (!%p1581_p4)   ;;  %v1967_v4 = vld [vmem:[%s2489_s1 + $0x48] sm:$0xff] (!%p1581_p4)   ;;  %v1971_v8 = vld [vmem:[%s2489_s1 + $0x50] sm:$0xff] (!%p1581_p4)  }
   0xf   : > { %v1964_v1 = vld [vmem:[%s2489_s1 + $0xc0] sm:$0xff] (!%p1581_p4)   ;;  %1773 = vmatprep.subr.bf16.mxu0 (!%p1581_p4), %v1963_v0  ;;  %v1968_v5 = vld [vmem:[%s2489_s1 + $0xc8] sm:$0xff] (!%p1581_p4)   ;;  %v1972_v9 = vld [vmem:[%s2489_s1 + $0xd0] sm:$0xff] (!%p1581_p4)  }
  0x10   : > { %v1965_v2 = vld [vmem:[%s2489_s1] sm:$0xff] (!%p1581_p4)   ;;  %1855 = vmatprep.subr.bf16.mxu1 (!%p1581_p4), %v1964_v1  ;;  %v1969_v6 = vld [vmem:[%s2489_s1 + $0x8] sm:$0xff] (!%p1581_p4)   ;;  %v1973_v10 = vld [vmem:[%s2489_s1 + $0x10] sm:$0xff] (!%p1581_p4)  }
  0x11   : > { %v1966_v3 = vld [vmem:[%s2489_s1 + $0x80] sm:$0xff] (!%p1581_p4)   ;;  %1774 = vmatpush3.bf16.msra.mxu0 (!%p1581_p4), %v1965_v2  ;;  %v1970_v7 = vld [vmem:[%s2489_s1 + $0x88] sm:$0xff] (!%p1581_p4)   ;;  %v1974_v11 = vld [vmem:[%s2489_s1 + $0x90] sm:$0xff] (!%p1581_p4)  }
  0x12   : > { %1856 = vmatpush3.bf16.msra.mxu1 (!%p1581_p4), %v1966_v3  ;;  %1775 = vmatprep.subr.bf16.mxu0 (!%p1581_p4), %v1967_v4  ;;  %v1975_v12 = vld [vmem:[%s2489_s1 + $0x58] sm:$0xff] (!%p1581_p4)   ;;  %v1979_v16 = vld [vmem:[%s2489_s1 + $0x60] sm:$0xff] (!%p1581_p4)   ;;  %v1983_v20 = vld [vmem:[%s2489_s1 + $0x68] sm:$0xff] (!%p1581_p4)  }
  0x13   : > { %1857 = vmatprep.subr.bf16.mxu1 (!%p1581_p4), %v1968_v5  ;;  %v1976_v13 = vld [vmem:[%s2489_s1 + $0xd8] sm:$0xff] (!%p1581_p4)   ;;  %v1980_v17 = vld [vmem:[%s2489_s1 + $0xe0] sm:$0xff] (!%p1581_p4)   ;;  %v1984_v21 = vld [vmem:[%s2489_s1 + $0xe8] sm:$0xff] (!%p1581_p4)  }
  0x14   : > { %v1977_v14 = vld [vmem:[%s2489_s1 + $0x18] sm:$0xff] (!%p1581_p4)   ;;  %v1981_v18 = vld [vmem:[%s2489_s1 + $0x20] sm:$0xff] (!%p1581_p4)   ;;  %v1985_v22 = vld [vmem:[%s2489_s1 + $0x28] sm:$0xff] (!%p1581_p4)  }
  0x15   : > { %1776 = vmatpush3.bf16.msra.mxu0 %v1969_v6  ;;  %v1978_v15 = vld [vmem:[%s2489_s1 + $0x98] sm:$0xff]   ;;  %v1982_v19 = vld [vmem:[%s2489_s1 + $0xa0] sm:$0xff]   ;;  %v1986_v23 = vld [vmem:[%s2489_s1 + $0xa8] sm:$0xff]  }
  0x16   : > { %1858 = vmatpush3.bf16.msra.mxu1 %v1970_v7  ;;  %1777 = vmatprep.subr.bf16.mxu0 %v1971_v8  ;;  %v1987_v24 = vld [vmem:[%s2489_s1 + $0x70] sm:$0xff]   ;;  %v1991_v28 = vld [vmem:[%s2489_s1 + $0x78] sm:$0xff]  }
  0x17   : > { %1859 = vmatprep.subr.bf16.mxu1 %v1972_v9  ;;  %v1988_v25 = vld [vmem:[%s2489_s1 + $0xf0] sm:$0xff]   ;;  %v1992_v29 = vld [vmem:[%s2489_s1 + $0xf8] sm:$0xff]  }
  0x18   : > { %v1989_v26 = vld [vmem:[%s2489_s1 + $0x30] sm:$0xff]   ;;  %v1993_v30 = vld [vmem:[%s2489_s1 + $0x38] sm:$0xff]  }
  0x19   : > { %1778 = vmatpush3.bf16.msra.mxu0 %v1973_v10  ;;  %v1990_v27 = vld [vmem:[%s2489_s1 + $0xb0] sm:$0xff]   ;;  %v1994_v31 = vld [vmem:[%s2489_s1 + $0xb8] sm:$0xff]  }
  0x1a   : > { %1860 = vmatpush3.bf16.msra.mxu1 %v1974_v11  ;;  %1779 = vmatprep.subr.bf16.mxu0 %v1975_v12  ;;  %v1995_v32 = vld [vmem:[%s2488_s0] ss:$16 sps:$4 sm:$0xff]   ;;  %v1997_v33 = vld [vmem:[%s2488_s0 + $0x4] ss:$16 sps:$4 sm:$0xff]   ;;  %v1998_v34 = vld [vmem:[%s2488_s0 + $0x8] ss:$16 sps:$4 sm:$0xff]  }
  0x1b   : > { %1861 = vmatprep.subr.bf16.mxu1 %v1976_v13  ;;  %v2000_v35 = vld [vmem:[%s2488_s0 + $0xc] ss:$16 sps:$4 sm:$0xff]   ;;  %797 = vmatprep.mubr.bf16.mxu0 %v1997_v33  ;;  %v2001_v36 = vld [vmem:[%s2488_s0 + $0x24] ss:$16 sps:$4 sm:$0xff]   ;;  %v2005_v38 = vld [vmem:[%s2488_s0 + $0x20] ss:$16 sps:$4 sm:$0xff]  }
  0x1c   : > { %918 = vmatprep.mubr.bf16.mxu1 %v2000_v35  ;;  %v2003_v37 = vld [vmem:[%s2488_s0 + $0x2c] ss:$16 sps:$4 sm:$0xff]   ;;  %v2006_v39 = vld [vmem:[%s2488_s0 + $0x28] ss:$16 sps:$4 sm:$0xff]   ;;  %v2007_v40 = vld [vmem:[%s2488_s0 + $0x44] ss:$16 sps:$4 sm:$0xff]  }
  0x1d   : > { %1780 = vmatpush3.bf16.msra.mxu0 %v1977_v14  ;;  %v2009_v41 = vld [vmem:[%s2488_s0 + $0x4c] ss:$16 sps:$4 sm:$0xff]   ;;  %v2011_v42 = vld [vmem:[%s2488_s0 + $0x40] ss:$16 sps:$4 sm:$0xff]   ;;  %v2012_v43 = vld [vmem:[%s2488_s0 + $0x48] ss:$16 sps:$4 sm:$0xff]  }
  0x1e   : > { %1862 = vmatpush3.bf16.msra.mxu1 %v1978_v15  ;;  %1781 = vmatprep.subr.bf16.mxu0 %v1979_v16  ;;  %v2013_v44 = vld [vmem:[%s2488_s0 + $0x64] ss:$16 sps:$4 sm:$0xff]   ;;  %v2015_v45 = vld [vmem:[%s2488_s0 + $0x6c] ss:$16 sps:$4 sm:$0xff]   ;;  %v2017_v46 = vld [vmem:[%s2488_s0 + $0x60] ss:$16 sps:$4 sm:$0xff]  }
  0x1f   : > { %1863 = vmatprep.subr.bf16.mxu1 %v1980_v17  ;;  %v2018_v47 = vld [vmem:[%s2488_s0 + $0x68] ss:$16 sps:$4 sm:$0xff]   ;;  %v2019_v48 = vld [vmem:[%s2488_s0 + $0x84] ss:$16 sps:$4 sm:$0xff]   ;;  %v2021_v49 = vld [vmem:[%s2488_s0 + $0x8c] ss:$16 sps:$4 sm:$0xff]  }
  0x20   : > { %v2023_v50 = vld [vmem:[%s2488_s0 + $0x80] ss:$16 sps:$4 sm:$0xff]   ;;  %v2024_v51 = vld [vmem:[%s2488_s0 + $0x88] ss:$16 sps:$4 sm:$0xff]   ;;  %v2025_v52 = vld [vmem:[%s2488_s0 + $0xa4] ss:$16 sps:$4 sm:$0xff]  }
  0x21   : > { %1782 = vmatpush3.bf16.msra.mxu0 %v1981_v18  ;;  %v2027_v53 = vld [vmem:[%s2488_s0 + $0xac] ss:$16 sps:$4 sm:$0xff]   ;;  %v2029_v54 = vld [vmem:[%s2488_s0 + $0xa0] ss:$16 sps:$4 sm:$0xff]   ;;  %v2030_v55 = vld [vmem:[%s2488_s0 + $0xa8] ss:$16 sps:$4 sm:$0xff]  }
  0x22   : > { %1864 = vmatpush3.bf16.msra.mxu1 %v1982_v19  ;;  %1783 = vmatprep.subr.bf16.mxu0 %v1983_v20  ;;  %v2031_v56 = vld [vmem:[%s2488_s0 + $0xc4] ss:$16 sps:$4 sm:$0xff]   ;;  %v2033_v57 = vld [vmem:[%s2488_s0 + $0xcc] ss:$16 sps:$4 sm:$0xff]   ;;  %v2035_v58 = vld [vmem:[%s2488_s0 + $0xc0] ss:$16 sps:$4 sm:$0xff]  }
  0x23   : > { %1865 = vmatprep.subr.bf16.mxu1 %v1984_v21  ;;  %v2036_v59 = vld [vmem:[%s2488_s0 + $0xc8] ss:$16 sps:$4 sm:$0xff]   ;;  %v2037_v60 = vld [vmem:[%s2488_s0 + $0xe4] ss:$16 sps:$4 sm:$0xff]   ;;  %v2039_v61 = vld [vmem:[%s2488_s0 + $0xec] ss:$16 sps:$4 sm:$0xff]  }
  0x24   : > { %v2041_v62 = vld [vmem:[%s2488_s0 + $0xe0] ss:$16 sps:$4 sm:$0xff]   ;;  %v2042_v63 = vld [vmem:[%s2488_s0 + $0xe8] ss:$16 sps:$4 sm:$0xff]   ;;  %v2043_v0 = vld [vmem:[%s2488_s0 + $0x104] ss:$16 sps:$4 sm:$0xff]  }
  0x25   : > { %1784 = vmatpush3.bf16.msra.mxu0 %v1985_v22  ;;  %v2045_v1 = vld [vmem:[%s2488_s0 + $0x10c] ss:$16 sps:$4 sm:$0xff]   ;;  %v2047_v2 = vld [vmem:[%s2488_s0 + $0x100] ss:$16 sps:$4 sm:$0xff]   ;;  %v2048_v3 = vld [vmem:[%s2488_s0 + $0x108] ss:$16 sps:$4 sm:$0xff]  }
  0x26   : > { %1866 = vmatpush3.bf16.msra.mxu1 %v1986_v23  ;;  %1785 = vmatprep.subr.bf16.mxu0 %v1987_v24  ;;  %v2049_v4 = vld [vmem:[%s2488_s0 + $0x124] ss:$16 sps:$4 sm:$0xff]   ;;  %v2051_v5 = vld [vmem:[%s2488_s0 + $0x12c] ss:$16 sps:$4 sm:$0xff]   ;;  %v2053_v6 = vld [vmem:[%s2488_s0 + $0x120] ss:$16 sps:$4 sm:$0xff]  }
  0x27   : > { %1867 = vmatprep.subr.bf16.mxu1 %v1988_v25  ;;  %v2054_v7 = vld [vmem:[%s2488_s0 + $0x128] ss:$16 sps:$4 sm:$0xff]   ;;  %v2055_v8 = vld [vmem:[%s2488_s0 + $0x144] ss:$16 sps:$4 sm:$0xff]   ;;  %v2057_v9 = vld [vmem:[%s2488_s0 + $0x14c] ss:$16 sps:$4 sm:$0xff]  }
  0x28   : > { %v2059_v10 = vld [vmem:[%s2488_s0 + $0x140] ss:$16 sps:$4 sm:$0xff]   ;;  %v2060_v11 = vld [vmem:[%s2488_s0 + $0x148] ss:$16 sps:$4 sm:$0xff]   ;;  %v2087_v12 = vmov 0.0  }
  0x29   : > { %1786 = vmatpush3.bf16.msra.mxu0 %v1989_v26  ;;  %1035 = vst [vmem:[#allocation3] sm:$0x1] %v2087_v12 }
  0x2a   : > { %1868 = vmatpush3.bf16.msra.mxu1 %v1990_v27  ;;  %1787 = vmatprep.subr.bf16.mxu0 %v1991_v28 }
  0x2b   : > { %1869 = vmatprep.subr.bf16.mxu1 %v1992_v29 }
  0x2d   : > { %1788 = vmatpush3.bf16.msra.mxu0 %v1993_v30 }
  0x2e   : > { %1870 = vmatpush3.bf16.msra.mxu1 %v1994_v31 }
  0x30   : > { %798 = vmatmul.mubr.bf16.vlgmr.msra.gmra.mrb[0].mxu0 %v1995_v32 }
  0x31   : > { %919 = vmatmul.mubr.bf16.vlgmr.msra.gmra.mrb[0].mxu1 %v1998_v34  ;;  %805 = vmatprep.mubr.bf16.mxu0 %v2001_v36 }
  0x32   : > { %926 = vmatprep.mubr.bf16.mxu1 %v2003_v37 }
  0x38   : > { %806 = vmatmul.mubr.bf16.gmra.mrb[4].mxu0 %v2005_v38 }
  0x39   : > { %927 = vmatmul.mubr.bf16.gmra.mrb[4].mxu1 %v2006_v39  ;;  %813 = vmatprep.mubr.bf16.mxu0 %v2007_v40 }
  0x3a   : > { %934 = vmatprep.mubr.bf16.mxu1 %v2009_v41 }
  0x40   : > { %814 = vmatmul.mubr.bf16.gmra.mrb[8].mxu0 %v2011_v42 }
  0x41   : > { %935 = vmatmul.mubr.bf16.gmra.mrb[8].mxu1 %v2012_v43  ;;  %821 = vmatprep.mubr.bf16.mxu0 %v2013_v44 }
  0x42   : > { %942 = vmatprep.mubr.bf16.mxu1 %v2015_v45 }
  0x48   : > { %822 = vmatmul.mubr.bf16.gmra.mrb[12].mxu0 %v2017_v46 }
  0x49   : > { %943 = vmatmul.mubr.bf16.gmra.mrb[12].mxu1 %v2018_v47  ;;  %829 = vmatprep.mubr.bf16.mxu0 %v2019_v48 }
  0x4a   : > { %950 = vmatprep.mubr.bf16.mxu1 %v2021_v49 }
  0x50   : > { %830 = vmatmul.mubr.bf16.gmra.mrb[16].mxu0 %v2023_v50 }
  0x51   : > { %951 = vmatmul.mubr.bf16.gmra.mrb[16].mxu1 %v2024_v51  ;;  %837 = vmatprep.mubr.bf16.mxu0 %v2025_v52 }
  0x52   : > { %958 = vmatprep.mubr.bf16.mxu1 %v2027_v53 }
  0x58   : > { %838 = vmatmul.mubr.bf16.gmra.mrb[20].mxu0 %v2029_v54 }
  0x59   : > { %959 = vmatmul.mubr.bf16.gmra.mrb[20].mxu1 %v2030_v55  ;;  %845 = vmatprep.mubr.bf16.mxu0 %v2031_v56 }
  0x5a   : > { %966 = vmatprep.mubr.bf16.mxu1 %v2033_v57 }
  0x60   : > { %846 = vmatmul.mubr.bf16.gmra.mrb[24].mxu0 %v2035_v58 }
  0x61   : > { %967 = vmatmul.mubr.bf16.gmra.mrb[24].mxu1 %v2036_v59  ;;  %853 = vmatprep.mubr.bf16.mxu0 %v2037_v60 }
  0x62   : > { %974 = vmatprep.mubr.bf16.mxu1 %v2039_v61 }
  0x68   : > { %854 = vmatmul.mubr.bf16.gmra.mrb[28].mxu0 %v2041_v62 }
  0x69   : > { %975 = vmatmul.mubr.bf16.gmra.mrb[28].mxu1 %v2042_v63  ;;  %861 = vmatprep.mubr.bf16.mxu0 %v2043_v0 }
  0x6a   : > { %982 = vmatprep.mubr.bf16.mxu1 %v2045_v1 }
  0x70   : > { %862 = vmatmul.mubr.bf16.gmra.mrb[32].mxu0 %v2047_v2 }
  0x71   : > { %983 = vmatmul.mubr.bf16.gmra.mrb[32].mxu1 %v2048_v3  ;;  %869 = vmatprep.mubr.bf16.mxu0 %v2049_v4 }
  0x72   : > { %990 = vmatprep.mubr.bf16.mxu1 %v2051_v5 }
  0x78   : > { %870 = vmatmul.mubr.bf16.gmra.mrb[36].mxu0 %v2053_v6 }
  0x79   : > { %991 = vmatmul.mubr.bf16.gmra.mrb[36].mxu1 %v2054_v7  ;;  %877 = vmatprep.mubr.bf16.mxu0 %v2055_v8 }
  0x7a   : > { %998 = vmatprep.mubr.bf16.mxu1 %v2057_v9 }
  0x80   : > { %878 = vmatmul.mubr.bf16.gmra.mrb[40].mxu0 %v2059_v10 }
  0x81   : > { %999 = vmatmul.mubr.bf16.gmra.mrb[40].mxu1 %v2060_v11 }
 0x103   : > { %v1789_v13 = vpop.f32.mrb[0].mxu0 }
 0x104   : > { %v1871_v14 = vpop.f32.mrb[0].mxu1  ;;  %v1790_v15 = vpop.f32.mrb[1].mxu0 }
 0x105   : > { %v1791_v16 = vadd.f32 %v1790_v15, %v1789_v13  ;;  %v1872_v17 = vpop.f32.mrb[1].mxu1  ;;  %v1792_v18 = vpop.f32.mrb[2].mxu0 }
 0x106   : > { %v1873_v19 = vadd.f32 %v1872_v17, %v1871_v14  ;;  %v1874_v20 = vpop.f32.mrb[2].mxu1  ;;  %v1793_v21 = vpop.f32.mrb[3].mxu0 }
 0x107   : > { %v1794_v22 = vadd.f32 %v1793_v21, %v1792_v18  ;;  %v1875_v23 = vpop.f32.mrb[3].mxu1 }
 0x108   : > { %v921_v24 = vadd.f32 %v1873_v19, %v1791_v16  ;;  %v1876_v25 = vadd.f32 %v1875_v23, %v1874_v20 }
 0x10a   : > { %1009 = vst [vmem:[#allocation2] sm:$0xff] %v921_v24  ;;  %v924_v26 = vadd.f32 %v1876_v25, %v1794_v22 }
 0x10b   : > { %v1795_v27 = vpop.f32.mrb[4].mxu0 }
 0x10c   : > { %1010 = vst [vmem:[#allocation2 + $0x8] sm:$0xff] %v924_v26  ;;  %v1037_v28 = vadd.f32 %v924_v26, %v921_v24  ;;  %v1877_v29 = vpop.f32.mrb[4].mxu1  ;;  %v1796_v30 = vpop.f32.mrb[5].mxu0 }
 0x10d   : > { %v1797_v31 = vadd.f32 %v1796_v30, %v1795_v27  ;;  %v1878_v32 = vpop.f32.mrb[5].mxu1  ;;  %v1798_v33 = vpop.f32.mrb[6].mxu0 }
 0x10e   : > { %v1879_v34 = vadd.f32 %v1878_v32, %v1877_v29  ;;  %v1880_v35 = vpop.f32.mrb[6].mxu1  ;;  %v1799_v36 = vpop.f32.mrb[7].mxu0 }
 0x10f   : > { %v1800_v37 = vadd.f32 %v1799_v36, %v1798_v33  ;;  %v1881_v38 = vpop.f32.mrb[7].mxu1 }
 0x110   : > { %v929_v39 = vadd.f32 %v1879_v34, %v1797_v31  ;;  %v1882_v40 = vadd.f32 %v1881_v38, %v1880_v35 }
 0x112   : > { %1011 = vst [vmem:[#allocation2 + $0x10] sm:$0xff] %v929_v39  ;;  %v1038_v41 = vadd.f32 %v1037_v28, %v929_v39  ;;  %v932_v42 = vadd.f32 %v1882_v40, %v1800_v37 }
 0x113   : > { %v1801_v43 = vpop.f32.mrb[8].mxu0 }
 0x114   : > { %1012 = vst [vmem:[#allocation2 + $0x18] sm:$0xff] %v932_v42  ;;  %v1039_v44 = vadd.f32 %v1038_v41, %v932_v42  ;;  %v1883_v45 = vpop.f32.mrb[8].mxu1  ;;  %v1802_v46 = vpop.f32.mrb[9].mxu0 }
 0x115   : > { %v1803_v47 = vadd.f32 %v1802_v46, %v1801_v43  ;;  %v1884_v48 = vpop.f32.mrb[9].mxu1  ;;  %v1804_v49 = vpop.f32.mrb[10].mxu0 }
 0x116   : > { %v1885_v50 = vadd.f32 %v1884_v48, %v1883_v45  ;;  %v1886_v51 = vpop.f32.mrb[10].mxu1  ;;  %v1805_v52 = vpop.f32.mrb[11].mxu0 }
 0x117   : > { %v1806_v53 = vadd.f32 %v1805_v52, %v1804_v49  ;;  %v1887_v54 = vpop.f32.mrb[11].mxu1 }
 0x118   : > { %v937_v55 = vadd.f32 %v1885_v50, %v1803_v47  ;;  %v1888_v56 = vadd.f32 %v1887_v54, %v1886_v51 }
 0x11a   : > { %1013 = vst [vmem:[#allocation2 + $0x20] sm:$0xff] %v937_v55  ;;  %v1040_v57 = vadd.f32 %v1039_v44, %v937_v55  ;;  %v940_v58 = vadd.f32 %v1888_v56, %v1806_v53 }
 0x11b   : > { %v1807_v59 = vpop.f32.mrb[12].mxu0 }
 0x11c   : > { %1014 = vst [vmem:[#allocation2 + $0x28] sm:$0xff] %v940_v58  ;;  %v1041_v60 = vadd.f32 %v1040_v57, %v940_v58  ;;  %v1889_v61 = vpop.f32.mrb[12].mxu1  ;;  %v1808_v62 = vpop.f32.mrb[13].mxu0 }
 0x11d   : > { %v1809_v63 = vadd.f32 %v1808_v62, %v1807_v59  ;;  %v1890_v0 = vpop.f32.mrb[13].mxu1  ;;  %v1810_v1 = vpop.f32.mrb[14].mxu0 }
 0x11e   : > { %v1891_v2 = vadd.f32 %v1890_v0, %v1889_v61  ;;  %v1892_v3 = vpop.f32.mrb[14].mxu1  ;;  %v1811_v4 = vpop.f32.mrb[15].mxu0 }
 0x11f   : > { %v1812_v5 = vadd.f32 %v1811_v4, %v1810_v1  ;;  %v1893_v6 = vpop.f32.mrb[15].mxu1 }
 0x120   : > { %v945_v7 = vadd.f32 %v1891_v2, %v1809_v63  ;;  %v1894_v8 = vadd.f32 %v1893_v6, %v1892_v3 }
 0x122   : > { %1015 = vst [vmem:[#allocation2 + $0x30] sm:$0xff] %v945_v7  ;;  %v1042_v9 = vadd.f32 %v1041_v60, %v945_v7  ;;  %v948_v10 = vadd.f32 %v1894_v8, %v1812_v5 }
 0x123   : > { %v1813_v11 = vpop.f32.mrb[16].mxu0 }
 0x124   : > { %1016 = vst [vmem:[#allocation2 + $0x38] sm:$0xff] %v948_v10  ;;  %v1043_v12 = vadd.f32 %v1042_v9, %v948_v10  ;;  %v1895_v13 = vpop.f32.mrb[16].mxu1  ;;  %v1814_v14 = vpop.f32.mrb[17].mxu0 }
 0x125   : > { %v1815_v15 = vadd.f32 %v1814_v14, %v1813_v11  ;;  %v1896_v16 = vpop.f32.mrb[17].mxu1  ;;  %v1816_v17 = vpop.f32.mrb[18].mxu0 }
 0x126   : > { %v1897_v18 = vadd.f32 %v1896_v16, %v1895_v13  ;;  %v1898_v19 = vpop.f32.mrb[18].mxu1  ;;  %v1817_v20 = vpop.f32.mrb[19].mxu0 }
 0x127   : > { %v1818_v21 = vadd.f32 %v1817_v20, %v1816_v17  ;;  %v1899_v22 = vpop.f32.mrb[19].mxu1 }
 0x128   : > { %v953_v23 = vadd.f32 %v1897_v18, %v1815_v15  ;;  %v1900_v24 = vadd.f32 %v1899_v22, %v1898_v19 }
 0x12a   : > { %1017 = vst [vmem:[#allocation2 + $0x40] sm:$0xff] %v953_v23  ;;  %v1044_v25 = vadd.f32 %v1043_v12, %v953_v23  ;;  %v956_v26 = vadd.f32 %v1900_v24, %v1818_v21 }
 0x12b   : > { %v1819_v27 = vpop.f32.mrb[20].mxu0 }
 0x12c   : > { %1018 = vst [vmem:[#allocation2 + $0x48] sm:$0xff] %v956_v26  ;;  %v1045_v28 = vadd.f32 %v1044_v25, %v956_v26  ;;  %v1901_v29 = vpop.f32.mrb[20].mxu1  ;;  %v1820_v30 = vpop.f32.mrb[21].mxu0 }
 0x12d   : > { %v1821_v31 = vadd.f32 %v1820_v30, %v1819_v27  ;;  %v1902_v32 = vpop.f32.mrb[21].mxu1  ;;  %v1822_v33 = vpop.f32.mrb[22].mxu0 }
 0x12e   : > { %v1903_v34 = vadd.f32 %v1902_v32, %v1901_v29  ;;  %v1904_v35 = vpop.f32.mrb[22].mxu1  ;;  %v1823_v36 = vpop.f32.mrb[23].mxu0 }
 0x12f   : > { %v1824_v37 = vadd.f32 %v1823_v36, %v1822_v33  ;;  %v1905_v38 = vpop.f32.mrb[23].mxu1 }
 0x130   : > { %v961_v39 = vadd.f32 %v1903_v34, %v1821_v31  ;;  %v1906_v40 = vadd.f32 %v1905_v38, %v1904_v35 }
 0x132   : > { %1019 = vst [vmem:[#allocation2 + $0x50] sm:$0xff] %v961_v39  ;;  %v1046_v41 = vadd.f32 %v1045_v28, %v961_v39  ;;  %v964_v42 = vadd.f32 %v1906_v40, %v1824_v37 }
 0x133   : > { %v1825_v43 = vpop.f32.mrb[24].mxu0 }
 0x134   : > { %1020 = vst [vmem:[#allocation2 + $0x58] sm:$0xff] %v964_v42  ;;  %v1047_v44 = vadd.f32 %v1046_v41, %v964_v42  ;;  %v1907_v45 = vpop.f32.mrb[24].mxu1  ;;  %v1826_v46 = vpop.f32.mrb[25].mxu0 }
 0x135   : > { %v1827_v47 = vadd.f32 %v1826_v46, %v1825_v43  ;;  %v1908_v48 = vpop.f32.mrb[25].mxu1  ;;  %v1828_v49 = vpop.f32.mrb[26].mxu0 }
 0x136   : > { %v1909_v50 = vadd.f32 %v1908_v48, %v1907_v45  ;;  %v1910_v51 = vpop.f32.mrb[26].mxu1  ;;  %v1829_v52 = vpop.f32.mrb[27].mxu0 }
 0x137   : > { %v1830_v53 = vadd.f32 %v1829_v52, %v1828_v49  ;;  %v1911_v54 = vpop.f32.mrb[27].mxu1 }
 0x138   : > { %v969_v55 = vadd.f32 %v1909_v50, %v1827_v47  ;;  %v1912_v56 = vadd.f32 %v1911_v54, %v1910_v51 }
 0x13a   : > { %1021 = vst [vmem:[#allocation2 + $0x60] sm:$0xff] %v969_v55  ;;  %v1048_v57 = vadd.f32 %v1047_v44, %v969_v55  ;;  %v972_v58 = vadd.f32 %v1912_v56, %v1830_v53 }
 0x13b   : > { %v1831_v59 = vpop.f32.mrb[28].mxu0 }
 0x13c   : > { %1022 = vst [vmem:[#allocation2 + $0x68] sm:$0xff] %v972_v58  ;;  %v1049_v60 = vadd.f32 %v1048_v57, %v972_v58  ;;  %v1913_v61 = vpop.f32.mrb[28].mxu1  ;;  %v1832_v62 = vpop.f32.mrb[29].mxu0 }
 0x13d   : > { %v1833_v63 = vadd.f32 %v1832_v62, %v1831_v59  ;;  %v1914_v0 = vpop.f32.mrb[29].mxu1  ;;  %v1834_v1 = vpop.f32.mrb[30].mxu0 }
 0x13e   : > { %v1915_v2 = vadd.f32 %v1914_v0, %v1913_v61  ;;  %v1916_v3 = vpop.f32.mrb[30].mxu1  ;;  %v1835_v4 = vpop.f32.mrb[31].mxu0 }
 0x13f   : > { %v1836_v5 = vadd.f32 %v1835_v4, %v1834_v1  ;;  %v1917_v6 = vpop.f32.mrb[31].mxu1  ;;  %v1036_v1 = vld [vmem:[#allocation3] sm:$0x1] }
 0x140   : > { %v977_v7 = vadd.f32 %v1915_v2, %v1833_v63  ;;  %v1918_v8 = vadd.f32 %v1917_v6, %v1916_v3 }
 0x142   : > { %1023 = vst [vmem:[#allocation2 + $0x70] sm:$0xff] %v977_v7  ;;  %v1050_v9 = vadd.f32 %v1049_v60, %v977_v7  ;;  %v980_v10 = vadd.f32 %v1918_v8, %v1836_v5 }
 0x143   : > { %v1837_v11 = vpop.f32.mrb[32].mxu0 }
 0x144   : > { %1024 = vst [vmem:[#allocation2 + $0x78] sm:$0xff] %v980_v10  ;;  %v1051_v12 = vadd.f32 %v1050_v9, %v980_v10  ;;  %v1919_v13 = vpop.f32.mrb[32].mxu1  ;;  %v1838_v14 = vpop.f32.mrb[33].mxu0 }
 0x145   : > { %v1839_v15 = vadd.f32 %v1838_v14, %v1837_v11  ;;  %v1920_v16 = vpop.f32.mrb[33].mxu1  ;;  %v1840_v17 = vpop.f32.mrb[34].mxu0 }
 0x146   : > { %v1921_v18 = vadd.f32 %v1920_v16, %v1919_v13  ;;  %v1922_v19 = vpop.f32.mrb[34].mxu1  ;;  %v1841_v20 = vpop.f32.mrb[35].mxu0 }
 0x147   : > { %v1842_v21 = vadd.f32 %v1841_v20, %v1840_v17  ;;  %v1923_v22 = vpop.f32.mrb[35].mxu1 }
 0x148   : > { %v985_v23 = vadd.f32 %v1921_v18, %v1839_v15  ;;  %v1924_v24 = vadd.f32 %v1923_v22, %v1922_v19 }
 0x14a   : > { %1025 = vst [vmem:[#allocation2 + $0x80] sm:$0xff] %v985_v23  ;;  %v1052_v25 = vadd.f32 %v1051_v12, %v985_v23  ;;  %v988_v26 = vadd.f32 %v1924_v24, %v1842_v21 }
 0x14b   : > { %v1843_v27 = vpop.f32.mrb[36].mxu0 }
 0x14c   : > { %1026 = vst [vmem:[#allocation2 + $0x88] sm:$0xff] %v988_v26  ;;  %v1053_v28 = vadd.f32 %v1052_v25, %v988_v26  ;;  %v1925_v29 = vpop.f32.mrb[36].mxu1  ;;  %v1844_v30 = vpop.f32.mrb[37].mxu0 }
 0x14d   : > { %v1845_v31 = vadd.f32 %v1844_v30, %v1843_v27  ;;  %v1926_v32 = vpop.f32.mrb[37].mxu1  ;;  %v1846_v33 = vpop.f32.mrb[38].mxu0 }
 0x14e   : > { %v1927_v34 = vadd.f32 %v1926_v32, %v1925_v29  ;;  %v1928_v35 = vpop.f32.mrb[38].mxu1  ;;  %v1847_v36 = vpop.f32.mrb[39].mxu0 }
 0x14f   : > { %v1848_v37 = vadd.f32 %v1847_v36, %v1846_v33  ;;  %v1929_v38 = vpop.f32.mrb[39].mxu1 }
 0x150   : > { %v993_v39 = vadd.f32 %v1927_v34, %v1845_v31  ;;  %v1930_v40 = vadd.f32 %v1929_v38, %v1928_v35 }
 0x152   : > { %1027 = vst [vmem:[#allocation2 + $0x90] sm:$0xff] %v993_v39  ;;  %v1054_v41 = vadd.f32 %v1053_v28, %v993_v39  ;;  %v996_v42 = vadd.f32 %v1930_v40, %v1848_v37 }
 0x153   : > { %v1849_v43 = vpop.f32.mrb[40].mxu0 }
 0x154   : > { %1028 = vst [vmem:[#allocation2 + $0x98] sm:$0xff] %v996_v42  ;;  %v1055_v44 = vadd.f32 %v1054_v41, %v996_v42  ;;  %v1931_v45 = vpop.f32.mrb[40].mxu1  ;;  %v1850_v46 = vpop.f32.mrb[41].mxu0 }
 0x155   : > { %v1851_v47 = vadd.f32 %v1850_v46, %v1849_v43  ;;  %v1932_v48 = vpop.f32.mrb[41].mxu1  ;;  %v1852_v49 = vpop.f32.mrb[42].mxu0 }
 0x156   : > { %v1933_v50 = vadd.f32 %v1932_v48, %v1931_v45  ;;  %v1934_v51 = vpop.f32.mrb[42].mxu1  ;;  %v1853_v52 = vpop.f32.mrb[43].mxu0 }
 0x157   : > { %v1854_v53 = vadd.f32 %v1853_v52, %v1852_v49  ;;  %v1935_v54 = vpop.f32.mrb[43].mxu1 }
 0x158   : > { %v1001_v55 = vadd.f32 %v1933_v50, %v1851_v47  ;;  %v1936_v56 = vadd.f32 %v1935_v54, %v1934_v51 }
 0x15a   : > { %1029 = vst [vmem:[#allocation2 + $0xa0] sm:$0xff] %v1001_v55  ;;  %v1056_v57 = vadd.f32 %v1055_v44, %v1001_v55  ;;  %v1004_v58 = vadd.f32 %v1936_v56, %v1854_v53 }
 0x15c   : > { %1030 = vst [vmem:[#allocation2 + $0xa8] sm:$0xff] %v1004_v58  ;;  %v1057_v59 = vadd.f32 %v1056_v57, %v1004_v58 }
 0x15e   : > { %v1058_v60 = vrot.slane %v1057_v59, 4 }
 0x160   : > { %v1059_v61 = vadd.f32 %v1058_v60, %v1057_v59 }
 0x162   : > { %v1060_v62 = vrot.slane %v1059_v61, 2 }
 0x164   : > { %v1061_v63 = vadd.f32 %v1060_v62, %v1059_v61 }
 0x166   : > { %v1062_v0 = vrot.slane %v1061_v63, 1 }
 0x168   : > { %v1063_v2 = vadd.f32 %v1062_v0, %v1061_v63 }
 0x16a   : > { %v1064_v3 = vadd.f32 %v1063_v2, %v1036_v1 }
 0x16c   : > { %1065 = vst [vmem:[#allocation3] sm:$0x1] %v1064_v3 }
 0x16d PF: > { %p1658_p5 = scmp.ne.s32.totalorder %s2077_s15, 1 }
 0x16e   : > { %v1078_v5 = vlaneseq (!%p1658_p5)  ;;  %v2088_v6 = vmov (!%p1658_p5), 0.0   ;;  %v1147_v11 = vld [vmem:[#allocation2] sm:$0xff] (!%p1658_p5)  ;;  %v1148_v12 = vld [vmem:[#allocation2 + $0x8] sm:$0xff] (!%p1658_p5)  ;;  %v1149_v13 = vld [vmem:[#allocation2 + $0x10] sm:$0xff] (!%p1658_p5) }
 0x16f   : > { %1069 = sbr.rel (%p1658_p5) target bundleno = 435 (0x1b3), region = 48  ;;  %1074 = vst [vmem:[#allocation4] sm:$0x1] (!%p1658_p5), %v2088_v6  ;;  %v1150_v16 = vld [vmem:[#allocation2 + $0x18] sm:$0xff] (!%p1658_p5)  ;;  %v1151_v18 = vld [vmem:[#allocation2 + $0x20] sm:$0xff] (!%p1658_p5)  ;;  %v1152_v22 = vld [vmem:[#allocation2 + $0x28] sm:$0xff] (!%p1658_p5) }
 0x170   : > { %v2364_v8 = vshrl.u32 (!%p1658_p5), %v1078_v5, 7  ;;  %v1153_v25 = vld [vmem:[#allocation2 + $0x30] sm:$0xff] (!%p1658_p5)  ;;  %v1154_v29 = vld [vmem:[#allocation2 + $0x38] sm:$0xff] (!%p1658_p5)  ;;  %v1155_v33 = vld [vmem:[#allocation2 + $0x40] sm:$0xff] (!%p1658_p5) }
 0x171   : > { %v1156_v37 = vld [vmem:[#allocation2 + $0x48] sm:$0xff] (!%p1658_p5)  ;;  %v1157_v41 = vld [vmem:[#allocation2 + $0x50] sm:$0xff] (!%p1658_p5)  ;;  %v1158_v45 = vld [vmem:[#allocation2 + $0x58] sm:$0xff] (!%p1658_p5) }
 0x172   : > { %v1172_v9 = vsub.s32 (!%p1658_p5), 0, %v2364_v8  ;;  %v1159_v49 = vld [vmem:[#allocation2 + $0x60] sm:$0xff] (!%p1658_p5)  ;;  %v1160_v53 = vld [vmem:[#allocation2 + $0x68] sm:$0xff] (!%p1658_p5)  ;;  %v1161_v57 = vld [vmem:[#allocation2 + $0x70] sm:$0xff] (!%p1658_p5) }
 0x173   : > { %v1075_v4 = vld [vmem:[#allocation3] sm:$0x1] (!%p1658_p5)  ;;  %v1162_v61 = vld [vmem:[#allocation2 + $0x78] sm:$0xff] (!%p1658_p5)  ;;  %v1163_v1 = vld [vmem:[#allocation2 + $0x80] sm:$0xff] (!%p1658_p5) }
 0x174   : > { %v1076_v7 = vmul.f32 (!%p1658_p5), 0.0061728396, %v1075_v4  ;;  %v1164_v5 = vld [vmem:[#allocation2 + $0x88] sm:$0xff] (!%p1658_p5) }
 0x176   : > { %v2367_v10 = vrot.slane %v1076_v7, %v1172_v9 }
 0x178   : > { %v1175_v14 = vsub.f32 %v1147_v11, %v2367_v10  ;;  %v1176_v15 = vsub.f32 %v1148_v12, %v2367_v10  ;;  %v1177_v17 = vsub.f32 %v1149_v13, %v2367_v10  ;;  %v1178_v19 = vsub.f32 %v1150_v16, %v2367_v10  ;;  %v1165_v11 = vld [vmem:[#allocation2 + $0x90] sm:$0xff]  ;;  %v1167_v13 = vld [vmem:[#allocation2 + $0xa0] sm:$0xff] }
 0x179   : > { %v1179_v23 = vsub.f32 %v1151_v18, %v2367_v10  ;;  %v1180_v26 = vsub.f32 %v1152_v22, %v2367_v10  ;;  %v1181_v30 = vsub.f32 %v1153_v25, %v2367_v10  ;;  %v1182_v34 = vsub.f32 %v1154_v29, %v2367_v10 }
 0x17a   : > { %v1220_v20 = vmul.f32 %v1175_v14, %v1175_v14  ;;  %v1221_v21 = vmul.f32 %v1176_v15, %v1176_v15  ;;  %v1222_v24 = vmul.f32 %v1177_v17, %v1177_v17  ;;  %v1223_v27 = vmul.f32 %v1178_v19, %v1178_v19  ;;  %v1166_v17 = vld [vmem:[#allocation2 + $0x98] sm:$0xff] }
 0x17b   : > { %v1224_v31 = vmul.f32 %v1179_v23, %v1179_v23  ;;  %v1225_v35 = vmul.f32 %v1180_v26, %v1180_v26  ;;  %v1183_v38 = vsub.f32 %v1155_v33, %v2367_v10  ;;  %v1226_v39 = vmul.f32 %v1181_v30, %v1181_v30 }
 0x17c   : > { %v1242_v28 = vadd.f32 %v1221_v21, %v1220_v20  ;;  %v1184_v42 = vsub.f32 %v1156_v37, %v2367_v10  ;;  %v1227_v43 = vmul.f32 %v1182_v34, %v1182_v34  ;;  %v1185_v46 = vsub.f32 %v1157_v41, %v2367_v10 }
 0x17d   : > { %v1228_v47 = vmul.f32 %v1183_v38, %v1183_v38  ;;  %v1186_v50 = vsub.f32 %v1158_v45, %v2367_v10  ;;  %v1187_v54 = vsub.f32 %v1159_v49, %v2367_v10  ;;  %v1188_v58 = vsub.f32 %v1160_v53, %v2367_v10  ;;  %v1219_v38 = vld [vmem:[#allocation4] sm:$0x1] }
 0x17e   : > { %v1243_v32 = vadd.f32 %v1242_v28, %v1222_v24  ;;  %v1229_v51 = vmul.f32 %v1184_v42, %v1184_v42  ;;  %v1230_v55 = vmul.f32 %v1185_v46, %v1185_v46  ;;  %v1189_v62 = vsub.f32 %v1161_v57, %v2367_v10 }
 0x17f   : > { %v1231_v59 = vmul.f32 %v1186_v50, %v1186_v50  ;;  %v1232_v63 = vmul.f32 %v1187_v54, %v1187_v54  ;;  %v1190_v2 = vsub.f32 %v1162_v61, %v2367_v10  ;;  %v1233_v3 = vmul.f32 %v1188_v58, %v1188_v58 }
 0x180   : > { %v1244_v36 = vadd.f32 %v1243_v32, %v1223_v27  ;;  %v1191_v6 = vsub.f32 %v1163_v1, %v2367_v10  ;;  %v1234_v7 = vmul.f32 %v1189_v62, %v1189_v62  ;;  %v1099_v12 = vadd.s32 160, %v2364_v8 }
 0x181   : > { %v1192_v14 = vsub.f32 %v1164_v5, %v2367_v10  ;;  %v1235_v15 = vmul.f32 %v1190_v2, %v1190_v2  ;;  %v1193_v18 = vsub.f32 %v1165_v11, %v2367_v10  ;;  %v1195_v21 = vsub.f32 %v1167_v13, %v2367_v10 }
 0x182   : > { %v1245_v40 = vadd.f32 %v1244_v36, %v1224_v31  ;;  %v1236_v19 = vmul.f32 %v1191_v6, %v1191_v6  ;;  %vm1144_vm0 = vcmp.lt.s32.totalorder %v1099_v12, 162  ;;  %v1194_v22 = vsub.f32 %v1166_v17, %v2367_v10 }
 0x183   : > { %v1237_v23 = vmul.f32 %v1192_v14, %v1192_v14  ;;  %v1238_v25 = vmul.f32 %v1193_v18, %v1193_v18  ;;  %v1217_v8 = vsel %vm1144_vm0, %v1195_v21, 0.0 }
 0x184   : > { %v1246_v44 = vadd.f32 %v1245_v40, %v1225_v35  ;;  %v1239_v27 = vmul.f32 %v1194_v22, %v1194_v22  ;;  %v1240_v29 = vmul.f32 %v1217_v8, %v1217_v8 }
 0x186   : > { %v1247_v48 = vadd.f32 %v1246_v44, %v1226_v39 }
 0x188   : > { %v1248_v52 = vadd.f32 %v1247_v48, %v1227_v43 }
 0x18a   : > { %v1249_v56 = vadd.f32 %v1248_v52, %v1228_v47 }
 0x18c   : > { %v1250_v60 = vadd.f32 %v1249_v56, %v1229_v51 }
 0x18e   : > { %v1251_v0 = vadd.f32 %v1250_v60, %v1230_v55 }
 0x190   : > { %v1252_v4 = vadd.f32 %v1251_v0, %v1231_v59 }
 0x192   : > { %v1253_v9 = vadd.f32 %v1252_v4, %v1232_v63 }
 0x194   : > { %v1254_v16 = vadd.f32 %v1253_v9, %v1233_v3 }
 0x196   : > { %v1255_v20 = vadd.f32 %v1254_v16, %v1234_v7 }
 0x198   : > { %v1256_v24 = vadd.f32 %v1255_v20, %v1235_v15 }
 0x19a   : > { %v1257_v26 = vadd.f32 %v1256_v24, %v1236_v19 }
 0x19c   : > { %v1258_v28 = vadd.f32 %v1257_v26, %v1237_v23 }
 0x19e   : > { %v1259_v30 = vadd.f32 %v1258_v28, %v1238_v25 }
 0x1a0   : > { %v1260_v31 = vadd.f32 %v1259_v30, %v1239_v27 }
 0x1a2   : > { %v1261_v32 = vadd.f32 %v1260_v31, %v1240_v29 }
 0x1a4   : > { %v1263_v33 = vrot.slane %v1261_v32, 4 }
 0x1a6   : > { %v1264_v34 = vadd.f32 %v1263_v33, %v1261_v32 }
 0x1a8   : > { %v1265_v35 = vrot.slane %v1264_v34, 2 }
 0x1aa   : > { %v1266_v36 = vadd.f32 %v1265_v35, %v1264_v34 }
 0x1ac   : > { %v1267_v37 = vrot.slane %v1266_v36, 1 }
 0x1ae   : > { %v1268_v39 = vadd.f32 %v1267_v37, %v1266_v36 }
 0x1b0   : > { %v1269_v40 = vadd.f32 %v1268_v39, %v1219_v38 }
 0x1b2   : > { %1270 = vst [vmem:[#allocation4] sm:$0x1] %v1269_v40 }
 0x1b3 PF: > { %p1659_p6 = scmp.ne.s32.totalorder %s2077_s15, 2 }
 0x1b4   : > { %v1311_v43 = vlaneseq (!%p1659_p6)  ;;  %v1275_v45 = vld [vmem:[#allocation3] sm:$0x1] (!%p1659_p6)  ;;  %v1279_v46 = vld [vmem:[%s2490_s2] sm:$0x1] (!%p1659_p6)  ;;  %v1289_v53 = vld [vmem:[#allocation2 + $0x8] sm:$0xff] (!%p1659_p6) }
 0x1b5   : > { %1274 = sbr.rel (%p1659_p6) target bundleno = 486 (0x1e6), region = 56  ;;  %v1276_v47 = vmul.f32 (!%p1659_p6), 0.0061728396, %v1275_v45  ;;  %v1283_v51 = vld [vmem:[%s2491_s3] sm:$0x1] (!%p1659_p6)  ;;  %v1290_v54 = vld [vmem:[#allocation2 + $0x10] sm:$0xff] (!%p1659_p6) }
 0x1b6   : > { %v1312_v44 = vshrl.u32 (!%p1659_p6), %v1311_v43, 7  ;;  %v1288_v52 = vld [vmem:[#allocation2] sm:$0xff] (!%p1659_p6)  ;;  %v1291_v55 = vld [vmem:[#allocation2 + $0x18] sm:$0xff] (!%p1659_p6)  ;;  %v1293_v59 = vld [vmem:[#allocation2 + $0x28] sm:$0xff] (!%p1659_p6) }
 0x1b7   : > { %v1292_v56 = vld [vmem:[#allocation2 + $0x20] sm:$0xff] (!%p1659_p6)  ;;  %v1294_v60 = vld [vmem:[#allocation2 + $0x30] sm:$0xff] (!%p1659_p6)  ;;  %v1295_v61 = vld [vmem:[#allocation2 + $0x38] sm:$0xff] (!%p1659_p6) }
 0x1b8   : > { %v1313_v48 = vsub.s32 (!%p1659_p6), 0, %v1312_v44  ;;  %v1296_v62 = vld [vmem:[#allocation2 + $0x40] sm:$0xff] (!%p1659_p6)  ;;  %v1297_v63 = vld [vmem:[#allocation2 + $0x48] sm:$0xff] (!%p1659_p6)  ;;  %v1298_v0 = vld [vmem:[#allocation2 + $0x50] sm:$0xff] (!%p1659_p6) }
 0x1b9   : > { %v1277_v10 = vld [vmem:[#allocation4] sm:$0x1] (!%p1659_p6)  ;;  %v1299_v5 = vld [vmem:[#allocation2 + $0x58] sm:$0xff] (!%p1659_p6)  ;;  %v1300_v6 = vld [vmem:[#allocation2 + $0x60] sm:$0xff] (!%p1659_p6) }
 0x1ba   : > { %v1278_v41 = vmul.f32 (!%p1659_p6), 0.0061728396, %v1277_v10  ;;  %v1301_v7 = vld [vmem:[#allocation2 + $0x68] sm:$0xff] (!%p1659_p6)  ;;  %v1302_v10 = vld [vmem:[#allocation2 + $0x70] sm:$0xff] (!%p1659_p6) }
 0x1bc   : > { %v1280_v42 = vadd.f32 1e-05, %v1278_v41  ;;  %v1303_v41 = vld [vmem:[#allocation2 + $0x78] sm:$0xff] }
 0x1be   : > { %2061 = vrsqrt.f32 %v1280_v42 }
 0x1c8   : > { %v2062_v49 = vpop.eup %2061 }
 0x1c9   : > { %v1282_v50 = vmul.f32 %v2062_v49, %v1279_v46  ;;  %v1304_v46 = vld [vmem:[#allocation2 + $0x80] sm:$0xff] }
 0x1cb   : > { %v1284_v57 = vmul.f32 %v1282_v50, %v1276_v47  ;;  %v2398_v58 = vrot.slane %v1282_v50, %v1313_v48 }
 0x1cd   : > { %v1285_v1 = vsub.f32 %v1283_v51, %v1284_v57  ;;  %v1316_v2 = vmul.f32 %v2398_v58, %v1288_v52  ;;  %v1317_v3 = vmul.f32 %v2398_v58, %v1289_v53  ;;  %v1318_v4 = vmul.f32 %v2398_v58, %v1290_v54  ;;  %v1305_v51 = vld [vmem:[#allocation2 + $0x88] sm:$0xff]  ;;  %v1307_v57 = vld [vmem:[#allocation2 + $0x98] sm:$0xff] }
 0x1ce   : > { %v1319_v9 = vmul.f32 %v2398_v58, %v1291_v55  ;;  %v1320_v11 = vmul.f32 %v2398_v58, %v1292_v56  ;;  %v1321_v12 = vmul.f32 %v2398_v58, %v1293_v59  ;;  %v1322_v13 = vmul.f32 %v2398_v58, %v1294_v60  ;;  %v1306_v56 = vld [vmem:[#allocation2 + $0x90] sm:$0xff] }
 0x1cf   : > { %v2407_v14 = vrot.slane %v1285_v1, %v1313_v48  ;;  %v1323_v15 = vmul.f32 %v2398_v58, %v1295_v61  ;;  %v1324_v16 = vmul.f32 %v2398_v58, %v1296_v62  ;;  %v1325_v17 = vmul.f32 %v2398_v58, %v1297_v63  ;;  %v1308_v63 = vld [vmem:[#allocation2 + $0xa0] sm:$0xff] }
 0x1d0   : > { %v1326_v18 = vmul.f32 %v2398_v58, %v1298_v0  ;;  %v1327_v19 = vmul.f32 %v2398_v58, %v1299_v5  ;;  %v1328_v20 = vmul.f32 %v2398_v58, %v1300_v6  ;;  %v1329_v21 = vmul.f32 %v2398_v58, %v1301_v7 }
 0x1d1   : > { %v1344_v22 = vadd.f32 %v2407_v14, %v1316_v2  ;;  %v1345_v23 = vadd.f32 %v2407_v14, %v1317_v3  ;;  %v1346_v24 = vadd.f32 %v2407_v14, %v1318_v4  ;;  %v1347_v25 = vadd.f32 %v2407_v14, %v1319_v9  ;;  %v1309_v4 = vld [vmem:[#allocation2 + $0xa8] sm:$0xff] }
 0x1d2   : > { %v1348_v26 = vadd.f32 %v2407_v14, %v1320_v11  ;;  %v1349_v8 = vadd.f32 %v2407_v14, %v1321_v12  ;;  %v1350_v27 = vadd.f32 %v2407_v14, %v1322_v13  ;;  %v1351_v28 = vadd.f32 %v2407_v14, %v1323_v15 }
 0x1d3   : > { %v1366_v29 = vmax.f32 %v1344_v22, 0.0  ;;  %v1367_v30 = vmax.f32 %v1345_v23, 0.0  ;;  %v1368_v31 = vmax.f32 %v1346_v24, 0.0  ;;  %v1369_v32 = vmax.f32 %v1347_v25, 0.0 }
 0x1d4   : > { %v1370_v33 = vmax.f32 %v1348_v26, 0.0  ;;  %v1371_v34 = vmax.f32 %v1349_v8, 0.0  ;;  %v1372_v35 = vmax.f32 %v1350_v27, 0.0  ;;  %v1373_v36 = vmax.f32 %v1351_v28, 0.0 }
 0x1d5   : > { %v1711_v37 = vpack.c.bf16 %v1367_v30, %v1366_v29  ;;  %v1716_v38 = vpack.c.bf16 %v1369_v32, %v1368_v31  ;;  %v1352_v39 = vadd.f32 %v2407_v14, %v1324_v16  ;;  %v1353_v40 = vadd.f32 %v2407_v14, %v1325_v17 }
 0x1d6   : > { %v1721_v42 = vpack.c.bf16 %v1371_v34, %v1370_v33  ;;  %v1726_v43 = vpack.c.bf16 %v1373_v36, %v1372_v35  ;;  %v1354_v44 = vadd.f32 %v2407_v14, %v1326_v18  ;;  %v1355_v45 = vadd.f32 %v2407_v14, %v1327_v19 }
 0x1d7   : > { %1712 = vst [vmem:[%s2492_s4] sm:$0xff] %v1711_v37   ;;  %1763 = vst [vmem:[%s2492_s4 + $0x8] sm:$0xff] %v1716_v38   ;;  %v1374_v47 = vmax.f32 %v1352_v39, 0.0  ;;  %v1375_v48 = vmax.f32 %v1353_v40, 0.0  ;;  %v1356_v49 = vadd.f32 %v2407_v14, %v1328_v20  ;;  %v1357_v50 = vadd.f32 %v2407_v14, %v1329_v21 }
 0x1d8   : > { %1764 = vst [vmem:[%s2492_s4 + $0x10] sm:$0xff] %v1721_v42   ;;  %1765 = vst [vmem:[%s2492_s4 + $0x18] sm:$0xff] %v1726_v43   ;;  %v1376_v52 = vmax.f32 %v1354_v44, 0.0  ;;  %v1377_v53 = vmax.f32 %v1355_v45, 0.0  ;;  %v1330_v54 = vmul.f32 %v2398_v58, %v1302_v10  ;;  %v1331_v55 = vmul.f32 %v2398_v58, %v1303_v41 }
 0x1d9   : > { %v1731_v59 = vpack.c.bf16 %v1375_v48, %v1374_v47  ;;  %v1378_v60 = vmax.f32 %v1356_v49, 0.0  ;;  %v1379_v61 = vmax.f32 %v1357_v50, 0.0  ;;  %v1332_v62 = vmul.f32 %v2398_v58, %v1304_v46 }
 0x1da   : > { %v1736_v0 = vpack.c.bf16 %v1377_v53, %v1376_v52  ;;  %v1358_v1 = vadd.f32 %v2407_v14, %v1330_v54  ;;  %v1359_v2 = vadd.f32 %v2407_v14, %v1331_v55  ;;  %v1333_v3 = vmul.f32 %v2398_v58, %v1305_v51 }
 0x1db   : > { %1766 = vst [vmem:[%s2492_s4 + $0x20] sm:$0xff] %v1731_v59   ;;  %v1741_v5 = vpack.c.bf16 %v1379_v61, %v1378_v60  ;;  %v1360_v6 = vadd.f32 %v2407_v14, %v1332_v62  ;;  %v1334_v7 = vmul.f32 %v2398_v58, %v1306_v56  ;;  %v1335_v9 = vmul.f32 %v2398_v58, %v1307_v57 }
 0x1dc   : > { %1767 = vst [vmem:[%s2492_s4 + $0x28] sm:$0xff] %v1736_v0   ;;  %v1380_v11 = vmax.f32 %v1358_v1, 0.0  ;;  %v1381_v12 = vmax.f32 %v1359_v2, 0.0  ;;  %v1361_v13 = vadd.f32 %v2407_v14, %v1333_v3  ;;  %v1336_v15 = vmul.f32 %v2398_v58, %v1308_v63 }
 0x1dd   : > { %1768 = vst [vmem:[%s2492_s4 + $0x30] sm:$0xff] %v1741_v5   ;;  %v1382_v16 = vmax.f32 %v1360_v6, 0.0  ;;  %v1362_v17 = vadd.f32 %v2407_v14, %v1334_v7  ;;  %v1363_v18 = vadd.f32 %v2407_v14, %v1335_v9  ;;  %v1337_v19 = vmul.f32 %v2398_v58, %v1309_v4 }
 0x1de   : > { %v1746_v20 = vpack.c.bf16 %v1381_v12, %v1380_v11  ;;  %v1383_v21 = vmax.f32 %v1361_v13, 0.0  ;;  %v1364_v22 = vadd.f32 %v2407_v14, %v1336_v15 }
 0x1df   : > { %v1384_v23 = vmax.f32 %v1362_v17, 0.0  ;;  %v1385_v24 = vmax.f32 %v1363_v18, 0.0  ;;  %v1365_v25 = vadd.f32 %v2407_v14, %v1337_v19 }
 0x1e0   : > { %1769 = vst [vmem:[%s2492_s4 + $0x38] sm:$0xff] %v1746_v20   ;;  %v1751_v26 = vpack.c.bf16 %v1383_v21, %v1382_v16  ;;  %v1386_v8 = vmax.f32 %v1364_v22, 0.0 }
 0x1e1   : > { %v1756_v27 = vpack.c.bf16 %v1385_v24, %v1384_v23  ;;  %v1387_v28 = vmax.f32 %v1365_v25, 0.0 }
 0x1e2   : > { %1770 = vst [vmem:[%s2492_s4 + $0x40] sm:$0xff] %v1751_v26  }
 0x1e3   : > { %1771 = vst [vmem:[%s2492_s4 + $0x48] sm:$0xff] %v1756_v27   ;;  %v1761_v58 = vpack.c.bf16 %v1387_v28, %v1386_v8 }
 0x1e5   : > { %1772 = vst [vmem:[%s2492_s4 + $0x50] sm:$0xff] %v1761_v58  }
 0x1e6 PF: > { %s14_s17 = sadd.s32 1, %s2085_s17   ;;  %s2493_s15 = smov %s2081_s16 }
 0x1e7   : > { %p11_p7 = scmp.ge.s32.totalorder %s14_s17, 5   ;;  %s2494_s16 = smov %s2496_s18 }
 0x1e9   :  { %13 = sbr.rel (!%p11_p7) target bundleno = 2 (0x2), region = 89 }

// kernel: forward.6
= control target key start
LH: loop header
LB: loop body
LE: loop exit
PB: predicated region body
PF: predicated region fallthrough
CT: control target
= control target key end

     0   :  { %s1952_s15 = smov 0   ;;  %s1954_s16 = smov 0   ;;  %s2278_s0 = inlined_call_operand.vmem [shape: bf16[112,576], index: 0, kind: input, shape index: {}]   ;;  %s2279_s1 = inlined_call_operand.vmem [shape: bf16[576,128], index: 1, kind: input, shape index: {}]   ;;  %s2280_s2 = inlined_call_operand.vmem [shape: f32[1,128], index: 2, kind: input, shape index: {}]   ;;  %s2281_s3 = inlined_call_operand.vmem [shape: f32[1,128], index: 3, kind: input, shape index: {}]   ;;  %s2282_s4 = inlined_call_operand.vmem [shape: bf16[112,128], index: 4, kind: output, shape index: {}]  }
   0x1   :  { %s1956_s17 = smov 0  }
   0x2 LB: > { %s26_s18 = sadd.s32 1, %s1918_s16  ;;  %p1460_p0 = scmp.ge.s32.totalorder %s1922_s17, 1  ;;  %s1922_s17 = sphi %s1956_s17, %s14_s17   ;;  %s1918_s16 = sphi %s1954_s16, %s2284_s16   ;;  %s1914_s15 = sphi %s1952_s15, %s2283_s15  }
   0x3   : > { %p28_p1 = scmp.ge.s32.totalorder %s26_s18, 3  ;;  %p188_p2 = scmp.lt.s32.totalorder %s1922_s17, 4 }
   0x5   : > { %s2286_s18 = smov (%p28_p1, %s26_s18), 0  ;;  %p189_p3 = pnand %p1460_p0, %p188_p2 }
   0x6   : > { %p1461_p4 = scmp.ne.s32.totalorder (!%p189_p3), %s1914_s15, 0 }
   0x7   : > { %192 = sbr.rel (%p189_p3) target bundleno = 470 (0x1d6), region = 36 }
   0xe   : > { %244 = sbr.rel (%p1461_p4) target bundleno = 373 (0x175), region = 40  ;;  %v1813_v0 = vld [vmem:[%s2279_s1 + $0x40] sm:$0xff] (!%p1461_p4)   ;;  %v1924_v2 = vmov (!%p1461_p4), 0.0   ;;  %v1817_v5 = vld [vmem:[%s2279_s1 + $0x48] sm:$0xff] (!%p1461_p4)   ;;  %v1821_v9 = vld [vmem:[%s2279_s1 + $0x50] sm:$0xff] (!%p1461_p4)   ;;  %vm1925_vm0 = vmmov (!%p1461_p4), 0  }
   0xf   : > { %v1814_v1 = vld [vmem:[%s2279_s1 + $0xc0] sm:$0xff] (!%p1461_p4)   ;;  %1059 = vst [vmem:[#allocation3] sm:$0x1] (!%p1461_p4), %v1924_v2  ;;  %1615 = vmatprep.subr.bf16.mxu0 (!%p1461_p4), %v1813_v0  ;;  %v1818_v6 = vld [vmem:[%s2279_s1 + $0xc8] sm:$0xff] (!%p1461_p4)   ;;  %v1822_v10 = vld [vmem:[%s2279_s1 + $0xd0] sm:$0xff] (!%p1461_p4)   ;;  %vm750_vm1 = vcmask (!%p1461_p4), 523264  }
  0x10   : > { %v1815_v3 = vld [vmem:[%s2279_s1] sm:$0xff] (!%p1461_p4)   ;;  %1673 = vmatprep.subr.bf16.mxu1 (!%p1461_p4), %v1814_v1  ;;  %v1819_v7 = vld [vmem:[%s2279_s1 + $0x8] sm:$0xff] (!%p1461_p4)   ;;  %v1823_v11 = vld [vmem:[%s2279_s1 + $0x10] sm:$0xff] (!%p1461_p4)  }
  0x11   : > { %v1816_v4 = vld [vmem:[%s2279_s1 + $0x80] sm:$0xff] (!%p1461_p4)   ;;  %1616 = vmatpush3.bf16.msra.mxu0 (!%p1461_p4), %v1815_v3  ;;  %v1820_v8 = vld [vmem:[%s2279_s1 + $0x88] sm:$0xff] (!%p1461_p4)   ;;  %v1824_v12 = vld [vmem:[%s2279_s1 + $0x90] sm:$0xff] (!%p1461_p4)  }
  0x12   : > { %1674 = vmatpush3.bf16.msra.mxu1 (!%p1461_p4), %v1816_v4  ;;  %1617 = vmatprep.subr.bf16.mxu0 (!%p1461_p4), %v1817_v5  ;;  %v1825_v13 = vld [vmem:[%s2279_s1 + $0x58] sm:$0xff] (!%p1461_p4)   ;;  %v1829_v17 = vld [vmem:[%s2279_s1 + $0x60] sm:$0xff] (!%p1461_p4)   ;;  %v1833_v21 = vld [vmem:[%s2279_s1 + $0x68] sm:$0xff] (!%p1461_p4)  }
  0x13   : > { %1675 = vmatprep.subr.bf16.mxu1 (!%p1461_p4), %v1818_v6  ;;  %v1826_v14 = vld [vmem:[%s2279_s1 + $0xd8] sm:$0xff] (!%p1461_p4)   ;;  %v1830_v18 = vld [vmem:[%s2279_s1 + $0xe0] sm:$0xff] (!%p1461_p4)   ;;  %v1834_v22 = vld [vmem:[%s2279_s1 + $0xe8] sm:$0xff] (!%p1461_p4)  }
  0x14   : > { %v1827_v15 = vld [vmem:[%s2279_s1 + $0x18] sm:$0xff] (!%p1461_p4)   ;;  %v1831_v19 = vld [vmem:[%s2279_s1 + $0x20] sm:$0xff] (!%p1461_p4)   ;;  %v1835_v23 = vld [vmem:[%s2279_s1 + $0x28] sm:$0xff] (!%p1461_p4)  }
  0x15   : > { %1618 = vmatpush3.bf16.msra.mxu0 %v1819_v7  ;;  %v1828_v16 = vld [vmem:[%s2279_s1 + $0x98] sm:$0xff]   ;;  %v1832_v20 = vld [vmem:[%s2279_s1 + $0xa0] sm:$0xff]   ;;  %v1836_v24 = vld [vmem:[%s2279_s1 + $0xa8] sm:$0xff]  }
  0x16   : > { %1676 = vmatpush3.bf16.msra.mxu1 %v1820_v8  ;;  %1619 = vmatprep.subr.bf16.mxu0 %v1821_v9  ;;  %v1837_v25 = vld [vmem:[%s2279_s1 + $0x70] sm:$0xff]   ;;  %v1841_v29 = vld [vmem:[%s2279_s1 + $0x78] sm:$0xff]   ;;  %v1850_v36 = vld [vmem:[%s2278_s0 + $0xc] ss:$20 sps:$4 sm:$0xff]  }
  0x17   : > { %1677 = vmatprep.subr.bf16.mxu1 %v1822_v10  ;;  %v1838_v26 = vld [vmem:[%s2279_s1 + $0xf0] sm:$0xff]   ;;  %v1842_v30 = vld [vmem:[%s2279_s1 + $0xf8] sm:$0xff]   ;;  %v1851_v37 = vld [vmem:[%s2279_s1 + $0x100] sm:$0xff]   ;;  %893 = vmatprep.mubr.bf16.mxu1 %v1850_v36 }
  0x18   : > { %v1839_v27 = vld [vmem:[%s2279_s1 + $0x30] sm:$0xff]   ;;  %v1843_v31 = vld [vmem:[%s2279_s1 + $0x38] sm:$0xff]   ;;  %v1852_v38 = vld [vmem:[%s2278_s0 + $0x2c] ss:$20 sps:$4 sm:$0xff]  }
  0x19   : > { %1620 = vmatpush3.bf16.msra.mxu0 %v1823_v11  ;;  %v1840_v28 = vld [vmem:[%s2279_s1 + $0xb0] sm:$0xff]   ;;  %v1844_v32 = vld [vmem:[%s2279_s1 + $0xb8] sm:$0xff]   ;;  %v1862_v43 = vld [vmem:[%s2279_s1 + $0x108] sm:$0xff]  }
  0x1a   : > { %1678 = vmatpush3.bf16.msra.mxu1 %v1824_v12  ;;  %1621 = vmatprep.subr.bf16.mxu0 %v1825_v13  ;;  %v1845_v33 = vld [vmem:[%s2278_s0] ss:$20 sps:$4 sm:$0xff]   ;;  %v1847_v34 = vld [vmem:[%s2278_s0 + $0x4] ss:$20 sps:$4 sm:$0xff]   ;;  %v1848_v35 = vld [vmem:[%s2278_s0 + $0x8] ss:$20 sps:$4 sm:$0xff]  }
  0x1b   : > { %1679 = vmatprep.subr.bf16.mxu1 %v1826_v14  ;;  %804 = vmatprep.mubr.bf16.mxu0 %v1847_v34  ;;  %v1854_v39 = vld [vmem:[%s2278_s0 + $0x34] ss:$20 sps:$4 sm:$0xff]   ;;  %v1857_v41 = vld [vmem:[%s2278_s0 + $0x30] ss:$20 sps:$4 sm:$0xff]   ;;  %v1864_v47 = vld [vmem:[%s2278_s0 + $0x58] ss:$20 sps:$4 sm:$0xff]  }
  0x1c   : > { %v1856_v40 = vld [vmem:[%s2278_s0 + $0x28] ss:$20 sps:$4 sm:$0xff]   ;;  %v1871_v45 = vld [vmem:[%s2279_s1 + $0x110] sm:$0xff]   ;;  %v1867_v49 = vld [vmem:[%s2278_s0 + $0x84] ss:$20 sps:$4 sm:$0xff]  }
  0x1d   : > { %1622 = vmatpush3.bf16.msra.mxu0 %v1827_v15  ;;  %v1858_v42 = vld [vmem:[%s2278_s0 + $0x54] ss:$20 sps:$4 sm:$0xff]   ;;  %v1860_v44 = vld [vmem:[%s2278_s0 + $0x5c] ss:$20 sps:$4 sm:$0xff]   ;;  %v1869_v51 = vld [vmem:[%s2278_s0 + $0x78] ss:$20 sps:$4 sm:$0xff]  }
  0x1e   : > { %1680 = vmatpush3.bf16.msra.mxu1 %v1828_v16  ;;  %1623 = vmatprep.subr.bf16.mxu0 %v1829_v17  ;;  %v1863_v46 = vld [vmem:[%s2278_s0 + $0x50] ss:$20 sps:$4 sm:$0xff]   ;;  %v1884_v50 = vld [vmem:[%s2279_s1 + $0x118] sm:$0xff]   ;;  %v1870_v52 = vld [vmem:[%s2278_s0 + $0x80] ss:$20 sps:$4 sm:$0xff]  }
  0x1f   : > { %1681 = vmatprep.subr.bf16.mxu1 %v1830_v18  ;;  %v1865_v48 = vld [vmem:[%s2278_s0 + $0x7c] ss:$20 sps:$4 sm:$0xff]   ;;  %v1872_v53 = vld [vmem:[%s2278_s0 + $0xa4] ss:$20 sps:$4 sm:$0xff]   ;;  %v1874_v54 = vld [vmem:[%s2278_s0 + $0xac] ss:$20 sps:$4 sm:$0xff]  }
  0x20   : > { %v1876_v55 = vld [vmem:[%s2278_s0 + $0xa0] ss:$20 sps:$4 sm:$0xff]   ;;  %v1877_v56 = vld [vmem:[%s2278_s0 + $0xa8] ss:$20 sps:$4 sm:$0xff]   ;;  %v1883_v60 = vld [vmem:[%s2278_s0 + $0xd0] ss:$20 sps:$4 sm:$0xff]  }
  0x21   : > { %1624 = vmatpush3.bf16.msra.mxu0 %v1831_v19  ;;  %v1878_v57 = vld [vmem:[%s2278_s0 + $0xcc] ss:$20 sps:$4 sm:$0xff]   ;;  %v1880_v58 = vld [vmem:[%s2278_s0 + $0xd4] ss:$20 sps:$4 sm:$0xff]   ;;  %v1887_v62 = vld [vmem:[%s2278_s0 + $0xfc] ss:$20 sps:$4 sm:$0xff]  }
  0x22   : > { %1682 = vmatpush3.bf16.msra.mxu1 %v1832_v20  ;;  %1625 = vmatprep.subr.bf16.mxu0 %v1833_v21  ;;  %v1882_v59 = vld [vmem:[%s2278_s0 + $0xc8] ss:$20 sps:$4 sm:$0xff]   ;;  %v1889_v63 = vld [vmem:[%s2278_s0 + $0xf0] ss:$20 sps:$4 sm:$0xff]   ;;  %v1890_v0 = vld [vmem:[%s2278_s0 + $0xf8] ss:$20 sps:$4 sm:$0xff]  }
  0x23   : > { %1683 = vmatprep.subr.bf16.mxu1 %v1834_v22  ;;  %v1885_v61 = vld [vmem:[%s2278_s0 + $0xf4] ss:$20 sps:$4 sm:$0xff]   ;;  %v1891_v1 = vld [vmem:[%s2278_s0 + $0x10] ss:$20 sps:$4 sm:$0xff]   ;;  %v1893_v4 = vld [vmem:[%s2278_s0 + $0x38] ss:$20 sps:$4 sm:$0xff]  }
  0x24   : > { %v1892_v3 = vld [vmem:[%s2278_s0 + $0xb0] ss:$20 sps:$4 sm:$0xff]   ;;  %v1894_v5 = vld [vmem:[%s2278_s0 + $0xd8] ss:$20 sps:$4 sm:$0xff]   ;;  %v1895_v6 = vld [vmem:[%s2278_s0 + $0x60] ss:$20 sps:$4 sm:$0xff]  }
  0x25   : > { %1626 = vmatpush3.bf16.msra.mxu0 %v1835_v23  ;;  %v1896_v7 = vld [vmem:[%s2278_s0 + $0x100] ss:$20 sps:$4 sm:$0xff]   ;;  %v1897_v8 = vld [vmem:[%s2278_s0 + $0x88] ss:$20 sps:$4 sm:$0xff]  }
  0x26   : > { %1684 = vmatpush3.bf16.msra.mxu1 %v1836_v24  ;;  %1627 = vmatprep.subr.bf16.mxu0 %v1837_v25 }
  0x27   : > { %1685 = vmatprep.subr.bf16.mxu1 %v1838_v26 }
  0x29   : > { %1628 = vmatpush3.bf16.msra.mxu0 %v1839_v27 }
  0x2a   : > { %1686 = vmatpush3.bf16.msra.mxu1 %v1840_v28  ;;  %1629 = vmatprep.subr.bf16.mxu0 %v1841_v29 }
  0x2b   : > { %1687 = vmatprep.subr.bf16.mxu1 %v1842_v30 }
  0x2d   : > { %1630 = vmatpush3.bf16.msra.mxu0 %v1843_v31 }
  0x2e   : > { %1688 = vmatpush3.bf16.msra.mxu1 %v1844_v32  ;;  %1742 = vmatprep.subr.bf16.mxu0 %v1924_v2 }
  0x2f   : > { %1778 = vmatprep.subr.bf16.mxu1 %v1924_v2 }
  0x30   : > { %805 = vmatmul.mubr.bf16.vlgmr.msra.gmra.mrb[0].mxu0 %v1845_v33 }
  0x31   : > { %894 = vmatmul.mubr.bf16.vlgmr.msra.gmra.mrb[0].mxu1 %v1848_v35  ;;  %1743 = vmatpush3.bf16.msra.mxu0 %v1851_v37 }
  0x32   : > { %812 = vmatprep.mubr.bf16.mxu0 %v1852_v38  ;;  %1744 = vmatprep.subr.bf16.mxu0 %v1924_v2 }
  0x33   : > { %901 = vmatprep.mubr.bf16.mxu1 %v1854_v39  ;;  %1782 = vmatpush3.bf16.msra.mxu1 %v1851_v37 }
  0x34   : > { %1779 = vmatprep.subr.bf16.mxu1 %v1924_v2 }
  0x35   : > { %1745 = vmatpush3.bf16.msra.mxu0 %v1862_v43 }
  0x36   : > { %1746 = vmatprep.subr.bf16.mxu0 %v1924_v2 }
  0x37   : > { %1783 = vmatpush3.bf16.msra.mxu1 %v1862_v43 }
  0x38   : > { %813 = vmatmul.mubr.bf16.gmra.mrb[4].mxu0 %v1856_v40  ;;  %1780 = vmatprep.subr.bf16.mxu1 %v1924_v2 }
  0x39   : > { %902 = vmatmul.mubr.bf16.gmra.mrb[4].mxu1 %v1857_v41  ;;  %820 = vmatprep.mubr.bf16.mxu0 %v1858_v42 }
  0x3a   : > { %909 = vmatprep.mubr.bf16.mxu1 %v1860_v44  ;;  %1747 = vmatpush3.bf16.msra.mxu0 %v1871_v45 }
  0x3b   : > { %1784 = vmatpush3.bf16.msra.mxu1 %v1871_v45  ;;  %1748 = vmatprep.subr.bf16.mxu0 %v1924_v2 }
  0x3c   : > { %1781 = vmatprep.subr.bf16.mxu1 %v1924_v2 }
  0x3e   : > { %1749 = vmatpush3.bf16.msra.mxu0 %v1884_v50 }
  0x3f   : > { %1785 = vmatpush3.bf16.msra.mxu1 %v1884_v50 }
  0x40   : > { %821 = vmatmul.mubr.bf16.gmra.mrb[8].mxu0 %v1863_v46 }
  0x41   : > { %910 = vmatmul.mubr.bf16.gmra.mrb[8].mxu1 %v1864_v47  ;;  %828 = vmatprep.mubr.bf16.mxu0 %v1865_v48 }
  0x42   : > { %917 = vmatprep.mubr.bf16.mxu1 %v1867_v49 }
  0x48   : > { %829 = vmatmul.mubr.bf16.gmra.mrb[12].mxu0 %v1869_v51 }
  0x49   : > { %918 = vmatmul.mubr.bf16.gmra.mrb[12].mxu1 %v1870_v52  ;;  %836 = vmatprep.mubr.bf16.mxu0 %v1872_v53 }
  0x4a   : > { %925 = vmatprep.mubr.bf16.mxu1 %v1874_v54 }
  0x50   : > { %837 = vmatmul.mubr.bf16.gmra.mrb[16].mxu0 %v1876_v55 }
  0x51   : > { %926 = vmatmul.mubr.bf16.gmra.mrb[16].mxu1 %v1877_v56  ;;  %844 = vmatprep.mubr.bf16.mxu0 %v1878_v57 }
  0x52   : > { %933 = vmatprep.mubr.bf16.mxu1 %v1880_v58 }
  0x58   : > { %845 = vmatmul.mubr.bf16.gmra.mrb[20].mxu0 %v1882_v59 }
  0x59   : > { %934 = vmatmul.mubr.bf16.gmra.mrb[20].mxu1 %v1883_v60  ;;  %852 = vmatprep.mubr.bf16.mxu0 %v1885_v61 }
  0x5a   : > { %941 = vmatprep.mubr.bf16.mxu1 %v1887_v62 }
  0x60   : > { %853 = vmatmul.mubr.bf16.gmra.mrb[24].mxu0 %v1889_v63 }
  0x61   : > { %942 = vmatmul.mubr.bf16.gmra.mrb[24].mxu1 %v1890_v0  ;;  %1750 = vmatprep.mubr.msk.bf16.mxu0 %vm1925_vm0, %v1924_v2 }
  0x62   : > { %1766 = vmatprep.mubr.msk.bf16.mxu1 %vm1925_vm0, %v1924_v2 }
  0x68   : > { %1751 = vmatmul.mubr.msk.bf16.vlgmr.msra.gmra.mrb[28].mxu0 %vm750_vm1, %v1891_v1 }
  0x69   : > { %1767 = vmatmul.mubr.msk.bf16.vlgmr.msra.gmra.mrb[28].mxu1 %vm750_vm1, %v1892_v3  ;;  %1754 = vmatprep.mubr.msk.bf16.mxu0 %vm1925_vm0, %v1924_v2 }
  0x6a   : > { %1770 = vmatprep.mubr.msk.bf16.mxu1 %vm1925_vm0, %v1924_v2 }
  0x70   : > { %1755 = vmatmul.mubr.msk.bf16.gmra.mrb[32].mxu0 %vm750_vm1, %v1893_v4 }
  0x71   : > { %1771 = vmatmul.mubr.msk.bf16.gmra.mrb[32].mxu1 %vm750_vm1, %v1894_v5  ;;  %1758 = vmatprep.mubr.msk.bf16.mxu0 %vm1925_vm0, %v1924_v2 }
  0x72   : > { %1774 = vmatprep.mubr.msk.bf16.mxu1 %vm1925_vm0, %v1924_v2 }
  0x78   : > { %1759 = vmatmul.mubr.msk.bf16.gmra.mrb[36].mxu0 %vm750_vm1, %v1895_v6 }
  0x79   : > { %1775 = vmatmul.mubr.msk.bf16.gmra.mrb[36].mxu1 %vm750_vm1, %v1896_v7  ;;  %1762 = vmatprep.mubr.msk.bf16.mxu0 %vm1925_vm0, %v1924_v2 }
  0x80   : > { %1763 = vmatmul.mubr.msk.bf16.gmra.mrb[40].mxu0 %vm750_vm1, %v1897_v8 }
 0x103   : > { %v1631_v9 = vpop.f32.mrb[0].mxu0 }
 0x104   : > { %v1689_v10 = vpop.f32.mrb[0].mxu1  ;;  %v1632_v11 = vpop.f32.mrb[1].mxu0 }
 0x105   : > { %v1633_v12 = vadd.f32 %v1632_v11, %v1631_v9  ;;  %v1690_v13 = vpop.f32.mrb[1].mxu1  ;;  %v1634_v14 = vpop.f32.mrb[2].mxu0 }
 0x106   : > { %v1691_v15 = vadd.f32 %v1690_v13, %v1689_v10  ;;  %v1692_v16 = vpop.f32.mrb[2].mxu1  ;;  %v1635_v17 = vpop.f32.mrb[3].mxu0 }
 0x107   : > { %v1636_v18 = vadd.f32 %v1635_v17, %v1634_v14  ;;  %v1693_v19 = vpop.f32.mrb[3].mxu1 }
 0x108   : > { %v1694_v20 = vadd.f32 %v1693_v19, %v1692_v16  ;;  %v2216_v21 = vadd.f32 %v1691_v15, %v1633_v12 }
 0x10a   : > { %v2218_v2 = vadd.f32 %v1694_v20, %v1636_v18 }
 0x10b   : > { %v1637_v22 = vpop.f32.mrb[4].mxu0 }
 0x10c   : > { %v1695_v23 = vpop.f32.mrb[4].mxu1  ;;  %v1638_v24 = vpop.f32.mrb[5].mxu0 }
 0x10d   : > { %v1639_v25 = vadd.f32 %v1638_v24, %v1637_v22  ;;  %v1696_v26 = vpop.f32.mrb[5].mxu1  ;;  %v1640_v27 = vpop.f32.mrb[6].mxu0 }
 0x10e   : > { %v1697_v28 = vadd.f32 %v1696_v26, %v1695_v23  ;;  %v1698_v29 = vpop.f32.mrb[6].mxu1  ;;  %v1641_v30 = vpop.f32.mrb[7].mxu0 }
 0x10f   : > { %v1642_v31 = vadd.f32 %v1641_v30, %v1640_v27  ;;  %v1699_v32 = vpop.f32.mrb[7].mxu1 }
 0x110   : > { %v1700_v33 = vadd.f32 %v1699_v32, %v1698_v29  ;;  %v2220_v34 = vadd.f32 %v1697_v28, %v1639_v25 }
 0x112   : > { %v2222_v35 = vadd.f32 %v1700_v33, %v1642_v31 }
 0x113   : > { %v1643_v36 = vpop.f32.mrb[8].mxu0 }
 0x114   : > { %v1701_v37 = vpop.f32.mrb[8].mxu1  ;;  %v1644_v38 = vpop.f32.mrb[9].mxu0 }
 0x115   : > { %v1645_v39 = vadd.f32 %v1644_v38, %v1643_v36  ;;  %v1702_v40 = vpop.f32.mrb[9].mxu1  ;;  %v1646_v41 = vpop.f32.mrb[10].mxu0 }
 0x116   : > { %v1703_v42 = vadd.f32 %v1702_v40, %v1701_v37  ;;  %v1704_v43 = vpop.f32.mrb[10].mxu1  ;;  %v1647_v44 = vpop.f32.mrb[11].mxu0 }
 0x117   : > { %v1648_v45 = vadd.f32 %v1647_v44, %v1646_v41  ;;  %v1705_v46 = vpop.f32.mrb[11].mxu1 }
 0x118   : > { %v1706_v47 = vadd.f32 %v1705_v46, %v1704_v43  ;;  %v2224_v48 = vadd.f32 %v1703_v42, %v1645_v39 }
 0x11a   : > { %v2226_v49 = vadd.f32 %v1706_v47, %v1648_v45 }
 0x11b   : > { %v1649_v50 = vpop.f32.mrb[12].mxu0 }
 0x11c   : > { %v1707_v51 = vpop.f32.mrb[12].mxu1  ;;  %v1650_v52 = vpop.f32.mrb[13].mxu0 }
 0x11d   : > { %v1651_v53 = vadd.f32 %v1650_v52, %v1649_v50  ;;  %v1708_v54 = vpop.f32.mrb[13].mxu1  ;;  %v1652_v55 = vpop.f32.mrb[14].mxu0 }
 0x11e   : > { %v1709_v56 = vadd.f32 %v1708_v54, %v1707_v51  ;;  %v1710_v57 = vpop.f32.mrb[14].mxu1  ;;  %v1653_v58 = vpop.f32.mrb[15].mxu0 }
 0x11f   : > { %v1654_v59 = vadd.f32 %v1653_v58, %v1652_v55  ;;  %v1711_v60 = vpop.f32.mrb[15].mxu1 }
 0x120   : > { %v1712_v61 = vadd.f32 %v1711_v60, %v1710_v57  ;;  %v2228_v62 = vadd.f32 %v1709_v56, %v1651_v53 }
 0x122   : > { %v2230_v63 = vadd.f32 %v1712_v61, %v1654_v59 }
 0x123   : > { %v1655_v0 = vpop.f32.mrb[16].mxu0 }
 0x124   : > { %v1713_v1 = vpop.f32.mrb[16].mxu1  ;;  %v1656_v3 = vpop.f32.mrb[17].mxu0 }
 0x125   : > { %v1657_v4 = vadd.f32 %v1656_v3, %v1655_v0  ;;  %v1714_v5 = vpop.f32.mrb[17].mxu1  ;;  %v1658_v6 = vpop.f32.mrb[18].mxu0 }
 0x126   : > { %v1715_v7 = vadd.f32 %v1714_v5, %v1713_v1  ;;  %v1716_v8 = vpop.f32.mrb[18].mxu1  ;;  %v1659_v9 = vpop.f32.mrb[19].mxu0 }
 0x127   : > { %v1660_v10 = vadd.f32 %v1659_v9, %v1658_v6  ;;  %v1717_v11 = vpop.f32.mrb[19].mxu1 }
 0x128   : > { %v1718_v12 = vadd.f32 %v1717_v11, %v1716_v8  ;;  %v928_v13 = vadd.f32 %v1715_v7, %v1657_v4 }
 0x12a   : > { %v931_v14 = vadd.f32 %v1718_v12, %v1660_v10 }
 0x12b   : > { %v1661_v15 = vpop.f32.mrb[20].mxu0 }
 0x12c   : > { %v1719_v16 = vpop.f32.mrb[20].mxu1  ;;  %v1662_v17 = vpop.f32.mrb[21].mxu0 }
 0x12d   : > { %v1663_v18 = vadd.f32 %v1662_v17, %v1661_v15  ;;  %v1720_v19 = vpop.f32.mrb[21].mxu1  ;;  %v1664_v20 = vpop.f32.mrb[22].mxu0 }
 0x12e   : > { %v1721_v22 = vadd.f32 %v1720_v19, %v1719_v16  ;;  %v1722_v23 = vpop.f32.mrb[22].mxu1  ;;  %v1665_v24 = vpop.f32.mrb[23].mxu0 }
 0x12f   : > { %v1666_v25 = vadd.f32 %v1665_v24, %v1664_v20  ;;  %v1723_v26 = vpop.f32.mrb[23].mxu1 }
 0x130   : > { %v1724_v27 = vadd.f32 %v1723_v26, %v1722_v23  ;;  %v936_v28 = vadd.f32 %v1721_v22, %v1663_v18 }
 0x132   : > { %v939_v29 = vadd.f32 %v1724_v27, %v1666_v25 }
 0x133   : > { %v1667_v30 = vpop.f32.mrb[24].mxu0 }
 0x134   : > { %v1725_v31 = vpop.f32.mrb[24].mxu1  ;;  %v1668_v32 = vpop.f32.mrb[25].mxu0 }
 0x135   : > { %v1669_v33 = vadd.f32 %v1668_v32, %v1667_v30  ;;  %v1726_v36 = vpop.f32.mrb[25].mxu1  ;;  %v1670_v37 = vpop.f32.mrb[26].mxu0 }
 0x136   : > { %v1727_v38 = vadd.f32 %v1726_v36, %v1725_v31  ;;  %v1728_v39 = vpop.f32.mrb[26].mxu1  ;;  %v1671_v40 = vpop.f32.mrb[27].mxu0 }
 0x137   : > { %v1672_v41 = vadd.f32 %v1671_v40, %v1670_v37  ;;  %v1729_v42 = vpop.f32.mrb[27].mxu1 }
 0x138   : > { %v1730_v43 = vadd.f32 %v1729_v42, %v1728_v39  ;;  %v944_v44 = vadd.f32 %v1727_v38, %v1669_v33 }
 0x13a   : > { %v947_v45 = vadd.f32 %v1730_v43, %v1672_v41  ;;  %v1060_v43 = vld [vmem:[#allocation3] sm:$0x1] }
 0x13b   : > { %v984_v46 = vpop.f32.mrb[28].mxu0 }
 0x13c   : > { %v985_v47 = vadd.f32 %v984_v46, %v2216_v21  ;;  %v1016_v50 = vpop.f32.mrb[28].mxu1  ;;  %v1752_v51 = vpop.f32.mrb[29].mxu0 }
 0x13d   : > { %v1017_v52 = vadd.f32 %v1016_v50, %v928_v13  ;;  %v1768_v53 = vpop.f32.mrb[29].mxu1  ;;  %v987_v54 = vpop.f32.mrb[30].mxu0 }
 0x13e   : > { %1041 = vst [vmem:[#allocation2] sm:$0xff] %v985_v47  ;;  %v988_v55 = vadd.f32 %v987_v54, %v2218_v2  ;;  %v1019_v56 = vpop.f32.mrb[30].mxu1  ;;  %v1753_v57 = vpop.f32.mrb[31].mxu0 }
 0x13f   : > { %1049 = vst [vmem:[#allocation2 + $0x40] sm:$0xff] %v1017_v52  ;;  %v1020_v58 = vadd.f32 %v1019_v56, %v931_v14  ;;  %v1769_v59 = vpop.f32.mrb[31].mxu1 }
 0x140   : > { %1042 = vst [vmem:[#allocation2 + $0x8] sm:$0xff] %v988_v55  ;;  %v1061_v60 = vadd.f32 %v988_v55, %v985_v47 }
 0x141   : > { %1050 = vst [vmem:[#allocation2 + $0x48] sm:$0xff] %v1020_v58 }
 0x143   : > { %v992_v61 = vpop.f32.mrb[32].mxu0 }
 0x144   : > { %v993_v0 = vadd.f32 %v992_v61, %v2220_v34  ;;  %v1024_v21 = vpop.f32.mrb[32].mxu1  ;;  %v1756_v1 = vpop.f32.mrb[33].mxu0 }
 0x145   : > { %v1025_v3 = vadd.f32 %v1024_v21, %v936_v28  ;;  %v1772_v4 = vpop.f32.mrb[33].mxu1  ;;  %v995_v5 = vpop.f32.mrb[34].mxu0 }
 0x146   : > { %1043 = vst [vmem:[#allocation2 + $0x10] sm:$0xff] %v993_v0  ;;  %v1062_v6 = vadd.f32 %v1061_v60, %v993_v0  ;;  %v996_v2 = vadd.f32 %v995_v5, %v2222_v35  ;;  %v1027_v7 = vpop.f32.mrb[34].mxu1  ;;  %v1757_v8 = vpop.f32.mrb[35].mxu0 }
 0x147   : > { %1051 = vst [vmem:[#allocation2 + $0x50] sm:$0xff] %v1025_v3  ;;  %v1028_v9 = vadd.f32 %v1027_v7, %v939_v29  ;;  %v1773_v10 = vpop.f32.mrb[35].mxu1 }
 0x148   : > { %1044 = vst [vmem:[#allocation2 + $0x18] sm:$0xff] %v996_v2  ;;  %v1063_v11 = vadd.f32 %v1062_v6, %v996_v2 }
 0x149   : > { %1052 = vst [vmem:[#allocation2 + $0x58] sm:$0xff] %v1028_v9 }
 0x14b   : > { %v1000_v12 = vpop.f32.mrb[36].mxu0 }
 0x14c   : > { %v1001_v34 = vadd.f32 %v1000_v12, %v2224_v48  ;;  %v1032_v13 = vpop.f32.mrb[36].mxu1  ;;  %v1760_v14 = vpop.f32.mrb[37].mxu0 }
 0x14d   : > { %v1033_v15 = vadd.f32 %v1032_v13, %v944_v44  ;;  %v1776_v16 = vpop.f32.mrb[37].mxu1  ;;  %v1003_v17 = vpop.f32.mrb[38].mxu0 }
 0x14e   : > { %1045 = vst [vmem:[#allocation2 + $0x20] sm:$0xff] %v1001_v34  ;;  %v1064_v18 = vadd.f32 %v1063_v11, %v1001_v34  ;;  %v1004_v35 = vadd.f32 %v1003_v17, %v2226_v49  ;;  %v1035_v19 = vpop.f32.mrb[38].mxu1  ;;  %v1761_v20 = vpop.f32.mrb[39].mxu0 }
 0x14f   : > { %1053 = vst [vmem:[#allocation2 + $0x60] sm:$0xff] %v1033_v15  ;;  %v1036_v22 = vadd.f32 %v1035_v19, %v947_v45  ;;  %v1777_v23 = vpop.f32.mrb[39].mxu1 }
 0x150   : > { %1046 = vst [vmem:[#allocation2 + $0x28] sm:$0xff] %v1004_v35  ;;  %v1065_v24 = vadd.f32 %v1064_v18, %v1004_v35 }
 0x151   : > { %1054 = vst [vmem:[#allocation2 + $0x68] sm:$0xff] %v1036_v22 }
 0x153   : > { %v1008_v25 = vpop.f32.mrb[40].mxu0 }
 0x154   : > { %v1009_v48 = vadd.f32 %v1008_v25, %v2228_v62  ;;  %v1764_v26 = vpop.f32.mrb[41].mxu0 }
 0x155   : > { %v1011_v27 = vpop.f32.mrb[42].mxu0 }
 0x156   : > { %1047 = vst [vmem:[#allocation2 + $0x30] sm:$0xff] %v1009_v48  ;;  %v1066_v28 = vadd.f32 %v1065_v24, %v1009_v48  ;;  %v1012_v29 = vadd.f32 %v1011_v27, %v2230_v63  ;;  %v1765_v30 = vpop.f32.mrb[43].mxu0 }
 0x158   : > { %1048 = vst [vmem:[#allocation2 + $0x38] sm:$0xff] %v1012_v29  ;;  %v1067_v49 = vadd.f32 %v1066_v28, %v1012_v29 }
 0x15a   : > { %v1068_v31 = vadd.f32 %v1067_v49, %v1017_v52 }
 0x15c   : > { %v1069_v32 = vadd.f32 %v1068_v31, %v1020_v58 }
 0x15e   : > { %v1070_v33 = vadd.f32 %v1069_v32, %v1025_v3 }
 0x160   : > { %v1071_v36 = vadd.f32 %v1070_v33, %v1028_v9 }
 0x162   : > { %v1072_v37 = vadd.f32 %v1071_v36, %v1033_v15 }
 0x164   : > { %v1073_v38 = vadd.f32 %v1072_v37, %v1036_v22 }
 0x166   : > { %v1074_v39 = vrot.slane %v1073_v38, 4 }
 0x168   : > { %v1075_v40 = vadd.f32 %v1074_v39, %v1073_v38 }
 0x16a   : > { %v1076_v41 = vrot.slane %v1075_v40, 2 }
 0x16c   : > { %v1077_v42 = vadd.f32 %v1076_v41, %v1075_v40 }
 0x16e   : > { %v1078_v62 = vrot.slane %v1077_v42, 1 }
 0x170   : > { %v1079_v44 = vadd.f32 %v1078_v62, %v1077_v42 }
 0x172   : > { %v1080_v45 = vadd.f32 %v1079_v44, %v1060_v43 }
 0x174   : > { %1081 = vst [vmem:[#allocation3] sm:$0x1] %v1080_v45 }
 0x175 PF: > { %p1540_p5 = scmp.ne.s32.totalorder %s1914_s15, 1 }
 0x176   : > { %v1094_v46 = vlaneseq (!%p1540_p5)  ;;  %v1926_v47 = vmov (!%p1540_p5), 0.0   ;;  %v1139_v53 = vld [vmem:[#allocation2] sm:$0xff] (!%p1540_p5)  ;;  %v1140_v54 = vld [vmem:[#allocation2 + $0x8] sm:$0xff] (!%p1540_p5)  ;;  %v1141_v55 = vld [vmem:[#allocation2 + $0x10] sm:$0xff] (!%p1540_p5) }
 0x177   : > { %1085 = sbr.rel (%p1540_p5) target bundleno = 427 (0x1ab), region = 48  ;;  %1090 = vst [vmem:[#allocation4] sm:$0x1] (!%p1540_p5), %v1926_v47  ;;  %v1142_v57 = vld [vmem:[#allocation2 + $0x18] sm:$0xff] (!%p1540_p5)  ;;  %v1143_v61 = vld [vmem:[#allocation2 + $0x20] sm:$0xff] (!%p1540_p5)  ;;  %v1144_v21 = vld [vmem:[#allocation2 + $0x28] sm:$0xff] (!%p1540_p5) }
 0x178   : > { %v1095_v51 = vshrl.u32 (!%p1540_p5), %v1094_v46, 7  ;;  %v1145_v6 = vld [vmem:[#allocation2 + $0x30] sm:$0xff] (!%p1540_p5)  ;;  %v1146_v9 = vld [vmem:[#allocation2 + $0x38] sm:$0xff] (!%p1540_p5)  ;;  %v1147_v34 = vld [vmem:[#allocation2 + $0x40] sm:$0xff] (!%p1540_p5) }
 0x179   : > { %v1148_v16 = vld [vmem:[#allocation2 + $0x48] sm:$0xff] (!%p1540_p5)  ;;  %v1149_v19 = vld [vmem:[#allocation2 + $0x50] sm:$0xff] (!%p1540_p5)  ;;  %v1151_v22 = vld [vmem:[#allocation2 + $0x60] sm:$0xff] (!%p1540_p5) }
 0x17a   : > { %v1156_v52 = vsub.s32 (!%p1540_p5), 0, %v1095_v51  ;;  %v1107_v20 = vadd.s32 (!%p1540_p5), 96, %v1095_v51  ;;  %v1150_v48 = vld [vmem:[#allocation2 + $0x58] sm:$0xff] (!%p1540_p5) }
 0x17b   : > { %v1091_v63 = vld [vmem:[#allocation3] sm:$0x1] (!%p1540_p5) }
 0x17c   : > { %v1092_v50 = vmul.f32 (!%p1540_p5), 0.010204081, %v1091_v63  ;;  %vm1136_vm2 = vcmp.lt.s32.totalorder (!%p1540_p5), %v1107_v20, 98 }
 0x17e   : > { %v1157_v56 = vrot.slane %v1092_v50, %v1156_v52  ;;  %v1187_v46 = vld [vmem:[#allocation4] sm:$0x1] }
 0x180   : > { %v1159_v58 = vsub.f32 %v1139_v53, %v1157_v56  ;;  %v1160_v59 = vsub.f32 %v1140_v54, %v1157_v56  ;;  %v1161_v60 = vsub.f32 %v1141_v55, %v1157_v56  ;;  %v1162_v0 = vsub.f32 %v1142_v57, %v1157_v56 }
 0x181   : > { %v1163_v4 = vsub.f32 %v1143_v61, %v1157_v56  ;;  %v1164_v2 = vsub.f32 %v1144_v21, %v1157_v56  ;;  %v1165_v10 = vsub.f32 %v1145_v6, %v1157_v56  ;;  %v1166_v13 = vsub.f32 %v1146_v9, %v1157_v56 }
 0x182   : > { %v1188_v1 = vmul.f32 %v1159_v58, %v1159_v58  ;;  %v1189_v3 = vmul.f32 %v1160_v59, %v1160_v59  ;;  %v1190_v5 = vmul.f32 %v1161_v60, %v1161_v60  ;;  %v1191_v7 = vmul.f32 %v1162_v0, %v1162_v0 }
 0x183   : > { %v1192_v11 = vmul.f32 %v1163_v4, %v1163_v4  ;;  %v1193_v14 = vmul.f32 %v1164_v2, %v1164_v2  ;;  %v1167_v17 = vsub.f32 %v1147_v34, %v1157_v56  ;;  %v1194_v18 = vmul.f32 %v1165_v10, %v1165_v10 }
 0x184   : > { %v1202_v8 = vadd.f32 %v1189_v3, %v1188_v1  ;;  %v1168_v23 = vsub.f32 %v1148_v16, %v1157_v56  ;;  %v1195_v24 = vmul.f32 %v1166_v13, %v1166_v13  ;;  %v1169_v26 = vsub.f32 %v1149_v19, %v1157_v56 }
 0x185   : > { %v1196_v27 = vmul.f32 %v1167_v17, %v1167_v17  ;;  %v1171_v29 = vsub.f32 %v1151_v22, %v1157_v56  ;;  %v1170_v30 = vsub.f32 %v1150_v48, %v1157_v56 }
 0x186   : > { %v1203_v12 = vadd.f32 %v1202_v8, %v1190_v5  ;;  %v1197_v49 = vmul.f32 %v1168_v23, %v1168_v23  ;;  %v1198_v32 = vmul.f32 %v1169_v26, %v1169_v26 }
 0x187   : > { %v1185_v36 = vsel %vm1136_vm2, %v1171_v29, 0.0  ;;  %v1199_v37 = vmul.f32 %v1170_v30, %v1170_v30 }
 0x188   : > { %v1204_v15 = vadd.f32 %v1203_v12, %v1191_v7  ;;  %v1200_v39 = vmul.f32 %v1185_v36, %v1185_v36 }
 0x18a   : > { %v1205_v35 = vadd.f32 %v1204_v15, %v1192_v11 }
 0x18c   : > { %v1206_v25 = vadd.f32 %v1205_v35, %v1193_v14 }
 0x18e   : > { %v1207_v28 = vadd.f32 %v1206_v25, %v1194_v18 }
 0x190   : > { %v1208_v31 = vadd.f32 %v1207_v28, %v1195_v24 }
 0x192   : > { %v1209_v33 = vadd.f32 %v1208_v31, %v1196_v27 }
 0x194   : > { %v1210_v38 = vadd.f32 %v1209_v33, %v1197_v49 }
 0x196   : > { %v1211_v40 = vadd.f32 %v1210_v38, %v1198_v32 }
 0x198   : > { %v1212_v41 = vadd.f32 %v1211_v40, %v1199_v37 }
 0x19a   : > { %v1213_v42 = vadd.f32 %v1212_v41, %v1200_v39 }
 0x19c   : > { %v1215_v62 = vrot.slane %v1213_v42, 4 }
 0x19e   : > { %v1216_v43 = vadd.f32 %v1215_v62, %v1213_v42 }
 0x1a0   : > { %v1217_v44 = vrot.slane %v1216_v43, 2 }
 0x1a2   : > { %v1218_v45 = vadd.f32 %v1217_v44, %v1216_v43 }
 0x1a4   : > { %v1219_v63 = vrot.slane %v1218_v45, 1 }
 0x1a6   : > { %v1220_v47 = vadd.f32 %v1219_v63, %v1218_v45 }
 0x1a8   : > { %v1221_v50 = vadd.f32 %v1220_v47, %v1187_v46 }
 0x1aa   : > { %1222 = vst [vmem:[#allocation4] sm:$0x1] %v1221_v50 }
 0x1ab PF: > { %p1541_p6 = scmp.ne.s32.totalorder %s1914_s15, 2 }
 0x1ac   : > { %v1255_v54 = vlaneseq (!%p1541_p6)  ;;  %v1227_v56 = vld [vmem:[#allocation3] sm:$0x1] (!%p1541_p6)  ;;  %v1231_v57 = vld [vmem:[%s2280_s2] sm:$0x1] (!%p1541_p6)  ;;  %v1241_v1 = vld [vmem:[#allocation2 + $0x8] sm:$0xff] (!%p1541_p6) }
 0x1ad   : > { %1226 = sbr.rel (%p1541_p6) target bundleno = 470 (0x1d6), region = 56  ;;  %v1228_v58 = vmul.f32 (!%p1541_p6), 0.010204081, %v1227_v56  ;;  %v1235_v0 = vld [vmem:[%s2281_s3] sm:$0x1] (!%p1541_p6)  ;;  %v1242_v3 = vld [vmem:[#allocation2 + $0x10] sm:$0xff] (!%p1541_p6) }
 0x1ae   : > { %v1256_v55 = vshrl.u32 (!%p1541_p6), %v1255_v54, 7  ;;  %v1240_v21 = vld [vmem:[#allocation2] sm:$0xff] (!%p1541_p6)  ;;  %v1243_v4 = vld [vmem:[#allocation2 + $0x18] sm:$0xff] (!%p1541_p6)  ;;  %v1245_v7 = vld [vmem:[#allocation2 + $0x28] sm:$0xff] (!%p1541_p6) }
 0x1af   : > { %v1244_v5 = vld [vmem:[#allocation2 + $0x20] sm:$0xff] (!%p1541_p6)  ;;  %v1246_v8 = vld [vmem:[#allocation2 + $0x30] sm:$0xff] (!%p1541_p6)  ;;  %v1247_v9 = vld [vmem:[#allocation2 + $0x38] sm:$0xff] (!%p1541_p6) }
 0x1b0   : > { %v1257_v59 = vsub.s32 (!%p1541_p6), 0, %v1256_v55  ;;  %v1248_v10 = vld [vmem:[#allocation2 + $0x40] sm:$0xff] (!%p1541_p6)  ;;  %v1249_v11 = vld [vmem:[#allocation2 + $0x48] sm:$0xff] (!%p1541_p6)  ;;  %v1250_v12 = vld [vmem:[#allocation2 + $0x50] sm:$0xff] (!%p1541_p6) }
 0x1b1   : > { %v1229_v51 = vld [vmem:[#allocation4] sm:$0x1] (!%p1541_p6)  ;;  %v1251_v16 = vld [vmem:[#allocation2 + $0x58] sm:$0xff] (!%p1541_p6)  ;;  %v1252_v17 = vld [vmem:[#allocation2 + $0x60] sm:$0xff] (!%p1541_p6) }
 0x1b2   : > { %v1230_v52 = vmul.f32 (!%p1541_p6), 0.010204081, %v1229_v51  ;;  %v1253_v18 = vld [vmem:[#allocation2 + $0x68] sm:$0xff] (!%p1541_p6) }
 0x1b4   : > { %v1232_v53 = vadd.f32 1e-05, %v1230_v52 }
 0x1b6   : > { %1898 = vrsqrt.f32 %v1232_v53 }
 0x1c0   : > { %v1899_v60 = vpop.eup %1898 }
 0x1c1   : > { %v1234_v61 = vmul.f32 %v1899_v60, %v1231_v57 }
 0x1c3   : > { %v1236_v6 = vmul.f32 %v1234_v61, %v1228_v58  ;;  %v1258_v2 = vrot.slane %v1234_v61, %v1257_v59 }
 0x1c5   : > { %v1237_v34 = vsub.f32 %v1235_v0, %v1236_v6  ;;  %v1260_v13 = vmul.f32 %v1258_v2, %v1240_v21  ;;  %v1261_v14 = vmul.f32 %v1258_v2, %v1241_v1  ;;  %v1262_v15 = vmul.f32 %v1258_v2, %v1242_v3 }
 0x1c6   : > { %v1263_v35 = vmul.f32 %v1258_v2, %v1243_v4  ;;  %v1264_v19 = vmul.f32 %v1258_v2, %v1244_v5  ;;  %v1265_v20 = vmul.f32 %v1258_v2, %v1245_v7  ;;  %v1266_v22 = vmul.f32 %v1258_v2, %v1246_v8 }
 0x1c7   : > { %v1278_v23 = vrot.slane %v1237_v34, %v1257_v59  ;;  %v1267_v24 = vmul.f32 %v1258_v2, %v1247_v9  ;;  %v1268_v25 = vmul.f32 %v1258_v2, %v1248_v10  ;;  %v1269_v48 = vmul.f32 %v1258_v2, %v1249_v11 }
 0x1c8   : > { %v1270_v26 = vmul.f32 %v1258_v2, %v1250_v12  ;;  %v1271_v27 = vmul.f32 %v1258_v2, %v1251_v16  ;;  %v1272_v28 = vmul.f32 %v1258_v2, %v1252_v17  ;;  %v1273_v29 = vmul.f32 %v1258_v2, %v1253_v18 }
 0x1c9   : > { %v1280_v30 = vadd.f32 %v1278_v23, %v1260_v13  ;;  %v1281_v49 = vadd.f32 %v1278_v23, %v1261_v14  ;;  %v1282_v31 = vadd.f32 %v1278_v23, %v1262_v15  ;;  %v1283_v32 = vadd.f32 %v1278_v23, %v1263_v35 }
 0x1ca   : > { %v1284_v33 = vadd.f32 %v1278_v23, %v1264_v19  ;;  %v1285_v36 = vadd.f32 %v1278_v23, %v1265_v20  ;;  %v1286_v37 = vadd.f32 %v1278_v23, %v1266_v22  ;;  %v1287_v38 = vadd.f32 %v1278_v23, %v1267_v24 }
 0x1cb   : > { %v1294_v39 = vmax.f32 %v1280_v30, 0.0  ;;  %v1295_v40 = vmax.f32 %v1281_v49, 0.0  ;;  %v1296_v41 = vmax.f32 %v1282_v31, 0.0  ;;  %v1297_v42 = vmax.f32 %v1283_v32, 0.0 }
 0x1cc   : > { %v1298_v62 = vmax.f32 %v1284_v33, 0.0  ;;  %v1299_v43 = vmax.f32 %v1285_v36, 0.0  ;;  %v1300_v44 = vmax.f32 %v1286_v37, 0.0  ;;  %v1301_v45 = vmax.f32 %v1287_v38, 0.0 }
 0x1cd   : > { %v1577_v63 = vpack.c.bf16 %v1295_v40, %v1294_v39  ;;  %v1582_v46 = vpack.c.bf16 %v1297_v42, %v1296_v41  ;;  %v1288_v47 = vadd.f32 %v1278_v23, %v1268_v25  ;;  %v1289_v50 = vadd.f32 %v1278_v23, %v1269_v48 }
 0x1ce   : > { %v1587_v51 = vpack.c.bf16 %v1299_v43, %v1298_v62  ;;  %v1592_v52 = vpack.c.bf16 %v1301_v45, %v1300_v44  ;;  %v1290_v53 = vadd.f32 %v1278_v23, %v1270_v26  ;;  %v1291_v54 = vadd.f32 %v1278_v23, %v1271_v27 }
 0x1cf   : > { %1578 = vst [vmem:[%s2282_s4] sm:$0xff] %v1577_v63   ;;  %1609 = vst [vmem:[%s2282_s4 + $0x8] sm:$0xff] %v1582_v46   ;;  %v1302_v55 = vmax.f32 %v1288_v47, 0.0  ;;  %v1303_v56 = vmax.f32 %v1289_v50, 0.0  ;;  %v1292_v57 = vadd.f32 %v1278_v23, %v1272_v28  ;;  %v1293_v58 = vadd.f32 %v1278_v23, %v1273_v29 }
 0x1d0   : > { %1610 = vst [vmem:[%s2282_s4 + $0x10] sm:$0xff] %v1587_v51   ;;  %1611 = vst [vmem:[%s2282_s4 + $0x18] sm:$0xff] %v1592_v52   ;;  %v1304_v59 = vmax.f32 %v1290_v53, 0.0  ;;  %v1305_v60 = vmax.f32 %v1291_v54, 0.0 }
 0x1d1   : > { %v1597_v61 = vpack.c.bf16 %v1303_v56, %v1302_v55  ;;  %v1306_v0 = vmax.f32 %v1292_v57, 0.0  ;;  %v1307_v21 = vmax.f32 %v1293_v58, 0.0 }
 0x1d2   : > { %v1602_v1 = vpack.c.bf16 %v1305_v60, %v1304_v59 }
 0x1d3   : > { %1612 = vst [vmem:[%s2282_s4 + $0x20] sm:$0xff] %v1597_v61   ;;  %v1607_v3 = vpack.c.bf16 %v1307_v21, %v1306_v0 }
 0x1d4   : > { %1613 = vst [vmem:[%s2282_s4 + $0x28] sm:$0xff] %v1602_v1  }
 0x1d5   : > { %1614 = vst [vmem:[%s2282_s4 + $0x30] sm:$0xff] %v1607_v3  }
 0x1d6 PF: > { %s14_s17 = sadd.s32 1, %s1922_s17   ;;  %s2283_s15 = smov %s1918_s16 }
 0x1d7   : > { %p11_p7 = scmp.ge.s32.totalorder %s14_s17, 5   ;;  %s2284_s16 = smov %s2286_s18 }
 0x1d9   :  { %13 = sbr.rel (!%p11_p7) target bundleno = 2 (0x2), region = 89 }

// kernel: forward.7
= control target key start
LH: loop header
LB: loop body
LE: loop exit
PB: predicated region body
PF: predicated region fallthrough
CT: control target
= control target key end

     0   :  { %s4355_s18 = smov 0   ;;  %s4357_s19 = smov 0   ;;  %s4999_s0 = inlined_call_operand.vmem [shape: bf16[16,3200], index: 0, kind: input, shape index: {}]   ;;  %s5000_s1 = inlined_call_operand.vmem [shape: bf16[3200,1024], index: 1, kind: input, shape index: {}]   ;;  %s5001_s2 = inlined_call_operand.vmem [shape: f32[1,1024], index: 2, kind: input, shape index: {}]   ;;  %s5002_s3 = inlined_call_operand.vmem [shape: bf16[1024,128], index: 3, kind: input, shape index: {}]   ;;  %s5003_s4 = inlined_call_operand.vmem [shape: f32[1,128], index: 4, kind: input, shape index: {}]   ;;  %s5004_s5 = inlined_call_operand.vmem [shape: f32[16,128], index: 5, kind: output, shape index: {}]  }
   0x1   :  { %s4359_s20 = smov 0  }
   0x2 LB: > { %s4371_s21 = sadd.s32 4294967295, %s4321_s20   ;;  %s4374_s22 = sadd.s32 1, %s4321_s20   ;;  %s4321_s20 = sphi %s4359_s20, %s5007_s20   ;;  %s4317_s19 = sphi %s4357_s19, %s5006_s19   ;;  %s4313_s18 = sphi %s4355_s18, %s5005_s18  }
   0x3   : > { %s19_s23 = ssub.s32 %s4321_s20, %s4374_s22  ;;  %s22_s24 = sadd.s32 1, %s4317_s19 }
   0x4   : > { %p20_p0 = scmp.eq.s32.totalorder %s19_s23, 0  ;;  %p29_p1 = scmp.ne.s32.totalorder %s4317_s19, %s4313_s18 }
   0x5   : > { %p30_p2 = scmp.eq.s32.totalorder %s4321_s20, 0  ;;  %p3673_p4 = scmp.ge.s32.totalorder %s4321_s20, 5 }
   0x6   : > { %s4383_s25 = scalar_select %p20_p0, %s4317_s19, %s22_s24  }
   0x7   : > { %p31_p3 = por %p30_p2, %p29_p1  ;;  %174 = sbr.rel (%p3673_p4) target bundleno = 22 (0x16), region = 28 }
   0xe   : > { %177 = sbr.rel (!%p31_p3) target bundleno = 22 (0x16), region = 32  ;;  %s179_s26 = sand.u32 (%p31_p3), 1, %s4317_s19  }
   0xf   : > { %s4076_s27 = smul.u32 (%p31_p3), 20, %s4321_s20 }
  0x10   : > { %s4198_s28 = smul.u32 (%p31_p3), 40, %s179_s26 }
  0x11   : > { %s184_s6 = scalar_lea.vmem (%p31_p3), %s4999_s0, %s4076_s27 }
  0x12   : > { %v199_v0 = vld [vmem:[%s184_s6] sm:$0xff] (%p31_p3)  ;;  %v201_v1 = vld [vmem:[%s184_s6 + $0x8] sm:$0xff] (%p31_p3)  ;;  %s181_s7 = scalar_lea.vmem (%p31_p3), [#allocation3], %s4198_s28  ;;  %v3675_v4 = vld [vmem:[%s184_s6 + $0x10] sm:$0xf] (%p31_p3) }
  0x13   : > { %v203_v2 = vld [vmem:[%s184_s6 + $0x64] sm:$0xff] (%p31_p3)  ;;  %200 = vst [vmem:[%s181_s7] sm:$0xff] (%p31_p3), %v199_v0  ;;  %202 = vst [vmem:[%s181_s7 + $0x8] sm:$0xff] (%p31_p3), %v201_v1  ;;  %v205_v3 = vld [vmem:[%s184_s6 + $0x6c] sm:$0xff] (%p31_p3) }
  0x14   : > { %204 = vst [vmem:[%s181_s7 + $0x14] sm:$0xff] (%p31_p3), %v203_v2  ;;  %v3677_v5 = vld [vmem:[%s184_s6 + $0x74] sm:$0xf] (%p31_p3)  ;;  %206 = vst [vmem:[%s181_s7 + $0x1c] sm:$0xff] (%p31_p3), %v205_v3 }
  0x15   : > { %3676 = vst [vmem:[%s181_s7 + $0x10] sm:$0xf] %v3675_v4  ;;  %3678 = vst [vmem:[%s181_s7 + $0x24] sm:$0xf] %v3677_v5 }
  0x16 PF: > { %p3679_p5 = scmp.ge.s32.totalorder %s4321_s20, 1  ;;  %p232_p6 = scmp.lt.s32.totalorder %s4321_s20, 6 }
  0x18   : > { %p233_p7 = pnand %p3679_p5, %p232_p6 }
  0x19   : > { %s239_s8 = sand.u32 (!%p233_p7), 1, %s4313_s18   ;;  %s268_s9 = smul.u32 (!%p233_p7), 80, %s4371_s21 }
  0x1a   : > { %236 = sbr.rel (%p233_p7) target bundleno = 993 (0x3e1), region = 62  ;;  %p3682_p9 = scmp.ne.s32.totalorder (!%p233_p7), %s4371_s21, 0 }
  0x1b   : > { %s4199_s10 = smul.u32 (!%p233_p7), 40, %s239_s8  ;;  %p269_p8 = scmp.lt.s32.totalorder (!%p233_p7), %s268_s9, 399 }
  0x1d   : > { %s4400_s15 = scalar_lea.vmem (!%p233_p7), [#allocation3], %s4199_s10 }
  0x21   : > { %s5009_s9 = smov (!%p269_p8, %s268_s9), 399  ;;  %279 = sbr.rel (%p3682_p9) target bundleno = 43 (0x2b), region = 70 }
  0x22   : > { %s4077_s11 = sshll.u32 %s5009_s9, 5  ;;  %v4323_v6 = vmov (!%p3682_p9), 0.0  }
  0x23   : > { %s4398_s14 = scalar_lea.vmem %s5000_s1, %s4077_s11  ;;  %280 = vst [vmem:[#allocation2] sm:$0xff] (!%p3682_p9), %v4323_v6  ;;  %281 = vst [vmem:[#allocation2 + $0x8] sm:$0xff] (!%p3682_p9), %v4323_v6 }
  0x24   : > { %282 = vst [vmem:[#allocation2 + $0x10] sm:$0xff] (!%p3682_p9), %v4323_v6  ;;  %283 = vst [vmem:[#allocation2 + $0x18] sm:$0xff] (!%p3682_p9), %v4323_v6 }
  0x25   : > { %284 = vst [vmem:[#allocation2 + $0x20] sm:$0xff] (!%p3682_p9), %v4323_v6  ;;  %285 = vst [vmem:[#allocation2 + $0x28] sm:$0xff] (!%p3682_p9), %v4323_v6 }
  0x26   : > { %286 = vst [vmem:[#allocation2 + $0x30] sm:$0xff] (!%p3682_p9), %v4323_v6  ;;  %287 = vst [vmem:[#allocation2 + $0x38] sm:$0xff] (!%p3682_p9), %v4323_v6 }
  0x27   : > { %288 = vst [vmem:[#allocation2 + $0x40] sm:$0xff] (!%p3682_p9), %v4323_v6  ;;  %289 = vst [vmem:[#allocation2 + $0x48] sm:$0xff] (!%p3682_p9), %v4323_v6 }
  0x28   : > { %290 = vst [vmem:[#allocation2 + $0x50] sm:$0xff] %v4323_v6  ;;  %291 = vst [vmem:[#allocation2 + $0x58] sm:$0xff] %v4323_v6 }
  0x29   : > { %292 = vst [vmem:[#allocation2 + $0x60] sm:$0xff] %v4323_v6  ;;  %293 = vst [vmem:[#allocation2 + $0x68] sm:$0xff] %v4323_v6 }
  0x2a   : > { %294 = vst [vmem:[#allocation2 + $0x70] sm:$0xff] %v4323_v6  ;;  %295 = vst [vmem:[#allocation2 + $0x78] sm:$0xff] %v4323_v6 }
  0x2b PF: > { %v318_v7 = vld [vmem:[%s4398_s14] sm:$0xff]  ;;  %v319_v9 = vld [vmem:[%s4398_s14 + $0x8] sm:$0xff]  ;;  %p4008_p10 = scmp.ne.s32.totalorder %s4371_s21, 4 }
  0x2c   : > { %v322_v8 = vld [vmem:[%s4398_s14 + $0x20] sm:$0xff]  ;;  %v323_v11 = vld [vmem:[%s4398_s14 + $0x28] sm:$0xff] }
  0x2d   : > { %v3689_v10 = vcombine.high %v318_v7, %v322_v8  ;;  %v3688_v12 = vcombine.low %v318_v7, %v322_v8  ;;  %v326_v13 = vld [vmem:[%s4398_s14 + $0x40] sm:$0xff]  ;;  %v3691_v15 = vcombine.high %v319_v9, %v323_v11  ;;  %v3690_v16 = vcombine.low %v319_v9, %v323_v11  ;;  %v327_v18 = vld [vmem:[%s4398_s14 + $0x48] sm:$0xff] }
  0x2e   : > { %v330_v14 = vld [vmem:[%s4398_s14 + $0x60] sm:$0xff]  ;;  %v331_v19 = vld [vmem:[%s4398_s14 + $0x68] sm:$0xff] }
  0x2f   : > { %v3697_v17 = vcombine.high %v326_v13, %v330_v14  ;;  %v334_v20 = vld [vmem:[%s4398_s14 + $0x80] sm:$0xff]  ;;  %2264 = vmatprep.subr.bf16.mxu0 %v3689_v10  ;;  %v3699_v21 = vcombine.high %v327_v18, %v331_v19  ;;  %v335_v23 = vld [vmem:[%s4398_s14 + $0x88] sm:$0xff]  ;;  %2393 = vmatprep.subr.bf16.mxu1 %v3691_v15  ;;  %v3696_v25 = vcombine.low %v326_v13, %v330_v14 }
  0x30   : > { %v338_v22 = vld [vmem:[%s4398_s14 + $0xa0] sm:$0xff]  ;;  %v339_v24 = vld [vmem:[%s4398_s14 + $0xa8] sm:$0xff]  ;;  %2265 = vmatpush1.bf16.msra.mxu0 %v3688_v12  ;;  %2394 = vmatpush1.bf16.msra.mxu1 %v3690_v16  ;;  %v3698_v26 = vcombine.low %v327_v18, %v331_v19 }
  0x31   : > { %2266 = vmatprep.subr.bf16.mxu0 %v3697_v17  ;;  %v3705_v27 = vcombine.high %v334_v20, %v338_v22  ;;  %2395 = vmatprep.subr.bf16.mxu1 %v3699_v21  ;;  %v3707_v28 = vcombine.high %v335_v23, %v339_v24  ;;  %v342_v29 = vld [vmem:[%s4398_s14 + $0xc0] sm:$0xff]  ;;  %v343_v31 = vld [vmem:[%s4398_s14 + $0xc8] sm:$0xff]  ;;  %v3704_v33 = vcombine.low %v334_v20, %v338_v22 }
  0x32   : > { %v346_v30 = vld [vmem:[%s4398_s14 + $0xe0] sm:$0xff]  ;;  %v347_v32 = vld [vmem:[%s4398_s14 + $0xe8] sm:$0xff]  ;;  %v3706_v34 = vcombine.low %v335_v23, %v339_v24 }
  0x33   : > { %v3713_v35 = vcombine.high %v342_v29, %v346_v30  ;;  %v3715_v36 = vcombine.high %v343_v31, %v347_v32  ;;  %v350_v37 = vld [vmem:[%s4398_s14 + $0x100] sm:$0xff]  ;;  %v351_v39 = vld [vmem:[%s4398_s14 + $0x108] sm:$0xff]  ;;  %v3712_v41 = vcombine.low %v342_v29, %v346_v30  ;;  %v3714_v42 = vcombine.low %v343_v31, %v347_v32 }
  0x34   : > { %2267 = vmatpush1.bf16.msra.mxu0 %v3696_v25  ;;  %2396 = vmatpush1.bf16.msra.mxu1 %v3698_v26  ;;  %v354_v38 = vld [vmem:[%s4398_s14 + $0x120] sm:$0xff]  ;;  %v355_v40 = vld [vmem:[%s4398_s14 + $0x128] sm:$0xff] }
  0x35   : > { %2268 = vmatprep.subr.bf16.mxu0 %v3705_v27  ;;  %2397 = vmatprep.subr.bf16.mxu1 %v3707_v28  ;;  %v3721_v43 = vcombine.high %v350_v37, %v354_v38  ;;  %v3723_v44 = vcombine.high %v351_v39, %v355_v40  ;;  %v358_v45 = vld [vmem:[%s4398_s14 + $0x140] sm:$0xff]  ;;  %v359_v47 = vld [vmem:[%s4398_s14 + $0x148] sm:$0xff]  ;;  %v3720_v49 = vcombine.low %v350_v37, %v354_v38 }
  0x36   : > { %v362_v46 = vld [vmem:[%s4398_s14 + $0x160] sm:$0xff]  ;;  %v363_v48 = vld [vmem:[%s4398_s14 + $0x168] sm:$0xff]  ;;  %v3722_v50 = vcombine.low %v351_v39, %v355_v40 }
  0x37   : > { %v3729_v51 = vcombine.high %v358_v45, %v362_v46  ;;  %v3731_v52 = vcombine.high %v359_v47, %v363_v48  ;;  %v366_v53 = vld [vmem:[%s4398_s14 + $0x180] sm:$0xff]  ;;  %v367_v55 = vld [vmem:[%s4398_s14 + $0x188] sm:$0xff]  ;;  %v3728_v57 = vcombine.low %v358_v45, %v362_v46  ;;  %v3730_v58 = vcombine.low %v359_v47, %v363_v48 }
  0x38   : > { %2269 = vmatpush1.bf16.msra.mxu0 %v3704_v33  ;;  %2398 = vmatpush1.bf16.msra.mxu1 %v3706_v34  ;;  %v370_v54 = vld [vmem:[%s4398_s14 + $0x1a0] sm:$0xff]  ;;  %v371_v56 = vld [vmem:[%s4398_s14 + $0x1a8] sm:$0xff] }
  0x39   : > { %2270 = vmatprep.subr.bf16.mxu0 %v3713_v35  ;;  %2399 = vmatprep.subr.bf16.mxu1 %v3715_v36  ;;  %v3737_v59 = vcombine.high %v366_v53, %v370_v54  ;;  %v3739_v60 = vcombine.high %v367_v55, %v371_v56  ;;  %v374_v61 = vld [vmem:[%s4398_s14 + $0x1c0] sm:$0xff]  ;;  %v375_v0 = vld [vmem:[%s4398_s14 + $0x1c8] sm:$0xff]  ;;  %v3736_v2 = vcombine.low %v366_v53, %v370_v54 }
  0x3a   : > { %v378_v62 = vld [vmem:[%s4398_s14 + $0x1e0] sm:$0xff]  ;;  %v379_v1 = vld [vmem:[%s4398_s14 + $0x1e8] sm:$0xff]  ;;  %v3738_v3 = vcombine.low %v367_v55, %v371_v56 }
  0x3b   : > { %v4434_v63 = vld [vmem:[%s4400_s15 + $0x4] ss:$20 sps:$4 sm:$0xff]   ;;  %v3745_v4 = vcombine.high %v374_v61, %v378_v62  ;;  %v3747_v5 = vcombine.high %v375_v0, %v379_v1  ;;  %v3744_v10 = vcombine.low %v374_v61, %v378_v62  ;;  %v3746_v11 = vcombine.low %v375_v0, %v379_v1 }
  0x3c   : > { %2271 = vmatpush1.bf16.msra.mxu0 %v3712_v41  ;;  %2400 = vmatpush1.bf16.msra.mxu1 %v3714_v42  ;;  %v382_v6 = vld [vmem:[%s4398_s14 + $0x200] sm:$0xff]  ;;  %v383_v8 = vld [vmem:[%s4398_s14 + $0x208] sm:$0xff] }
  0x3d   : > { %2272 = vmatprep.subr.bf16.mxu0 %v3721_v43  ;;  %2401 = vmatprep.subr.bf16.mxu1 %v3723_v44  ;;  %v386_v7 = vld [vmem:[%s4398_s14 + $0x220] sm:$0xff]  ;;  %v387_v9 = vld [vmem:[%s4398_s14 + $0x228] sm:$0xff] }
  0x3e   : > { %2296 = vmatprep.mubr.bf16.mxu0 %v4434_v63  ;;  %2425 = vmatprep.mubr.bf16.mxu1 %v4434_v63  ;;  %v3753_v12 = vcombine.high %v382_v6, %v386_v7  ;;  %v3755_v13 = vcombine.high %v383_v8, %v387_v9  ;;  %v390_v14 = vld [vmem:[%s4398_s14 + $0x240] sm:$0xff]  ;;  %v391_v16 = vld [vmem:[%s4398_s14 + $0x248] sm:$0xff]  ;;  %v3752_v18 = vcombine.low %v382_v6, %v386_v7 }
  0x3f   : > { %v394_v15 = vld [vmem:[%s4398_s14 + $0x260] sm:$0xff]  ;;  %v395_v17 = vld [vmem:[%s4398_s14 + $0x268] sm:$0xff]  ;;  %v3754_v19 = vcombine.low %v383_v8, %v387_v9 }
  0x40   : > { %2273 = vmatpush1.bf16.msra.mxu0 %v3720_v49  ;;  %2402 = vmatpush1.bf16.msra.mxu1 %v3722_v50  ;;  %v3761_v20 = vcombine.high %v390_v14, %v394_v15  ;;  %v3763_v21 = vcombine.high %v391_v16, %v395_v17  ;;  %v398_v22 = vld [vmem:[%s4398_s14 + $0x280] sm:$0xff]  ;;  %v399_v24 = vld [vmem:[%s4398_s14 + $0x288] sm:$0xff]  ;;  %v3760_v26 = vcombine.low %v390_v14, %v394_v15 }
  0x41   : > { %2274 = vmatprep.subr.bf16.mxu0 %v3729_v51  ;;  %2403 = vmatprep.subr.bf16.mxu1 %v3731_v52  ;;  %v402_v23 = vld [vmem:[%s4398_s14 + $0x2a0] sm:$0xff]  ;;  %v403_v25 = vld [vmem:[%s4398_s14 + $0x2a8] sm:$0xff]  ;;  %v3762_v27 = vcombine.low %v391_v16, %v395_v17 }
  0x42   : > { %v3769_v28 = vcombine.high %v398_v22, %v402_v23  ;;  %v3771_v29 = vcombine.high %v399_v24, %v403_v25  ;;  %v406_v30 = vld [vmem:[%s4398_s14 + $0x2c0] sm:$0xff]  ;;  %v407_v32 = vld [vmem:[%s4398_s14 + $0x2c8] sm:$0xff]  ;;  %v3768_v34 = vcombine.low %v398_v22, %v402_v23  ;;  %v3770_v35 = vcombine.low %v399_v24, %v403_v25 }
  0x43   : > { %v410_v31 = vld [vmem:[%s4398_s14 + $0x2e0] sm:$0xff]  ;;  %v411_v33 = vld [vmem:[%s4398_s14 + $0x2e8] sm:$0xff] }
  0x44   : > { %2275 = vmatpush1.bf16.msra.mxu0 %v3728_v57  ;;  %2404 = vmatpush1.bf16.msra.mxu1 %v3730_v58  ;;  %v3777_v36 = vcombine.high %v406_v30, %v410_v31  ;;  %v3779_v37 = vcombine.high %v407_v32, %v411_v33  ;;  %v414_v38 = vld [vmem:[%s4398_s14 + $0x300] sm:$0xff]  ;;  %v415_v40 = vld [vmem:[%s4398_s14 + $0x308] sm:$0xff]  ;;  %v3776_v42 = vcombine.low %v406_v30, %v410_v31 }
  0x45   : > { %2276 = vmatprep.subr.bf16.mxu0 %v3737_v59  ;;  %2405 = vmatprep.subr.bf16.mxu1 %v3739_v60  ;;  %v418_v39 = vld [vmem:[%s4398_s14 + $0x320] sm:$0xff]  ;;  %v419_v41 = vld [vmem:[%s4398_s14 + $0x328] sm:$0xff]  ;;  %v3778_v43 = vcombine.low %v407_v32, %v411_v33 }
  0x46   : > { %v3785_v44 = vcombine.high %v414_v38, %v418_v39  ;;  %v3787_v45 = vcombine.high %v415_v40, %v419_v41  ;;  %v422_v46 = vld [vmem:[%s4398_s14 + $0x340] sm:$0xff]  ;;  %v423_v48 = vld [vmem:[%s4398_s14 + $0x348] sm:$0xff]  ;;  %v3784_v50 = vcombine.low %v414_v38, %v418_v39  ;;  %v3786_v51 = vcombine.low %v415_v40, %v419_v41 }
  0x47   : > { %v426_v47 = vld [vmem:[%s4398_s14 + $0x360] sm:$0xff]  ;;  %v427_v49 = vld [vmem:[%s4398_s14 + $0x368] sm:$0xff] }
  0x48   : > { %2277 = vmatpush1.bf16.msra.mxu0 %v3736_v2  ;;  %2406 = vmatpush1.bf16.msra.mxu1 %v3738_v3  ;;  %v3793_v52 = vcombine.high %v422_v46, %v426_v47  ;;  %v3795_v53 = vcombine.high %v423_v48, %v427_v49  ;;  %v430_v54 = vld [vmem:[%s4398_s14 + $0x380] sm:$0xff]  ;;  %v431_v56 = vld [vmem:[%s4398_s14 + $0x388] sm:$0xff]  ;;  %v3792_v58 = vcombine.low %v422_v46, %v426_v47 }
  0x49   : > { %2278 = vmatprep.subr.bf16.mxu0 %v3745_v4  ;;  %2407 = vmatprep.subr.bf16.mxu1 %v3747_v5  ;;  %v434_v55 = vld [vmem:[%s4398_s14 + $0x3a0] sm:$0xff]  ;;  %v435_v57 = vld [vmem:[%s4398_s14 + $0x3a8] sm:$0xff]  ;;  %v3794_v59 = vcombine.low %v423_v48, %v427_v49 }
  0x4a   : > { %v3801_v60 = vcombine.high %v430_v54, %v434_v55  ;;  %v3803_v61 = vcombine.high %v431_v56, %v435_v57  ;;  %v438_v62 = vld [vmem:[%s4398_s14 + $0x3c0] sm:$0xff]  ;;  %v439_v1 = vld [vmem:[%s4398_s14 + $0x3c8] sm:$0xff]  ;;  %v3800_v3 = vcombine.low %v430_v54, %v434_v55  ;;  %v3802_v4 = vcombine.low %v431_v56, %v435_v57 }
  0x4b   : > { %v442_v0 = vld [vmem:[%s4398_s14 + $0x3e0] sm:$0xff]  ;;  %v443_v2 = vld [vmem:[%s4398_s14 + $0x3e8] sm:$0xff] }
  0x4c   : > { %2279 = vmatpush1.bf16.msra.mxu0 %v3744_v10  ;;  %2408 = vmatpush1.bf16.msra.mxu1 %v3746_v11  ;;  %v3809_v5 = vcombine.high %v438_v62, %v442_v0  ;;  %v3811_v6 = vcombine.high %v439_v1, %v443_v2  ;;  %v446_v7 = vld [vmem:[%s4398_s14 + $0x400] sm:$0xff]  ;;  %v447_v9 = vld [vmem:[%s4398_s14 + $0x408] sm:$0xff]  ;;  %v3808_v11 = vcombine.low %v438_v62, %v442_v0 }
  0x4d   : > { %2280 = vmatprep.subr.bf16.mxu0 %v3753_v12  ;;  %2409 = vmatprep.subr.bf16.mxu1 %v3755_v13  ;;  %v450_v8 = vld [vmem:[%s4398_s14 + $0x420] sm:$0xff]  ;;  %v451_v10 = vld [vmem:[%s4398_s14 + $0x428] sm:$0xff]  ;;  %v3810_v12 = vcombine.low %v439_v1, %v443_v2 }
  0x4e   : > { %v3817_v13 = vcombine.high %v446_v7, %v450_v8  ;;  %v3819_v14 = vcombine.high %v447_v9, %v451_v10  ;;  %v454_v15 = vld [vmem:[%s4398_s14 + $0x440] sm:$0xff] }
  0x4f   : > { %v458_v16 = vld [vmem:[%s4398_s14 + $0x460] sm:$0xff] }
  0x50   : > { %2281 = vmatpush1.bf16.msra.mxu0 %v3752_v18  ;;  %2410 = vmatpush1.bf16.msra.mxu1 %v3754_v19  ;;  %v4479_v17 = vld [vmem:[%s4400_s15] ss:$20 sps:$4 sm:$0xff]   ;;  %v3825_v22 = vcombine.high %v454_v15, %v458_v16 }
  0x51   : > { %2282 = vmatprep.subr.bf16.mxu0 %v3761_v20  ;;  %2411 = vmatprep.subr.bf16.mxu1 %v3763_v21  ;;  %v455_v18 = vld [vmem:[%s4398_s14 + $0x448] sm:$0xff]  ;;  %v3816_v20 = vcombine.low %v446_v7, %v450_v8  ;;  %v3818_v21 = vcombine.low %v447_v9, %v451_v10  ;;  %v462_v24 = vld [vmem:[%s4398_s14 + $0x480] sm:$0xff] }
  0x52   : > { %v459_v19 = vld [vmem:[%s4398_s14 + $0x468] sm:$0xff]  ;;  %v466_v25 = vld [vmem:[%s4398_s14 + $0x4a0] sm:$0xff] }
  0x53   : > { %v3827_v23 = vcombine.high %v455_v18, %v459_v19  ;;  %v3826_v30 = vcombine.low %v455_v18, %v459_v19  ;;  %v3833_v31 = vcombine.high %v462_v24, %v466_v25  ;;  %v470_v33 = vld [vmem:[%s4398_s14 + $0x4c0] sm:$0xff] }
  0x54   : > { %2283 = vmatpush1.bf16.msra.mxu0 %v3760_v26  ;;  %2412 = vmatpush1.bf16.msra.mxu1 %v3762_v27  ;;  %v4486_v26 = vld [vmem:[%s4400_s15 + $0xc] ss:$20 sps:$4 sm:$0xff]  }
  0x55   : > { %2284 = vmatprep.subr.bf16.mxu0 %v3769_v28  ;;  %2413 = vmatprep.subr.bf16.mxu1 %v3771_v29  ;;  %v463_v27 = vld [vmem:[%s4398_s14 + $0x488] sm:$0xff]  ;;  %v3824_v29 = vcombine.low %v454_v15, %v458_v16  ;;  %v478_v41 = vld [vmem:[%s4398_s14 + $0x500] sm:$0xff] }
  0x56   : > { %v467_v28 = vld [vmem:[%s4398_s14 + $0x4a8] sm:$0xff]  ;;  %v486_v49 = vld [vmem:[%s4398_s14 + $0x540] sm:$0xff] }
  0x57   : > { %v3835_v32 = vcombine.high %v463_v27, %v467_v28  ;;  %v3834_v38 = vcombine.low %v463_v27, %v467_v28  ;;  %v494_v57 = vld [vmem:[%s4398_s14 + $0x580] sm:$0xff] }
  0x58   : > { %2285 = vmatpush1.bf16.msra.mxu0 %v3768_v34  ;;  %2414 = vmatpush1.bf16.msra.mxu1 %v3770_v35  ;;  %v474_v34 = vld [vmem:[%s4398_s14 + $0x4e0] sm:$0xff]  ;;  %v471_v35 = vld [vmem:[%s4398_s14 + $0x4c8] sm:$0xff] }
  0x59   : > { %2286 = vmatprep.subr.bf16.mxu0 %v3777_v36  ;;  %2415 = vmatprep.subr.bf16.mxu1 %v3779_v37  ;;  %v475_v36 = vld [vmem:[%s4398_s14 + $0x4e8] sm:$0xff]  ;;  %v3832_v37 = vcombine.low %v462_v24, %v466_v25  ;;  %v3841_v39 = vcombine.high %v470_v33, %v474_v34  ;;  %v502_v2 = vld [vmem:[%s4398_s14 + $0x5c0] sm:$0xff] }
  0x5a   : > { %v3843_v40 = vcombine.high %v471_v35, %v475_v36  ;;  %v3842_v46 = vcombine.low %v471_v35, %v475_v36  ;;  %v510_v10 = vld [vmem:[%s4398_s14 + $0x600] sm:$0xff] }
  0x5b   : > { %v518_v19 = vld [vmem:[%s4398_s14 + $0x640] sm:$0xff] }
  0x5c   : > { %2287 = vmatpush1.bf16.msra.mxu0 %v3776_v42  ;;  %2416 = vmatpush1.bf16.msra.mxu1 %v3778_v43  ;;  %v482_v42 = vld [vmem:[%s4398_s14 + $0x520] sm:$0xff]  ;;  %v479_v43 = vld [vmem:[%s4398_s14 + $0x508] sm:$0xff] }
  0x5d   : > { %2288 = vmatprep.subr.bf16.mxu0 %v3785_v44  ;;  %2417 = vmatprep.subr.bf16.mxu1 %v3787_v45  ;;  %v483_v44 = vld [vmem:[%s4398_s14 + $0x528] sm:$0xff]  ;;  %v3840_v45 = vcombine.low %v470_v33, %v474_v34  ;;  %v3849_v47 = vcombine.high %v478_v41, %v482_v42  ;;  %v526_v28 = vld [vmem:[%s4398_s14 + $0x680] sm:$0xff] }
  0x5e   : > { %v3851_v48 = vcombine.high %v479_v43, %v483_v44  ;;  %v3850_v54 = vcombine.low %v479_v43, %v483_v44  ;;  %v534_v36 = vld [vmem:[%s4398_s14 + $0x6c0] sm:$0xff] }
  0x5f   : > { %v542_v44 = vld [vmem:[%s4398_s14 + $0x700] sm:$0xff] }
  0x60   : > { %2289 = vmatpush1.bf16.msra.mxu0 %v3784_v50  ;;  %2418 = vmatpush1.bf16.msra.mxu1 %v3786_v51  ;;  %v490_v50 = vld [vmem:[%s4398_s14 + $0x560] sm:$0xff]  ;;  %v487_v51 = vld [vmem:[%s4398_s14 + $0x548] sm:$0xff] }
  0x61   : > { %2290 = vmatprep.subr.bf16.mxu0 %v3793_v52  ;;  %2419 = vmatprep.subr.bf16.mxu1 %v3795_v53  ;;  %v491_v52 = vld [vmem:[%s4398_s14 + $0x568] sm:$0xff]  ;;  %v3848_v53 = vcombine.low %v478_v41, %v482_v42  ;;  %v3857_v55 = vcombine.high %v486_v49, %v490_v50 }
  0x62   : > { %v3859_v56 = vcombine.high %v487_v51, %v491_v52  ;;  %v3858_v62 = vcombine.low %v487_v51, %v491_v52  ;;  %v550_v52 = vld [vmem:[%s4398_s14 + $0x740] sm:$0xff] }
  0x64   : > { %2291 = vmatpush1.bf16.msra.mxu0 %v3792_v58  ;;  %2420 = vmatpush1.bf16.msra.mxu1 %v3794_v59  ;;  %v498_v58 = vld [vmem:[%s4398_s14 + $0x5a0] sm:$0xff]  ;;  %v495_v59 = vld [vmem:[%s4398_s14 + $0x588] sm:$0xff] }
  0x65   : > { %2292 = vmatprep.subr.bf16.mxu0 %v3801_v60  ;;  %2421 = vmatprep.subr.bf16.mxu1 %v3803_v61  ;;  %v499_v60 = vld [vmem:[%s4398_s14 + $0x5a8] sm:$0xff]  ;;  %v3856_v61 = vcombine.low %v486_v49, %v490_v50  ;;  %v3865_v0 = vcombine.high %v494_v57, %v498_v58 }
  0x66   : > { %v3867_v1 = vcombine.high %v495_v59, %v499_v60  ;;  %v3866_v7 = vcombine.low %v495_v59, %v499_v60  ;;  %v558_v60 = vld [vmem:[%s4398_s14 + $0x780] sm:$0xff] }
  0x68   : > { %2293 = vmatpush1.bf16.msra.mxu0 %v3800_v3  ;;  %2422 = vmatpush1.bf16.msra.mxu1 %v3802_v4  ;;  %v506_v3 = vld [vmem:[%s4398_s14 + $0x5e0] sm:$0xff]  ;;  %v503_v4 = vld [vmem:[%s4398_s14 + $0x5c8] sm:$0xff] }
  0x69   : > { %2294 = vmatprep.subr.bf16.mxu0 %v3809_v5  ;;  %2423 = vmatprep.subr.bf16.mxu1 %v3811_v6  ;;  %v507_v5 = vld [vmem:[%s4398_s14 + $0x5e8] sm:$0xff]  ;;  %v3864_v6 = vcombine.low %v494_v57, %v498_v58  ;;  %v3873_v8 = vcombine.high %v502_v2, %v506_v3 }
  0x6a   : > { %v3875_v9 = vcombine.high %v503_v4, %v507_v5  ;;  %v3874_v15 = vcombine.low %v503_v4, %v507_v5  ;;  %v566_v5 = vld [vmem:[%s4398_s14 + $0x7c0] sm:$0xff] }
  0x6c   : > { %2295 = vmatpush1.bf16.msra.mxu0 %v3808_v11  ;;  %2424 = vmatpush1.bf16.msra.mxu1 %v3810_v12  ;;  %v514_v11 = vld [vmem:[%s4398_s14 + $0x620] sm:$0xff]  ;;  %v511_v12 = vld [vmem:[%s4398_s14 + $0x608] sm:$0xff] }
  0x6d   : > { %2307 = vmatprep.subr.bf16.mxu0 %v3817_v13  ;;  %2436 = vmatprep.subr.bf16.mxu1 %v3819_v14  ;;  %v515_v13 = vld [vmem:[%s4398_s14 + $0x628] sm:$0xff]  ;;  %v3872_v14 = vcombine.low %v502_v2, %v506_v3  ;;  %v3881_v16 = vcombine.high %v510_v10, %v514_v11 }
  0x6e   : > { %v3883_v18 = vcombine.high %v511_v12, %v515_v13  ;;  %v3882_v24 = vcombine.low %v511_v12, %v515_v13  ;;  %v574_v13 = vld [vmem:[%s4398_s14 + $0x800] sm:$0xff] }
  0x6f   : > { %2297 = vmatmul.mubr.bf16.vlgmr.msra.gmra.mrb[0].mxu0 %v4479_v17  ;;  %2426 = vmatmul.mubr.bf16.vlgmr.msra.gmra.mrb[0].mxu1 %v4479_v17 }
  0x70   : > { %2308 = vmatpush1.bf16.msra.mxu0 %v3816_v20  ;;  %2437 = vmatpush1.bf16.msra.mxu1 %v3818_v21  ;;  %v522_v20 = vld [vmem:[%s4398_s14 + $0x660] sm:$0xff]  ;;  %v519_v21 = vld [vmem:[%s4398_s14 + $0x648] sm:$0xff] }
  0x71   : > { %2309 = vmatprep.subr.bf16.mxu0 %v3825_v22  ;;  %2438 = vmatprep.subr.bf16.mxu1 %v3827_v23  ;;  %v523_v22 = vld [vmem:[%s4398_s14 + $0x668] sm:$0xff]  ;;  %v3880_v23 = vcombine.low %v510_v10, %v514_v11  ;;  %v3889_v25 = vcombine.high %v518_v19, %v522_v20 }
  0x72   : > { %2339 = vmatprep.mubr.bf16.mxu0 %v4486_v26  ;;  %2468 = vmatprep.mubr.bf16.mxu1 %v4486_v26  ;;  %v3891_v27 = vcombine.high %v519_v21, %v523_v22  ;;  %v3890_v33 = vcombine.low %v519_v21, %v523_v22  ;;  %v582_v22 = vld [vmem:[%s4398_s14 + $0x840] sm:$0xff] }
  0x74   : > { %2310 = vmatpush1.bf16.msra.mxu0 %v3824_v29  ;;  %2439 = vmatpush1.bf16.msra.mxu1 %v3826_v30  ;;  %v530_v29 = vld [vmem:[%s4398_s14 + $0x6a0] sm:$0xff]  ;;  %v527_v30 = vld [vmem:[%s4398_s14 + $0x688] sm:$0xff] }
  0x75   : > { %2311 = vmatprep.subr.bf16.mxu0 %v3833_v31  ;;  %2440 = vmatprep.subr.bf16.mxu1 %v3835_v32  ;;  %v531_v31 = vld [vmem:[%s4398_s14 + $0x6a8] sm:$0xff]  ;;  %v3888_v32 = vcombine.low %v518_v19, %v522_v20  ;;  %v3897_v34 = vcombine.high %v526_v28, %v530_v29 }
  0x76   : > { %v3899_v35 = vcombine.high %v527_v30, %v531_v31  ;;  %v3898_v41 = vcombine.low %v527_v30, %v531_v31 }
  0x78   : > { %2312 = vmatpush1.bf16.msra.mxu0 %v3832_v37  ;;  %2441 = vmatpush1.bf16.msra.mxu1 %v3834_v38  ;;  %v538_v37 = vld [vmem:[%s4398_s14 + $0x6e0] sm:$0xff]  ;;  %v535_v38 = vld [vmem:[%s4398_s14 + $0x6c8] sm:$0xff] }
  0x79   : > { %2313 = vmatprep.subr.bf16.mxu0 %v3841_v39  ;;  %2442 = vmatprep.subr.bf16.mxu1 %v3843_v40  ;;  %v539_v39 = vld [vmem:[%s4398_s14 + $0x6e8] sm:$0xff]  ;;  %v3896_v40 = vcombine.low %v526_v28, %v530_v29  ;;  %v3905_v42 = vcombine.high %v534_v36, %v538_v37 }
  0x7a   : > { %v3907_v43 = vcombine.high %v535_v38, %v539_v39  ;;  %v3906_v49 = vcombine.low %v535_v38, %v539_v39 }
  0x7c   : > { %2314 = vmatpush1.bf16.msra.mxu0 %v3840_v45  ;;  %2443 = vmatpush1.bf16.msra.mxu1 %v3842_v46  ;;  %v546_v45 = vld [vmem:[%s4398_s14 + $0x720] sm:$0xff]  ;;  %v543_v46 = vld [vmem:[%s4398_s14 + $0x708] sm:$0xff] }
  0x7d   : > { %2315 = vmatprep.subr.bf16.mxu0 %v3849_v47  ;;  %2444 = vmatprep.subr.bf16.mxu1 %v3851_v48  ;;  %v547_v47 = vld [vmem:[%s4398_s14 + $0x728] sm:$0xff]  ;;  %v3904_v48 = vcombine.low %v534_v36, %v538_v37  ;;  %v3913_v50 = vcombine.high %v542_v44, %v546_v45 }
  0x7e   : > { %v3915_v51 = vcombine.high %v543_v46, %v547_v47  ;;  %v3914_v57 = vcombine.low %v543_v46, %v547_v47 }
  0x80   : > { %2316 = vmatpush1.bf16.msra.mxu0 %v3848_v53  ;;  %2445 = vmatpush1.bf16.msra.mxu1 %v3850_v54  ;;  %v554_v53 = vld [vmem:[%s4398_s14 + $0x760] sm:$0xff]  ;;  %v551_v54 = vld [vmem:[%s4398_s14 + $0x748] sm:$0xff] }
  0x81   : > { %2317 = vmatprep.subr.bf16.mxu0 %v3857_v55  ;;  %2446 = vmatprep.subr.bf16.mxu1 %v3859_v56  ;;  %v555_v55 = vld [vmem:[%s4398_s14 + $0x768] sm:$0xff]  ;;  %v3912_v56 = vcombine.low %v542_v44, %v546_v45  ;;  %v3921_v58 = vcombine.high %v550_v52, %v554_v53 }
  0x82   : > { %v3923_v59 = vcombine.high %v551_v54, %v555_v55  ;;  %v3922_v2 = vcombine.low %v551_v54, %v555_v55  ;;  %v603_v44 = vld [vmem:[%s4398_s14 + $0x8e8] sm:$0xff] }
  0x84   : > { %2318 = vmatpush1.bf16.msra.mxu0 %v3856_v61  ;;  %2447 = vmatpush1.bf16.msra.mxu1 %v3858_v62  ;;  %v562_v61 = vld [vmem:[%s4398_s14 + $0x7a0] sm:$0xff]  ;;  %v559_v62 = vld [vmem:[%s4398_s14 + $0x788] sm:$0xff] }
  0x85   : > { %2319 = vmatprep.subr.bf16.mxu0 %v3865_v0  ;;  %2448 = vmatprep.subr.bf16.mxu1 %v3867_v1  ;;  %v563_v0 = vld [vmem:[%s4398_s14 + $0x7a8] sm:$0xff]  ;;  %v3920_v1 = vcombine.low %v550_v52, %v554_v53  ;;  %v3929_v3 = vcombine.high %v558_v60, %v562_v61 }
  0x86   : > { %v3931_v4 = vcombine.high %v559_v62, %v563_v0  ;;  %v3930_v10 = vcombine.low %v559_v62, %v563_v0  ;;  %v611_v52 = vld [vmem:[%s4398_s14 + $0x928] sm:$0xff] }
  0x88   : > { %2320 = vmatpush1.bf16.msra.mxu0 %v3864_v6  ;;  %2449 = vmatpush1.bf16.msra.mxu1 %v3866_v7  ;;  %v570_v6 = vld [vmem:[%s4398_s14 + $0x7e0] sm:$0xff]  ;;  %v567_v7 = vld [vmem:[%s4398_s14 + $0x7c8] sm:$0xff] }
  0x89   : > { %2321 = vmatprep.subr.bf16.mxu0 %v3873_v8  ;;  %2450 = vmatprep.subr.bf16.mxu1 %v3875_v9  ;;  %v571_v8 = vld [vmem:[%s4398_s14 + $0x7e8] sm:$0xff]  ;;  %v3928_v9 = vcombine.low %v558_v60, %v562_v61  ;;  %v3937_v11 = vcombine.high %v566_v5, %v570_v6 }
  0x8a   : > { %v3939_v12 = vcombine.high %v567_v7, %v571_v8  ;;  %v3938_v19 = vcombine.low %v567_v7, %v571_v8  ;;  %v619_v60 = vld [vmem:[%s4398_s14 + $0x968] sm:$0xff] }
  0x8c   : > { %2322 = vmatpush1.bf16.msra.mxu0 %v3872_v14  ;;  %2451 = vmatpush1.bf16.msra.mxu1 %v3874_v15  ;;  %v578_v14 = vld [vmem:[%s4398_s14 + $0x820] sm:$0xff]  ;;  %v575_v15 = vld [vmem:[%s4398_s14 + $0x808] sm:$0xff] }
  0x8d   : > { %2323 = vmatprep.subr.bf16.mxu0 %v3881_v16  ;;  %2452 = vmatprep.subr.bf16.mxu1 %v3883_v18  ;;  %v579_v16 = vld [vmem:[%s4398_s14 + $0x828] sm:$0xff]  ;;  %v3936_v18 = vcombine.low %v566_v5, %v570_v6  ;;  %v3945_v20 = vcombine.high %v574_v13, %v578_v14  ;;  %v3944_v28 = vcombine.low %v574_v13, %v578_v14 }
  0x8e   : > { %v3947_v21 = vcombine.high %v575_v15, %v579_v16  ;;  %v3946_v29 = vcombine.low %v575_v15, %v579_v16  ;;  %v627_v5 = vld [vmem:[%s4398_s14 + $0x9a8] sm:$0xff] }
  0x8f   : > { %v635_v13 = vld [vmem:[%s4398_s14 + $0x9e8] sm:$0xff] }
  0x90   : > { %2324 = vmatpush1.bf16.msra.mxu0 %v3880_v23  ;;  %2453 = vmatpush1.bf16.msra.mxu1 %v3882_v24  ;;  %v586_v23 = vld [vmem:[%s4398_s14 + $0x860] sm:$0xff] }
  0x91   : > { %2325 = vmatprep.subr.bf16.mxu0 %v3889_v25  ;;  %2454 = vmatprep.subr.bf16.mxu1 %v3891_v27  ;;  %v4553_v24 = vld [vmem:[%s4400_s15 + $0x8] ss:$20 sps:$4 sm:$0xff]   ;;  %v3953_v30 = vcombine.high %v582_v22, %v586_v23  ;;  %v3952_v36 = vcombine.low %v582_v22, %v586_v23 }
  0x92   : > { %v583_v25 = vld [vmem:[%s4398_s14 + $0x848] sm:$0xff]  ;;  %v325_v22 = vld [vmem:[%s4398_s14 + $0x38] sm:$0xff] }
  0x93   : > { %v587_v27 = vld [vmem:[%s4398_s14 + $0x868] sm:$0xff] }
  0x94   : > { %2326 = vmatpush1.bf16.msra.mxu0 %v3888_v32  ;;  %2455 = vmatpush1.bf16.msra.mxu1 %v3890_v33  ;;  %v3955_v31 = vcombine.high %v583_v25, %v587_v27  ;;  %v590_v32 = vld [vmem:[%s4398_s14 + $0x880] sm:$0xff]  ;;  %v3954_v37 = vcombine.low %v583_v25, %v587_v27 }
  0x95   : > { %2327 = vmatprep.subr.bf16.mxu0 %v3897_v34  ;;  %2456 = vmatprep.subr.bf16.mxu1 %v3899_v35  ;;  %v594_v33 = vld [vmem:[%s4398_s14 + $0x8a0] sm:$0xff]  ;;  %v591_v34 = vld [vmem:[%s4398_s14 + $0x888] sm:$0xff] }
  0x96   : > { %v595_v35 = vld [vmem:[%s4398_s14 + $0x8a8] sm:$0xff]  ;;  %v3961_v38 = vcombine.high %v590_v32, %v594_v33  ;;  %v3960_v45 = vcombine.low %v590_v32, %v594_v33  ;;  %v329_v32 = vld [vmem:[%s4398_s14 + $0x58] sm:$0xff] }
  0x97   : > { %v3963_v39 = vcombine.high %v591_v34, %v595_v35  ;;  %v3962_v46 = vcombine.low %v591_v34, %v595_v35  ;;  %v333_v33 = vld [vmem:[%s4398_s14 + $0x78] sm:$0xff] }
  0x98   : > { %2328 = vmatpush1.bf16.msra.mxu0 %v3896_v40  ;;  %2457 = vmatpush1.bf16.msra.mxu1 %v3898_v41  ;;  %v598_v40 = vld [vmem:[%s4398_s14 + $0x8c0] sm:$0xff] }
  0x99   : > { %2329 = vmatprep.subr.bf16.mxu0 %v3905_v42  ;;  %2458 = vmatprep.subr.bf16.mxu1 %v3907_v43  ;;  %v602_v41 = vld [vmem:[%s4398_s14 + $0x8e0] sm:$0xff]  ;;  %v4324_v42 = vmov 0   ;;  %v599_v43 = vld [vmem:[%s4398_s14 + $0x8c8] sm:$0xff] }
  0x9a   : > { %v3969_v47 = vcombine.high %v598_v40, %v602_v41  ;;  %v3968_v53 = vcombine.low %v598_v40, %v602_v41  ;;  %v3970_v54 = vcombine.low %v599_v43, %v603_v44  ;;  %v337_v40 = vld [vmem:[%s4398_s14 + $0x98] sm:$0xff] }
  0x9b   : > { %v341_v41 = vld [vmem:[%s4398_s14 + $0xb8] sm:$0xff] }
  0x9c   : > { %2330 = vmatpush1.bf16.msra.mxu0 %v3904_v48  ;;  %2459 = vmatpush1.bf16.msra.mxu1 %v3906_v49  ;;  %v3971_v48 = vcombine.high %v599_v43, %v603_v44  ;;  %v606_v49 = vld [vmem:[%s4398_s14 + $0x900] sm:$0xff]  ;;  %v3702_v44 = vcombine.low %v329_v32, %v333_v33 }
  0x9d   : > { %2331 = vmatprep.subr.bf16.mxu0 %v3913_v50  ;;  %2460 = vmatprep.subr.bf16.mxu1 %v3915_v51  ;;  %v610_v50 = vld [vmem:[%s4398_s14 + $0x920] sm:$0xff]  ;;  %v607_v51 = vld [vmem:[%s4398_s14 + $0x908] sm:$0xff] }
  0x9e   : > { %v3977_v55 = vcombine.high %v606_v49, %v610_v50  ;;  %v3976_v61 = vcombine.low %v606_v49, %v610_v50  ;;  %v3978_v62 = vcombine.low %v607_v51, %v611_v52  ;;  %v345_v49 = vld [vmem:[%s4398_s14 + $0xd8] sm:$0xff] }
  0x9f   : > { %v349_v50 = vld [vmem:[%s4398_s14 + $0xf8] sm:$0xff] }
  0xa0   : > { %2332 = vmatpush1.bf16.msra.mxu0 %v3912_v56  ;;  %2461 = vmatpush1.bf16.msra.mxu1 %v3914_v57  ;;  %v3979_v56 = vcombine.high %v607_v51, %v611_v52  ;;  %v614_v57 = vld [vmem:[%s4398_s14 + $0x940] sm:$0xff]  ;;  %v3710_v52 = vcombine.low %v337_v40, %v341_v41 }
  0xa1   : > { %2333 = vmatprep.subr.bf16.mxu0 %v3921_v58  ;;  %2462 = vmatprep.subr.bf16.mxu1 %v3923_v59  ;;  %v618_v58 = vld [vmem:[%s4398_s14 + $0x960] sm:$0xff]  ;;  %v615_v59 = vld [vmem:[%s4398_s14 + $0x948] sm:$0xff] }
  0xa2   : > { %v3985_v0 = vcombine.high %v614_v57, %v618_v58  ;;  %v3984_v6 = vcombine.low %v614_v57, %v618_v58  ;;  %v3986_v7 = vcombine.low %v615_v59, %v619_v60  ;;  %v353_v57 = vld [vmem:[%s4398_s14 + $0x118] sm:$0xff] }
  0xa3   : > { %v357_v58 = vld [vmem:[%s4398_s14 + $0x138] sm:$0xff] }
  0xa4   : > { %2334 = vmatpush1.bf16.msra.mxu0 %v3920_v1  ;;  %2463 = vmatpush1.bf16.msra.mxu1 %v3922_v2  ;;  %v3987_v1 = vcombine.high %v615_v59, %v619_v60  ;;  %v622_v2 = vld [vmem:[%s4398_s14 + $0x980] sm:$0xff] }
  0xa5   : > { %2335 = vmatprep.subr.bf16.mxu0 %v3929_v3  ;;  %2464 = vmatprep.subr.bf16.mxu1 %v3931_v4  ;;  %v626_v3 = vld [vmem:[%s4398_s14 + $0x9a0] sm:$0xff]  ;;  %v623_v4 = vld [vmem:[%s4398_s14 + $0x988] sm:$0xff] }
  0xa6   : > { %v3993_v8 = vcombine.high %v622_v2, %v626_v3  ;;  %v3992_v14 = vcombine.low %v622_v2, %v626_v3  ;;  %v3994_v15 = vcombine.low %v623_v4, %v627_v5  ;;  %v365_v2 = vld [vmem:[%s4398_s14 + $0x178] sm:$0xff] }
  0xa8   : > { %2336 = vmatpush1.bf16.msra.mxu0 %v3928_v9  ;;  %2465 = vmatpush1.bf16.msra.mxu1 %v3930_v10  ;;  %v3995_v9 = vcombine.high %v623_v4, %v627_v5  ;;  %v630_v10 = vld [vmem:[%s4398_s14 + $0x9c0] sm:$0xff]  ;;  %v3726_v4 = vcombine.low %v353_v57, %v357_v58 }
  0xa9   : > { %2337 = vmatprep.subr.bf16.mxu0 %v3937_v11  ;;  %2466 = vmatprep.subr.bf16.mxu1 %v3939_v12  ;;  %v634_v11 = vld [vmem:[%s4398_s14 + $0x9e0] sm:$0xff]  ;;  %v631_v12 = vld [vmem:[%s4398_s14 + $0x9c8] sm:$0xff] }
  0xaa   : > { %v4001_v16 = vcombine.high %v630_v10, %v634_v11  ;;  %v4000_v23 = vcombine.low %v630_v10, %v634_v11  ;;  %v4002_v25 = vcombine.low %v631_v12, %v635_v13  ;;  %v373_v10 = vld [vmem:[%s4398_s14 + $0x1b8] sm:$0xff] }
  0xac   : > { %2338 = vmatpush1.bf16.msra.mxu0 %v3936_v18  ;;  %2467 = vmatpush1.bf16.msra.mxu1 %v3938_v19  ;;  %v4003_v18 = vcombine.high %v631_v12, %v635_v13  ;;  %v320_v19 = vld [vmem:[%s4398_s14 + $0x10] sm:$0xff] }
  0xad   : > { %2350 = vmatprep.subr.bf16.mxu0 %v3945_v20  ;;  %2479 = vmatprep.subr.bf16.mxu1 %v3947_v21  ;;  %v324_v20 = vld [vmem:[%s4398_s14 + $0x30] sm:$0xff]  ;;  %v321_v21 = vld [vmem:[%s4398_s14 + $0x18] sm:$0xff] }
  0xae   : > { %v3693_v27 = vcombine.high %v320_v19, %v324_v20  ;;  %v3692_v34 = vcombine.low %v320_v19, %v324_v20  ;;  %v3694_v35 = vcombine.low %v321_v21, %v325_v22  ;;  %v381_v19 = vld [vmem:[%s4398_s14 + $0x1f8] sm:$0xff] }
  0xaf   : > { %2340 = vmatmul.mubr.bf16.vlgmr.msra.gmra.mrb[0].mxu0 %v4553_v24  ;;  %2469 = vmatmul.mubr.bf16.vlgmr.msra.gmra.mrb[0].mxu1 %v4553_v24 }
  0xb0   : > { %2351 = vmatpush1.bf16.msra.mxu0 %v3944_v28  ;;  %2480 = vmatpush1.bf16.msra.mxu1 %v3946_v29  ;;  %v3695_v28 = vcombine.high %v321_v21, %v325_v22  ;;  %v328_v29 = vld [vmem:[%s4398_s14 + $0x50] sm:$0xff] }
  0xb1   : > { %2352 = vmatprep.subr.bf16.mxu0 %v3953_v30  ;;  %2481 = vmatprep.subr.bf16.mxu1 %v3955_v31  ;;  %v332_v30 = vld [vmem:[%s4398_s14 + $0x70] sm:$0xff] }
  0xb2   : > { %2382 = vmatprep.mubr.bf16.mxu0 %v4324_v42  ;;  %2511 = vmatprep.mubr.bf16.mxu1 %v4324_v42  ;;  %v4592_v31 = vld [vmem:[%s4400_s15 + $0x10] ss:$20 sps:$4 sm:$0xff]   ;;  %v3700_v43 = vcombine.low %v328_v29, %v332_v30 }
  0xb4   : > { %2353 = vmatpush1.bf16.msra.mxu0 %v3952_v36  ;;  %2482 = vmatpush1.bf16.msra.mxu1 %v3954_v37  ;;  %v3701_v36 = vcombine.high %v328_v29, %v332_v30  ;;  %v3703_v37 = vcombine.high %v329_v32, %v333_v33  ;;  %v389_v29 = vld [vmem:[%s4398_s14 + $0x238] sm:$0xff] }
  0xb5   : > { %2354 = vmatprep.subr.bf16.mxu0 %v3961_v38  ;;  %2483 = vmatprep.subr.bf16.mxu1 %v3963_v39  ;;  %v336_v38 = vld [vmem:[%s4398_s14 + $0x90] sm:$0xff] }
  0xb6   : > { %v340_v39 = vld [vmem:[%s4398_s14 + $0xb0] sm:$0xff] }
  0xb7   : > { %v3708_v51 = vcombine.low %v336_v38, %v340_v39 }
  0xb8   : > { %2355 = vmatpush1.bf16.msra.mxu0 %v3960_v45  ;;  %2484 = vmatpush1.bf16.msra.mxu1 %v3962_v46  ;;  %v3709_v45 = vcombine.high %v336_v38, %v340_v39  ;;  %v3711_v46 = vcombine.high %v337_v40, %v341_v41  ;;  %v397_v38 = vld [vmem:[%s4398_s14 + $0x278] sm:$0xff] }
  0xb9   : > { %2356 = vmatprep.subr.bf16.mxu0 %v3969_v47  ;;  %2485 = vmatprep.subr.bf16.mxu1 %v3971_v48  ;;  %v344_v47 = vld [vmem:[%s4398_s14 + $0xd0] sm:$0xff] }
  0xba   : > { %v348_v48 = vld [vmem:[%s4398_s14 + $0xf0] sm:$0xff] }
  0xbb   : > { %v3716_v59 = vcombine.low %v344_v47, %v348_v48 }
  0xbc   : > { %2357 = vmatpush1.bf16.msra.mxu0 %v3968_v53  ;;  %2486 = vmatpush1.bf16.msra.mxu1 %v3970_v54  ;;  %v3717_v53 = vcombine.high %v344_v47, %v348_v48  ;;  %v3719_v54 = vcombine.high %v345_v49, %v349_v50  ;;  %v405_v47 = vld [vmem:[%s4398_s14 + $0x2b8] sm:$0xff] }
  0xbd   : > { %2358 = vmatprep.subr.bf16.mxu0 %v3977_v55  ;;  %2487 = vmatprep.subr.bf16.mxu1 %v3979_v56  ;;  %v352_v55 = vld [vmem:[%s4398_s14 + $0x110] sm:$0xff] }
  0xbe   : > { %v356_v56 = vld [vmem:[%s4398_s14 + $0x130] sm:$0xff] }
  0xbf   : > { %v3725_v60 = vcombine.high %v352_v55, %v356_v56  ;;  %v3724_v3 = vcombine.low %v352_v55, %v356_v56  ;;  %v413_v55 = vld [vmem:[%s4398_s14 + $0x2f8] sm:$0xff] }
  0xc0   : > { %2359 = vmatpush1.bf16.msra.mxu0 %v3976_v61  ;;  %2488 = vmatpush1.bf16.msra.mxu1 %v3978_v62  ;;  %v3727_v61 = vcombine.high %v353_v57, %v357_v58  ;;  %v360_v62 = vld [vmem:[%s4398_s14 + $0x150] sm:$0xff] }
  0xc1   : > { %2360 = vmatprep.subr.bf16.mxu0 %v3985_v0  ;;  %2489 = vmatprep.subr.bf16.mxu1 %v3987_v1  ;;  %v364_v0 = vld [vmem:[%s4398_s14 + $0x170] sm:$0xff]  ;;  %v361_v1 = vld [vmem:[%s4398_s14 + $0x158] sm:$0xff] }
  0xc2   : > { %v3733_v5 = vcombine.high %v360_v62, %v364_v0  ;;  %v3732_v11 = vcombine.low %v360_v62, %v364_v0  ;;  %v3734_v12 = vcombine.low %v361_v1, %v365_v2  ;;  %v421_v62 = vld [vmem:[%s4398_s14 + $0x338] sm:$0xff] }
  0xc4   : > { %2361 = vmatpush1.bf16.msra.mxu0 %v3984_v6  ;;  %2490 = vmatpush1.bf16.msra.mxu1 %v3986_v7  ;;  %v3735_v6 = vcombine.high %v361_v1, %v365_v2  ;;  %v368_v7 = vld [vmem:[%s4398_s14 + $0x190] sm:$0xff] }
  0xc5   : > { %2362 = vmatprep.subr.bf16.mxu0 %v3993_v8  ;;  %2491 = vmatprep.subr.bf16.mxu1 %v3995_v9  ;;  %v372_v8 = vld [vmem:[%s4398_s14 + $0x1b0] sm:$0xff]  ;;  %v369_v9 = vld [vmem:[%s4398_s14 + $0x198] sm:$0xff] }
  0xc6   : > { %v3741_v13 = vcombine.high %v368_v7, %v372_v8  ;;  %v3740_v20 = vcombine.low %v368_v7, %v372_v8  ;;  %v3742_v21 = vcombine.low %v369_v9, %v373_v10  ;;  %v429_v7 = vld [vmem:[%s4398_s14 + $0x378] sm:$0xff] }
  0xc8   : > { %2363 = vmatpush1.bf16.msra.mxu0 %v3992_v14  ;;  %2492 = vmatpush1.bf16.msra.mxu1 %v3994_v15  ;;  %v3743_v14 = vcombine.high %v369_v9, %v373_v10  ;;  %v376_v15 = vld [vmem:[%s4398_s14 + $0x1d0] sm:$0xff] }
  0xc9   : > { %2364 = vmatprep.subr.bf16.mxu0 %v4001_v16  ;;  %2493 = vmatprep.subr.bf16.mxu1 %v4003_v18  ;;  %v380_v16 = vld [vmem:[%s4398_s14 + $0x1f0] sm:$0xff]  ;;  %v377_v18 = vld [vmem:[%s4398_s14 + $0x1d8] sm:$0xff] }
  0xca   : > { %v3749_v22 = vcombine.high %v376_v15, %v380_v16  ;;  %v3748_v30 = vcombine.low %v376_v15, %v380_v16  ;;  %v3750_v32 = vcombine.low %v377_v18, %v381_v19  ;;  %v437_v15 = vld [vmem:[%s4398_s14 + $0x3b8] sm:$0xff] }
  0xcc   : > { %2365 = vmatpush1.bf16.msra.mxu0 %v4000_v23  ;;  %2494 = vmatpush1.bf16.msra.mxu1 %v4002_v25  ;;  %v3751_v23 = vcombine.high %v377_v18, %v381_v19  ;;  %v384_v25 = vld [vmem:[%s4398_s14 + $0x210] sm:$0xff] }
  0xcd   : > { %2522 = vmatprep.subr.bf16.mxu0 %v3693_v27  ;;  %2651 = vmatprep.subr.bf16.mxu1 %v3695_v28  ;;  %v388_v27 = vld [vmem:[%s4398_s14 + $0x230] sm:$0xff]  ;;  %v385_v28 = vld [vmem:[%s4398_s14 + $0x218] sm:$0xff] }
  0xce   : > { %v3757_v33 = vcombine.high %v384_v25, %v388_v27  ;;  %v3756_v39 = vcombine.low %v384_v25, %v388_v27  ;;  %v3758_v40 = vcombine.low %v385_v28, %v389_v29  ;;  %v445_v25 = vld [vmem:[%s4398_s14 + $0x3f8] sm:$0xff] }
  0xcf   : > { %2383 = vmatmul.mubr.bf16.vlgmr.msra.gmra.mrb[0].mxu0 %v4592_v31  ;;  %2512 = vmatmul.mubr.bf16.vlgmr.msra.gmra.mrb[0].mxu1 %v4592_v31 }
  0xd0   : > { %2523 = vmatpush1.bf16.msra.mxu0 %v3692_v34  ;;  %2652 = vmatpush1.bf16.msra.mxu1 %v3694_v35  ;;  %v3759_v34 = vcombine.high %v385_v28, %v389_v29  ;;  %v392_v35 = vld [vmem:[%s4398_s14 + $0x250] sm:$0xff] }
  0xd1   : > { %2524 = vmatprep.subr.bf16.mxu0 %v3701_v36  ;;  %2653 = vmatprep.subr.bf16.mxu1 %v3703_v37  ;;  %v396_v36 = vld [vmem:[%s4398_s14 + $0x270] sm:$0xff]  ;;  %v393_v37 = vld [vmem:[%s4398_s14 + $0x258] sm:$0xff] }
  0xd2   : > { %2554 = vmatprep.mubr.bf16.mxu0 %v4434_v63  ;;  %2683 = vmatprep.mubr.bf16.mxu1 %v4434_v63  ;;  %v3718_v63 = vcombine.low %v345_v49, %v349_v50  ;;  %v3765_v41 = vcombine.high %v392_v35, %v396_v36  ;;  %v3764_v48 = vcombine.low %v392_v35, %v396_v36  ;;  %v453_v35 = vld [vmem:[%s4398_s14 + $0x438] sm:$0xff] }
  0xd3   : > { %v3766_v49 = vcombine.low %v393_v37, %v397_v38 }
  0xd4   : > { %2525 = vmatpush1.bf16.msra.mxu0 %v3700_v43  ;;  %2654 = vmatpush1.bf16.msra.mxu1 %v3702_v44  ;;  %v3767_v43 = vcombine.high %v393_v37, %v397_v38  ;;  %v400_v44 = vld [vmem:[%s4398_s14 + $0x290] sm:$0xff] }
  0xd5   : > { %2526 = vmatprep.subr.bf16.mxu0 %v3709_v45  ;;  %2655 = vmatprep.subr.bf16.mxu1 %v3711_v46  ;;  %v404_v45 = vld [vmem:[%s4398_s14 + $0x2b0] sm:$0xff]  ;;  %v401_v46 = vld [vmem:[%s4398_s14 + $0x298] sm:$0xff] }
  0xd6   : > { %v3773_v50 = vcombine.high %v400_v44, %v404_v45  ;;  %v3772_v56 = vcombine.low %v400_v44, %v404_v45  ;;  %v3774_v57 = vcombine.low %v401_v46, %v405_v47  ;;  %v461_v44 = vld [vmem:[%s4398_s14 + $0x478] sm:$0xff] }
  0xd8   : > { %2527 = vmatpush1.bf16.msra.mxu0 %v3708_v51  ;;  %2656 = vmatpush1.bf16.msra.mxu1 %v3710_v52  ;;  %v3775_v51 = vcombine.high %v401_v46, %v405_v47  ;;  %v408_v52 = vld [vmem:[%s4398_s14 + $0x2d0] sm:$0xff] }
  0xd9   : > { %2528 = vmatprep.subr.bf16.mxu0 %v3717_v53  ;;  %2657 = vmatprep.subr.bf16.mxu1 %v3719_v54  ;;  %v412_v53 = vld [vmem:[%s4398_s14 + $0x2f0] sm:$0xff]  ;;  %v409_v54 = vld [vmem:[%s4398_s14 + $0x2d8] sm:$0xff] }
  0xda   : > { %v3781_v58 = vcombine.high %v408_v52, %v412_v53  ;;  %v3780_v0 = vcombine.low %v408_v52, %v412_v53  ;;  %v3782_v1 = vcombine.low %v409_v54, %v413_v55  ;;  %v469_v52 = vld [vmem:[%s4398_s14 + $0x4b8] sm:$0xff] }
  0xdb   : > { %v4233_v53 = vld [vmem:[%s4400_s15] ss:$20 sps:$4 sm:$0xff]  }
  0xdc   : > { %2529 = vmatpush1.bf16.msra.mxu0 %v3716_v59  ;;  %2658 = vmatpush1.bf16.msra.mxu1 %v3718_v63  ;;  %v3783_v59 = vcombine.high %v409_v54, %v413_v55  ;;  %v416_v63 = vld [vmem:[%s4398_s14 + $0x310] sm:$0xff] }
  0xdd   : > { %2530 = vmatprep.subr.bf16.mxu0 %v3725_v60  ;;  %2659 = vmatprep.subr.bf16.mxu1 %v3727_v61  ;;  %v420_v60 = vld [vmem:[%s4398_s14 + $0x330] sm:$0xff]  ;;  %v417_v61 = vld [vmem:[%s4398_s14 + $0x318] sm:$0xff] }
  0xde   : > { %v3789_v2 = vcombine.high %v416_v63, %v420_v60  ;;  %v3788_v8 = vcombine.low %v416_v63, %v420_v60  ;;  %v3790_v9 = vcombine.low %v417_v61, %v421_v62  ;;  %v477_v63 = vld [vmem:[%s4398_s14 + $0x4f8] sm:$0xff]  ;;  %v4234_v60 = vld [vmem:[%s4400_s15 + $0xc] ss:$20 sps:$4 sm:$0xff]  }
  0xe0   : > { %2531 = vmatpush1.bf16.msra.mxu0 %v3724_v3  ;;  %2660 = vmatpush1.bf16.msra.mxu1 %v3726_v4  ;;  %v3791_v3 = vcombine.high %v417_v61, %v421_v62  ;;  %v424_v4 = vld [vmem:[%s4398_s14 + $0x350] sm:$0xff] }
  0xe1   : > { %2532 = vmatprep.subr.bf16.mxu0 %v3733_v5  ;;  %2661 = vmatprep.subr.bf16.mxu1 %v3735_v6  ;;  %v428_v5 = vld [vmem:[%s4398_s14 + $0x370] sm:$0xff]  ;;  %v425_v6 = vld [vmem:[%s4398_s14 + $0x358] sm:$0xff] }
  0xe2   : > { %v3797_v10 = vcombine.high %v424_v4, %v428_v5  ;;  %v3796_v16 = vcombine.low %v424_v4, %v428_v5  ;;  %v3798_v18 = vcombine.low %v425_v6, %v429_v7  ;;  %v485_v4 = vld [vmem:[%s4398_s14 + $0x538] sm:$0xff] }
  0xe4   : > { %2533 = vmatpush1.bf16.msra.mxu0 %v3732_v11  ;;  %2662 = vmatpush1.bf16.msra.mxu1 %v3734_v12  ;;  %v3799_v11 = vcombine.high %v425_v6, %v429_v7  ;;  %v432_v12 = vld [vmem:[%s4398_s14 + $0x390] sm:$0xff] }
  0xe5   : > { %2534 = vmatprep.subr.bf16.mxu0 %v3741_v13  ;;  %2663 = vmatprep.subr.bf16.mxu1 %v3743_v14  ;;  %v436_v13 = vld [vmem:[%s4398_s14 + $0x3b0] sm:$0xff]  ;;  %v433_v14 = vld [vmem:[%s4398_s14 + $0x398] sm:$0xff] }
  0xe6   : > { %v3805_v19 = vcombine.high %v432_v12, %v436_v13  ;;  %v3804_v27 = vcombine.low %v432_v12, %v436_v13  ;;  %v3806_v28 = vcombine.low %v433_v14, %v437_v15  ;;  %v493_v12 = vld [vmem:[%s4398_s14 + $0x578] sm:$0xff] }
  0xe8   : > { %2535 = vmatpush1.bf16.msra.mxu0 %v3740_v20  ;;  %2664 = vmatpush1.bf16.msra.mxu1 %v3742_v21  ;;  %v3807_v20 = vcombine.high %v433_v14, %v437_v15  ;;  %v440_v21 = vld [vmem:[%s4398_s14 + $0x3d0] sm:$0xff] }
  0xe9   : > { %2536 = vmatprep.subr.bf16.mxu0 %v3749_v22  ;;  %2665 = vmatprep.subr.bf16.mxu1 %v3751_v23  ;;  %v444_v22 = vld [vmem:[%s4398_s14 + $0x3f0] sm:$0xff]  ;;  %v441_v23 = vld [vmem:[%s4398_s14 + $0x3d8] sm:$0xff] }
  0xea   : > { %v3813_v29 = vcombine.high %v440_v21, %v444_v22  ;;  %v3812_v36 = vcombine.low %v440_v21, %v444_v22  ;;  %v3814_v37 = vcombine.low %v441_v23, %v445_v25  ;;  %v501_v21 = vld [vmem:[%s4398_s14 + $0x5b8] sm:$0xff] }
  0xec   : > { %2537 = vmatpush1.bf16.msra.mxu0 %v3748_v30  ;;  %2666 = vmatpush1.bf16.msra.mxu1 %v3750_v32  ;;  %v3815_v30 = vcombine.high %v441_v23, %v445_v25  ;;  %v448_v32 = vld [vmem:[%s4398_s14 + $0x410] sm:$0xff] }
  0xed   : > { %2538 = vmatprep.subr.bf16.mxu0 %v3757_v33  ;;  %2667 = vmatprep.subr.bf16.mxu1 %v3759_v34  ;;  %v452_v33 = vld [vmem:[%s4398_s14 + $0x430] sm:$0xff]  ;;  %v449_v34 = vld [vmem:[%s4398_s14 + $0x418] sm:$0xff] }
  0xee   : > { %v3821_v38 = vcombine.high %v448_v32, %v452_v33  ;;  %v3820_v45 = vcombine.low %v448_v32, %v452_v33  ;;  %v3822_v46 = vcombine.low %v449_v34, %v453_v35  ;;  %v509_v32 = vld [vmem:[%s4398_s14 + $0x5f8] sm:$0xff] }
  0xf0   : > { %2539 = vmatpush1.bf16.msra.mxu0 %v3756_v39  ;;  %2668 = vmatpush1.bf16.msra.mxu1 %v3758_v40  ;;  %v3823_v39 = vcombine.high %v449_v34, %v453_v35  ;;  %v456_v40 = vld [vmem:[%s4398_s14 + $0x450] sm:$0xff] }
  0xf1   : > { %2540 = vmatprep.subr.bf16.mxu0 %v3765_v41  ;;  %2669 = vmatprep.subr.bf16.mxu1 %v3767_v43  ;;  %v460_v41 = vld [vmem:[%s4398_s14 + $0x470] sm:$0xff]  ;;  %v457_v43 = vld [vmem:[%s4398_s14 + $0x458] sm:$0xff] }
  0xf2   : > { %v3829_v47 = vcombine.high %v456_v40, %v460_v41  ;;  %v3828_v54 = vcombine.low %v456_v40, %v460_v41  ;;  %v3830_v55 = vcombine.low %v457_v43, %v461_v44  ;;  %v517_v40 = vld [vmem:[%s4398_s14 + $0x638] sm:$0xff] }
  0xf4   : > { %2541 = vmatpush1.bf16.msra.mxu0 %v3764_v48  ;;  %2670 = vmatpush1.bf16.msra.mxu1 %v3766_v49  ;;  %v3831_v48 = vcombine.high %v457_v43, %v461_v44  ;;  %v464_v49 = vld [vmem:[%s4398_s14 + $0x490] sm:$0xff] }
  0xf5   : > { %2542 = vmatprep.subr.bf16.mxu0 %v3773_v50  ;;  %2671 = vmatprep.subr.bf16.mxu1 %v3775_v51  ;;  %v468_v50 = vld [vmem:[%s4398_s14 + $0x4b0] sm:$0xff]  ;;  %v465_v51 = vld [vmem:[%s4398_s14 + $0x498] sm:$0xff] }
  0xf6   : > { %v3836_v61 = vcombine.low %v464_v49, %v468_v50  ;;  %v3838_v62 = vcombine.low %v465_v51, %v469_v52 }
  0xf8   : > { %2543 = vmatpush1.bf16.msra.mxu0 %v3772_v56  ;;  %2672 = vmatpush1.bf16.msra.mxu1 %v3774_v57  ;;  %v3837_v56 = vcombine.high %v464_v49, %v468_v50  ;;  %v3839_v57 = vcombine.high %v465_v51, %v469_v52  ;;  %v525_v49 = vld [vmem:[%s4398_s14 + $0x678] sm:$0xff] }
  0xf9   : > { %2544 = vmatprep.subr.bf16.mxu0 %v3781_v58  ;;  %2673 = vmatprep.subr.bf16.mxu1 %v3783_v59  ;;  %v472_v58 = vld [vmem:[%s4398_s14 + $0x4d0] sm:$0xff] }
  0xfa   : > { %v476_v59 = vld [vmem:[%s4398_s14 + $0x4f0] sm:$0xff] }
  0xfb   : > { %v3844_v5 = vcombine.low %v472_v58, %v476_v59 }
  0xfc   : > { %2545 = vmatpush1.bf16.msra.mxu0 %v3780_v0  ;;  %2674 = vmatpush1.bf16.msra.mxu1 %v3782_v1  ;;  %v3845_v0 = vcombine.high %v472_v58, %v476_v59 }
  0xfd   : > { %2546 = vmatprep.subr.bf16.mxu0 %v3789_v2  ;;  %2675 = vmatprep.subr.bf16.mxu1 %v3791_v3  ;;  %v480_v2 = vld [vmem:[%s4398_s14 + $0x510] sm:$0xff] }
  0xfe   : > { %v484_v3 = vld [vmem:[%s4398_s14 + $0x530] sm:$0xff] }
  0xff   : > { %v3853_v7 = vcombine.high %v480_v2, %v484_v3  ;;  %v3852_v13 = vcombine.low %v480_v2, %v484_v3 }
 0x100   : > { %2547 = vmatpush1.bf16.msra.mxu0 %v3788_v8  ;;  %2676 = vmatpush1.bf16.msra.mxu1 %v3790_v9  ;;  %v488_v9 = vld [vmem:[%s4398_s14 + $0x550] sm:$0xff] }
 0x101   : > { %2548 = vmatprep.subr.bf16.mxu0 %v3797_v10  ;;  %2677 = vmatprep.subr.bf16.mxu1 %v3799_v11  ;;  %v492_v10 = vld [vmem:[%s4398_s14 + $0x570] sm:$0xff]  ;;  %v489_v11 = vld [vmem:[%s4398_s14 + $0x558] sm:$0xff] }
 0x102   : > { %v3861_v15 = vcombine.high %v488_v9, %v492_v10  ;;  %v3860_v22 = vcombine.low %v488_v9, %v492_v10  ;;  %v3862_v23 = vcombine.low %v489_v11, %v493_v12 }
 0x104   : > { %2549 = vmatpush1.bf16.msra.mxu0 %v3796_v16  ;;  %2678 = vmatpush1.bf16.msra.mxu1 %v3798_v18  ;;  %v3863_v16 = vcombine.high %v489_v11, %v493_v12  ;;  %v496_v18 = vld [vmem:[%s4398_s14 + $0x590] sm:$0xff] }
 0x105   : > { %2550 = vmatprep.subr.bf16.mxu0 %v3805_v19  ;;  %2679 = vmatprep.subr.bf16.mxu1 %v3807_v20  ;;  %v500_v19 = vld [vmem:[%s4398_s14 + $0x5b0] sm:$0xff]  ;;  %v497_v20 = vld [vmem:[%s4398_s14 + $0x598] sm:$0xff] }
 0x106   : > { %v3869_v25 = vcombine.high %v496_v18, %v500_v19  ;;  %v3868_v33 = vcombine.low %v496_v18, %v500_v19  ;;  %v3870_v34 = vcombine.low %v497_v20, %v501_v21  ;;  %v552_v12 = vld [vmem:[%s4398_s14 + $0x750] sm:$0xff] }
 0x108   : > { %2551 = vmatpush1.bf16.msra.mxu0 %v3804_v27  ;;  %2680 = vmatpush1.bf16.msra.mxu1 %v3806_v28  ;;  %v3871_v27 = vcombine.high %v497_v20, %v501_v21  ;;  %v504_v28 = vld [vmem:[%s4398_s14 + $0x5d0] sm:$0xff] }
 0x109   : > { %2552 = vmatprep.subr.bf16.mxu0 %v3813_v29  ;;  %2681 = vmatprep.subr.bf16.mxu1 %v3815_v30  ;;  %v508_v29 = vld [vmem:[%s4398_s14 + $0x5f0] sm:$0xff]  ;;  %v505_v30 = vld [vmem:[%s4398_s14 + $0x5d8] sm:$0xff] }
 0x10a   : > { %v3877_v35 = vcombine.high %v504_v28, %v508_v29  ;;  %v3876_v41 = vcombine.low %v504_v28, %v508_v29  ;;  %v3878_v43 = vcombine.low %v505_v30, %v509_v32  ;;  %v560_v21 = vld [vmem:[%s4398_s14 + $0x790] sm:$0xff] }
 0x10c   : > { %2553 = vmatpush1.bf16.msra.mxu0 %v3812_v36  ;;  %2682 = vmatpush1.bf16.msra.mxu1 %v3814_v37  ;;  %v3879_v36 = vcombine.high %v505_v30, %v509_v32  ;;  %v512_v37 = vld [vmem:[%s4398_s14 + $0x610] sm:$0xff] }
 0x10d   : > { %2565 = vmatprep.subr.bf16.mxu0 %v3821_v38  ;;  %2694 = vmatprep.subr.bf16.mxu1 %v3823_v39  ;;  %v516_v38 = vld [vmem:[%s4398_s14 + $0x630] sm:$0xff]  ;;  %v513_v39 = vld [vmem:[%s4398_s14 + $0x618] sm:$0xff] }
 0x10e   : > { %v3885_v44 = vcombine.high %v512_v37, %v516_v38  ;;  %v3884_v50 = vcombine.low %v512_v37, %v516_v38  ;;  %v3886_v51 = vcombine.low %v513_v39, %v517_v40  ;;  %v568_v32 = vld [vmem:[%s4398_s14 + $0x7d0] sm:$0xff] }
 0x10f   : > { %2555 = vmatmul.mubr.bf16.vlgmr.msra.gmra.mrb[4].mxu0 %v4479_v17  ;;  %2684 = vmatmul.mubr.bf16.vlgmr.msra.gmra.mrb[4].mxu1 %v4233_v53  ;;  %v473_v17 = vld [vmem:[%s4398_s14 + $0x4d8] sm:$0xff] }
 0x110   : > { %2566 = vmatpush1.bf16.msra.mxu0 %v3820_v45  ;;  %2695 = vmatpush1.bf16.msra.mxu1 %v3822_v46  ;;  %v3847_v1 = vcombine.high %v473_v17, %v477_v63  ;;  %v3846_v6 = vcombine.low %v473_v17, %v477_v63  ;;  %v3887_v45 = vcombine.high %v513_v39, %v517_v40  ;;  %v520_v46 = vld [vmem:[%s4398_s14 + $0x650] sm:$0xff] }
 0x111   : > { %2567 = vmatprep.subr.bf16.mxu0 %v3829_v47  ;;  %2696 = vmatprep.subr.bf16.mxu1 %v3831_v48  ;;  %v524_v47 = vld [vmem:[%s4398_s14 + $0x670] sm:$0xff]  ;;  %v521_v48 = vld [vmem:[%s4398_s14 + $0x658] sm:$0xff] }
 0x112   : > { %2597 = vmatprep.mubr.bf16.mxu0 %v4486_v26  ;;  %2726 = vmatprep.mubr.bf16.mxu1 %v4234_v60  ;;  %v481_v26 = vld [vmem:[%s4398_s14 + $0x518] sm:$0xff]  ;;  %v3893_v52 = vcombine.high %v520_v46, %v524_v47  ;;  %v3895_v53 = vcombine.high %v521_v48, %v525_v49  ;;  %v3892_v58 = vcombine.low %v520_v46, %v524_v47  ;;  %v536_v60 = vld [vmem:[%s4398_s14 + $0x6d0] sm:$0xff] }
 0x113   : > { %v3855_v8 = vcombine.high %v481_v26, %v485_v4  ;;  %v3854_v14 = vcombine.low %v481_v26, %v485_v4  ;;  %v3894_v59 = vcombine.low %v521_v48, %v525_v49  ;;  %v544_v4 = vld [vmem:[%s4398_s14 + $0x710] sm:$0xff] }
 0x114   : > { %2568 = vmatpush1.bf16.msra.mxu0 %v3828_v54  ;;  %2697 = vmatpush1.bf16.msra.mxu1 %v3830_v55  ;;  %v528_v54 = vld [vmem:[%s4398_s14 + $0x690] sm:$0xff] }
 0x115   : > { %2569 = vmatprep.subr.bf16.mxu0 %v3837_v56  ;;  %2698 = vmatprep.subr.bf16.mxu1 %v3839_v57  ;;  %v532_v55 = vld [vmem:[%s4398_s14 + $0x6b0] sm:$0xff]  ;;  %v529_v56 = vld [vmem:[%s4398_s14 + $0x698] sm:$0xff] }
 0x116   : > { %v533_v57 = vld [vmem:[%s4398_s14 + $0x6b8] sm:$0xff]  ;;  %v3901_v17 = vcombine.high %v528_v54, %v532_v55  ;;  %v576_v40 = vld [vmem:[%s4398_s14 + $0x810] sm:$0xff] }
 0x117   : > { %v3903_v63 = vcombine.high %v529_v56, %v533_v57  ;;  %v3902_v2 = vcombine.low %v529_v56, %v533_v57  ;;  %v584_v49 = vld [vmem:[%s4398_s14 + $0x850] sm:$0xff] }
 0x118   : > { %2570 = vmatpush1.bf16.msra.mxu0 %v3836_v61  ;;  %2699 = vmatpush1.bf16.msra.mxu1 %v3838_v62  ;;  %v540_v61 = vld [vmem:[%s4398_s14 + $0x6f0] sm:$0xff]  ;;  %v537_v62 = vld [vmem:[%s4398_s14 + $0x6d8] sm:$0xff] }
 0x119   : > { %2571 = vmatprep.subr.bf16.mxu0 %v3845_v0  ;;  %2700 = vmatprep.subr.bf16.mxu1 %v3847_v1  ;;  %v541_v0 = vld [vmem:[%s4398_s14 + $0x6f8] sm:$0xff]  ;;  %v3900_v1 = vcombine.low %v528_v54, %v532_v55  ;;  %v3909_v3 = vcombine.high %v536_v60, %v540_v61  ;;  %v592_v57 = vld [vmem:[%s4398_s14 + $0x890] sm:$0xff] }
 0x11a   : > { %v3911_v26 = vcombine.high %v537_v62, %v541_v0  ;;  %v3910_v9 = vcombine.low %v537_v62, %v541_v0  ;;  %v600_v0 = vld [vmem:[%s4398_s14 + $0x8d0] sm:$0xff] }
 0x11c   : > { %2572 = vmatpush1.bf16.msra.mxu0 %v3844_v5  ;;  %2701 = vmatpush1.bf16.msra.mxu1 %v3846_v6  ;;  %v548_v5 = vld [vmem:[%s4398_s14 + $0x730] sm:$0xff]  ;;  %v545_v6 = vld [vmem:[%s4398_s14 + $0x718] sm:$0xff] }
 0x11d   : > { %2573 = vmatprep.subr.bf16.mxu0 %v3853_v7  ;;  %2702 = vmatprep.subr.bf16.mxu1 %v3855_v8  ;;  %v549_v7 = vld [vmem:[%s4398_s14 + $0x738] sm:$0xff]  ;;  %v3908_v8 = vcombine.low %v536_v60, %v540_v61  ;;  %v3917_v10 = vcombine.high %v544_v4, %v548_v5 }
 0x11e   : > { %v3919_v11 = vcombine.high %v545_v6, %v549_v7  ;;  %v3918_v18 = vcombine.low %v545_v6, %v549_v7  ;;  %v608_v6 = vld [vmem:[%s4398_s14 + $0x910] sm:$0xff] }
 0x11f   : > { %v612_v7 = vld [vmem:[%s4398_s14 + $0x930] sm:$0xff] }
 0x120   : > { %2574 = vmatpush1.bf16.msra.mxu0 %v3852_v13  ;;  %2703 = vmatpush1.bf16.msra.mxu1 %v3854_v14  ;;  %v556_v13 = vld [vmem:[%s4398_s14 + $0x770] sm:$0xff]  ;;  %v553_v14 = vld [vmem:[%s4398_s14 + $0x758] sm:$0xff] }
 0x121   : > { %2575 = vmatprep.subr.bf16.mxu0 %v3861_v15  ;;  %2704 = vmatprep.subr.bf16.mxu1 %v3863_v16  ;;  %v557_v15 = vld [vmem:[%s4398_s14 + $0x778] sm:$0xff]  ;;  %v3916_v16 = vcombine.low %v544_v4, %v548_v5  ;;  %v3925_v19 = vcombine.high %v552_v12, %v556_v13 }
 0x122   : > { %v3927_v20 = vcombine.high %v553_v14, %v557_v15  ;;  %v3926_v28 = vcombine.low %v553_v14, %v557_v15  ;;  %v620_v14 = vld [vmem:[%s4398_s14 + $0x970] sm:$0xff]  ;;  %v617_v15 = vld [vmem:[%s4398_s14 + $0x958] sm:$0xff] }
 0x124   : > { %2576 = vmatpush1.bf16.msra.mxu0 %v3860_v22  ;;  %2705 = vmatpush1.bf16.msra.mxu1 %v3862_v23  ;;  %v564_v22 = vld [vmem:[%s4398_s14 + $0x7b0] sm:$0xff]  ;;  %v561_v23 = vld [vmem:[%s4398_s14 + $0x798] sm:$0xff] }
 0x125   : > { %2577 = vmatprep.subr.bf16.mxu0 %v3869_v25  ;;  %2706 = vmatprep.subr.bf16.mxu1 %v3871_v27  ;;  %v565_v25 = vld [vmem:[%s4398_s14 + $0x7b8] sm:$0xff]  ;;  %v3924_v27 = vcombine.low %v552_v12, %v556_v13  ;;  %v3933_v29 = vcombine.high %v560_v21, %v564_v22  ;;  %v616_v13 = vld [vmem:[%s4398_s14 + $0x950] sm:$0xff] }
 0x126   : > { %v3935_v30 = vcombine.high %v561_v23, %v565_v25  ;;  %v3934_v37 = vcombine.low %v561_v23, %v565_v25  ;;  %v628_v23 = vld [vmem:[%s4398_s14 + $0x9b0] sm:$0xff]  ;;  %v625_v25 = vld [vmem:[%s4398_s14 + $0x998] sm:$0xff] }
 0x128   : > { %2578 = vmatpush1.bf16.msra.mxu0 %v3868_v33  ;;  %2707 = vmatpush1.bf16.msra.mxu1 %v3870_v34  ;;  %v572_v33 = vld [vmem:[%s4398_s14 + $0x7f0] sm:$0xff]  ;;  %v569_v34 = vld [vmem:[%s4398_s14 + $0x7d8] sm:$0xff] }
 0x129   : > { %2579 = vmatprep.subr.bf16.mxu0 %v3877_v35  ;;  %2708 = vmatprep.subr.bf16.mxu1 %v3879_v36  ;;  %v573_v35 = vld [vmem:[%s4398_s14 + $0x7f8] sm:$0xff]  ;;  %v3932_v36 = vcombine.low %v560_v21, %v564_v22  ;;  %v3941_v38 = vcombine.high %v568_v32, %v572_v33  ;;  %v624_v22 = vld [vmem:[%s4398_s14 + $0x990] sm:$0xff] }
 0x12a   : > { %v3943_v39 = vcombine.high %v569_v34, %v573_v35  ;;  %v3942_v46 = vcombine.low %v569_v34, %v573_v35  ;;  %v636_v34 = vld [vmem:[%s4398_s14 + $0x9f0] sm:$0xff]  ;;  %v633_v35 = vld [vmem:[%s4398_s14 + $0x9d8] sm:$0xff] }
 0x12c   : > { %2580 = vmatpush1.bf16.msra.mxu0 %v3876_v41  ;;  %2709 = vmatpush1.bf16.msra.mxu1 %v3878_v43  ;;  %v580_v41 = vld [vmem:[%s4398_s14 + $0x830] sm:$0xff]  ;;  %v577_v43 = vld [vmem:[%s4398_s14 + $0x818] sm:$0xff] }
 0x12d   : > { %2581 = vmatprep.subr.bf16.mxu0 %v3885_v44  ;;  %2710 = vmatprep.subr.bf16.mxu1 %v3887_v45  ;;  %v581_v44 = vld [vmem:[%s4398_s14 + $0x838] sm:$0xff]  ;;  %v3940_v45 = vcombine.low %v568_v32, %v572_v33  ;;  %v3949_v47 = vcombine.high %v576_v40, %v580_v41  ;;  %v632_v33 = vld [vmem:[%s4398_s14 + $0x9d0] sm:$0xff] }
 0x12e   : > { %v3951_v48 = vcombine.high %v577_v43, %v581_v44  ;;  %v3950_v54 = vcombine.low %v577_v43, %v581_v44  ;;  %v296_v44 = vld [vmem:[#allocation2] sm:$0xff] }
 0x130   : > { %2582 = vmatpush1.bf16.msra.mxu0 %v3884_v50  ;;  %2711 = vmatpush1.bf16.msra.mxu1 %v3886_v51  ;;  %v588_v50 = vld [vmem:[%s4398_s14 + $0x870] sm:$0xff]  ;;  %v585_v51 = vld [vmem:[%s4398_s14 + $0x858] sm:$0xff] }
 0x131   : > { %2583 = vmatprep.subr.bf16.mxu0 %v3893_v52  ;;  %2712 = vmatprep.subr.bf16.mxu1 %v3895_v53  ;;  %v589_v52 = vld [vmem:[%s4398_s14 + $0x878] sm:$0xff]  ;;  %v3948_v53 = vcombine.low %v576_v40, %v580_v41  ;;  %v3957_v55 = vcombine.high %v584_v49, %v588_v50  ;;  %v4004_v41 = vcombine.low %v632_v33, %v636_v34 }
 0x132   : > { %v3959_v56 = vcombine.high %v585_v51, %v589_v52  ;;  %v3958_v60 = vcombine.low %v585_v51, %v589_v52 }
 0x134   : > { %2584 = vmatpush1.bf16.msra.mxu0 %v3892_v58  ;;  %2713 = vmatpush1.bf16.msra.mxu1 %v3894_v59  ;;  %v596_v58 = vld [vmem:[%s4398_s14 + $0x8b0] sm:$0xff]  ;;  %v593_v59 = vld [vmem:[%s4398_s14 + $0x898] sm:$0xff] }
 0x135   : > { %2585 = vmatprep.subr.bf16.mxu0 %v3901_v17  ;;  %2714 = vmatprep.subr.bf16.mxu1 %v3903_v63  ;;  %v597_v17 = vld [vmem:[%s4398_s14 + $0x8b8] sm:$0xff]  ;;  %v3956_v63 = vcombine.low %v584_v49, %v588_v50  ;;  %v3965_v61 = vcombine.high %v592_v57, %v596_v58  ;;  %v304_v49 = vld [vmem:[#allocation2 + $0x40] sm:$0xff] }
 0x136   : > { %v3967_v62 = vcombine.high %v593_v59, %v597_v17 }
 0x138   : > { %2586 = vmatpush1.bf16.msra.mxu0 %v3900_v1  ;;  %2715 = vmatpush1.bf16.msra.mxu1 %v3902_v2  ;;  %v604_v1 = vld [vmem:[%s4398_s14 + $0x8f0] sm:$0xff]  ;;  %v601_v2 = vld [vmem:[%s4398_s14 + $0x8d8] sm:$0xff] }
 0x139   : > { %2587 = vmatprep.subr.bf16.mxu0 %v3909_v3  ;;  %2716 = vmatprep.subr.bf16.mxu1 %v3911_v26  ;;  %v605_v3 = vld [vmem:[%s4398_s14 + $0x8f8] sm:$0xff]  ;;  %v3966_v26 = vcombine.low %v593_v59, %v597_v17  ;;  %v3973_v4 = vcombine.high %v600_v0, %v604_v1 }
 0x13a   : > { %v3975_v5 = vcombine.high %v601_v2, %v605_v3  ;;  %v307_v59 = vld [vmem:[#allocation2 + $0x58] sm:$0xff] }
 0x13c   : > { %2588 = vmatpush1.bf16.msra.mxu0 %v3908_v8  ;;  %2717 = vmatpush1.bf16.msra.mxu1 %v3910_v9  ;;  %v609_v8 = vld [vmem:[%s4398_s14 + $0x918] sm:$0xff] }
 0x13d   : > { %2589 = vmatprep.subr.bf16.mxu0 %v3917_v10  ;;  %2718 = vmatprep.subr.bf16.mxu1 %v3919_v11  ;;  %v613_v9 = vld [vmem:[%s4398_s14 + $0x938] sm:$0xff]  ;;  %v3972_v10 = vcombine.low %v600_v0, %v604_v1  ;;  %v3981_v11 = vcombine.high %v608_v6, %v612_v7 }
 0x13e   : > { %v3983_v12 = vcombine.high %v609_v8, %v613_v9 }
 0x140   : > { %2590 = vmatpush1.bf16.msra.mxu0 %v3916_v16  ;;  %2719 = vmatpush1.bf16.msra.mxu1 %v3918_v18  ;;  %v621_v16 = vld [vmem:[%s4398_s14 + $0x978] sm:$0xff]  ;;  %v3980_v18 = vcombine.low %v608_v6, %v612_v7 }
 0x141   : > { %2591 = vmatprep.subr.bf16.mxu0 %v3925_v19  ;;  %2720 = vmatprep.subr.bf16.mxu1 %v3927_v20  ;;  %v3982_v19 = vcombine.low %v609_v8, %v613_v9  ;;  %v3989_v20 = vcombine.high %v616_v13, %v620_v14  ;;  %v3991_v21 = vcombine.high %v617_v15, %v621_v16  ;;  %v310_v9 = vld [vmem:[#allocation2 + $0x70] sm:$0xff] }
 0x144   : > { %2592 = vmatpush1.bf16.msra.mxu0 %v3924_v27  ;;  %2721 = vmatpush1.bf16.msra.mxu1 %v3926_v28  ;;  %v629_v27 = vld [vmem:[%s4398_s14 + $0x9b8] sm:$0xff]  ;;  %v3988_v28 = vcombine.low %v616_v13, %v620_v14 }
 0x145   : > { %2593 = vmatprep.subr.bf16.mxu0 %v3933_v29  ;;  %2722 = vmatprep.subr.bf16.mxu1 %v3935_v30  ;;  %v3990_v29 = vcombine.low %v617_v15, %v621_v16  ;;  %v3997_v30 = vcombine.high %v624_v22, %v628_v23  ;;  %v3999_v32 = vcombine.high %v625_v25, %v629_v27  ;;  %v311_v14 = vld [vmem:[#allocation2 + $0x78] sm:$0xff] }
 0x148   : > { %2594 = vmatpush1.bf16.msra.mxu0 %v3932_v36  ;;  %2723 = vmatpush1.bf16.msra.mxu1 %v3934_v37  ;;  %v637_v36 = vld [vmem:[%s4398_s14 + $0x9f8] sm:$0xff]  ;;  %v3996_v37 = vcombine.low %v624_v22, %v628_v23 }
 0x149   : > { %2595 = vmatprep.subr.bf16.mxu0 %v3941_v38  ;;  %2724 = vmatprep.subr.bf16.mxu1 %v3943_v39  ;;  %v3998_v38 = vcombine.low %v625_v25, %v629_v27  ;;  %v4005_v39 = vcombine.high %v632_v33, %v636_v34  ;;  %v4007_v40 = vcombine.high %v633_v35, %v637_v36  ;;  %v4235_v25 = vld [vmem:[%s5002_s3 + $0x40] sm:$0xff] (!%p4008_p10)   ;;  %v4241_v33 = vld [vmem:[%s5002_s3 + $0x8] sm:$0xff] (!%p4008_p10)  }
 0x14a   : > { %v4006_v43 = vcombine.low %v633_v35, %v637_v36  ;;  %v4236_v27 = vld [vmem:[%s5002_s3 + $0xc0] sm:$0xff] (!%p4008_p10)   ;;  %v4242_v34 = vld [vmem:[%s5002_s3 + $0x88] sm:$0xff] (!%p4008_p10)   ;;  %v4243_v35 = vld [vmem:[%s5002_s3 + $0x50] sm:$0xff] (!%p4008_p10)  }
 0x14b   : > { %v4244_v36 = vld [vmem:[%s5002_s3 + $0xd0] sm:$0xff] (!%p4008_p10)  }
 0x14c   : > { %2596 = vmatpush1.bf16.msra.mxu0 %v3940_v45  ;;  %2725 = vmatpush1.bf16.msra.mxu1 %v3942_v46  ;;  %v298_v45 = vld [vmem:[#allocation2 + $0x10] sm:$0xff]  ;;  %v297_v46 = vld [vmem:[#allocation2 + $0x8] sm:$0xff] }
 0x14d   : > { %2608 = vmatprep.subr.bf16.mxu0 %v3949_v47  ;;  %2737 = vmatprep.subr.bf16.mxu1 %v3951_v48  ;;  %v299_v48 = vld [vmem:[#allocation2 + $0x18] sm:$0xff] }
 0x14f   : > { %2598 = vmatmul.mubr.bf16.vlgmr.msra.gmra.mrb[4].mxu0 %v4553_v24  ;;  %2727 = vmatmul.mubr.bf16.vlgmr.msra.gmra.mrb[4].mxu1 %v4553_v24  ;;  %v3964_v24 = vcombine.low %v592_v57, %v596_v58 }
 0x150   : > { %2609 = vmatpush1.bf16.msra.mxu0 %v3948_v53  ;;  %2738 = vmatpush1.bf16.msra.mxu1 %v3950_v54  ;;  %v306_v53 = vld [vmem:[#allocation2 + $0x50] sm:$0xff]  ;;  %v305_v54 = vld [vmem:[#allocation2 + $0x48] sm:$0xff] }
 0x151   : > { %2610 = vmatprep.subr.bf16.mxu0 %v3957_v55  ;;  %2739 = vmatprep.subr.bf16.mxu1 %v3959_v56 }
 0x152   : > { %2640 = vmatprep.mubr.bf16.mxu0 %v4324_v42  ;;  %2769 = vmatprep.mubr.bf16.mxu1 %v4324_v42  ;;  %v3974_v42 = vcombine.low %v601_v2, %v605_v3  ;;  %v300_v2 = vld [vmem:[#allocation2 + $0x20] sm:$0xff]  ;;  %v302_v3 = vld [vmem:[#allocation2 + $0x30] sm:$0xff] }
 0x154   : > { %2611 = vmatpush1.bf16.msra.mxu0 %v3956_v63  ;;  %2740 = vmatpush1.bf16.msra.mxu1 %v3958_v60 }
 0x155   : > { %2612 = vmatprep.subr.bf16.mxu0 %v3965_v61  ;;  %2741 = vmatprep.subr.bf16.mxu1 %v3967_v62 }
 0x158   : > { %2613 = vmatpush1.bf16.msra.mxu0 %v3964_v24  ;;  %2742 = vmatpush1.bf16.msra.mxu1 %v3966_v26  ;;  %v301_v24 = vld [vmem:[#allocation2 + $0x28] sm:$0xff] }
 0x159   : > { %2614 = vmatprep.subr.bf16.mxu0 %v3973_v4  ;;  %2743 = vmatprep.subr.bf16.mxu1 %v3975_v5  ;;  %v303_v4 = vld [vmem:[#allocation2 + $0x38] sm:$0xff]  ;;  %v308_v5 = vld [vmem:[#allocation2 + $0x60] sm:$0xff] }
 0x15c   : > { %2615 = vmatpush1.bf16.msra.mxu0 %v3972_v10  ;;  %2744 = vmatpush1.bf16.msra.mxu1 %v3974_v42  ;;  %v309_v10 = vld [vmem:[#allocation2 + $0x68] sm:$0xff] }
 0x15d   : > { %2616 = vmatprep.subr.bf16.mxu0 %v3981_v11  ;;  %2745 = vmatprep.subr.bf16.mxu1 %v3983_v12 }
 0x160   : > { %2617 = vmatpush1.bf16.msra.mxu0 %v3980_v18  ;;  %2746 = vmatpush1.bf16.msra.mxu1 %v3982_v19 }
 0x161   : > { %2618 = vmatprep.subr.bf16.mxu0 %v3989_v20  ;;  %2747 = vmatprep.subr.bf16.mxu1 %v3991_v21 }
 0x164   : > { %2619 = vmatpush1.bf16.msra.mxu0 %v3988_v28  ;;  %2748 = vmatpush1.bf16.msra.mxu1 %v3990_v29  ;;  %v4237_v28 = vld [vmem:[%s5002_s3] sm:$0xff] (!%p4008_p10)  }
 0x165   : > { %2620 = vmatprep.subr.bf16.mxu0 %v3997_v30  ;;  %2749 = vmatprep.subr.bf16.mxu1 %v3999_v32  ;;  %v4238_v29 = vld [vmem:[%s5002_s3 + $0x80] sm:$0xff] (!%p4008_p10)   ;;  %v4239_v30 = vld [vmem:[%s5002_s3 + $0x48] sm:$0xff] (!%p4008_p10)  }
 0x166   : > { %v4240_v32 = vld [vmem:[%s5002_s3 + $0xc8] sm:$0xff] (!%p4008_p10)  }
 0x168   : > { %2621 = vmatpush1.bf16.msra.mxu0 %v3996_v37  ;;  %2750 = vmatpush1.bf16.msra.mxu1 %v3998_v38  ;;  %v4245_v37 = vld [vmem:[%s5002_s3 + $0x10] sm:$0xff] (!%p4008_p10)  }
 0x169   : > { %2622 = vmatprep.subr.bf16.mxu0 %v4005_v39  ;;  %2751 = vmatprep.subr.bf16.mxu1 %v4007_v40  ;;  %v4246_v38 = vld [vmem:[%s5002_s3 + $0x90] sm:$0xff] (!%p4008_p10)   ;;  %v4247_v39 = vld [vmem:[%s5002_s3 + $0x58] sm:$0xff] (!%p4008_p10)  }
 0x16a   : > { %v4248_v40 = vld [vmem:[%s5002_s3 + $0xd8] sm:$0xff] (!%p4008_p10)  }
 0x16c   : > { %2623 = vmatpush1.bf16.msra.mxu0 %v4004_v41  ;;  %2752 = vmatpush1.bf16.msra.mxu1 %v4006_v43  ;;  %v4249_v41 = vld [vmem:[%s5002_s3 + $0x18] sm:$0xff] (!%p4008_p10)  }
 0x16d   : > { %4078 = vmatprep.subr.bf16.mxu0 (!%p4008_p10), %v4235_v25  ;;  %4100 = vmatprep.subr.bf16.mxu1 (!%p4008_p10), %v4236_v27  ;;  %v4250_v43 = vld [vmem:[%s5002_s3 + $0x98] sm:$0xff] (!%p4008_p10)  }
 0x16f   : > { %2641 = vmatmul.mubr.bf16.vlgmr.msra.gmra.mrb[4].mxu0 %v4592_v31  ;;  %2770 = vmatmul.mubr.bf16.vlgmr.msra.gmra.mrb[4].mxu1 %v4592_v31 }
 0x170   : > { %4079 = vmatpush3.bf16.msra.mxu0 (!%p4008_p10), %v4237_v28  ;;  %4101 = vmatpush3.bf16.msra.mxu1 (!%p4008_p10), %v4238_v29 }
 0x171   : > { %4080 = vmatprep.subr.bf16.mxu0 (!%p4008_p10), %v4239_v30  ;;  %4102 = vmatprep.subr.bf16.mxu1 (!%p4008_p10), %v4240_v32 }
 0x174   : > { %4081 = vmatpush3.bf16.msra.mxu0 (!%p4008_p10), %v4241_v33  ;;  %4103 = vmatpush3.bf16.msra.mxu1 (!%p4008_p10), %v4242_v34  ;;  %v4269_v34 = vld [vmem:[%s5002_s3 + $0x100] sm:$0xff] (!%p4008_p10)  }
 0x175   : > { %4082 = vmatprep.subr.bf16.mxu0 (!%p4008_p10), %v4243_v35  ;;  %4104 = vmatprep.subr.bf16.mxu1 (!%p4008_p10), %v4244_v36 }
 0x178   : > { %4083 = vmatpush3.bf16.msra.mxu0 (!%p4008_p10), %v4245_v37  ;;  %4105 = vmatpush3.bf16.msra.mxu1 (!%p4008_p10), %v4246_v38  ;;  %v4270_v37 = vld [vmem:[%s5002_s3 + $0x180] sm:$0xff] (!%p4008_p10)   ;;  %v4271_v38 = vld [vmem:[%s5002_s3 + $0x148] sm:$0xff] (!%p4008_p10)  }
 0x179   : > { %4084 = vmatprep.subr.bf16.mxu0 (!%p4008_p10), %v4247_v39  ;;  %4106 = vmatprep.subr.bf16.mxu1 (!%p4008_p10), %v4248_v40  ;;  %v4272_v39 = vld [vmem:[%s5002_s3 + $0x1c8] sm:$0xff] (!%p4008_p10)  }
 0x17a   : > { %v4273_v40 = vld [vmem:[%s5002_s3 + $0x108] sm:$0xff] (!%p4008_p10)  }
 0x17c   : > { %4085 = vmatpush3.bf16.msra.mxu0 (!%p4008_p10), %v4249_v41  ;;  %4107 = vmatpush3.bf16.msra.mxu1 (!%p4008_p10), %v4250_v43  ;;  %v4274_v41 = vld [vmem:[%s5002_s3 + $0x188] sm:$0xff] (!%p4008_p10)   ;;  %v4275_v43 = vld [vmem:[%s5002_s3 + $0x150] sm:$0xff] (!%p4008_p10)  }
 0x1a2   : > { %v2384_v47 = vpop.f32.mrb[0].mxu0  ;;  %v2513_v51 = vpop.f32.mrb[0].mxu1 }
 0x1a3   : > { %v2780_v50 = vadd.f32 %v2384_v47, %v296_v44  ;;  %v2386_v52 = vpop.f32.mrb[1].mxu0  ;;  %v2782_v55 = vadd.f32 %v2513_v51, %v298_v45  ;;  %v2515_v57 = vpop.f32.mrb[1].mxu1  ;;  %v4251_v44 = vld [vmem:[%s5002_s3 + $0x60] sm:$0xff] (!%p4008_p10)   ;;  %v2834_v47 = vlaneseq (!%p4008_p10)  ;;  %v4257_v51 = vld [vmem:[%s5002_s3 + $0x28] sm:$0xff] (!%p4008_p10)  }
 0x1a4   : > { %v2781_v56 = vadd.f32 %v2386_v52, %v297_v46  ;;  %v2388_v58 = vpop.f32.mrb[2].mxu0  ;;  %v2783_v17 = vadd.f32 %v2515_v57, %v299_v48  ;;  %v2517_v31 = vpop.f32.mrb[2].mxu1  ;;  %v4252_v45 = vld [vmem:[%s5002_s3 + $0xe0] sm:$0xff] (!%p4008_p10)   ;;  %4086 = vmatprep.subr.bf16.mxu0 (!%p4008_p10), %v4251_v44  ;;  %v4276_v44 = vld [vmem:[%s5002_s3 + $0x1d0] sm:$0xff] (!%p4008_p10)  }
 0x1a5   : > { %2796 = vst [vmem:[#allocation2] sm:$0xff] %v2780_v50  ;;  %v2788_v63 = vadd.f32 %v2388_v58, %v304_v49  ;;  %v2390_v60 = vpop.f32.mrb[3].mxu0  ;;  %2798 = vst [vmem:[#allocation2 + $0x10] sm:$0xff] %v2782_v55  ;;  %v2790_v61 = vadd.f32 %v2517_v31, %v306_v53  ;;  %v2519_v0 = vpop.f32.mrb[3].mxu1  ;;  %v4253_v46 = vld [vmem:[%s5002_s3 + $0x20] sm:$0xff] (!%p4008_p10)   ;;  %4108 = vmatprep.subr.bf16.mxu1 (!%p4008_p10), %v4252_v45  ;;  %v4255_v49 = vld [vmem:[%s5002_s3 + $0x68] sm:$0xff] (!%p4008_p10)  }
 0x1a6   : > { %2797 = vst [vmem:[#allocation2 + $0x8] sm:$0xff] %v2781_v56  ;;  %v2789_v62 = vadd.f32 %v2390_v60, %v305_v54  ;;  %2799 = vst [vmem:[#allocation2 + $0x18] sm:$0xff] %v2783_v17  ;;  %v2791_v1 = vadd.f32 %v2519_v0, %v307_v59  ;;  %v4254_v48 = vld [vmem:[%s5002_s3 + $0xa0] sm:$0xff] (!%p4008_p10)   ;;  %4087 = vmatpush3.bf16.msra.mxu0 (!%p4008_p10), %v4253_v46  ;;  %v4256_v50 = vld [vmem:[%s5002_s3 + $0xe8] sm:$0xff] (!%p4008_p10)   ;;  %v4833_v52 = vshrl.u32 (!%p4008_p10), %v2834_v47, 7 }
 0x1a7   : > { %2804 = vst [vmem:[#allocation2 + $0x40] sm:$0xff] %v2788_v63  ;;  %2806 = vst [vmem:[#allocation2 + $0x50] sm:$0xff] %v2790_v61  ;;  %4109 = vmatpush3.bf16.msra.mxu1 (!%p4008_p10), %v4254_v48  ;;  %4088 = vmatprep.subr.bf16.mxu0 (!%p4008_p10), %v4255_v49  ;;  %v4258_v53 = vld [vmem:[%s5002_s3 + $0xa8] sm:$0xff] (!%p4008_p10)   ;;  %v4259_v54 = vld [vmem:[%s5002_s3 + $0x70] sm:$0xff] (!%p4008_p10)  }
 0x1a8   : > { %2805 = vst [vmem:[#allocation2 + $0x48] sm:$0xff] %v2789_v62  ;;  %2807 = vst [vmem:[#allocation2 + $0x58] sm:$0xff] %v2791_v1  ;;  %4110 = vmatprep.subr.bf16.mxu1 (!%p4008_p10), %v4256_v50  ;;  %v4260_v55 = vld [vmem:[%s5002_s3 + $0xf0] sm:$0xff] (!%p4008_p10)   ;;  %v2840_v57 = vsub.s32 (!%p4008_p10), 1, %v4833_v52  ;;  %v2848_v59 = vsub.s32 (!%p4008_p10), 3, %v4833_v52  ;;  %v4263_v17 = vld [vmem:[%s5002_s3 + $0x78] sm:$0xff] (!%p4008_p10)  }
 0x1a9   : > { %v4261_v56 = vld [vmem:[%s5002_s3 + $0x30] sm:$0xff] (!%p4008_p10)   ;;  %v2836_v63 = vsub.s32 (!%p4008_p10), 0, %v4833_v52  ;;  %v4264_v31 = vld [vmem:[%s5002_s3 + $0xf8] sm:$0xff] (!%p4008_p10)   ;;  %v2844_v60 = vsub.s32 (!%p4008_p10), 2, %v4833_v52 }
 0x1aa   : > { %4089 = vmatpush3.bf16.msra.mxu0 (!%p4008_p10), %v4257_v51  ;;  %v4262_v58 = vld [vmem:[%s5002_s3 + $0xb0] sm:$0xff] (!%p4008_p10)   ;;  %v4265_v61 = vld [vmem:[%s5002_s3 + $0x38] sm:$0xff] (!%p4008_p10)  }
 0x1ab   : > { %4111 = vmatpush3.bf16.msra.mxu1 (!%p4008_p10), %v4258_v53  ;;  %4090 = vmatprep.subr.bf16.mxu0 (!%p4008_p10), %v4259_v54  ;;  %v4266_v62 = vld [vmem:[%s5002_s3 + $0xb8] sm:$0xff] (!%p4008_p10)   ;;  %v4277_v45 = vld [vmem:[%s5002_s3 + $0x110] sm:$0xff] (!%p4008_p10)   ;;  %v4283_v53 = vld [vmem:[%s5002_s3 + $0x160] sm:$0xff] (!%p4008_p10)  }
 0x1ac   : > { %4112 = vmatprep.subr.bf16.mxu1 (!%p4008_p10), %v4260_v55  ;;  %v4278_v46 = vld [vmem:[%s5002_s3 + $0x190] sm:$0xff] (!%p4008_p10)   ;;  %v4279_v48 = vld [vmem:[%s5002_s3 + $0x158] sm:$0xff] (!%p4008_p10)   ;;  %v4284_v54 = vld [vmem:[%s5002_s3 + $0x1e0] sm:$0xff] (!%p4008_p10)  }
 0x1ad   : > { %v2817_v0 = vld [vmem:[#allocation2 + $0x8] sm:$0xff] (!%p4008_p10)  ;;  %v4280_v49 = vld [vmem:[%s5002_s3 + $0x1d8] sm:$0xff] (!%p4008_p10)   ;;  %v4285_v55 = vld [vmem:[%s5002_s3 + $0x120] sm:$0xff] (!%p4008_p10)  }
 0x1ae   : > { %4091 = vmatpush3.bf16.msra.mxu0 (!%p4008_p10), %v4261_v56  ;;  %v4281_v50 = vld [vmem:[%s5002_s3 + $0x118] sm:$0xff] (!%p4008_p10)   ;;  %v4286_v56 = vld [vmem:[%s5002_s3 + $0x1a0] sm:$0xff] (!%p4008_p10)  }
 0x1af   : > { %4113 = vmatpush3.bf16.msra.mxu1 (!%p4008_p10), %v4262_v58  ;;  %4092 = vmatprep.subr.bf16.mxu0 (!%p4008_p10), %v4263_v17  ;;  %v2825_v1 = vld [vmem:[#allocation2 + $0x48] sm:$0xff] (!%p4008_p10)  ;;  %v4282_v51 = vld [vmem:[%s5002_s3 + $0x198] sm:$0xff] (!%p4008_p10)  }
 0x1b0   : > { %4114 = vmatprep.subr.bf16.mxu1 (!%p4008_p10), %v4264_v31  ;;  %v4288_v58 = vld [vmem:[%s5002_s3 + $0x1e8] sm:$0xff] (!%p4008_p10)   ;;  %v4291_v31 = vld [vmem:[%s5002_s3 + $0x170] sm:$0xff] (!%p4008_p10)  }
 0x1b1   : > { %v4290_v17 = vld [vmem:[%s5002_s3 + $0x1a8] sm:$0xff] (!%p4008_p10)  }
 0x1b2   : > { %4093 = vmatpush3.bf16.msra.mxu0 (!%p4008_p10), %v4265_v61  ;;  %v4292_v61 = vld [vmem:[%s5002_s3 + $0x1f0] sm:$0xff] (!%p4008_p10)  }
 0x1b3   : > { %4115 = vmatpush3.bf16.msra.mxu1 (!%p4008_p10), %v4266_v62  ;;  %v2852_v62 = vsub.s32 (!%p4008_p10), 4, %v4833_v52 }
 0x242   : > { %v2642_v26 = vpop.f32.mrb[4].mxu0  ;;  %v2771_v7 = vpop.f32.mrb[4].mxu1  ;;  %2815 = sbr.rel (%p4008_p10) target bundleno = 993 (0x3e1), region = 74 }
 0x243   : > { %v2784_v6 = vadd.f32 %v2642_v26, %v300_v2  ;;  %v2644_v8 = vpop.f32.mrb[5].mxu0  ;;  %v2786_v42 = vadd.f32 %v2771_v7, %v302_v3  ;;  %v2773_v12 = vpop.f32.mrb[5].mxu1  ;;  %v4869_v2 = vld [vmem:[%s5001_s2] sm:$0xff] (!%p4008_p10)  ;;  %v2827_v26 = vld [vmem:[#allocation2 + $0x58] sm:$0xff] (!%p4008_p10) }
 0x244   : > { %v2785_v11 = vadd.f32 %v2644_v8, %v301_v24  ;;  %v2646_v13 = vpop.f32.mrb[6].mxu0  ;;  %v2787_v15 = vadd.f32 %v2773_v12, %v303_v4  ;;  %v2775_v18 = vpop.f32.mrb[6].mxu1  ;;  %v2841_v3 = vrot.slane (!%p4008_p10), %v4869_v2, %v2840_v57  ;;  %v2819_v24 = vld [vmem:[#allocation2 + $0x18] sm:$0xff] (!%p4008_p10)  ;;  %v2849_v4 = vrot.slane (!%p4008_p10), %v4869_v2, %v2848_v59  ;;  %v2824_v8 = vld [vmem:[#allocation2 + $0x40] sm:$0xff] (!%p4008_p10)  ;;  %v4287_v57 = vld [vmem:[%s5002_s3 + $0x168] sm:$0xff] (!%p4008_p10)  }
 0x245   : > { %2800 = vst [vmem:[#allocation2 + $0x20] sm:$0xff] %v2784_v6  ;;  %v2792_v16 = vadd.f32 %v2646_v13, %v308_v5  ;;  %v2648_v19 = vpop.f32.mrb[7].mxu0  ;;  %2802 = vst [vmem:[#allocation2 + $0x30] sm:$0xff] %v2786_v42  ;;  %v2794_v20 = vadd.f32 %v2775_v18, %v310_v9  ;;  %v2777_v22 = vpop.f32.mrb[7].mxu1  ;;  %v2816_v5 = vld [vmem:[#allocation2] sm:$0xff] (!%p4008_p10)  ;;  %v2837_v6 = vrot.slane (!%p4008_p10), %v4869_v2, %v2836_v63  ;;  %v2818_v9 = vld [vmem:[#allocation2 + $0x10] sm:$0xff] (!%p4008_p10) }
 0x246   : > { %2801 = vst [vmem:[#allocation2 + $0x28] sm:$0xff] %v2785_v11  ;;  %v2793_v21 = vadd.f32 %v2648_v19, %v309_v10  ;;  %2803 = vst [vmem:[#allocation2 + $0x38] sm:$0xff] %v2787_v15  ;;  %v2795_v23 = vadd.f32 %v2777_v22, %v311_v14  ;;  %v2845_v7 = vrot.slane (!%p4008_p10), %v4869_v2, %v2844_v60  ;;  %v2826_v10 = vld [vmem:[#allocation2 + $0x50] sm:$0xff] (!%p4008_p10)  ;;  %v4267_v14 = vld [vmem:[%s5002_s3 + $0x140] sm:$0xff] (!%p4008_p10)   ;;  %v2856_v63 = vsub.s32 (!%p4008_p10), 5, %v4833_v52 }
 0x247   : > { %2808 = vst [vmem:[#allocation2 + $0x60] sm:$0xff] %v2792_v16  ;;  %2810 = vst [vmem:[#allocation2 + $0x70] sm:$0xff] %v2794_v20  ;;  %v2875_v42 = vadd.f32 (!%p4008_p10), %v2841_v3, %v2817_v0  ;;  %v2883_v11 = vadd.f32 (!%p4008_p10), %v2841_v3, %v2825_v1  ;;  %v2877_v12 = vadd.f32 (!%p4008_p10), %v2849_v4, %v2819_v24  ;;  %v4268_v20 = vld [vmem:[%s5002_s3 + $0x1c0] sm:$0xff] (!%p4008_p10)   ;;  %4122 = vmatprep.subr.bf16.mxu0 (!%p4008_p10), %v4267_v14  ;;  %v4289_v59 = vld [vmem:[%s5002_s3 + $0x128] sm:$0xff] (!%p4008_p10)  }
 0x248   : > { %2809 = vst [vmem:[#allocation2 + $0x68] sm:$0xff] %v2793_v21  ;;  %2811 = vst [vmem:[#allocation2 + $0x78] sm:$0xff] %v2795_v23  ;;  %v2885_v13 = vadd.f32 (!%p4008_p10), %v2849_v4, %v2827_v26  ;;  %v2874_v15 = vadd.f32 (!%p4008_p10), %v2837_v6, %v2816_v5  ;;  %v2882_v16 = vadd.f32 (!%p4008_p10), %v2837_v6, %v2824_v8  ;;  %4144 = vmatprep.subr.bf16.mxu1 (!%p4008_p10), %v4268_v20  ;;  %v4293_v0 = vld [vmem:[%s5002_s3 + $0x130] sm:$0xff] (!%p4008_p10)   ;;  %v4295_v24 = vld [vmem:[%s5002_s3 + $0x178] sm:$0xff] (!%p4008_p10)  }
 0x249   : > { %v2876_v18 = vadd.f32 %v2845_v7, %v2818_v9  ;;  %v2884_v19 = vadd.f32 %v2845_v7, %v2826_v10  ;;  %v2891_v21 = vmax.f32 %v2875_v42, 0.0  ;;  %v2899_v22 = vmax.f32 %v2883_v11, 0.0  ;;  %v4294_v3 = vld [vmem:[%s5002_s3 + $0x1b0] sm:$0xff]   ;;  %v4296_v4 = vld [vmem:[%s5002_s3 + $0x1f8] sm:$0xff]  }
 0x24a   : > { %v2893_v23 = vmax.f32 %v2877_v12, 0.0  ;;  %v2901_v25 = vmax.f32 %v2885_v13, 0.0  ;;  %v2890_v27 = vmax.f32 %v2874_v15, 0.0  ;;  %v2898_v28 = vmax.f32 %v2882_v16, 0.0  ;;  %v4297_v6 = vld [vmem:[%s5002_s3 + $0x138] sm:$0xff]  }
 0x24b   : > { %v2892_v29 = vmax.f32 %v2876_v18, 0.0  ;;  %v2900_v30 = vmax.f32 %v2884_v19, 0.0  ;;  %v2907_v32 = vpack.c.bf16 %v2899_v22, %v2891_v21  ;;  %v2864_v60 = vsub.s32 7, %v4833_v52  ;;  %v4298_v8 = vld [vmem:[%s5002_s3 + $0x1b8] sm:$0xff]  }
 0x24c   : > { %v2909_v33 = vpack.c.bf16 %v2901_v25, %v2893_v23  ;;  %v2906_v35 = vpack.c.bf16 %v2898_v28, %v2890_v27  ;;  %v2860_v1 = vsub.s32 6, %v4833_v52  ;;  %v2857_v26 = vrot.slane %v4869_v2, %v2856_v63  ;;  %v2820_v14 = vld [vmem:[#allocation2 + $0x20] sm:$0xff]  ;;  %v2822_v20 = vld [vmem:[#allocation2 + $0x30] sm:$0xff] }
 0x24d   : > { %v2908_v36 = vpack.c.bf16 %v2900_v30, %v2892_v29  ;;  %3465 = vmatprep.mubr.bf16.mxu0 %v2907_v32  ;;  %v2865_v5 = vrot.slane %v4869_v2, %v2864_v60  ;;  %v2853_v52 = vrot.slane %v4869_v2, %v2852_v62  ;;  %v2821_v9 = vld [vmem:[#allocation2 + $0x28] sm:$0xff]  ;;  %v2823_v12 = vld [vmem:[#allocation2 + $0x38] sm:$0xff] }
 0x24e   : > { %3506 = vmatprep.mubr.bf16.mxu1 %v2909_v33  ;;  %3466 = vmatmul.mubr.bf16.vlgmr.msra.gmra.mrb[0].mxu0 %v2906_v35  ;;  %v2861_v7 = vrot.slane %v4869_v2, %v2860_v1  ;;  %v2879_v42 = vadd.f32 %v2857_v26, %v2821_v9  ;;  %v2828_v18 = vld [vmem:[#allocation2 + $0x60] sm:$0xff]  ;;  %v2830_v21 = vld [vmem:[#allocation2 + $0x70] sm:$0xff] }
 0x24f   : > { %3507 = vmatmul.mubr.bf16.vlgmr.msra.gmra.mrb[0].mxu1 %v2908_v36  ;;  %4123 = vmatpush3.bf16.msra.mxu0 %v4269_v34  ;;  %v2829_v10 = vld [vmem:[#allocation2 + $0x68] sm:$0xff]  ;;  %v2831_v13 = vld [vmem:[#allocation2 + $0x78] sm:$0xff]  ;;  %v2881_v15 = vadd.f32 %v2865_v5, %v2823_v12  ;;  %v2878_v19 = vadd.f32 %v2853_v52, %v2820_v14  ;;  %v2886_v23 = vadd.f32 %v2853_v52, %v2828_v18 }
 0x250   : > { %4145 = vmatpush3.bf16.msra.mxu1 %v4270_v37  ;;  %4124 = vmatprep.subr.bf16.mxu0 %v4271_v38  ;;  %v2887_v11 = vadd.f32 %v2857_v26, %v2829_v10  ;;  %v2889_v16 = vadd.f32 %v2865_v5, %v2831_v13  ;;  %v2895_v2 = vmax.f32 %v2879_v42, 0.0  ;;  %v2880_v25 = vadd.f32 %v2861_v7, %v2822_v20 }
 0x251   : > { %4146 = vmatprep.subr.bf16.mxu1 %v4272_v39  ;;  %v2897_v27 = vmax.f32 %v2881_v15, 0.0  ;;  %v2894_v29 = vmax.f32 %v2878_v19, 0.0  ;;  %v2888_v30 = vadd.f32 %v2861_v7, %v2830_v21  ;;  %v2902_v33 = vmax.f32 %v2886_v23, 0.0 }
 0x252   : > { %v2903_v22 = vmax.f32 %v2887_v11, 0.0  ;;  %v2905_v28 = vmax.f32 %v2889_v16, 0.0  ;;  %v2896_v34 = vmax.f32 %v2880_v25, 0.0 }
 0x253   : > { %4125 = vmatpush3.bf16.msra.mxu0 %v4273_v40  ;;  %v2904_v36 = vmax.f32 %v2888_v30, 0.0  ;;  %v2910_v37 = vpack.c.bf16 %v2902_v33, %v2894_v29 }
 0x254   : > { %4147 = vmatpush3.bf16.msra.mxu1 %v4274_v41  ;;  %4126 = vmatprep.subr.bf16.mxu0 %v4275_v43  ;;  %v2911_v32 = vpack.c.bf16 %v2903_v22, %v2895_v2  ;;  %v2913_v35 = vpack.c.bf16 %v2905_v28, %v2897_v27  ;;  %v4009_v41 = vld [vmem:[%s5003_s4] ss:$0 sm:$0xff] }
 0x255   : > { %4148 = vmatprep.subr.bf16.mxu1 %v4276_v44  ;;  %v2912_v38 = vpack.c.bf16 %v2904_v36, %v2896_v34 }
 0x256   : > { %3547 = vmatprep.mubr.bf16.mxu0 %v2911_v32  ;;  %3588 = vmatprep.mubr.bf16.mxu1 %v2913_v35 }
 0x257   : > { %4127 = vmatpush3.bf16.msra.mxu0 %v4277_v45 }
 0x258   : > { %4149 = vmatpush3.bf16.msra.mxu1 %v4278_v46  ;;  %4128 = vmatprep.subr.bf16.mxu0 %v4279_v48 }
 0x259   : > { %4150 = vmatprep.subr.bf16.mxu1 %v4280_v49 }
 0x25b   : > { %4129 = vmatpush3.bf16.msra.mxu0 %v4281_v50 }
 0x25c   : > { %4151 = vmatpush3.bf16.msra.mxu1 %v4282_v51  ;;  %4130 = vmatprep.subr.bf16.mxu0 %v4283_v53 }
 0x25d   : > { %4152 = vmatprep.subr.bf16.mxu1 %v4284_v54 }
 0x25f   : > { %4131 = vmatpush3.bf16.msra.mxu0 %v4285_v55 }
 0x260   : > { %4153 = vmatpush3.bf16.msra.mxu1 %v4286_v56  ;;  %4132 = vmatprep.subr.bf16.mxu0 %v4287_v57 }
 0x261   : > { %4154 = vmatprep.subr.bf16.mxu1 %v4288_v58 }
 0x263   : > { %4133 = vmatpush3.bf16.msra.mxu0 %v4289_v59 }
 0x264   : > { %4155 = vmatpush3.bf16.msra.mxu1 %v4290_v17  ;;  %4134 = vmatprep.subr.bf16.mxu0 %v4291_v31  ;;  %v3598_v31 = vand.u32 127, %v2834_v47 }
 0x265   : > { %4156 = vmatprep.subr.bf16.mxu1 %v4292_v61 }
 0x266   : > { %vm3606_vm0 = vcmp.eq.s32.totalorder %v3598_v31, 6  ;;  %vm3599_vm1 = vcmp.lt.s32.totalorder %v3598_v31, 6 }
 0x267   : > { %4135 = vmatpush3.bf16.msra.mxu0 %v4293_v0 }
 0x268   : > { %4157 = vmatpush3.bf16.msra.mxu1 %v4294_v3  ;;  %4136 = vmatprep.subr.bf16.mxu0 %v4295_v24 }
 0x269   : > { %4158 = vmatprep.subr.bf16.mxu1 %v4296_v4 }
 0x26b   : > { %4137 = vmatpush3.bf16.msra.mxu0 %v4297_v6 }
 0x26c   : > { %4159 = vmatpush3.bf16.msra.mxu1 %v4298_v8 }
 0x26e   : > { %3548 = vmatmul.mubr.bf16.vlgmr.msra.gmra.mrb[4].mxu0 %v2910_v37 }
 0x26f   : > { %3589 = vmatmul.mubr.bf16.vlgmr.msra.gmra.mrb[4].mxu1 %v2912_v38 }
 0x321   : > { %v4094_v39 = vpop.f32.mrb[0].mxu0 }
 0x322   : > { %v4116_v40 = vpop.f32.mrb[0].mxu1  ;;  %v4095_v43 = vpop.f32.mrb[1].mxu0 }
 0x323   : > { %v4117_v44 = vpop.f32.mrb[1].mxu1  ;;  %v4096_v45 = vadd.f32 %v4095_v43, %v4094_v39  ;;  %v4097_v48 = vpop.f32.mrb[2].mxu0 }
 0x324   : > { %v4118_v46 = vadd.f32 %v4117_v44, %v4116_v40  ;;  %v4119_v49 = vpop.f32.mrb[2].mxu1  ;;  %v4098_v50 = vpop.f32.mrb[3].mxu0 }
 0x325   : > { %v4120_v51 = vpop.f32.mrb[3].mxu1  ;;  %v3468_v53 = vadd.f32 %v4096_v45, %v4009_v41  ;;  %v4099_v54 = vadd.f32 %v4098_v50, %v4097_v48 }
 0x326   : > { %v4121_v55 = vadd.f32 %v4120_v51, %v4119_v49 }
 0x327   : > { %v3509_v56 = vadd.f32 %v4118_v46, %v3468_v53  ;;  %v3471_v57 = vadd.f32 %v4099_v54, %v4009_v41 }
 0x329   : > { %v3512_v58 = vadd.f32 %v4121_v55, %v3471_v57 }
 0x341   : > { %v4138_v59 = vpop.f32.mrb[4].mxu0 }
 0x342   : > { %v4160_v17 = vpop.f32.mrb[4].mxu1  ;;  %v4139_v63 = vpop.f32.mrb[5].mxu0 }
 0x343   : > { %v4140_v60 = vadd.f32 %v4139_v63, %v4138_v59  ;;  %v4161_v61 = vpop.f32.mrb[5].mxu1  ;;  %v4141_v62 = vpop.f32.mrb[6].mxu0 }
 0x344   : > { %v4162_v0 = vadd.f32 %v4161_v61, %v4160_v17  ;;  %v4163_v1 = vpop.f32.mrb[6].mxu1  ;;  %v4142_v3 = vpop.f32.mrb[7].mxu0 }
 0x345   : > { %v3550_v24 = vadd.f32 %v4140_v60, %v3509_v56  ;;  %v4143_v26 = vadd.f32 %v4142_v3, %v4141_v62  ;;  %v4164_v4 = vpop.f32.mrb[7].mxu1 }
 0x346   : > { %v4165_v5 = vadd.f32 %v4164_v4, %v4163_v1 }
 0x347   : > { %v3591_v52 = vadd.f32 %v4162_v0, %v3550_v24  ;;  %v3553_v6 = vadd.f32 %v4143_v26, %v3512_v58 }
 0x349   : > { %v3594_v7 = vadd.f32 %v4165_v5, %v3553_v6  ;;  %v3607_v8 = vsel %vm3606_vm0, %v3591_v52, 0.0  ;;  %v3600_v9 = vsel %vm3599_vm1, %v3591_v52, 0.0 }
 0x34a   : > { %3609 = vadd.xlane.f32.xlu1 %v3607_v8  ;;  %3602 = vadd.xlane.f32.xlu0 %v3600_v9 }
 0x34b   : > { %v3608_v47 = vsel %vm3606_vm0, %v3594_v7, 0.0  ;;  %v3601_v10 = vsel %vm3599_vm1, %v3594_v7, 0.0 }
 0x34e   : > { %3611 = vadd.xlane.f32.xlu1 %v3608_v47  ;;  %3604 = vadd.xlane.f32.xlu0 %v3601_v10 }
 0x3d7   : > { %v3610_v42 = vpop.xlane.xlu1 %3609  ;;  %v3603_v11 = vpop.xlane.xlu0 %3602 }
 0x3d8   : > { %v3613_v12 = vadd.f32 %v3610_v42, %v3591_v52  ;;  %v3615_v13 = vmul.f32 0.16666667, %v3603_v11 }
 0x3da   : > { %v3617_v14 = vsub.f32 %v3613_v12, %v3615_v13 }
 0x3db   : > { %v3612_v15 = vpop.xlane.xlu1 %3611  ;;  %v3605_v16 = vpop.xlane.xlu0 %3604 }
 0x3dc   : > { %3619 = vst [vmem:[%s5004_s5] sm:$0xff] %v3617_v14  ;;  %v3614_v18 = vadd.f32 %v3612_v15, %v3594_v7  ;;  %v3616_v19 = vmul.f32 0.16666667, %v3605_v16 }
 0x3de   : > { %v3618_v20 = vsub.f32 %v3614_v18, %v3616_v19 }
 0x3e0   : > { %3620 = vst [vmem:[%s5004_s5 + $0x8] sm:$0xff] %v3618_v20 }
 0x3e1 PF: > { %p12_p11 = scmp.ge.s32.totalorder %s4374_s22, 7   ;;  %s5005_s18 = smov %s4317_s19 }
 0x3e2   : > { %s5006_s19 = smov %s4383_s25  ;;  %s5007_s20 = smov %s4374_s22 }
 0x3e3   :  { %14 = sbr.rel (!%p12_p11) target bundleno = 2 (0x2), region = 114 }

</bundles_post_ra>
